<compile_context>
chip_gen: v7x
topology: tpu7x:2x2x1
jax: 0.10.0
libtpu: 0.0.40
codegen_flags: <defaults>
</compile_context>

<pallas_src>
import jax
import jax.numpy as jnp
import numpy as np
from jax.experimental import pallas as pl
from jax.experimental.pallas import tpu as pltpu


# ----------------------------------------------------------------------------
# Pallas kernel: one batch element of the whole Inception block
# ----------------------------------------------------------------------------
def inception_kernel(
    x_ref,                                   # (1, H, W, Cin)          bf16
    wA_ref, bA_ref,                          # (Cin, c1+r3+r5) bf16, (1, c1+r3+r5) f32
    w2b_ref, b2b_ref,                        # (9*r3, c3)  bf16, (1, c3) f32
    w3b_ref, b3b_ref,                        # (25*r5, c5) bf16, (1, c5) f32
    w4_ref, b4_ref,                          # (Cin, pp)   bf16, (1, pp) f32
    wc1_ref, wc2_ref, wc3_ref, wc4_ref,      # (c1|c3|c5|pp, Cout) bf16
    o_ref,                                   # (H*W, Cout) f32
    pad3_ref, pad5_ref, padp_ref,            # f32 VMEM scratch (padded planes)
):
    _, H, W, Cin = x_ref.shape
    N = H * W
    c1 = wc1_ref.shape[0]
    r3 = pad3_ref.shape[-1]
    r5 = pad5_ref.shape[-1]

    xb = x_ref[...]                          # bf16 (1, H, W, Cin)
    xf = xb.reshape(N, Cin)                  # bf16 (N, Cin)

    # ---- fused shared 1x1 convs (branch 1 + 3x3 reduce + 5x5 reduce) -------
    # BN scale already folded into the weight columns; only bias + ReLU here.
    tA = jnp.dot(xf, wA_ref[...], preferred_element_type=jnp.float32)
    tA = jnp.maximum(tA + bA_ref[...], 0.0)                  # (N, c1+r3+r5) f32
    y1 = tA[:, :c1]
    t2 = tA[:, c1:c1 + r3]
    t3 = tA[:, c1 + r3:]

    # ---- branch 2: 3x3 conv (pad 1) as ONE im2col matmul, K = 9*r3 ---------
    pad3_ref[...] = jnp.zeros(pad3_ref.shape, jnp.float32)
    pad3_ref[:, 1:H + 1, 1:W + 1, :] = t2.reshape(1, H, W, r3)
    p2 = jnp.concatenate(
        [pad3_ref[:, ky:ky + H, kx:kx + W, :].reshape(N, r3)
         for ky in range(3) for kx in range(3)], axis=-1)     # (N, 9*r3)
    y2 = jnp.maximum(
        jnp.dot(p2.astype(jnp.bfloat16), w2b_ref[...],
                preferred_element_type=jnp.float32) + b2b_ref[...], 0.0)

    # ---- branch 3: 5x5 conv (pad 2) as ONE im2col matmul, K = 25*r5 --------
    pad5_ref[...] = jnp.zeros(pad5_ref.shape, jnp.float32)
    pad5_ref[:, 2:H + 2, 2:W + 2, :] = t3.reshape(1, H, W, r5)
    p3 = jnp.concatenate(
        [pad5_ref[:, ky:ky + H, kx:kx + W, :].reshape(N, r5)
         for ky in range(5) for kx in range(5)], axis=-1)     # (N, 25*r5)
    y3 = jnp.maximum(
        jnp.dot(p3.astype(jnp.bfloat16), w3b_ref[...],
                preferred_element_type=jnp.float32) + b3b_ref[...], 0.0)

    # ---- branch 4: 3x3 maxpool (stride 1, pad 1) -> 1x1 conv ---------------
    padp_ref[...] = jnp.full(padp_ref.shape, -jnp.inf, jnp.float32)
    padp_ref[:, 1:H + 1, 1:W + 1, :] = xb.astype(jnp.float32)
    m = padp_ref[:, 0:H, 0:W, :]
    for ky in range(3):
        for kx in range(3):
            if ky == 0 and kx == 0:
                continue
            m = jnp.maximum(m, padp_ref[:, ky:ky + H, kx:kx + W, :])
    y4 = jnp.maximum(
        jnp.dot(m.reshape(N, Cin).astype(jnp.bfloat16), w4_ref[...],
                preferred_element_type=jnp.float32) + b4_ref[...], 0.0)

    # ---- final 1x1 conv as partial sums (no channel concat) ----------------
    out = (jnp.dot(y1.astype(jnp.bfloat16), wc1_ref[...],
                   preferred_element_type=jnp.float32)
           + jnp.dot(y2.astype(jnp.bfloat16), wc2_ref[...],
                     preferred_element_type=jnp.float32)
           + jnp.dot(y3.astype(jnp.bfloat16), wc3_ref[...],
                     preferred_element_type=jnp.float32)
           + jnp.dot(y4.astype(jnp.bfloat16), wc4_ref[...],
                     preferred_element_type=jnp.float32))
    o_ref[...] = out


# ----------------------------------------------------------------------------
# Parameters: raw (PyTorch-style) and prepared (folded / fused / bf16)
# ----------------------------------------------------------------------------
def make_raw_params(key, cin, c1, r3, c3, r5, c5, pp):
    """Deterministic synthetic PyTorch-style parameters."""
    ks = iter(jax.random.split(key, 32))

    def conv_w(shape):
        return 0.1 * jax.random.normal(next(ks), shape, jnp.float32)

    def bn(c):
        gamma = 1.0 + 0.1 * jax.random.normal(next(ks), (c,), jnp.float32)
        beta = 0.1 * jax.random.normal(next(ks), (c,), jnp.float32)
        mean = 0.1 * jax.random.normal(next(ks), (c,), jnp.float32)
        var = jnp.abs(jax.random.normal(next(ks), (c,), jnp.float32)) + 0.5
        return (gamma, beta, mean, var)

    return dict(
        w1=conv_w((c1, cin, 1, 1)), bn1=bn(c1),
        w2a=conv_w((r3, cin, 1, 1)), bn2a=bn(r3),
        w2b=conv_w((c3, r3, 3, 3)), bn2b=bn(c3),
        w3a=conv_w((r5, cin, 1, 1)), bn3a=bn(r5),
        w3b=conv_w((c5, r5, 5, 5)), bn3b=bn(c5),
        w4=conv_w((pp, cin, 1, 1)), bn4=bn(pp),
        wc=conv_w((cin, c1 + c3 + c5 + pp, 1, 1)),
    )


def prepare_params(raw, eps=1e-5, mxu_dtype=jnp.bfloat16):
    """Fold BN scale into weights, fuse the shared 1x1 convs, build im2col
    weight matrices, split the final 1x1 weight per branch, cast to bf16."""
    def fold(bn):
        gamma, beta, mean, var = bn
        scale = gamma / jnp.sqrt(var + eps)
        return scale, beta - mean * scale

    def w1x1(w):                               # (cout, cin, 1, 1) -> (cin, cout)
        return w[:, :, 0, 0].T

    def im2col_w(w, scale):                    # (cout, rin, k, k) -> (k*k*rin, cout)
        k = w.shape[-1]
        wm = jnp.concatenate([w[:, :, ky, kx].T
                              for ky in range(k) for kx in range(k)], axis=0)
        return wm * scale                      # per-output-channel BN scale

    s1, b1 = fold(raw['bn1']); s2a, b2a = fold(raw['bn2a']); s2b, b2b = fold(raw['bn2b'])
    s3a, b3a = fold(raw['bn3a']); s3b, b3b = fold(raw['bn3b']); s4, b4 = fold(raw['bn4'])

    wA = jnp.concatenate([w1x1(raw['w1']) * s1,
                          w1x1(raw['w2a']) * s2a,
                          w1x1(raw['w3a']) * s3a], axis=1)     # (cin, c1+r3+r5)
    bA = jnp.concatenate([b1, b2a, b3a])[None, :]

    c1 = raw['w1'].shape[0]; c3 = raw['w2b'].shape[0]
    c5 = raw['w3b'].shape[0]; pp = raw['w4'].shape[0]
    wc = w1x1(raw['wc'])                                       # (ctot, cout)

    return dict(
        wA=wA.astype(mxu_dtype), bA=bA,
        w2b=im2col_w(raw['w2b'], s2b).astype(mxu_dtype), b2b=b2b[None, :],
        w3b=im2col_w(raw['w3b'], s3b).astype(mxu_dtype), b3b=b3b[None, :],
        w4=(w1x1(raw['w4']) * s4).astype(mxu_dtype), b4=b4[None, :],
        wc1=wc[:c1].astype(mxu_dtype),
        wc2=wc[c1:c1 + c3].astype(mxu_dtype),
        wc3=wc[c1 + c3:c1 + c3 + c5].astype(mxu_dtype),
        wc4=wc[c1 + c3 + c5:].astype(mxu_dtype),
    )


# ----------------------------------------------------------------------------
# Wrapper
# ----------------------------------------------------------------------------
@jax.jit
def inception_forward(x_nchw, p):
    """x_nchw: (B, Cin, H, W) float32 (PyTorch layout). Returns NCHW float32."""
    x = jnp.transpose(x_nchw, (0, 2, 3, 1)).astype(jnp.bfloat16)   # NHWC, bf16
    B, H, W, Cin = x.shape
    N = H * W
    Cout = p['wc1'].shape[1]
    r3 = p['w2b'].shape[0] // 9
    r5 = p['w3b'].shape[0] // 25

    weight_names = ['wA', 'bA', 'w2b', 'b2b', 'w3b', 'b3b', 'w4', 'b4',
                    'wc1', 'wc2', 'wc3', 'wc4']
    args = [x] + [p[k] for k in weight_names]

    ctot = sum(p[k].shape[0] for k in ('wc1', 'wc2', 'wc3', 'wc4'))
    flops = 2 * B * N * (Cin * p['wA'].shape[1]
                         + p['w2b'].shape[0] * p['w2b'].shape[1]
                         + p['w3b'].shape[0] * p['w3b'].shape[1]
                         + Cin * p['w4'].shape[1]
                         + ctot * Cout)
    bytes_accessed = (x.size * x.dtype.itemsize
                      + sum(p[k].size * p[k].dtype.itemsize for k in weight_names)
                      + B * N * Cout * 4)

    out_flat = pl.pallas_call(
        inception_kernel,
        out_shape=jax.ShapeDtypeStruct((B * N, Cout), jnp.float32),
        grid=(B,),
        in_specs=[pl.BlockSpec((1, H, W, Cin), lambda b: (b, 0, 0, 0))]
                 + [pl.BlockSpec(tuple(p[k].shape), lambda b: (0, 0))
                    for k in weight_names],
        out_specs=pl.BlockSpec((N, Cout), lambda b: (b, 0)),
        scratch_shapes=[
            pltpu.VMEM((1, H + 2, W + 2, r3), jnp.float32),   # 3x3 padded plane
            pltpu.VMEM((1, H + 4, W + 4, r5), jnp.float32),   # 5x5 padded plane
            pltpu.VMEM((1, H + 2, W + 2, Cin), jnp.float32),  # maxpool padded plane
        ],
        compiler_params=pltpu.CompilerParams(
            dimension_semantics=("parallel",),
            vmem_limit_bytes=32 * 1024 * 1024),
        cost_estimate=pl.CostEstimate(flops=flops, transcendentals=0,
                                      bytes_accessed=bytes_accessed),
    )(*args)

    out = out_flat.reshape(B, H, W, Cout)
    return jnp.transpose(out, (0, 3, 1, 2))                   # back to NCHW


# ----------------------------------------------------------------------------
# Pure-JAX references
# ----------------------------------------------------------------------------
def ref_forward_prepared(x_nchw, p):
    """Same fused/bf16 math as the kernel (only f32-accumulation order differs)."""
    x = jnp.transpose(x_nchw, (0, 2, 3, 1)).astype(jnp.bfloat16)
    B, H, W, Cin = x.shape
    N = B * H * W
    c1 = p['wc1'].shape[0]
    r3 = p['w2b'].shape[0] // 9
    r5 = p['w3b'].shape[0] // 25

    xf = x.reshape(N, Cin)
    tA = jnp.maximum(
        jnp.dot(xf, p['wA'], preferred_element_type=jnp.float32) + p['bA'], 0.0)
    y1 = tA[:, :c1]
    t2 = tA[:, c1:c1 + r3].astype(jnp.bfloat16).reshape(B, H, W, r3)
    t3 = tA[:, c1 + r3:].astype(jnp.bfloat16).reshape(B, H, W, r5)

    def conv_im2col(t, wm, k):
        pad = k // 2
        C = t.shape[-1]
        tp = jnp.pad(t, ((0, 0), (pad, pad), (pad, pad), (0, 0)))
        patches = jnp.concatenate(
            [tp[:, ky:ky + H, kx:kx + W, :] for ky in range(k) for kx in range(k)],
            axis=-1).reshape(N, k * k * C)
        return jnp.dot(patches, wm, preferred_element_type=jnp.float32)

    y2 = jnp.maximum(conv_im2col(t2, p['w2b'], 3) + p['b2b'], 0.0)
    y3 = jnp.maximum(conv_im2col(t3, p['w3b'], 5) + p['b3b'], 0.0)

    xp = jnp.pad(x, ((0, 0), (1, 1), (1, 1), (0, 0)), constant_values=-jnp.inf)
    m = xp[:, 0:H, 0:W, :]
    for ky in range(3):
        for kx in range(3):
            m = jnp.maximum(m, xp[:, ky:ky + H, kx:kx + W, :])
    y4 = jnp.maximum(
        jnp.dot(m.reshape(N, Cin), p['w4'],
                preferred_element_type=jnp.float32) + p['b4'], 0.0)

    out = (jnp.dot(y1.astype(jnp.bfloat16), p['wc1'], preferred_element_type=jnp.float32)
           + jnp.dot(y2.astype(jnp.bfloat16), p['wc2'], preferred_element_type=jnp.float32)
           + jnp.dot(y3.astype(jnp.bfloat16), p['wc3'], preferred_element_type=jnp.float32)
           + jnp.dot(y4.astype(jnp.bfloat16), p['wc4'], preferred_element_type=jnp.float32))
    return jnp.transpose(out.reshape(B, H, W, -1), (0, 3, 1, 2))


def ref_forward_raw(x_nchw, raw, eps=1e-5):
    """Straightforward f32 reference of the PyTorch module (eval-mode BN)."""
    hi = jax.lax.Precision.HIGHEST
    x = jnp.transpose(x_nchw, (0, 2, 3, 1)).astype(jnp.float32)
    B, H, W, _ = x.shape

    def conv1x1(t, w):                         # w: (cout, cin, 1, 1)
        return jnp.einsum('bhwc,dc->bhwd', t, w[:, :, 0, 0], precision=hi)

    def bn_relu(t, bn):
        gamma, beta, mean, var = bn
        s = gamma / jnp.sqrt(var + eps)
        return jnp.maximum(t * s + (beta - mean * s), 0.0)

    def convkxk(t, w):                         # w: (cout, cin, k, k), pad = k//2
        k = w.shape[-1]
        pad = k // 2
        tp = jnp.pad(t, ((0, 0), (pad, pad), (pad, pad), (0, 0)))
        out = jnp.zeros(t.shape[:3] + (w.shape[0],), jnp.float32)
        for ky in range(k):
            for kx in range(k):
                out = out + jnp.einsum('bhwc,dc->bhwd',
                                       tp[:, ky:ky + H, kx:kx + W, :],
                                       w[:, :, ky, kx], precision=hi)
        return out

    y1 = bn_relu(conv1x1(x, raw['w1']), raw['bn1'])
    y2 = bn_relu(convkxk(bn_relu(conv1x1(x, raw['w2a']), raw['bn2a']), raw['w2b']),
                 raw['bn2b'])
    y3 = bn_relu(convkxk(bn_relu(conv1x1(x, raw['w3a']), raw['bn3a']), raw['w3b']),
                 raw['bn3b'])
    xp = jnp.pad(x, ((0, 0), (1, 1), (1, 1), (0, 0)), constant_values=-jnp.inf)
    m = xp[:, 0:H, 0:W, :]
    for ky in range(3):
        for kx in range(3):
            m = jnp.maximum(m, xp[:, ky:ky + H, kx:kx + W, :])
    y4 = bn_relu(conv1x1(m, raw['w4']), raw['bn4'])
    cat = jnp.concatenate([y1, y2, y3, y4], axis=-1)
    out = conv1x1(cat, raw['wc'])
    return jnp.transpose(out, (0, 3, 1, 2))


# ----------------------------------------------------------------------------
if __name__ == "__main__":
    key = jax.random.PRNGKey(0)
    kx, kp = jax.random.split(key)

    # InceptionModule(in_channels=4, out_channels_1=8, reduce_3=4,
    #                 out_channels_3=8, reduce_5=4, out_channels_5=8, pool_proj=8)
    B, Cin, H, W = 2, 4, 16, 16
    raw = make_raw_params(kp, Cin, c1=8, r3=4, c3=8, r5=4, c5=8, pp=8)
    params = prepare_params(raw)

    x = jax.random.normal(kx, (B, Cin, H, W), jnp.float32)

    out = jax.block_until_ready(inception_forward(x, params))

    # Tight check: same fused/bf16 math in pure JAX (accumulation order only).
    ref_p = jax.block_until_ready(ref_forward_prepared(x, params))
    np.testing.assert_allclose(np.asarray(out), np.asarray(ref_p),
                               rtol=1e-3, atol=1e-4)

    # Semantic check: straightforward f32 PyTorch-style reference from the raw
    # (unfused, unfolded) parameters; tolerance covers bf16 quantization.
    ref_r = jax.block_until_ready(ref_forward_raw(x, raw))
    np.testing.assert_allclose(np.asarray(out), np.asarray(ref_r),
                               rtol=1e-1, atol=2e-2)

    print("KERNEL_OK")
</pallas_src>

<mosaic_0001>
module attributes {stable_mosaic.version = 11 : i64} {
  func.func @inception_kernel(%arg0: i32, %arg1: memref<1x16x16x4xbf16, #tpu.memory_space<vmem>>, %arg2: memref<4x16xbf16, #tpu.memory_space<vmem>>, %arg3: memref<1x16xf32, #tpu.memory_space<vmem>>, %arg4: memref<36x8xbf16, #tpu.memory_space<vmem>>, %arg5: memref<1x8xf32, #tpu.memory_space<vmem>>, %arg6: memref<100x8xbf16, #tpu.memory_space<vmem>>, %arg7: memref<1x8xf32, #tpu.memory_space<vmem>>, %arg8: memref<4x8xbf16, #tpu.memory_space<vmem>>, %arg9: memref<1x8xf32, #tpu.memory_space<vmem>>, %arg10: memref<8x4xbf16, #tpu.memory_space<vmem>>, %arg11: memref<8x4xbf16, #tpu.memory_space<vmem>>, %arg12: memref<8x4xbf16, #tpu.memory_space<vmem>>, %arg13: memref<8x4xbf16, #tpu.memory_space<vmem>>, %arg14: memref<256x4xf32, #tpu.memory_space<vmem>>, %arg15: memref<1x18x18x4xf32, #tpu.memory_space<vmem>>, %arg16: memref<1x20x20x4xf32, #tpu.memory_space<vmem>>, %arg17: memref<1x18x18x4xf32, #tpu.memory_space<vmem>>) attributes {dimension_semantics = [#tpu.dimension_semantics<parallel>], iteration_bounds = array<i64: 2>, scalar_prefetch = 0 : i64, scratch_operands = 3 : i64, tpu.core_type = #tpu.core_type<tc>, window_params = [{transform_indices = @transform_0, window_bounds = array<i64: 1, 16, 16, 4>}, {pipeline_mode = #tpu.pipeline_mode<synchronous>, transform_indices = @transform_1, window_bounds = array<i64: 4, 16>}, {pipeline_mode = #tpu.pipeline_mode<synchronous>, transform_indices = @transform_2, window_bounds = array<i64: 1, 16>}, {pipeline_mode = #tpu.pipeline_mode<synchronous>, transform_indices = @transform_3, window_bounds = array<i64: 36, 8>}, {pipeline_mode = #tpu.pipeline_mode<synchronous>, transform_indices = @transform_4, window_bounds = array<i64: 1, 8>}, {pipeline_mode = #tpu.pipeline_mode<synchronous>, transform_indices = @transform_5, window_bounds = array<i64: 100, 8>}, {pipeline_mode = #tpu.pipeline_mode<synchronous>, transform_indices = @transform_6, window_bounds = array<i64: 1, 8>}, {pipeline_mode = #tpu.pipeline_mode<synchronous>, transform_indices = @transform_7, window_bounds = array<i64: 4, 8>}, {pipeline_mode = #tpu.pipeline_mode<synchronous>, transform_indices = @transform_8, window_bounds = array<i64: 1, 8>}, {pipeline_mode = #tpu.pipeline_mode<synchronous>, transform_indices = @transform_9, window_bounds = array<i64: 8, 4>}, {pipeline_mode = #tpu.pipeline_mode<synchronous>, transform_indices = @transform_10, window_bounds = array<i64: 8, 4>}, {pipeline_mode = #tpu.pipeline_mode<synchronous>, transform_indices = @transform_11, window_bounds = array<i64: 8, 4>}, {pipeline_mode = #tpu.pipeline_mode<synchronous>, transform_indices = @transform_12, window_bounds = array<i64: 8, 4>}, {transform_indices = @transform_13, window_bounds = array<i64: 256, 4>}]} {
    %c0 = arith.constant 0 : index
    %c0_0 = arith.constant 0 : index
    %c0_1 = arith.constant 0 : index
    %c0_2 = arith.constant 0 : index
    %0 = vector.load %arg1[%c0, %c0_0, %c0_1, %c0_2] : memref<1x16x16x4xbf16, #tpu.memory_space<vmem>>, vector<1x16x16x4xbf16>
    %1 = vector.shape_cast %0 : vector<1x16x16x4xbf16> to vector<256x4xbf16>
    %c0_3 = arith.constant 0 : index
    %c0_4 = arith.constant 0 : index
    %2 = vector.load %arg2[%c0_3, %c0_4] : memref<4x16xbf16, #tpu.memory_space<vmem>>, vector<4x16xbf16>
    %cst = arith.constant dense<0.000000e+00> : vector<256x16xf32>
    %3 = tpu.matmul %1, %2, %cst {dimension_numbers = #tpu.dot_dimension_numbers<[1], [0], [0], [1], [0, 0, 1, 1], [], []>} : vector<256x4xbf16>, vector<4x16xbf16>, vector<256x16xf32> -> vector<256x16xf32>
    %c0_5 = arith.constant 0 : index
    %c0_6 = arith.constant 0 : index
    %4 = vector.load %arg3[%c0_5, %c0_6] : memref<1x16xf32, #tpu.memory_space<vmem>>, vector<1x16xf32>
    %5 = vector.broadcast %4 : vector<1x16xf32> to vector<256x16xf32>
    %6 = arith.addf %3, %5 : vector<256x16xf32>
    %cst_7 = arith.constant 0.000000e+00 : f32
    %7 = vector.broadcast %cst_7 : f32 to vector<256x16xf32>
    %8 = arith.maximumf %6, %7 : vector<256x16xf32>
    %9 = vector.extract_strided_slice %8 {offsets = [0, 0], sizes = [256, 8], strides = [1, 1]} : vector<256x16xf32> to vector<256x8xf32>
    %10 = vector.extract_strided_slice %8 {offsets = [0, 8], sizes = [256, 4], strides = [1, 1]} : vector<256x16xf32> to vector<256x4xf32>
    %11 = vector.extract_strided_slice %8 {offsets = [0, 12], sizes = [256, 4], strides = [1, 1]} : vector<256x16xf32> to vector<256x4xf32>
    %cst_8 = arith.constant 0.000000e+00 : f32
    %12 = vector.broadcast %cst_8 : f32 to vector<1x18x18x4xf32>
    %c0_9 = arith.constant 0 : index
    %c0_10 = arith.constant 0 : index
    %c0_11 = arith.constant 0 : index
    %c0_12 = arith.constant 0 : index
    %13 = vector.load %arg15[%c0_9, %c0_10, %c0_11, %c0_12] : memref<1x18x18x4xf32, #tpu.memory_space<vmem>>, vector<1x18x18x4xf32>
    tpu.vector_store %arg15[%c0_9, %c0_10, %c0_11, %c0_12], %12 {strides = array<i32>} : memref<1x18x18x4xf32, #tpu.memory_space<vmem>>, vector<1x18x18x4xf32>,
    %14 = vector.shape_cast %10 : vector<256x4xf32> to vector<1x16x16x4xf32>
    %c0_13 = arith.constant 0 : index
    %c1 = arith.constant 1 : index
    %c1_14 = arith.constant 1 : index
    %c0_15 = arith.constant 0 : index
    %15 = vector.load %arg15[%c0_13, %c1, %c1_14, %c0_15] : memref<1x18x18x4xf32, #tpu.memory_space<vmem>>, vector<1x16x16x4xf32>
    tpu.vector_store %arg15[%c0_13, %c1, %c1_14, %c0_15], %14 {strides = array<i32>} : memref<1x18x18x4xf32, #tpu.memory_space<vmem>>, vector<1x16x16x4xf32>,
    %c0_16 = arith.constant 0 : index
    %c0_17 = arith.constant 0 : index
    %c0_18 = arith.constant 0 : index
    %c0_19 = arith.constant 0 : index
    %16 = vector.load %arg15[%c0_16, %c0_17, %c0_18, %c0_19] : memref<1x18x18x4xf32, #tpu.memory_space<vmem>>, vector<1x16x16x4xf32>
    %17 = vector.shape_cast %16 : vector<1x16x16x4xf32> to vector<256x4xf32>
    %c0_20 = arith.constant 0 : index
    %c0_21 = arith.constant 0 : index
    %c1_22 = arith.constant 1 : index
    %c0_23 = arith.constant 0 : index
    %18 = vector.load %arg15[%c0_20, %c0_21, %c1_22, %c0_23] : memref<1x18x18x4xf32, #tpu.memory_space<vmem>>, vector<1x16x16x4xf32>
    %19 = vector.shape_cast %18 : vector<1x16x16x4xf32> to vector<256x4xf32>
    %c0_24 = arith.constant 0 : index
    %c0_25 = arith.constant 0 : index
    %c2 = arith.constant 2 : index
    %c0_26 = arith.constant 0 : index
    %20 = vector.load %arg15[%c0_24, %c0_25, %c2, %c0_26] : memref<1x18x18x4xf32, #tpu.memory_space<vmem>>, vector<1x16x16x4xf32>
    %21 = vector.shape_cast %20 : vector<1x16x16x4xf32> to vector<256x4xf32>
    %c0_27 = arith.constant 0 : index
    %c1_28 = arith.constant 1 : index
    %c0_29 = arith.constant 0 : index
    %c0_30 = arith.constant 0 : index
    %22 = vector.load %arg15[%c0_27, %c1_28, %c0_29, %c0_30] : memref<1x18x18x4xf32, #tpu.memory_space<vmem>>, vector<1x16x16x4xf32>
    %23 = vector.shape_cast %22 : vector<1x16x16x4xf32> to vector<256x4xf32>
    %c0_31 = arith.constant 0 : index
    %c1_32 = arith.constant 1 : index
    %c1_33 = arith.constant 1 : index
    %c0_34 = arith.constant 0 : index
    %24 = vector.load %arg15[%c0_31, %c1_32, %c1_33, %c0_34] : memref<1x18x18x4xf32, #tpu.memory_space<vmem>>, vector<1x16x16x4xf32>
    %25 = vector.shape_cast %24 : vector<1x16x16x4xf32> to vector<256x4xf32>
    %c0_35 = arith.constant 0 : index
    %c1_36 = arith.constant 1 : index
    %c2_37 = arith.constant 2 : index
    %c0_38 = arith.constant 0 : index
    %26 = vector.load %arg15[%c0_35, %c1_36, %c2_37, %c0_38] : memref<1x18x18x4xf32, #tpu.memory_space<vmem>>, vector<1x16x16x4xf32>
    %27 = vector.shape_cast %26 : vector<1x16x16x4xf32> to vector<256x4xf32>
    %c0_39 = arith.constant 0 : index
    %c2_40 = arith.constant 2 : index
    %c0_41 = arith.constant 0 : index
    %c0_42 = arith.constant 0 : index
    %28 = vector.load %arg15[%c0_39, %c2_40, %c0_41, %c0_42] : memref<1x18x18x4xf32, #tpu.memory_space<vmem>>, vector<1x16x16x4xf32>
    %29 = vector.shape_cast %28 : vector<1x16x16x4xf32> to vector<256x4xf32>
    %c0_43 = arith.constant 0 : index
    %c2_44 = arith.constant 2 : index
    %c1_45 = arith.constant 1 : index
    %c0_46 = arith.constant 0 : index
    %30 = vector.load %arg15[%c0_43, %c2_44, %c1_45, %c0_46] : memref<1x18x18x4xf32, #tpu.memory_space<vmem>>, vector<1x16x16x4xf32>
    %31 = vector.shape_cast %30 : vector<1x16x16x4xf32> to vector<256x4xf32>
    %c0_47 = arith.constant 0 : index
    %c2_48 = arith.constant 2 : index
    %c2_49 = arith.constant 2 : index
    %c0_50 = arith.constant 0 : index
    %32 = vector.load %arg15[%c0_47, %c2_48, %c2_49, %c0_50] : memref<1x18x18x4xf32, #tpu.memory_space<vmem>>, vector<1x16x16x4xf32>
    %33 = vector.shape_cast %32 : vector<1x16x16x4xf32> to vector<256x4xf32>
    %34 = tpu.concatenate %17, %19, %21, %23, %25, %27, %29, %31, %33 in 1 : vector<256x4xf32>, vector<256x4xf32>, vector<256x4xf32>, vector<256x4xf32>, vector<256x4xf32>, vector<256x4xf32>, vector<256x4xf32>, vector<256x4xf32>, vector<256x4xf32> -> vector<256x36xf32>
    %35 = arith.truncf %34 : vector<256x36xf32> to vector<256x36xbf16>
    %c0_51 = arith.constant 0 : index
    %c0_52 = arith.constant 0 : index
    %36 = vector.load %arg4[%c0_51, %c0_52] : memref<36x8xbf16, #tpu.memory_space<vmem>>, vector<36x8xbf16>
    %cst_53 = arith.constant dense<0.000000e+00> : vector<256x8xf32>
    %37 = tpu.matmul %35, %36, %cst_53 {dimension_numbers = #tpu.dot_dimension_numbers<[1], [0], [0], [1], [0, 0, 1, 1], [], []>} : vector<256x36xbf16>, vector<36x8xbf16>, vector<256x8xf32> -> vector<256x8xf32>
    %c0_54 = arith.constant 0 : index
    %c0_55 = arith.constant 0 : index
    %38 = vector.load %arg5[%c0_54, %c0_55] : memref<1x8xf32, #tpu.memory_space<vmem>>, vector<1x8xf32>
    %39 = vector.broadcast %38 : vector<1x8xf32> to vector<256x8xf32>
    %40 = arith.addf %37, %39 : vector<256x8xf32>
    %cst_56 = arith.constant 0.000000e+00 : f32
    %41 = vector.broadcast %cst_56 : f32 to vector<256x8xf32>
    %42 = arith.maximumf %40, %41 : vector<256x8xf32>
    %cst_57 = arith.constant 0.000000e+00 : f32
    %43 = vector.broadcast %cst_57 : f32 to vector<1x20x20x4xf32>
    %c0_58 = arith.constant 0 : index
    %c0_59 = arith.constant 0 : index
    %c0_60 = arith.constant 0 : index
    %c0_61 = arith.constant 0 : index
    %44 = vector.load %arg16[%c0_58, %c0_59, %c0_60, %c0_61] : memref<1x20x20x4xf32, #tpu.memory_space<vmem>>, vector<1x20x20x4xf32>
    tpu.vector_store %arg16[%c0_58, %c0_59, %c0_60, %c0_61], %43 {strides = array<i32>} : memref<1x20x20x4xf32, #tpu.memory_space<vmem>>, vector<1x20x20x4xf32>,
    %45 = vector.shape_cast %11 : vector<256x4xf32> to vector<1x16x16x4xf32>
    %c0_62 = arith.constant 0 : index
    %c2_63 = arith.constant 2 : index
    %c2_64 = arith.constant 2 : index
    %c0_65 = arith.constant 0 : index
    %46 = vector.load %arg16[%c0_62, %c2_63, %c2_64, %c0_65] : memref<1x20x20x4xf32, #tpu.memory_space<vmem>>, vector<1x16x16x4xf32>
    tpu.vector_store %arg16[%c0_62, %c2_63, %c2_64, %c0_65], %45 {strides = array<i32>} : memref<1x20x20x4xf32, #tpu.memory_space<vmem>>, vector<1x16x16x4xf32>,
    %c0_66 = arith.constant 0 : index
    %c0_67 = arith.constant 0 : index
    %c0_68 = arith.constant 0 : index
    %c0_69 = arith.constant 0 : index
    %47 = vector.load %arg16[%c0_66, %c0_67, %c0_68, %c0_69] : memref<1x20x20x4xf32, #tpu.memory_space<vmem>>, vector<1x16x16x4xf32>
    %48 = vector.shape_cast %47 : vector<1x16x16x4xf32> to vector<256x4xf32>
    %c0_70 = arith.constant 0 : index
    %c0_71 = arith.constant 0 : index
    %c1_72 = arith.constant 1 : index
    %c0_73 = arith.constant 0 : index
    %49 = vector.load %arg16[%c0_70, %c0_71, %c1_72, %c0_73] : memref<1x20x20x4xf32, #tpu.memory_space<vmem>>, vector<1x16x16x4xf32>
    %50 = vector.shape_cast %49 : vector<1x16x16x4xf32> to vector<256x4xf32>
    %c0_74 = arith.constant 0 : index
    %c0_75 = arith.constant 0 : index
    %c2_76 = arith.constant 2 : index
    %c0_77 = arith.constant 0 : index
    %51 = vector.load %arg16[%c0_74, %c0_75, %c2_76, %c0_77] : memref<1x20x20x4xf32, #tpu.memory_space<vmem>>, vector<1x16x16x4xf32>
    %52 = vector.shape_cast %51 : vector<1x16x16x4xf32> to vector<256x4xf32>
    %c0_78 = arith.constant 0 : index
    %c0_79 = arith.constant 0 : index
    %c3 = arith.constant 3 : index
    %c0_80 = arith.constant 0 : index
    %53 = vector.load %arg16[%c0_78, %c0_79, %c3, %c0_80] : memref<1x20x20x4xf32, #tpu.memory_space<vmem>>, vector<1x16x16x4xf32>
    %54 = vector.shape_cast %53 : vector<1x16x16x4xf32> to vector<256x4xf32>
    %c0_81 = arith.constant 0 : index
    %c0_82 = arith.constant 0 : index
    %c4 = arith.constant 4 : index
    %c0_83 = arith.constant 0 : index
    %55 = vector.load %arg16[%c0_81, %c0_82, %c4, %c0_83] : memref<1x20x20x4xf32, #tpu.memory_space<vmem>>, vector<1x16x16x4xf32>
    %56 = vector.shape_cast %55 : vector<1x16x16x4xf32> to vector<256x4xf32>
    %c0_84 = arith.constant 0 : index
    %c1_85 = arith.constant 1 : index
    %c0_86 = arith.constant 0 : index
    %c0_87 = arith.constant 0 : index
    %57 = vector.load %arg16[%c0_84, %c1_85, %c0_86, %c0_87] : memref<1x20x20x4xf32, #tpu.memory_space<vmem>>, vector<1x16x16x4xf32>
    %58 = vector.shape_cast %57 : vector<1x16x16x4xf32> to vector<256x4xf32>
    %c0_88 = arith.constant 0 : index
    %c1_89 = arith.constant 1 : index
    %c1_90 = arith.constant 1 : index
    %c0_91 = arith.constant 0 : index
    %59 = vector.load %arg16[%c0_88, %c1_89, %c1_90, %c0_91] : memref<1x20x20x4xf32, #tpu.memory_space<vmem>>, vector<1x16x16x4xf32>
    %60 = vector.shape_cast %59 : vector<1x16x16x4xf32> to vector<256x4xf32>
    %c0_92 = arith.constant 0 : index
    %c1_93 = arith.constant 1 : index
    %c2_94 = arith.constant 2 : index
    %c0_95 = arith.constant 0 : index
    %61 = vector.load %arg16[%c0_92, %c1_93, %c2_94, %c0_95] : memref<1x20x20x4xf32, #tpu.memory_space<vmem>>, vector<1x16x16x4xf32>
    %62 = vector.shape_cast %61 : vector<1x16x16x4xf32> to vector<256x4xf32>
    %c0_96 = arith.constant 0 : index
    %c1_97 = arith.constant 1 : index
    %c3_98 = arith.constant 3 : index
    %c0_99 = arith.constant 0 : index
    %63 = vector.load %arg16[%c0_96, %c1_97, %c3_98, %c0_99] : memref<1x20x20x4xf32, #tpu.memory_space<vmem>>, vector<1x16x16x4xf32>
    %64 = vector.shape_cast %63 : vector<1x16x16x4xf32> to vector<256x4xf32>
    %c0_100 = arith.constant 0 : index
    %c1_101 = arith.constant 1 : index
    %c4_102 = arith.constant 4 : index
    %c0_103 = arith.constant 0 : index
    %65 = vector.load %arg16[%c0_100, %c1_101, %c4_102, %c0_103] : memref<1x20x20x4xf32, #tpu.memory_space<vmem>>, vector<1x16x16x4xf32>
    %66 = vector.shape_cast %65 : vector<1x16x16x4xf32> to vector<256x4xf32>
    %c0_104 = arith.constant 0 : index
    %c2_105 = arith.constant 2 : index
    %c0_106 = arith.constant 0 : index
    %c0_107 = arith.constant 0 : index
    %67 = vector.load %arg16[%c0_104, %c2_105, %c0_106, %c0_107] : memref<1x20x20x4xf32, #tpu.memory_space<vmem>>, vector<1x16x16x4xf32>
    %68 = vector.shape_cast %67 : vector<1x16x16x4xf32> to vector<256x4xf32>
    %c0_108 = arith.constant 0 : index
    %c2_109 = arith.constant 2 : index
    %c1_110 = arith.constant 1 : index
    %c0_111 = arith.constant 0 : index
    %69 = vector.load %arg16[%c0_108, %c2_109, %c1_110, %c0_111] : memref<1x20x20x4xf32, #tpu.memory_space<vmem>>, vector<1x16x16x4xf32>
    %70 = vector.shape_cast %69 : vector<1x16x16x4xf32> to vector<256x4xf32>
    %c0_112 = arith.constant 0 : index
    %c2_113 = arith.constant 2 : index
    %c2_114 = arith.constant 2 : index
    %c0_115 = arith.constant 0 : index
    %71 = vector.load %arg16[%c0_112, %c2_113, %c2_114, %c0_115] : memref<1x20x20x4xf32, #tpu.memory_space<vmem>>, vector<1x16x16x4xf32>
    %72 = vector.shape_cast %71 : vector<1x16x16x4xf32> to vector<256x4xf32>
    %c0_116 = arith.constant 0 : index
    %c2_117 = arith.constant 2 : index
    %c3_118 = arith.constant 3 : index
    %c0_119 = arith.constant 0 : index
    %73 = vector.load %arg16[%c0_116, %c2_117, %c3_118, %c0_119] : memref<1x20x20x4xf32, #tpu.memory_space<vmem>>, vector<1x16x16x4xf32>
    %74 = vector.shape_cast %73 : vector<1x16x16x4xf32> to vector<256x4xf32>
    %c0_120 = arith.constant 0 : index
    %c2_121 = arith.constant 2 : index
    %c4_122 = arith.constant 4 : index
    %c0_123 = arith.constant 0 : index
    %75 = vector.load %arg16[%c0_120, %c2_121, %c4_122, %c0_123] : memref<1x20x20x4xf32, #tpu.memory_space<vmem>>, vector<1x16x16x4xf32>
    %76 = vector.shape_cast %75 : vector<1x16x16x4xf32> to vector<256x4xf32>
    %c0_124 = arith.constant 0 : index
    %c3_125 = arith.constant 3 : index
    %c0_126 = arith.constant 0 : index
    %c0_127 = arith.constant 0 : index
    %77 = vector.load %arg16[%c0_124, %c3_125, %c0_126, %c0_127] : memref<1x20x20x4xf32, #tpu.memory_space<vmem>>, vector<1x16x16x4xf32>
    %78 = vector.shape_cast %77 : vector<1x16x16x4xf32> to vector<256x4xf32>
    %c0_128 = arith.constant 0 : index
    %c3_129 = arith.constant 3 : index
    %c1_130 = arith.constant 1 : index
    %c0_131 = arith.constant 0 : index
    %79 = vector.load %arg16[%c0_128, %c3_129, %c1_130, %c0_131] : memref<1x20x20x4xf32, #tpu.memory_space<vmem>>, vector<1x16x16x4xf32>
    %80 = vector.shape_cast %79 : vector<1x16x16x4xf32> to vector<256x4xf32>
    %c0_132 = arith.constant 0 : index
    %c3_133 = arith.constant 3 : index
    %c2_134 = arith.constant 2 : index
    %c0_135 = arith.constant 0 : index
    %81 = vector.load %arg16[%c0_132, %c3_133, %c2_134, %c0_135] : memref<1x20x20x4xf32, #tpu.memory_space<vmem>>, vector<1x16x16x4xf32>
    %82 = vector.shape_cast %81 : vector<1x16x16x4xf32> to vector<256x4xf32>
    %c0_136 = arith.constant 0 : index
    %c3_137 = arith.constant 3 : index
    %c3_138 = arith.constant 3 : index
    %c0_139 = arith.constant 0 : index
    %83 = vector.load %arg16[%c0_136, %c3_137, %c3_138, %c0_139] : memref<1x20x20x4xf32, #tpu.memory_space<vmem>>, vector<1x16x16x4xf32>
    %84 = vector.shape_cast %83 : vector<1x16x16x4xf32> to vector<256x4xf32>
    %c0_140 = arith.constant 0 : index
    %c3_141 = arith.constant 3 : index
    %c4_142 = arith.constant 4 : index
    %c0_143 = arith.constant 0 : index
    %85 = vector.load %arg16[%c0_140, %c3_141, %c4_142, %c0_143] : memref<1x20x20x4xf32, #tpu.memory_space<vmem>>, vector<1x16x16x4xf32>
    %86 = vector.shape_cast %85 : vector<1x16x16x4xf32> to vector<256x4xf32>
    %c0_144 = arith.constant 0 : index
    %c4_145 = arith.constant 4 : index
    %c0_146 = arith.constant 0 : index
    %c0_147 = arith.constant 0 : index
    %87 = vector.load %arg16[%c0_144, %c4_145, %c0_146, %c0_147] : memref<1x20x20x4xf32, #tpu.memory_space<vmem>>, vector<1x16x16x4xf32>
    %88 = vector.shape_cast %87 : vector<1x16x16x4xf32> to vector<256x4xf32>
    %c0_148 = arith.constant 0 : index
    %c4_149 = arith.constant 4 : index
    %c1_150 = arith.constant 1 : index
    %c0_151 = arith.constant 0 : index
    %89 = vector.load %arg16[%c0_148, %c4_149, %c1_150, %c0_151] : memref<1x20x20x4xf32, #tpu.memory_space<vmem>>, vector<1x16x16x4xf32>
    %90 = vector.shape_cast %89 : vector<1x16x16x4xf32> to vector<256x4xf32>
    %c0_152 = arith.constant 0 : index
    %c4_153 = arith.constant 4 : index
    %c2_154 = arith.constant 2 : index
    %c0_155 = arith.constant 0 : index
    %91 = vector.load %arg16[%c0_152, %c4_153, %c2_154, %c0_155] : memref<1x20x20x4xf32, #tpu.memory_space<vmem>>, vector<1x16x16x4xf32>
    %92 = vector.shape_cast %91 : vector<1x16x16x4xf32> to vector<256x4xf32>
    %c0_156 = arith.constant 0 : index
    %c4_157 = arith.constant 4 : index
    %c3_158 = arith.constant 3 : index
    %c0_159 = arith.constant 0 : index
    %93 = vector.load %arg16[%c0_156, %c4_157, %c3_158, %c0_159] : memref<1x20x20x4xf32, #tpu.memory_space<vmem>>, vector<1x16x16x4xf32>
    %94 = vector.shape_cast %93 : vector<1x16x16x4xf32> to vector<256x4xf32>
    %c0_160 = arith.constant 0 : index
    %c4_161 = arith.constant 4 : index
    %c4_162 = arith.constant 4 : index
    %c0_163 = arith.constant 0 : index
    %95 = vector.load %arg16[%c0_160, %c4_161, %c4_162, %c0_163] : memref<1x20x20x4xf32, #tpu.memory_space<vmem>>, vector<1x16x16x4xf32>
    %96 = vector.shape_cast %95 : vector<1x16x16x4xf32> to vector<256x4xf32>
    %97 = tpu.concatenate %48, %50, %52, %54, %56, %58, %60, %62, %64, %66, %68, %70, %72, %74, %76, %78 in 1 : vector<256x4xf32>, vector<256x4xf32>, vector<256x4xf32>, vector<256x4xf32>, vector<256x4xf32>, vector<256x4xf32>, vector<256x4xf32>, vector<256x4xf32>, vector<256x4xf32>, vector<256x4xf32>, vector<256x4xf32>, vector<256x4xf32>, vector<256x4xf32>, vector<256x4xf32>, vector<256x4xf32>, vector<256x4xf32> -> vector<256x64xf32>
    %98 = tpu.concatenate %80, %82, %84, %86, %88, %90, %92, %94, %96 in 1 : vector<256x4xf32>, vector<256x4xf32>, vector<256x4xf32>, vector<256x4xf32>, vector<256x4xf32>, vector<256x4xf32>, vector<256x4xf32>, vector<256x4xf32>, vector<256x4xf32> -> vector<256x36xf32>
    %99 = tpu.concatenate %97, %98 in 1 : vector<256x64xf32>, vector<256x36xf32> -> vector<256x100xf32>
    %100 = arith.truncf %99 : vector<256x100xf32> to vector<256x100xbf16>
    %c0_164 = arith.constant 0 : index
    %c0_165 = arith.constant 0 : index
    %101 = vector.load %arg6[%c0_164, %c0_165] : memref<100x8xbf16, #tpu.memory_space<vmem>>, vector<100x8xbf16>
    %cst_166 = arith.constant dense<0.000000e+00> : vector<256x8xf32>
    %102 = tpu.matmul %100, %101, %cst_166 {dimension_numbers = #tpu.dot_dimension_numbers<[1], [0], [0], [1], [0, 0, 1, 1], [], []>} : vector<256x100xbf16>, vector<100x8xbf16>, vector<256x8xf32> -> vector<256x8xf32>
    %c0_167 = arith.constant 0 : index
    %c0_168 = arith.constant 0 : index
    %103 = vector.load %arg7[%c0_167, %c0_168] : memref<1x8xf32, #tpu.memory_space<vmem>>, vector<1x8xf32>
    %104 = vector.broadcast %103 : vector<1x8xf32> to vector<256x8xf32>
    %105 = arith.addf %102, %104 : vector<256x8xf32>
    %cst_169 = arith.constant 0.000000e+00 : f32
    %106 = vector.broadcast %cst_169 : f32 to vector<256x8xf32>
    %107 = arith.maximumf %105, %106 : vector<256x8xf32>
    %cst_170 = arith.constant 0xFF800000 : f32
    %108 = vector.broadcast %cst_170 : f32 to vector<1x18x18x4xf32>
    %c0_171 = arith.constant 0 : index
    %c0_172 = arith.constant 0 : index
    %c0_173 = arith.constant 0 : index
    %c0_174 = arith.constant 0 : index
    %109 = vector.load %arg17[%c0_171, %c0_172, %c0_173, %c0_174] : memref<1x18x18x4xf32, #tpu.memory_space<vmem>>, vector<1x18x18x4xf32>
    tpu.vector_store %arg17[%c0_171, %c0_172, %c0_173, %c0_174], %108 {strides = array<i32>} : memref<1x18x18x4xf32, #tpu.memory_space<vmem>>, vector<1x18x18x4xf32>,
    %110 = arith.extf %0 : vector<1x16x16x4xbf16> to vector<1x16x16x4xf32>
    %c0_175 = arith.constant 0 : index
    %c1_176 = arith.constant 1 : index
    %c1_177 = arith.constant 1 : index
    %c0_178 = arith.constant 0 : index
    %111 = vector.load %arg17[%c0_175, %c1_176, %c1_177, %c0_178] : memref<1x18x18x4xf32, #tpu.memory_space<vmem>>, vector<1x16x16x4xf32>
    tpu.vector_store %arg17[%c0_175, %c1_176, %c1_177, %c0_178], %110 {strides = array<i32>} : memref<1x18x18x4xf32, #tpu.memory_space<vmem>>, vector<1x16x16x4xf32>,
    %c0_179 = arith.constant 0 : index
    %c0_180 = arith.constant 0 : index
    %c0_181 = arith.constant 0 : index
    %c0_182 = arith.constant 0 : index
    %112 = vector.load %arg17[%c0_179, %c0_180, %c0_181, %c0_182] : memref<1x18x18x4xf32, #tpu.memory_space<vmem>>, vector<1x16x16x4xf32>
    %c0_183 = arith.constant 0 : index
    %c0_184 = arith.constant 0 : index
    %c1_185 = arith.constant 1 : index
    %c0_186 = arith.constant 0 : index
    %113 = vector.load %arg17[%c0_183, %c0_184, %c1_185, %c0_186] : memref<1x18x18x4xf32, #tpu.memory_space<vmem>>, vector<1x16x16x4xf32>
    %114 = arith.maximumf %112, %113 : vector<1x16x16x4xf32>
    %c0_187 = arith.constant 0 : index
    %c0_188 = arith.constant 0 : index
    %c2_189 = arith.constant 2 : index
    %c0_190 = arith.constant 0 : index
    %115 = vector.load %arg17[%c0_187, %c0_188, %c2_189, %c0_190] : memref<1x18x18x4xf32, #tpu.memory_space<vmem>>, vector<1x16x16x4xf32>
    %116 = arith.maximumf %114, %115 : vector<1x16x16x4xf32>
    %c0_191 = arith.constant 0 : index
    %c1_192 = arith.constant 1 : index
    %c0_193 = arith.constant 0 : index
    %c0_194 = arith.constant 0 : index
    %117 = vector.load %arg17[%c0_191, %c1_192, %c0_193, %c0_194] : memref<1x18x18x4xf32, #tpu.memory_space<vmem>>, vector<1x16x16x4xf32>
    %118 = arith.maximumf %116, %117 : vector<1x16x16x4xf32>
    %c0_195 = arith.constant 0 : index
    %c1_196 = arith.constant 1 : index
    %c1_197 = arith.constant 1 : index
    %c0_198 = arith.constant 0 : index
    %119 = vector.load %arg17[%c0_195, %c1_196, %c1_197, %c0_198] : memref<1x18x18x4xf32, #tpu.memory_space<vmem>>, vector<1x16x16x4xf32>
    %120 = arith.maximumf %118, %119 : vector<1x16x16x4xf32>
    %c0_199 = arith.constant 0 : index
    %c1_200 = arith.constant 1 : index
    %c2_201 = arith.constant 2 : index
    %c0_202 = arith.constant 0 : index
    %121 = vector.load %arg17[%c0_199, %c1_200, %c2_201, %c0_202] : memref<1x18x18x4xf32, #tpu.memory_space<vmem>>, vector<1x16x16x4xf32>
    %122 = arith.maximumf %120, %121 : vector<1x16x16x4xf32>
    %c0_203 = arith.constant 0 : index
    %c2_204 = arith.constant 2 : index
    %c0_205 = arith.constant 0 : index
    %c0_206 = arith.constant 0 : index
    %123 = vector.load %arg17[%c0_203, %c2_204, %c0_205, %c0_206] : memref<1x18x18x4xf32, #tpu.memory_space<vmem>>, vector<1x16x16x4xf32>
    %124 = arith.maximumf %122, %123 : vector<1x16x16x4xf32>
    %c0_207 = arith.constant 0 : index
    %c2_208 = arith.constant 2 : index
    %c1_209 = arith.constant 1 : index
    %c0_210 = arith.constant 0 : index
    %125 = vector.load %arg17[%c0_207, %c2_208, %c1_209, %c0_210] : memref<1x18x18x4xf32, #tpu.memory_space<vmem>>, vector<1x16x16x4xf32>
    %126 = arith.maximumf %124, %125 : vector<1x16x16x4xf32>
    %c0_211 = arith.constant 0 : index
    %c2_212 = arith.constant 2 : index
    %c2_213 = arith.constant 2 : index
    %c0_214 = arith.constant 0 : index
    %127 = vector.load %arg17[%c0_211, %c2_212, %c2_213, %c0_214] : memref<1x18x18x4xf32, #tpu.memory_space<vmem>>, vector<1x16x16x4xf32>
    %128 = arith.maximumf %126, %127 : vector<1x16x16x4xf32>
    %129 = vector.shape_cast %128 : vector<1x16x16x4xf32> to vector<256x4xf32>
    %130 = arith.truncf %129 : vector<256x4xf32> to vector<256x4xbf16>
    %c0_215 = arith.constant 0 : index
    %c0_216 = arith.constant 0 : index
    %131 = vector.load %arg8[%c0_215, %c0_216] : memref<4x8xbf16, #tpu.memory_space<vmem>>, vector<4x8xbf16>
    %cst_217 = arith.constant dense<0.000000e+00> : vector<256x8xf32>
    %132 = tpu.matmul %130, %131, %cst_217 {dimension_numbers = #tpu.dot_dimension_numbers<[1], [0], [0], [1], [0, 0, 1, 1], [], []>} : vector<256x4xbf16>, vector<4x8xbf16>, vector<256x8xf32> -> vector<256x8xf32>
    %c0_218 = arith.constant 0 : index
    %c0_219 = arith.constant 0 : index
    %133 = vector.load %arg9[%c0_218, %c0_219] : memref<1x8xf32, #tpu.memory_space<vmem>>, vector<1x8xf32>
    %134 = vector.broadcast %133 : vector<1x8xf32> to vector<256x8xf32>
    %135 = arith.addf %132, %134 : vector<256x8xf32>
    %cst_220 = arith.constant 0.000000e+00 : f32
    %136 = vector.broadcast %cst_220 : f32 to vector<256x8xf32>
    %137 = arith.maximumf %135, %136 : vector<256x8xf32>
    %138 = arith.truncf %9 : vector<256x8xf32> to vector<256x8xbf16>
    %c0_221 = arith.constant 0 : index
    %c0_222 = arith.constant 0 : index
    %139 = vector.load %arg10[%c0_221, %c0_222] : memref<8x4xbf16, #tpu.memory_space<vmem>>, vector<8x4xbf16>
    %cst_223 = arith.constant dense<0.000000e+00> : vector<256x4xf32>
    %140 = tpu.matmul %138, %139, %cst_223 {dimension_numbers = #tpu.dot_dimension_numbers<[1], [0], [0], [1], [0, 0, 1, 1], [], []>} : vector<256x8xbf16>, vector<8x4xbf16>, vector<256x4xf32> -> vector<256x4xf32>
    %141 = arith.truncf %42 : vector<256x8xf32> to vector<256x8xbf16>
    %c0_224 = arith.constant 0 : index
    %c0_225 = arith.constant 0 : index
    %142 = vector.load %arg11[%c0_224, %c0_225] : memref<8x4xbf16, #tpu.memory_space<vmem>>, vector<8x4xbf16>
    %cst_226 = arith.constant dense<0.000000e+00> : vector<256x4xf32>
    %143 = tpu.matmul %141, %142, %cst_226 {dimension_numbers = #tpu.dot_dimension_numbers<[1], [0], [0], [1], [0, 0, 1, 1], [], []>} : vector<256x8xbf16>, vector<8x4xbf16>, vector<256x4xf32> -> vector<256x4xf32>
    %144 = arith.addf %140, %143 : vector<256x4xf32>
    %145 = arith.truncf %107 : vector<256x8xf32> to vector<256x8xbf16>
    %c0_227 = arith.constant 0 : index
    %c0_228 = arith.constant 0 : index
    %146 = vector.load %arg12[%c0_227, %c0_228] : memref<8x4xbf16, #tpu.memory_space<vmem>>, vector<8x4xbf16>
    %cst_229 = arith.constant dense<0.000000e+00> : vector<256x4xf32>
    %147 = tpu.matmul %145, %146, %cst_229 {dimension_numbers = #tpu.dot_dimension_numbers<[1], [0], [0], [1], [0, 0, 1, 1], [], []>} : vector<256x8xbf16>, vector<8x4xbf16>, vector<256x4xf32> -> vector<256x4xf32>
    %148 = arith.addf %144, %147 : vector<256x4xf32>
    %149 = arith.truncf %137 : vector<256x8xf32> to vector<256x8xbf16>
    %c0_230 = arith.constant 0 : index
    %c0_231 = arith.constant 0 : index
    %150 = vector.load %arg13[%c0_230, %c0_231] : memref<8x4xbf16, #tpu.memory_space<vmem>>, vector<8x4xbf16>
    %cst_232 = arith.constant dense<0.000000e+00> : vector<256x4xf32>
    %151 = tpu.matmul %149, %150, %cst_232 {dimension_numbers = #tpu.dot_dimension_numbers<[1], [0], [0], [1], [0, 0, 1, 1], [], []>} : vector<256x8xbf16>, vector<8x4xbf16>, vector<256x4xf32> -> vector<256x4xf32>
    %152 = arith.addf %148, %151 : vector<256x4xf32>
    %c0_233 = arith.constant 0 : index
    %c0_234 = arith.constant 0 : index
    %153 = vector.load %arg14[%c0_233, %c0_234] : memref<256x4xf32, #tpu.memory_space<vmem>>, vector<256x4xf32>
    tpu.vector_store %arg14[%c0_233, %c0_234], %152 {strides = array<i32>} : memref<256x4xf32, #tpu.memory_space<vmem>>, vector<256x4xf32>,
    return
  }
  func.func @transform_0(%arg0: i32) -> (i32, i32, i32, i32) {
    %c0_i32 = arith.constant 0 : i32
    %c0_i32_0 = arith.constant 0 : i32
    %c0_i32_1 = arith.constant 0 : i32
    %c0_i32_2 = arith.constant 0 : i32
    return %arg0, %c0_i32, %c0_i32_0, %c0_i32_1 : i32, i32, i32, i32
  }
  func.func @transform_1(%arg0: i32) -> (i32, i32) {
    %c0_i32 = arith.constant 0 : i32
    %c0_i32_0 = arith.constant 0 : i32
    %c0_i32_1 = arith.constant 0 : i32
    return %c0_i32, %c0_i32_0 : i32, i32
  }
  func.func @transform_2(%arg0: i32) -> (i32, i32) {
    %c0_i32 = arith.constant 0 : i32
    %c0_i32_0 = arith.constant 0 : i32
    %c0_i32_1 = arith.constant 0 : i32
    return %c0_i32, %c0_i32_0 : i32, i32
  }
  func.func @transform_3(%arg0: i32) -> (i32, i32) {
    %c0_i32 = arith.constant 0 : i32
    %c0_i32_0 = arith.constant 0 : i32
    %c0_i32_1 = arith.constant 0 : i32
    return %c0_i32, %c0_i32_0 : i32, i32
  }
  func.func @transform_4(%arg0: i32) -> (i32, i32) {
    %c0_i32 = arith.constant 0 : i32
    %c0_i32_0 = arith.constant 0 : i32
    %c0_i32_1 = arith.constant 0 : i32
    return %c0_i32, %c0_i32_0 : i32, i32
  }
  func.func @transform_5(%arg0: i32) -> (i32, i32) {
    %c0_i32 = arith.constant 0 : i32
    %c0_i32_0 = arith.constant 0 : i32
    %c0_i32_1 = arith.constant 0 : i32
    return %c0_i32, %c0_i32_0 : i32, i32
  }
  func.func @transform_6(%arg0: i32) -> (i32, i32) {
    %c0_i32 = arith.constant 0 : i32
    %c0_i32_0 = arith.constant 0 : i32
    %c0_i32_1 = arith.constant 0 : i32
    return %c0_i32, %c0_i32_0 : i32, i32
  }
  func.func @transform_7(%arg0: i32) -> (i32, i32) {
    %c0_i32 = arith.constant 0 : i32
    %c0_i32_0 = arith.constant 0 : i32
    %c0_i32_1 = arith.constant 0 : i32
    return %c0_i32, %c0_i32_0 : i32, i32
  }
  func.func @transform_8(%arg0: i32) -> (i32, i32) {
    %c0_i32 = arith.constant 0 : i32
    %c0_i32_0 = arith.constant 0 : i32
    %c0_i32_1 = arith.constant 0 : i32
    return %c0_i32, %c0_i32_0 : i32, i32
  }
  func.func @transform_9(%arg0: i32) -> (i32, i32) {
    %c0_i32 = arith.constant 0 : i32
    %c0_i32_0 = arith.constant 0 : i32
    %c0_i32_1 = arith.constant 0 : i32
    return %c0_i32, %c0_i32_0 : i32, i32
  }
  func.func @transform_10(%arg0: i32) -> (i32, i32) {
    %c0_i32 = arith.constant 0 : i32
    %c0_i32_0 = arith.constant 0 : i32
    %c0_i32_1 = arith.constant 0 : i32
    return %c0_i32, %c0_i32_0 : i32, i32
  }
  func.func @transform_11(%arg0: i32) -> (i32, i32) {
    %c0_i32 = arith.constant 0 : i32
    %c0_i32_0 = arith.constant 0 : i32
    %c0_i32_1 = arith.constant 0 : i32
    return %c0_i32, %c0_i32_0 : i32, i32
  }
  func.func @transform_12(%arg0: i32) -> (i32, i32) {
    %c0_i32 = arith.constant 0 : i32
    %c0_i32_0 = arith.constant 0 : i32
    %c0_i32_1 = arith.constant 0 : i32
    return %c0_i32, %c0_i32_0 : i32, i32
  }
  func.func @transform_13(%arg0: i32) -> (i32, i32) {
    %c0_i32 = arith.constant 0 : i32
    %c0_i32_0 = arith.constant 0 : i32
    return %arg0, %c0_i32 : i32, i32
  }
}

</mosaic_0001>

<bundles_post_ra>
// kernel: inception_forward.1
= control target key start
LH: loop header
LB: loop body
LE: loop exit
PB: predicated region body
PF: predicated region fallthrough
CT: control target
= control target key end

     0   :  { %s13515_s25 = smov 0   ;;  %s19756_s0 = inlined_call_operand.vmem [shape: bf16[2,16,16,4], index: 0, kind: input, shape index: {}]   ;;  %s19757_s1 = inlined_call_operand.vmem [shape: bf16[4,16], index: 1, kind: input, shape index: {}]   ;;  %s19758_s2 = inlined_call_operand.vmem [shape: f32[1,16], index: 2, kind: input, shape index: {}]   ;;  %s19759_s3 = inlined_call_operand.vmem [shape: bf16[36,8], index: 3, kind: input, shape index: {}]   ;;  %s19760_s4 = inlined_call_operand.vmem [shape: f32[1,8], index: 4, kind: input, shape index: {}]   ;;  %s19761_s5 = inlined_call_operand.vmem [shape: bf16[100,8], index: 5, kind: input, shape index: {}]   ;;  %s19762_s6 = inlined_call_operand.vmem [shape: f32[1,8], index: 6, kind: input, shape index: {}]   ;;  %s19763_s7 = inlined_call_operand.vmem [shape: bf16[4,8], index: 7, kind: input, shape index: {}]   ;;  %s19764_s8 = inlined_call_operand.vmem [shape: f32[1,8], index: 8, kind: input, shape index: {}]   ;;  %s19765_s9 = inlined_call_operand.vmem [shape: bf16[8,4], index: 9, kind: input, shape index: {}]   ;;  %s19766_s10 = inlined_call_operand.vmem [shape: bf16[8,4], index: 10, kind: input, shape index: {}]   ;;  %s19767_s11 = inlined_call_operand.vmem [shape: bf16[8,4], index: 11, kind: input, shape index: {}]   ;;  %s19768_s12 = inlined_call_operand.vmem [shape: bf16[8,4], index: 12, kind: input, shape index: {}]   ;;  %s19769_s13 = inlined_call_operand.vmem [shape: f32[512,4], index: 13, kind: output, shape index: {}]  }
   0x1 LB: > { %s13521_s26 = sadd.s32 4294967295, %s13423_s25   ;;  %p10054_p0 = scmp.ge.s32.totalorder %s13423_s25, 1  ;;  %s13423_s25 = sphi %s13515_s25, %s23_s25  }
   0x2   : > { %p387_p1 = scmp.lt.s32.totalorder %s13423_s25, 3 }
   0x4   : > { %p388_p2 = pnand %p10054_p0, %p387_p1 }
   0x6   : > { %391 = sbr.rel (%p388_p2) target bundleno = 2072 (0x818), region = 72 }
   0xd   : > { %v475_v0 = vld [vmem:[%s19757_s1] sm:$0x3]  ;;  %vm612_vm0 = vcmask 1041408   ;;  %p431_p3 = scmp.lt.s32.totalorder %s13521_s26, 1  ;;  %vm811_vm1 = vcmask 25600   ;;  %vm20096_vm2 = vcmask 31744  }
   0xe   : > { %10748 = vmatprep.subr.msk.bf16.mxu1 %vm612_vm0, %v475_v0  ;;  %v614_v1 = vsel %vm612_vm0, %v475_v0, 0  ;;  %v13425_v2 = vmov -inf   ;;  %v13426_v3 = vmov 0.0   ;;  %s13427_s17 = smov 24   ;;  %s13428_s18 = smov 4   ;;  %vm2891_vm3 = vcmask 27648  }
   0xf   : > { %10365 = vmatpush3.bf16.msra.mxu1 %v614_v1  ;;  %s13532_s29 = scalar_select %p431_p3, %s13521_s26, 1  ;;  %8052 = vst.msk [vmem:[#allocation4 + $0x18] sm:$0xff] %vm20096_vm2, %v13425_v2  ;;  %8053 = vst.msk [vmem:[#allocation4 + $0x20] sm:$0xff] %vm20096_vm2, %v13425_v2  ;;  %vm20095_vm4 = vcmask 64512   ;;  %vm2403_vm5 = vcmask 97280   ;;  %vm2436_vm6 = vcmask 130048  }
  0x10   : > { %8054 = vst.msk [vmem:[#allocation4 + $0x28] sm:$0x3] %vm811_vm1, %v13425_v2  ;;  %8051 = vst.msk [vmem:[#allocation4 + $0x10] sm:$0x3] %vm811_vm1, %v13425_v2  ;;  %s13429_s19 = smov 28   ;;  %s13430_s20 = smov 8  }
  0x11   : > { %8049 = vst.msk [vmem:[#allocation4] sm:$0xff] %vm20096_vm2, %v13425_v2  ;;  %8050 = vst.msk [vmem:[#allocation4 + $0x8] sm:$0xff] %vm20096_vm2, %v13425_v2  ;;  %s10219_s30 = sshll.u32 %s13532_s29, 7  ;;  %s13431_s21 = smov 32   ;;  %vm2469_vm7 = vcmask 162816   ;;  %vm2502_vm8 = vcmask 195584  }
  0x12   : > { %8055 = vst.msk [vmem:[#allocation4 + $0x30] sm:$0xff] %vm20096_vm2, %v13425_v2  ;;  %8056 = vst.msk [vmem:[#allocation4 + $0x38] sm:$0xff] %vm20096_vm2, %v13425_v2  ;;  %s13780_s16 = scalar_lea.vmem %s19756_s0, %s10219_s30  ;;  %s13432_s24 = smov 116   ;;  %vm2535_vm9 = vcmask 228352   ;;  %vm2568_vm10 = vcmask 261120   ;;  %vm2644_vm11 = vcmask 293888  }
  0x13   : > { %8057 = vst.msk [vmem:[#allocation4 + $0x40] sm:$0x3] %vm811_vm1, %v13425_v2  ;;  %8060 = vst.msk [vmem:[#allocation4 + $0x58] sm:$0x3] %vm811_vm1, %v13425_v2  ;;  %v443_v4 = vld [vmem:[%s13780_s16] sm:$0xff]   ;;  %v445_v5 = vld [vmem:[%s13780_s16 + $0x8] sm:$0xff]  }
  0x14   : > { %8058 = vst.msk [vmem:[#allocation4 + $0x48] sm:$0xff] %vm20096_vm2, %v13425_v2  ;;  %8059 = vst.msk [vmem:[#allocation4 + $0x50] sm:$0xff] %vm20096_vm2, %v13425_v2  ;;  %v447_v6 = vld [vmem:[%s13780_s16 + $0x10] sm:$0xff]   ;;  %v8103_v7 = vunpack.c.l.bf16 %v443_v4  ;;  %v8104_v8 = vunpack.c.h.bf16 %v443_v4  ;;  %v8105_v9 = vunpack.c.l.bf16 %v445_v5  ;;  %v8106_v10 = vunpack.c.h.bf16 %v445_v5  ;;  %v13786_v12 = vld [vmem:[%s13780_s16 + $0x18] sm:$0xff]   ;;  %10366 = vmatprep.mubr.msk.bf16.mxu1 %vm20096_vm2, %v443_v4  ;;  %s13433_s27 = smov 120   ;;  %s13434_s28 = smov 12  }
  0x15   : > { %8061 = vst.msk [vmem:[#allocation4 + $0x60] sm:$0xff] %vm20096_vm2, %v13425_v2  ;;  %8062 = vst.msk [vmem:[#allocation4 + $0x68] sm:$0xff] %vm20096_vm2, %v13425_v2  ;;  %v8107_v11 = vunpack.c.l.bf16 %v447_v6  ;;  %v8108_v13 = vunpack.c.h.bf16 %v447_v6  ;;  %v8109_v14 = vunpack.c.l.bf16 %v13786_v12  ;;  %v8110_v15 = vunpack.c.h.bf16 %v13786_v12  ;;  %v13794_v16 = vld [vmem:[%s13780_s16 + $0x20] sm:$0xff]   ;;  %10367 = vmatmul.mubr.msk.bf16.vlgmr.msra.gmra.mrb[0].mxu1 %vm20096_vm2, %v445_v5  ;;  %v13803_v19 = vld [vmem:[%s13780_s16 + $0x28] sm:$0xff]   ;;  %s13435_s29 = smov 16   ;;  %s13436_s30 = smov 20  }
  0x16   : > { %8063 = vst.msk [vmem:[#allocation4 + $0x70] sm:$0x3] %vm811_vm1, %v13425_v2  ;;  %8066 = vst.msk [vmem:[#allocation4 + $0x88] sm:$0x3] %vm811_vm1, %v13425_v2  ;;  %v8111_v17 = vunpack.c.l.bf16 %v13794_v16  ;;  %v8112_v18 = vunpack.c.h.bf16 %v13794_v16  ;;  %v13806_v20 = vld [vmem:[%s13780_s16 + $0x30] sm:$0xff]   ;;  %10370 = vmatprep.mubr.msk.bf16.mxu1 %vm20096_vm2, %v447_v6  ;;  %v8113_v21 = vunpack.c.l.bf16 %v13803_v19  ;;  %v8114_v22 = vunpack.c.h.bf16 %v13803_v19  ;;  %v13816_v24 = vld [vmem:[%s13780_s16 + $0x38] sm:$0xff]  }
  0x17   : > { %8064 = vst.msk [vmem:[#allocation4 + $0x78] sm:$0xff] %vm20096_vm2, %v13425_v2  ;;  %8065 = vst.msk [vmem:[#allocation4 + $0x80] sm:$0xff] %vm20096_vm2, %v13425_v2  ;;  %v8115_v23 = vunpack.c.l.bf16 %v13806_v20  ;;  %v8116_v25 = vunpack.c.h.bf16 %v13806_v20  ;;  %v8117_v26 = vunpack.c.l.bf16 %v13816_v24  ;;  %v8118_v27 = vunpack.c.h.bf16 %v13816_v24  ;;  %v13824_v28 = vld [vmem:[%s13780_s16 + $0x40] sm:$0xff]   ;;  %v13827_v29 = vld [vmem:[%s13780_s16 + $0x48] sm:$0xff]   ;;  %s13439_s14 = smov 44   ;;  %s13440_s22 = smov 48  }
  0x18   : > { %8067 = vst.msk [vmem:[#allocation4 + $0x90] sm:$0xff] %vm20096_vm2, %v13425_v2  ;;  %8068 = vst.msk [vmem:[#allocation4 + $0x98] sm:$0xff] %vm20096_vm2, %v13425_v2  ;;  %v8119_v30 = vunpack.c.l.bf16 %v13824_v28  ;;  %v8120_v31 = vunpack.c.h.bf16 %v13824_v28  ;;  %v13835_v32 = vld [vmem:[%s13780_s16 + $0x50] sm:$0xff]   ;;  %v13838_v33 = vld [vmem:[%s13780_s16 + $0x58] sm:$0xff]   ;;  %v8121_v35 = vunpack.c.l.bf16 %v13827_v29  ;;  %v8122_v36 = vunpack.c.h.bf16 %v13827_v29  ;;  %s13441_s23 = smov 52  }
  0x19   : > { %8069 = vst.msk [vmem:[#allocation4 + $0xa0] sm:$0x3] %vm811_vm1, %v13425_v2  ;;  %8072 = vst.msk [vmem:[#allocation4 + $0xb8] sm:$0x3] %vm811_vm1, %v13425_v2  ;;  %v13841_v34 = vld [vmem:[%s13780_s16 + $0x60] sm:$0xff]   ;;  %v8123_v37 = vunpack.c.l.bf16 %v13835_v32  ;;  %v13850_v38 = vld [vmem:[%s13780_s16 + $0x68] sm:$0xff]   ;;  %v8124_v44 = vunpack.c.h.bf16 %v13835_v32  ;;  %v8125_v45 = vunpack.c.l.bf16 %v13838_v33  ;;  %v8126_v46 = vunpack.c.h.bf16 %v13838_v33 }
  0x1a   : > { %8070 = vst.msk [vmem:[#allocation4 + $0xa8] sm:$0xff] %vm20096_vm2, %v13425_v2  ;;  %8071 = vst.msk [vmem:[#allocation4 + $0xb0] sm:$0xff] %vm20096_vm2, %v13425_v2  ;;  %v13853_v39 = vld [vmem:[%s13780_s16 + $0x70] sm:$0xff]   ;;  %v473_v47 = vld [vmem:[%s13780_s16 + $0x78] sm:$0xff]   ;;  %v8127_v48 = vunpack.c.l.bf16 %v13841_v34  ;;  %v8128_v49 = vunpack.c.h.bf16 %v13841_v34  ;;  %v8129_v50 = vunpack.c.l.bf16 %v13850_v38  ;;  %v8130_v51 = vunpack.c.h.bf16 %v13850_v38 }
  0x1b   : > { %8073 = vst.msk [vmem:[#allocation4 + $0xc0] sm:$0xff] %vm20096_vm2, %v13425_v2  ;;  %8074 = vst.msk [vmem:[#allocation4 + $0xc8] sm:$0xff] %vm20096_vm2, %v13425_v2  ;;  %v8131_v52 = vunpack.c.l.bf16 %v13853_v39  ;;  %v8132_v54 = vunpack.c.h.bf16 %v13853_v39  ;;  %v8133_v55 = vunpack.c.l.bf16 %v473_v47  ;;  %v8134_v56 = vunpack.c.h.bf16 %v473_v47 }
  0x1c   : > { %8075 = vst.msk [vmem:[#allocation4 + $0xd0] sm:$0x3] %vm811_vm1, %v13425_v2  ;;  %8078 = vst.msk [vmem:[#allocation4 + $0xe8] sm:$0x3] %vm811_vm1, %v13425_v2  ;;  %vm9063_vm12 = vcmask 1043456   ;;  %vm6090_vm13 = vcmask 326656  }
  0x1d   : > { %8076 = vst.msk [vmem:[#allocation4 + $0xd8] sm:$0xff] %vm20096_vm2, %v13425_v2  ;;  %8077 = vst.msk [vmem:[#allocation4 + $0xe0] sm:$0xff] %vm20096_vm2, %v13425_v2  ;;  %10371 = vmatmul.mubr.msk.bf16.gmra.mrb[4].mxu1 %vm20096_vm2, %v13786_v12  ;;  %vm6123_vm14 = vcmask 359424   ;;  %vm6156_vm15 = vcmask 392192  }
  0x1e   : > { %8079 = vst.msk [vmem:[#allocation4 + $0xf0] sm:$0xff] %vm20096_vm2, %v13425_v2  ;;  %8080 = vst.msk [vmem:[#allocation4 + $0xf8] sm:$0xff] %vm20096_vm2, %v13425_v2  ;;  %10374 = vmatprep.mubr.msk.bf16.mxu1 %vm20096_vm2, %v13794_v16 }
  0x1f   : > { %8081 = vst.msk [vmem:[#allocation4 + $0x100] sm:$0x3] %vm811_vm1, %v13425_v2  ;;  %8084 = vst.msk [vmem:[#allocation4 + $0x118] sm:$0x3] %vm811_vm1, %v13425_v2 }
  0x20   : > { %8082 = vst.msk [vmem:[#allocation4 + $0x108] sm:$0xff] %vm20096_vm2, %v13425_v2  ;;  %8083 = vst.msk [vmem:[#allocation4 + $0x110] sm:$0xff] %vm20096_vm2, %v13425_v2 }
  0x21   : > { %8085 = vst.msk [vmem:[#allocation4 + $0x120] sm:$0xff] %vm20096_vm2, %v13425_v2  ;;  %8086 = vst.msk [vmem:[#allocation4 + $0x128] sm:$0xff] %vm20096_vm2, %v13425_v2 }
  0x22   : > { %8087 = vst.msk [vmem:[#allocation4 + $0x130] sm:$0x3] %vm811_vm1, %v13425_v2  ;;  %8090 = vst.msk [vmem:[#allocation4 + $0x148] sm:$0x3] %vm811_vm1, %v13425_v2 }
  0x23   : > { %8088 = vst.msk [vmem:[#allocation4 + $0x138] sm:$0xff] %vm20096_vm2, %v13425_v2  ;;  %8089 = vst.msk [vmem:[#allocation4 + $0x140] sm:$0xff] %vm20096_vm2, %v13425_v2 }
  0x24   : > { %8091 = vst.msk [vmem:[#allocation4 + $0x150] sm:$0xff] %vm20096_vm2, %v13425_v2  ;;  %8092 = vst.msk [vmem:[#allocation4 + $0x158] sm:$0xff] %vm20096_vm2, %v13425_v2 }
  0x25   : > { %8093 = vst.msk [vmem:[#allocation4 + $0x160] sm:$0x3] %vm811_vm1, %v13425_v2  ;;  %8096 = vst.msk [vmem:[#allocation4 + $0x178] sm:$0x3] %vm811_vm1, %v13425_v2  ;;  %10375 = vmatmul.mubr.msk.bf16.gmra.mrb[8].mxu1 %vm20096_vm2, %v13803_v19 }
  0x26   : > { %8094 = vst.msk [vmem:[#allocation4 + $0x168] sm:$0xff] %vm20096_vm2, %v13425_v2  ;;  %8095 = vst.msk [vmem:[#allocation4 + $0x170] sm:$0xff] %vm20096_vm2, %v13425_v2  ;;  %10378 = vmatprep.mubr.msk.bf16.mxu1 %vm20096_vm2, %v13806_v20 }
  0x27   : > { %8097 = vst.msk [vmem:[#allocation4 + $0x180] sm:$0xff] %vm20096_vm2, %v13425_v2  ;;  %8098 = vst.msk [vmem:[#allocation4 + $0x188] sm:$0xff] %vm20096_vm2, %v13425_v2 }
  0x28   : > { %8099 = vst.msk [vmem:[#allocation4 + $0x190] sm:$0x3] %vm811_vm1, %v13425_v2  ;;  %8102 = vst.msk [vmem:[#allocation4 + $0x1a8] sm:$0x3] %vm811_vm1, %v13425_v2 }
  0x29   : > { %8100 = vst.msk [vmem:[#allocation4 + $0x198] sm:$0xff] %vm20096_vm2, %v13425_v2  ;;  %8101 = vst.msk [vmem:[#allocation4 + $0x1a0] sm:$0xff] %vm20096_vm2, %v13425_v2 }
  0x2a   : > { %861 = vst.msk [vmem:[#allocation2 + $0x198] sm:$0xff] %vm20096_vm2, %v13426_v3  ;;  %862 = vst.msk [vmem:[#allocation2 + $0x1a0] sm:$0xff] %vm20096_vm2, %v13426_v3 }
  0x2b   : > { %809 = vst.msk [vmem:[#allocation2] sm:$0xff] %vm20096_vm2, %v13426_v3  ;;  %810 = vst.msk [vmem:[#allocation2 + $0x8] sm:$0xff] %vm20096_vm2, %v13426_v3 }
  0x2c   : > { %812 = vst.msk [vmem:[#allocation2 + $0x10] sm:$0x3] %vm811_vm1, %v13426_v3  ;;  %815 = vst.msk [vmem:[#allocation2 + $0x28] sm:$0x3] %vm811_vm1, %v13426_v3 }
  0x2d   : > { %813 = vst.msk [vmem:[#allocation2 + $0x18] sm:$0xff] %vm20096_vm2, %v13426_v3  ;;  %814 = vst.msk [vmem:[#allocation2 + $0x20] sm:$0xff] %vm20096_vm2, %v13426_v3  ;;  %10379 = vmatmul.mubr.msk.bf16.gmra.mrb[12].mxu1 %vm20096_vm2, %v13816_v24 }
  0x2e   : > { %816 = vst.msk [vmem:[#allocation2 + $0x30] sm:$0xff] %vm20096_vm2, %v13426_v3  ;;  %817 = vst.msk [vmem:[#allocation2 + $0x38] sm:$0xff] %vm20096_vm2, %v13426_v3  ;;  %10382 = vmatprep.mubr.msk.bf16.mxu1 %vm20096_vm2, %v13824_v28 }
  0x2f   : > { %818 = vst.msk [vmem:[#allocation2 + $0x40] sm:$0x3] %vm811_vm1, %v13426_v3  ;;  %821 = vst.msk [vmem:[#allocation2 + $0x58] sm:$0x3] %vm811_vm1, %v13426_v3 }
  0x30   : > { %819 = vst.msk [vmem:[#allocation2 + $0x48] sm:$0xff] %vm20096_vm2, %v13426_v3  ;;  %820 = vst.msk [vmem:[#allocation2 + $0x50] sm:$0xff] %vm20096_vm2, %v13426_v3 }
  0x31   : > { %822 = vst.msk [vmem:[#allocation2 + $0x60] sm:$0xff] %vm20096_vm2, %v13426_v3  ;;  %823 = vst.msk [vmem:[#allocation2 + $0x68] sm:$0xff] %vm20096_vm2, %v13426_v3  ;;  %v1248_v40 = vld [vmem:[#allocation2 + $0x198] sm:$0xff]  ;;  %v1249_v41 = vld [vmem:[#allocation2 + $0x1a0] sm:$0xff] }
  0x32   : > { %824 = vst.msk [vmem:[#allocation2 + $0x70] sm:$0x3] %vm811_vm1, %v13426_v3  ;;  %827 = vst.msk [vmem:[#allocation2 + $0x88] sm:$0x3] %vm811_vm1, %v13426_v3  ;;  %v1057_v42 = vld [vmem:[#allocation2 + $0x1] sm:$0xff]  ;;  %v1280_v53 = vld [vmem:[#allocation2 + $0x199] sm:$0xff]  ;;  %v10794_v60 = vpack.i.bf16 %v1249_v41, %v1248_v40 }
  0x33   : > { %825 = vst.msk [vmem:[#allocation2 + $0x78] sm:$0xff] %vm20096_vm2, %v13426_v3  ;;  %826 = vst.msk [vmem:[#allocation2 + $0x80] sm:$0xff] %vm20096_vm2, %v13426_v3  ;;  %v1058_v43 = vld [vmem:[#allocation2 + $0x9] sm:$0xff]  ;;  %v1312_v0 = vld [vmem:[#allocation2 + $0x19a] sm:$0xff] }
  0x34   : > { %828 = vst.msk [vmem:[#allocation2 + $0x90] sm:$0xff] %vm20096_vm2, %v13426_v3  ;;  %829 = vst.msk [vmem:[#allocation2 + $0x98] sm:$0xff] %vm20096_vm2, %v13426_v3  ;;  %v1089_v58 = vld [vmem:[#allocation2 + $0x2] sm:$0xff]  ;;  %v1090_v59 = vld [vmem:[#allocation2 + $0xa] sm:$0xff]  ;;  %v10784_v61 = vpack.i.bf16 %v1058_v43, %v1057_v42  ;;  %10795 = vrot.lane.b32.xlu1 %v10794_v60, %s13427_s17 }
  0x35   : > { %830 = vst.msk [vmem:[#allocation2 + $0xa0] sm:$0x3] %vm811_vm1, %v13426_v3  ;;  %833 = vst.msk [vmem:[#allocation2 + $0xb8] sm:$0x3] %vm811_vm1, %v13426_v3  ;;  %v10789_v63 = vpack.i.bf16 %v1090_v59, %v1089_v58  ;;  %10383 = vmatmul.mubr.msk.bf16.gmra.mrb[16].mxu1 %vm20096_vm2, %v13827_v29 }
  0x36   : > { %831 = vst.msk [vmem:[#allocation2 + $0xa8] sm:$0xff] %vm20096_vm2, %v13426_v3  ;;  %832 = vst.msk [vmem:[#allocation2 + $0xb0] sm:$0xff] %vm20096_vm2, %v13426_v3  ;;  %10785 = vrot.lane.b32.xlu0 %v10784_v61, %s13428_s18  ;;  %10386 = vmatprep.mubr.msk.bf16.mxu1 %vm20096_vm2, %v13835_v32 }
  0x37   : > { %834 = vst.msk [vmem:[#allocation2 + $0xc0] sm:$0xff] %vm20096_vm2, %v13426_v3  ;;  %835 = vst.msk [vmem:[#allocation2 + $0xc8] sm:$0xff] %vm20096_vm2, %v13426_v3 }
  0x38   : > { %836 = vst.msk [vmem:[#allocation2 + $0xd0] sm:$0x3] %vm811_vm1, %v13426_v3  ;;  %839 = vst.msk [vmem:[#allocation2 + $0xe8] sm:$0x3] %vm811_vm1, %v13426_v3 }
  0x39   : > { %837 = vst.msk [vmem:[#allocation2 + $0xd8] sm:$0xff] %vm20096_vm2, %v13426_v3  ;;  %838 = vst.msk [vmem:[#allocation2 + $0xe0] sm:$0xff] %vm20096_vm2, %v13426_v3 }
  0x3a   : > { %840 = vst.msk [vmem:[#allocation2 + $0xf0] sm:$0xff] %vm20096_vm2, %v13426_v3  ;;  %841 = vst.msk [vmem:[#allocation2 + $0xf8] sm:$0xff] %vm20096_vm2, %v13426_v3  ;;  %10790 = vrot.lane.b32.xlu0 %v10789_v63, %s13430_s20 }
  0x3b   : > { %842 = vst.msk [vmem:[#allocation2 + $0x100] sm:$0x3] %vm811_vm1, %v13426_v3  ;;  %845 = vst.msk [vmem:[#allocation2 + $0x118] sm:$0x3] %vm811_vm1, %v13426_v3 }
  0x3c   : > { %843 = vst.msk [vmem:[#allocation2 + $0x108] sm:$0xff] %vm20096_vm2, %v13426_v3  ;;  %844 = vst.msk [vmem:[#allocation2 + $0x110] sm:$0xff] %vm20096_vm2, %v13426_v3 }
  0x3d   : > { %846 = vst.msk [vmem:[#allocation2 + $0x120] sm:$0xff] %vm20096_vm2, %v13426_v3  ;;  %847 = vst.msk [vmem:[#allocation2 + $0x128] sm:$0xff] %vm20096_vm2, %v13426_v3  ;;  %10387 = vmatmul.mubr.msk.bf16.gmra.mrb[20].mxu1 %vm20096_vm2, %v13838_v33 }
  0x3e   : > { %848 = vst.msk [vmem:[#allocation2 + $0x130] sm:$0x3] %vm811_vm1, %v13426_v3  ;;  %851 = vst.msk [vmem:[#allocation2 + $0x148] sm:$0x3] %vm811_vm1, %v13426_v3  ;;  %10390 = vmatprep.mubr.msk.bf16.mxu1 %vm20096_vm2, %v13841_v34 }
  0x3f   : > { %849 = vst.msk [vmem:[#allocation2 + $0x138] sm:$0xff] %vm20096_vm2, %v13426_v3  ;;  %850 = vst.msk [vmem:[#allocation2 + $0x140] sm:$0xff] %vm20096_vm2, %v13426_v3 }
  0x40   : > { %852 = vst.msk [vmem:[#allocation2 + $0x150] sm:$0xff] %vm20096_vm2, %v13426_v3  ;;  %853 = vst.msk [vmem:[#allocation2 + $0x158] sm:$0xff] %vm20096_vm2, %v13426_v3 }
  0x41   : > { %854 = vst.msk [vmem:[#allocation2 + $0x160] sm:$0x3] %vm811_vm1, %v13426_v3  ;;  %857 = vst.msk [vmem:[#allocation2 + $0x178] sm:$0x3] %vm811_vm1, %v13426_v3 }
  0x42   : > { %855 = vst.msk [vmem:[#allocation2 + $0x168] sm:$0xff] %vm20096_vm2, %v13426_v3  ;;  %856 = vst.msk [vmem:[#allocation2 + $0x170] sm:$0xff] %vm20096_vm2, %v13426_v3 }
  0x43   : > { %858 = vst.msk [vmem:[#allocation2 + $0x180] sm:$0xff] %vm20096_vm2, %v13426_v3  ;;  %859 = vst.msk [vmem:[#allocation2 + $0x188] sm:$0xff] %vm20096_vm2, %v13426_v3 }
  0x44   : > { %860 = vst.msk [vmem:[#allocation2 + $0x190] sm:$0x3] %vm811_vm1, %v13426_v3  ;;  %863 = vst.msk [vmem:[#allocation2 + $0x1a8] sm:$0x3] %vm811_vm1, %v13426_v3  ;;  %vm6189_vm1 = vcmask 424960  }
  0x45   : > { %2889 = vst.msk [vmem:[#allocation3] sm:$0xff] %vm20096_vm2, %v13426_v3  ;;  %2890 = vst.msk [vmem:[#allocation3 + $0x8] sm:$0xff] %vm20096_vm2, %v13426_v3  ;;  %10391 = vmatmul.mubr.msk.bf16.gmra.mrb[24].mxu1 %vm20096_vm2, %v13850_v38 }
  0x46   : > { %2893 = vst.msk [vmem:[#allocation3 + $0x18] sm:$0xff] %vm20096_vm2, %v13426_v3  ;;  %2894 = vst.msk [vmem:[#allocation3 + $0x20] sm:$0xff] %vm20096_vm2, %v13426_v3  ;;  %10394 = vmatprep.mubr.msk.bf16.mxu1 %vm20096_vm2, %v13853_v39 }
  0x47   : > { %2896 = vst.msk [vmem:[#allocation3 + $0x30] sm:$0xff] %vm20096_vm2, %v13426_v3  ;;  %2897 = vst.msk [vmem:[#allocation3 + $0x38] sm:$0xff] %vm20096_vm2, %v13426_v3 }
  0x48   : > { %2899 = vst.msk [vmem:[#allocation3 + $0x48] sm:$0xff] %vm20096_vm2, %v13426_v3  ;;  %2900 = vst.msk [vmem:[#allocation3 + $0x50] sm:$0xff] %vm20096_vm2, %v13426_v3 }
  0x49   : > { %2902 = vst.msk [vmem:[#allocation3 + $0x60] sm:$0xff] %vm20096_vm2, %v13426_v3  ;;  %2903 = vst.msk [vmem:[#allocation3 + $0x68] sm:$0xff] %vm20096_vm2, %v13426_v3 }
  0x4a   : > { %2905 = vst.msk [vmem:[#allocation3 + $0x78] sm:$0xff] %vm20096_vm2, %v13426_v3  ;;  %2906 = vst.msk [vmem:[#allocation3 + $0x80] sm:$0xff] %vm20096_vm2, %v13426_v3 }
  0x4b   : > { %2908 = vst.msk [vmem:[#allocation3 + $0x90] sm:$0xff] %vm20096_vm2, %v13426_v3  ;;  %2909 = vst.msk [vmem:[#allocation3 + $0x98] sm:$0xff] %vm20096_vm2, %v13426_v3  ;;  %v1281_v57 = vld [vmem:[#allocation2 + $0x1a1] sm:$0xff] }
  0x4c   : > { %2911 = vst.msk [vmem:[#allocation3 + $0xa8] sm:$0xff] %vm20096_vm2, %v13426_v3  ;;  %2912 = vst.msk [vmem:[#allocation3 + $0xb0] sm:$0xff] %vm20096_vm2, %v13426_v3  ;;  %v10799_v62 = vpack.i.bf16 %v1281_v57, %v1280_v53  ;;  %v1313_v1 = vld [vmem:[#allocation2 + $0x1a2] sm:$0xff]  ;;  %v3111_v6 = vld [vmem:[#allocation3 + $0x1] sm:$0xff] }
  0x4d   : > { %2914 = vst.msk [vmem:[#allocation3 + $0xc0] sm:$0xff] %vm20096_vm2, %v13426_v3  ;;  %2915 = vst.msk [vmem:[#allocation3 + $0xc8] sm:$0xff] %vm20096_vm2, %v13426_v3  ;;  %v10804_v2 = vpack.i.bf16 %v1313_v1, %v1312_v0  ;;  %10395 = vmatmul.mubr.msk.bf16.gmra.mrb[28].mxu1 %vm20096_vm2, %v473_v47  ;;  %v3113_v4 = vld [vmem:[#allocation3 + $0x19] sm:$0xff] }
  0x4e   : > { %2917 = vst.msk [vmem:[#allocation3 + $0xd8] sm:$0xff] %vm20096_vm2, %v13426_v3  ;;  %2918 = vst.msk [vmem:[#allocation3 + $0xe0] sm:$0xff] %vm20096_vm2, %v13426_v3  ;;  %10800 = vrot.lane.b32.xlu1 %v10799_v62, %s13429_s19 }
  0x4f   : > { %2920 = vst.msk [vmem:[#allocation3 + $0xf0] sm:$0xff] %vm20096_vm2, %v13426_v3  ;;  %2921 = vst.msk [vmem:[#allocation3 + $0xf8] sm:$0xff] %vm20096_vm2, %v13426_v3 }
  0x50   : > { %2923 = vst.msk [vmem:[#allocation3 + $0x108] sm:$0xff] %vm20096_vm2, %v13426_v3  ;;  %2924 = vst.msk [vmem:[#allocation3 + $0x110] sm:$0xff] %vm20096_vm2, %v13426_v3 }
  0x51   : > { %2926 = vst.msk [vmem:[#allocation3 + $0x120] sm:$0xff] %vm20096_vm2, %v13426_v3  ;;  %2927 = vst.msk [vmem:[#allocation3 + $0x128] sm:$0xff] %vm20096_vm2, %v13426_v3 }
  0x52   : > { %2929 = vst.msk [vmem:[#allocation3 + $0x138] sm:$0xff] %vm20096_vm2, %v13426_v3  ;;  %2930 = vst.msk [vmem:[#allocation3 + $0x140] sm:$0xff] %vm20096_vm2, %v13426_v3  ;;  %10805 = vrot.lane.b32.xlu1 %v10804_v2, %s13431_s21 }
  0x53   : > { %2932 = vst.msk [vmem:[#allocation3 + $0x150] sm:$0xff] %vm20096_vm2, %v13426_v3  ;;  %2933 = vst.msk [vmem:[#allocation3 + $0x158] sm:$0xff] %vm20096_vm2, %v13426_v3 }
  0x54   : > { %2935 = vst.msk [vmem:[#allocation3 + $0x168] sm:$0xff] %vm20096_vm2, %v13426_v3  ;;  %2936 = vst.msk [vmem:[#allocation3 + $0x170] sm:$0xff] %vm20096_vm2, %v13426_v3 }
  0x55   : > { %2938 = vst.msk [vmem:[#allocation3 + $0x180] sm:$0xff] %vm20096_vm2, %v13426_v3  ;;  %2939 = vst.msk [vmem:[#allocation3 + $0x188] sm:$0xff] %vm20096_vm2, %v13426_v3 }
  0x56   : > { %2941 = vst.msk [vmem:[#allocation3 + $0x198] sm:$0xff] %vm20096_vm2, %v13426_v3  ;;  %2942 = vst.msk [vmem:[#allocation3 + $0x1a0] sm:$0xff] %vm20096_vm2, %v13426_v3 }
  0x57   : > { %2944 = vst.msk [vmem:[#allocation3 + $0x1b0] sm:$0xff] %vm20096_vm2, %v13426_v3  ;;  %2945 = vst.msk [vmem:[#allocation3 + $0x1b8] sm:$0xff] %vm20096_vm2, %v13426_v3 }
  0x58   : > { %2947 = vst.msk [vmem:[#allocation3 + $0x1c8] sm:$0xff] %vm20096_vm2, %v13426_v3  ;;  %2948 = vst.msk [vmem:[#allocation3 + $0x1d0] sm:$0xff] %vm20096_vm2, %v13426_v3 }
  0x59   : > { %8136 = vst.msk [vmem:[#allocation4 + $0x19] sm:$0xff] %vm20096_vm2, %v8103_v7  ;;  %8137 = vst.msk [vmem:[#allocation4 + $0x21] sm:$0xff] %vm20096_vm2, %v8104_v8 }
  0x5a   : > { %8138 = vst.msk [vmem:[#allocation4 + $0x31] sm:$0xff] %vm20096_vm2, %v8105_v9  ;;  %8139 = vst.msk [vmem:[#allocation4 + $0x39] sm:$0xff] %vm20096_vm2, %v8106_v10  ;;  %v13956_v10 = vld [vmem:[%s19758_s2] ss:$0 sm:$0xff] }
  0x5b   : > { %8140 = vst.msk [vmem:[#allocation4 + $0x49] sm:$0xff] %vm20096_vm2, %v8107_v11  ;;  %8141 = vst.msk [vmem:[#allocation4 + $0x51] sm:$0xff] %vm20096_vm2, %v8108_v13 }
  0x5c   : > { %8142 = vst.msk [vmem:[#allocation4 + $0x61] sm:$0xff] %vm20096_vm2, %v8109_v14  ;;  %8143 = vst.msk [vmem:[#allocation4 + $0x69] sm:$0xff] %vm20096_vm2, %v8110_v15 }
  0x5d   : > { %8144 = vst.msk [vmem:[#allocation4 + $0x79] sm:$0xff] %vm20096_vm2, %v8111_v17  ;;  %8145 = vst.msk [vmem:[#allocation4 + $0x81] sm:$0xff] %vm20096_vm2, %v8112_v18 }
  0x5e   : > { %8146 = vst.msk [vmem:[#allocation4 + $0x91] sm:$0xff] %vm20096_vm2, %v8113_v21  ;;  %8147 = vst.msk [vmem:[#allocation4 + $0x99] sm:$0xff] %vm20096_vm2, %v8114_v22 }
  0x5f   : > { %8148 = vst.msk [vmem:[#allocation4 + $0xa9] sm:$0xff] %vm20096_vm2, %v8115_v23  ;;  %8149 = vst.msk [vmem:[#allocation4 + $0xb1] sm:$0xff] %vm20096_vm2, %v8116_v25 }
  0x60   : > { %8150 = vst.msk [vmem:[#allocation4 + $0xc1] sm:$0xff] %vm20096_vm2, %v8117_v26  ;;  %8151 = vst.msk [vmem:[#allocation4 + $0xc9] sm:$0xff] %vm20096_vm2, %v8118_v27 }
  0x61   : > { %8152 = vst.msk [vmem:[#allocation4 + $0xd9] sm:$0xff] %vm20096_vm2, %v8119_v30  ;;  %8153 = vst.msk [vmem:[#allocation4 + $0xe1] sm:$0xff] %vm20096_vm2, %v8120_v31 }
  0x62   : > { %8154 = vst.msk [vmem:[#allocation4 + $0xf1] sm:$0xff] %vm20096_vm2, %v8121_v35  ;;  %8155 = vst.msk [vmem:[#allocation4 + $0xf9] sm:$0xff] %vm20096_vm2, %v8122_v36 }
  0x63   : > { %8156 = vst.msk [vmem:[#allocation4 + $0x109] sm:$0xff] %vm20096_vm2, %v8123_v37  ;;  %8157 = vst.msk [vmem:[#allocation4 + $0x111] sm:$0xff] %vm20096_vm2, %v8124_v44 }
  0x64   : > { %8158 = vst.msk [vmem:[#allocation4 + $0x121] sm:$0xff] %vm20096_vm2, %v8125_v45  ;;  %8159 = vst.msk [vmem:[#allocation4 + $0x129] sm:$0xff] %vm20096_vm2, %v8126_v46 }
  0x65   : > { %8160 = vst.msk [vmem:[#allocation4 + $0x139] sm:$0xff] %vm20096_vm2, %v8127_v48  ;;  %8161 = vst.msk [vmem:[#allocation4 + $0x141] sm:$0xff] %vm20096_vm2, %v8128_v49 }
  0x66   : > { %8162 = vst.msk [vmem:[#allocation4 + $0x151] sm:$0xff] %vm20096_vm2, %v8129_v50  ;;  %8163 = vst.msk [vmem:[#allocation4 + $0x159] sm:$0xff] %vm20096_vm2, %v8130_v51 }
  0x67   : > { %8164 = vst.msk [vmem:[#allocation4 + $0x169] sm:$0xff] %vm20096_vm2, %v8131_v52  ;;  %8165 = vst.msk [vmem:[#allocation4 + $0x171] sm:$0xff] %vm20096_vm2, %v8132_v54 }
  0x68   : > { %8166 = vst.msk [vmem:[#allocation4 + $0x181] sm:$0xff] %vm20096_vm2, %v8133_v55  ;;  %8167 = vst.msk [vmem:[#allocation4 + $0x189] sm:$0xff] %vm20096_vm2, %v8134_v56 }
  0x69   : > { %2895 = vst.msk [vmem:[#allocation3 + $0x28] sm:$0xf] %vm2891_vm3, %v13426_v3  ;;  %2892 = vst.msk [vmem:[#allocation3 + $0x10] sm:$0xf] %vm2891_vm3, %v13426_v3 }
  0x6a   : > { %2898 = vst.msk [vmem:[#allocation3 + $0x40] sm:$0xf] %vm2891_vm3, %v13426_v3  ;;  %2901 = vst.msk [vmem:[#allocation3 + $0x58] sm:$0xf] %vm2891_vm3, %v13426_v3 }
  0x6b   : > { %2904 = vst.msk [vmem:[#allocation3 + $0x70] sm:$0xf] %vm2891_vm3, %v13426_v3  ;;  %2907 = vst.msk [vmem:[#allocation3 + $0x88] sm:$0xf] %vm2891_vm3, %v13426_v3 }
  0x6c   : > { %2910 = vst.msk [vmem:[#allocation3 + $0xa0] sm:$0xf] %vm2891_vm3, %v13426_v3  ;;  %2913 = vst.msk [vmem:[#allocation3 + $0xb8] sm:$0xf] %vm2891_vm3, %v13426_v3 }
  0x6d   : > { %2916 = vst.msk [vmem:[#allocation3 + $0xd0] sm:$0xf] %vm2891_vm3, %v13426_v3  ;;  %2919 = vst.msk [vmem:[#allocation3 + $0xe8] sm:$0xf] %vm2891_vm3, %v13426_v3 }
  0x6e   : > { %2922 = vst.msk [vmem:[#allocation3 + $0x100] sm:$0xf] %vm2891_vm3, %v13426_v3  ;;  %2925 = vst.msk [vmem:[#allocation3 + $0x118] sm:$0xf] %vm2891_vm3, %v13426_v3 }
  0x6f   : > { %2928 = vst.msk [vmem:[#allocation3 + $0x130] sm:$0xf] %vm2891_vm3, %v13426_v3  ;;  %2931 = vst.msk [vmem:[#allocation3 + $0x148] sm:$0xf] %vm2891_vm3, %v13426_v3 }
  0x70   : > { %2934 = vst.msk [vmem:[#allocation3 + $0x160] sm:$0xf] %vm2891_vm3, %v13426_v3  ;;  %2937 = vst.msk [vmem:[#allocation3 + $0x178] sm:$0xf] %vm2891_vm3, %v13426_v3  ;;  %v3114_v5 = vld [vmem:[#allocation3 + $0x21] sm:$0xff]  ;;  %v3112_v8 = vld [vmem:[#allocation3 + $0x9] sm:$0xff] }
  0x71   : > { %2940 = vst.msk [vmem:[#allocation3 + $0x190] sm:$0xf] %vm2891_vm3, %v13426_v3  ;;  %2943 = vst.msk [vmem:[#allocation3 + $0x1a8] sm:$0xf] %vm2891_vm3, %v13426_v3  ;;  %v10814_v7 = vpack.i.bf16 %v3114_v5, %v3113_v4  ;;  %v10809_v9 = vpack.i.bf16 %v3112_v8, %v3111_v6 }
  0x72   : > { %2946 = vst.msk [vmem:[#allocation3 + $0x1c0] sm:$0xf] %vm2891_vm3, %v13426_v3  ;;  %2949 = vst.msk [vmem:[#allocation3 + $0x1d8] sm:$0xf] %vm2891_vm3, %v13426_v3  ;;  %vm6222_vm3 = vcmask 457728  }
  0x73   : > { %10815 = vrot.lane.b32.xlu1 %v10814_v7, %s13428_s18  ;;  %10810 = vrot.lane.b32.xlu0 %v10809_v9, %s13428_s18 }
  0xe8   : > { %v10368_v11 = vpop.f32.mrb[0].mxu1 }
  0xe9   : > { %v659_v12 = vadd.f32 %v10368_v11, %v13956_v10  ;;  %v650_v13 = vpop.f32.mrb[1].mxu1 }
  0xea   : > { %v651_v3 = vadd.f32 %v13956_v10, %v650_v13  ;;  %v10369_v14 = vpop.f32.mrb[2].mxu1 }
  0xeb   : > { %v13960_v15 = vmax.f32 %v659_v12, 0.0  ;;  %v662_v16 = vadd.f32 %v10369_v14, %v13956_v10  ;;  %v653_v17 = vpop.f32.mrb[3].mxu1 }
  0xec   : > { %v654_v18 = vadd.f32 %v13956_v10, %v653_v17  ;;  %v13970_v20 = vmax.f32 %v651_v3, 0.0 }
  0xed   : > { %v13964_v19 = vmax.f32 %v662_v16, 0.0  ;;  %2954 = vrot.lane.b32.xlu0 %v13960_v15, %s13432_s24  ;;  %900 = vrot.lane.b32.xlu1 %v13960_v15, %s13433_s27 }
  0xee   : > { %v13972_v21 = vmax.f32 %v654_v18, 0.0 }
  0xf0   : > { %v10372_v24 = vpop.f32.mrb[4].mxu1 }
  0xf1   : > { %902 = vrot.lane.b32.xlu1 %v13964_v19, %s13433_s27  ;;  %896 = vrot.lane.b32.xlu0 %v13970_v20, %s13433_s27  ;;  %v675_v25 = vadd.f32 %v10372_v24, %v13956_v10  ;;  %v666_v26 = vpop.f32.mrb[5].mxu1 }
  0xf2   : > { %v667_v27 = vadd.f32 %v13956_v10, %v666_v26  ;;  %v10373_v28 = vpop.f32.mrb[6].mxu1 }
  0xf3   : > { %v13984_v29 = vmax.f32 %v675_v25, 0.0  ;;  %v678_v30 = vadd.f32 %v10373_v28, %v13956_v10  ;;  %v669_v31 = vpop.f32.mrb[7].mxu1 }
  0xf4   : > { %v13987_v32 = vmax.f32 %v667_v27, 0.0  ;;  %v670_v33 = vadd.f32 %v13956_v10, %v669_v31 }
  0xf5   : > { %2956 = vrot.lane.b32.xlu1 %v13964_v19, %s13432_s24  ;;  %2950 = vrot.lane.b32.xlu0 %v13970_v20, %s13432_s24  ;;  %v13994_v34 = vmax.f32 %v678_v30, 0.0 }
  0xf6   : > { %v13996_v35 = vmax.f32 %v670_v33, 0.0 }
  0xf8   : > { %v10376_v38 = vpop.f32.mrb[8].mxu1 }
  0xf9   : > { %2952 = vrot.lane.b32.xlu1 %v13972_v21, %s13432_s24  ;;  %898 = vrot.lane.b32.xlu0 %v13972_v21, %s13433_s27  ;;  %v691_v39 = vadd.f32 %v10376_v38, %v13956_v10  ;;  %v682_v40 = vpop.f32.mrb[9].mxu1 }
  0xfa   : > { %v683_v41 = vadd.f32 %v13956_v10, %v682_v40  ;;  %v10377_v42 = vpop.f32.mrb[10].mxu1 }
  0xfb   : > { %v14008_v43 = vmax.f32 %v691_v39, 0.0  ;;  %v694_v44 = vadd.f32 %v10377_v42, %v13956_v10  ;;  %v685_v45 = vpop.f32.mrb[11].mxu1 }
  0xfc   : > { %v14011_v46 = vmax.f32 %v683_v41, 0.0  ;;  %v686_v47 = vadd.f32 %v13956_v10, %v685_v45 }
  0xfd   : > { %910 = vrot.lane.b32.xlu1 %v13994_v34, %s13433_s27  ;;  %908 = vrot.lane.b32.xlu0 %v13984_v29, %s13433_s27  ;;  %v14018_v48 = vmax.f32 %v694_v44, 0.0 }
  0xfe   : > { %v14020_v49 = vmax.f32 %v686_v47, 0.0 }
 0x100   : > { %v10380_v52 = vpop.f32.mrb[12].mxu1 }
 0x101   : > { %2964 = vrot.lane.b32.xlu1 %v13994_v34, %s13432_s24  ;;  %2962 = vrot.lane.b32.xlu0 %v13984_v29, %s13432_s24  ;;  %v707_v53 = vadd.f32 %v10380_v52, %v13956_v10  ;;  %v698_v54 = vpop.f32.mrb[13].mxu1 }
 0x102   : > { %v699_v55 = vadd.f32 %v13956_v10, %v698_v54  ;;  %v10381_v56 = vpop.f32.mrb[14].mxu1 }
 0x103   : > { %v14032_v57 = vmax.f32 %v707_v53, 0.0  ;;  %v710_v58 = vadd.f32 %v10381_v56, %v13956_v10  ;;  %v701_v59 = vpop.f32.mrb[15].mxu1 }
 0x104   : > { %v14035_v60 = vmax.f32 %v699_v55, 0.0  ;;  %v702_v61 = vadd.f32 %v13956_v10, %v701_v59 }
 0x105   : > { %906 = vrot.lane.b32.xlu1 %v13996_v35, %s13433_s27  ;;  %904 = vrot.lane.b32.xlu0 %v13987_v32, %s13433_s27  ;;  %v14042_v62 = vmax.f32 %v710_v58, 0.0 }
 0x106   : > { %v14044_v63 = vmax.f32 %v702_v61, 0.0 }
 0x108   : > { %v10384_v2 = vpop.f32.mrb[16].mxu1 }
 0x109   : > { %2960 = vrot.lane.b32.xlu1 %v13996_v35, %s13432_s24  ;;  %2958 = vrot.lane.b32.xlu0 %v13987_v32, %s13432_s24  ;;  %v723_v4 = vadd.f32 %v10384_v2, %v13956_v10  ;;  %v714_v5 = vpop.f32.mrb[17].mxu1 }
 0x10a   : > { %v715_v6 = vadd.f32 %v13956_v10, %v714_v5  ;;  %v10385_v7 = vpop.f32.mrb[18].mxu1 }
 0x10b   : > { %v14056_v8 = vmax.f32 %v723_v4, 0.0  ;;  %v726_v9 = vadd.f32 %v10385_v7, %v13956_v10  ;;  %v717_v11 = vpop.f32.mrb[19].mxu1 }
 0x10c   : > { %v14059_v12 = vmax.f32 %v715_v6, 0.0  ;;  %v718_v13 = vadd.f32 %v13956_v10, %v717_v11 }
 0x10d   : > { %20097 = vst [vmem:[#allocation5_spill] sm:$0xff] %v14056_v8  ;;  %918 = vrot.lane.b32.xlu1 %v14018_v48, %s13433_s27  ;;  %916 = vrot.lane.b32.xlu0 %v14008_v43, %s13433_s27  ;;  %v14066_v3 = vmax.f32 %v726_v9, 0.0 }
 0x10e   : > { %20098 = vst [vmem:[#allocation6_spill] sm:$0xff] %v14059_v12  ;;  %v14068_v14 = vmax.f32 %v718_v13, 0.0 }
 0x10f   : > { %20099 = vst [vmem:[#allocation7_spill] sm:$0xff] %v14066_v3 }
 0x110   : > { %20100 = vst [vmem:[#allocation8_spill] sm:$0xff] %v14068_v14  ;;  %v10388_v18 = vpop.f32.mrb[20].mxu1 }
 0x111   : > { %2972 = vrot.lane.b32.xlu1 %v14018_v48, %s13432_s24  ;;  %2970 = vrot.lane.b32.xlu0 %v14008_v43, %s13432_s24  ;;  %v739_v24 = vadd.f32 %v10388_v18, %v13956_v10  ;;  %v730_v25 = vpop.f32.mrb[21].mxu1 }
 0x112   : > { %v731_v26 = vadd.f32 %v13956_v10, %v730_v25  ;;  %v10389_v27 = vpop.f32.mrb[22].mxu1 }
 0x113   : > { %v14080_v28 = vmax.f32 %v739_v24, 0.0  ;;  %v742_v30 = vadd.f32 %v10389_v27, %v13956_v10  ;;  %v733_v31 = vpop.f32.mrb[23].mxu1 }
 0x114   : > { %v14083_v33 = vmax.f32 %v731_v26, 0.0  ;;  %v734_v38 = vadd.f32 %v13956_v10, %v733_v31 }
 0x115   : > { %20101 = vst [vmem:[#allocation9_spill] sm:$0xff] %v14080_v28  ;;  %914 = vrot.lane.b32.xlu1 %v14020_v49, %s13433_s27  ;;  %912 = vrot.lane.b32.xlu0 %v14011_v46, %s13433_s27  ;;  %v14090_v39 = vmax.f32 %v742_v30, 0.0 }
 0x116   : > { %20102 = vst [vmem:[#allocation10_spill] sm:$0xff] %v14083_v33  ;;  %v14092_v40 = vmax.f32 %v734_v38, 0.0  ;;  %v14184_v38 = vpop.permute.xlu0 %10785 }
 0x117   : > { %20103 = vst [vmem:[#allocation11_spill] sm:$0xff] %v14090_v39 }
 0x118   : > { %20104 = vst [vmem:[#allocation12_spill] sm:$0xff] %v14092_v40  ;;  %v10392_v44 = vpop.f32.mrb[24].mxu1 }
 0x119   : > { %2968 = vrot.lane.b32.xlu1 %v14020_v49, %s13432_s24  ;;  %2966 = vrot.lane.b32.xlu0 %v14011_v46, %s13432_s24  ;;  %v755_v45 = vadd.f32 %v10392_v44, %v13956_v10  ;;  %v746_v47 = vpop.f32.mrb[25].mxu1 }
 0x11a   : > { %v747_v52 = vadd.f32 %v13956_v10, %v746_v47  ;;  %v10393_v53 = vpop.f32.mrb[26].mxu1 }
 0x11b   : > { %v14104_v54 = vmax.f32 %v755_v45, 0.0  ;;  %v758_v55 = vadd.f32 %v10393_v53, %v13956_v10  ;;  %v749_v56 = vpop.f32.mrb[27].mxu1  ;;  %v14192_v45 = vpop.permute.xlu0 %10790 }
 0x11c   : > { %v14107_v58 = vmax.f32 %v747_v52, 0.0  ;;  %v750_v59 = vadd.f32 %v13956_v10, %v749_v56 }
 0x11d   : > { %20105 = vst [vmem:[#allocation13_spill] sm:$0xff] %v14104_v54  ;;  %926 = vrot.lane.b32.xlu1 %v14042_v62, %s13433_s27  ;;  %924 = vrot.lane.b32.xlu0 %v14032_v57, %s13433_s27  ;;  %v14114_v61 = vmax.f32 %v758_v55, 0.0 }
 0x11e   : > { %20106 = vst [vmem:[#allocation14_spill] sm:$0xff] %v14107_v58  ;;  %v14116_v2 = vmax.f32 %v750_v59, 0.0 }
 0x11f   : > { %20107 = vst [vmem:[#allocation15_spill] sm:$0xff] %v14114_v61  ;;  %v14204_v52 = vpop.permute.xlu0 %10810 }
 0x120   : > { %20108 = vst [vmem:[#allocation16_spill] sm:$0xff] %v14116_v2  ;;  %v10396_v6 = vpop.f32.mrb[28].mxu1  ;;  %20112 = vst [vmem:[#allocation20_spill] sm:$0xff] %v14204_v52 }
 0x121   : > { %2980 = vrot.lane.b32.xlu1 %v14042_v62, %s13432_s24  ;;  %2978 = vrot.lane.b32.xlu0 %v14032_v57, %s13432_s24  ;;  %v771_v7 = vadd.f32 %v10396_v6, %v13956_v10  ;;  %v762_v9 = vpop.f32.mrb[29].mxu1 }
 0x122   : > { %v763_v11 = vadd.f32 %v13956_v10, %v762_v9  ;;  %v10397_v13 = vpop.f32.mrb[30].mxu1 }
 0x123   : > { %v14128_v18 = vmax.f32 %v771_v7, 0.0  ;;  %v774_v24 = vadd.f32 %v10397_v13, %v13956_v10  ;;  %v765_v25 = vpop.f32.mrb[31].mxu1 }
 0x124   : > { %v766_v26 = vadd.f32 %v13956_v10, %v765_v25  ;;  %v14172_v10 = vpop.permute.xlu1 %10795  ;;  %v14216_v56 = vmax.f32 %v763_v11, 0.0 }
 0x125   : > { %20109 = vst [vmem:[#allocation17_spill] sm:$0xff] %v14128_v18  ;;  %922 = vrot.lane.b32.xlu1 %v14044_v63, %s13433_s27  ;;  %920 = vrot.lane.b32.xlu0 %v14035_v60, %s13433_s27  ;;  %v14136_v27 = vmax.f32 %v774_v24, 0.0 }
 0x126   : > { %20113 = vst [vmem:[#allocation21_spill] sm:$0xff] %v14216_v56  ;;  %v14218_v59 = vmax.f32 %v766_v26, 0.0 }
 0x127   : > { %20110 = vst [vmem:[#allocation18_spill] sm:$0xff] %v14136_v27 }
 0x128   : > { %v14182_v31 = vpop.permute.xlu1 %10800  ;;  %20114 = vst [vmem:[#allocation22_spill] sm:$0xff] %v14218_v59 }
 0x129   : > { %2976 = vrot.lane.b32.xlu1 %v14044_v63, %s13432_s24  ;;  %2974 = vrot.lane.b32.xlu0 %v14035_v60, %s13432_s24 }
 0x12c   : > { %v14190_v44 = vpop.permute.xlu1 %10805 }
 0x12d   : > { %934 = vrot.lane.b32.xlu1 %v14066_v3, %s13433_s27  ;;  %932 = vrot.lane.b32.xlu0 %v14056_v8, %s13433_s27 }
 0x130   : > { %v14202_v47 = vpop.permute.xlu1 %10815 }
 0x131   : > { %2988 = vrot.lane.b32.xlu1 %v14066_v3, %s13432_s24  ;;  %2986 = vrot.lane.b32.xlu0 %v14056_v8, %s13432_s24  ;;  %20111 = vst [vmem:[#allocation19_spill] sm:$0xff] %v14202_v47 }
 0x135   : > { %930 = vrot.lane.b32.xlu1 %v14068_v14, %s13433_s27  ;;  %928 = vrot.lane.b32.xlu0 %v14059_v12, %s13433_s27 }
 0x139   : > { %2984 = vrot.lane.b32.xlu1 %v14068_v14, %s13432_s24  ;;  %2982 = vrot.lane.b32.xlu0 %v14059_v12, %s13432_s24 }
 0x13d   : > { %942 = vrot.lane.b32.xlu1 %v14090_v39, %s13433_s27  ;;  %940 = vrot.lane.b32.xlu0 %v14080_v28, %s13433_s27 }
 0x141   : > { %2996 = vrot.lane.b32.xlu1 %v14090_v39, %s13432_s24  ;;  %2994 = vrot.lane.b32.xlu0 %v14080_v28, %s13432_s24  ;;  %v10793_v28 = vunpack.i.h.bf16 %v14192_v45 }
 0x145   : > { %938 = vrot.lane.b32.xlu1 %v14092_v40, %s13433_s27  ;;  %936 = vrot.lane.b32.xlu0 %v14083_v33, %s13433_s27 }
 0x149   : > { %2992 = vrot.lane.b32.xlu1 %v14092_v40, %s13432_s24  ;;  %2990 = vrot.lane.b32.xlu0 %v14083_v33, %s13432_s24 }
 0x14d   : > { %950 = vrot.lane.b32.xlu1 %v14114_v61, %s13433_s27  ;;  %948 = vrot.lane.b32.xlu0 %v14104_v54, %s13433_s27 }
 0x151   : > { %3004 = vrot.lane.b32.xlu1 %v14114_v61, %s13432_s24  ;;  %3002 = vrot.lane.b32.xlu0 %v14104_v54, %s13432_s24 }
 0x155   : > { %946 = vrot.lane.b32.xlu1 %v14116_v2, %s13433_s27  ;;  %944 = vrot.lane.b32.xlu0 %v14107_v58, %s13433_s27 }
 0x159   : > { %3000 = vrot.lane.b32.xlu1 %v14116_v2, %s13432_s24  ;;  %2998 = vrot.lane.b32.xlu0 %v14107_v58, %s13432_s24 }
 0x15d   : > { %958 = vrot.lane.b32.xlu1 %v14136_v27, %s13433_s27  ;;  %956 = vrot.lane.b32.xlu0 %v14128_v18, %s13433_s27 }
 0x15f   : > { %v2955_v53 = vpop.permute.xlu0 %2954  ;;  %v901_v55 = vpop.permute.xlu1 %900 }
 0x160   : > { %3049 = vst.msk [vmem:[#allocation3 + $0x4a] sm:$0xff] %vm20096_vm2, %v2955_v53  ;;  %995 = vst.msk [vmem:[#allocation2 + $0x31] sm:$0xff] %vm20096_vm2, %v901_v55 }
 0x161   : > { %3012 = vrot.lane.b32.xlu1 %v14136_v27, %s13432_s24  ;;  %3010 = vrot.lane.b32.xlu0 %v14128_v18, %s13432_s24  ;;  %v10787_v18 = vunpack.i.l.bf16 %v14184_v38  ;;  %v1025_v27 = vld [vmem:[#allocation2] sm:$0xff] }
 0x163   : > { %v903_v6 = vpop.permute.xlu1 %902  ;;  %v897_v7 = vpop.permute.xlu0 %896  ;;  %v2338_v39 = vsel %vm20096_vm2, %v1025_v27, %v10787_v18 }
 0x164   : > { %996 = vst.msk [vmem:[#allocation2 + $0x39] sm:$0xff] %vm20096_vm2, %v903_v6  ;;  %993 = vst.msk [vmem:[#allocation2 + $0x19] sm:$0xff] %vm20096_vm2, %v897_v7 }
 0x165   : > { %954 = vrot.lane.b32.xlu1 %v14218_v59, %s13433_s27  ;;  %952 = vrot.lane.b32.xlu0 %v14216_v56, %s13433_s27  ;;  %s13438_s27 = smov 40  }
 0x167   : > { %v2957_v9 = vpop.permute.xlu1 %2956  ;;  %v2951_v13 = vpop.permute.xlu0 %2950  ;;  %v14232_v11 = vld [vmem:[#allocation2 + $0x30] sm:$0xff] }
 0x168   : > { %3050 = vst.msk [vmem:[#allocation3 + $0x52] sm:$0xff] %vm20096_vm2, %v2957_v9  ;;  %3047 = vst.msk [vmem:[#allocation3 + $0x32] sm:$0xff] %vm20096_vm2, %v2951_v13  ;;  %v1061_v53 = vld [vmem:[#allocation2 + $0x31] sm:$0xff] }
 0x169   : > { %3008 = vrot.lane.b32.xlu1 %v14218_v59, %s13432_s24  ;;  %3006 = vrot.lane.b32.xlu0 %v14216_v56, %s13432_s24  ;;  %s13437_s24 = smov 36  }
 0x16b   : > { %v2953_v24 = vpop.permute.xlu1 %2952  ;;  %v899_v25 = vpop.permute.xlu0 %898  ;;  %v14234_v26 = vld [vmem:[#allocation2 + $0x38] sm:$0xff] }
 0x16c   : > { %v1062_v55 = vld [vmem:[#allocation2 + $0x39] sm:$0xff]  ;;  %3048 = vst.msk [vmem:[#allocation3 + $0x3a] sm:$0xff] %vm20096_vm2, %v2953_v24  ;;  %994 = vst.msk [vmem:[#allocation2 + $0x21] sm:$0xff] %vm20096_vm2, %v899_v25  ;;  %v10829_v6 = vpack.i.bf16 %v14234_v26, %v14232_v11 }
 0x16d   : > { %v10819_v7 = vpack.i.bf16 %v1062_v55, %v1061_v53  ;;  %v1093_v9 = vld [vmem:[#allocation2 + $0x32] sm:$0xff]  ;;  %v1094_v13 = vld [vmem:[#allocation2 + $0x3a] sm:$0xff] }
 0x16e   : > { %10830 = vrot.lane.b32.xlu1 %v10829_v6, %s13434_s28  ;;  %v10824_v24 = vpack.i.bf16 %v1094_v13, %v1093_v9  ;;  %v3117_v9 = vld [vmem:[#allocation3 + $0x49] sm:$0xff] }
 0x16f   : > { %10820 = vrot.lane.b32.xlu0 %v10819_v7, %s13428_s18  ;;  %v911_v30 = vpop.permute.xlu1 %910  ;;  %v909_v4 = vpop.permute.xlu0 %908  ;;  %v3118_v55 = vld [vmem:[#allocation3 + $0x51] sm:$0xff]  ;;  %v1059_v41 = vld [vmem:[#allocation2 + $0x19] sm:$0xff] }
 0x170   : > { %1000 = vst.msk [vmem:[#allocation2 + $0x69] sm:$0xff] %vm20096_vm2, %v911_v30  ;;  %999 = vst.msk [vmem:[#allocation2 + $0x61] sm:$0xff] %vm20096_vm2, %v909_v4  ;;  %v10859_v13 = vpack.i.bf16 %v3118_v55, %v3117_v9  ;;  %v14260_v9 = vld [vmem:[#allocation2 + $0x18] sm:$0xff] }
 0x172   : > { %10835 = vrot.lane.b32.xlu1 %v10819_v7, %s13435_s29 }
 0x173   : > { %10825 = vrot.lane.b32.xlu0 %v10824_v24, %s13430_s20  ;;  %v2965_v25 = vpop.permute.xlu1 %2964  ;;  %v2963_v53 = vpop.permute.xlu0 %2962  ;;  %v1060_v5 = vld [vmem:[#allocation2 + $0x21] sm:$0xff] }
 0x174   : > { %3054 = vst.msk [vmem:[#allocation3 + $0x82] sm:$0xff] %vm20096_vm2, %v2965_v25  ;;  %3053 = vst.msk [vmem:[#allocation3 + $0x7a] sm:$0xff] %vm20096_vm2, %v2963_v53  ;;  %v14256_v42 = vld [vmem:[#allocation2 + $0x20] sm:$0xff] }
 0x175   : > { %v1091_v16 = vld [vmem:[#allocation2 + $0x1a] sm:$0xff] }
 0x176   : > { %10840 = vrot.lane.b32.xlu1 %v10824_v24, %s13436_s30 }
 0x177   : > { %10845 = vrot.lane.b32.xlu0 %v10829_v6, %s13427_s17  ;;  %v907_v30 = vpop.permute.xlu1 %906  ;;  %v905_v4 = vpop.permute.xlu0 %904  ;;  %v10864_v6 = vpack.i.bf16 %v1060_v5, %v1059_v41  ;;  %v1127_v5 = vld [vmem:[#allocation2 + $0x60] sm:$0xff]  ;;  %v1160_v17 = vld [vmem:[#allocation2 + $0x69] sm:$0xff] }
 0x178   : > { %998 = vst.msk [vmem:[#allocation2 + $0x51] sm:$0xff] %vm20096_vm2, %v907_v30  ;;  %997 = vst.msk [vmem:[#allocation2 + $0x49] sm:$0xff] %vm20096_vm2, %v905_v4  ;;  %v1092_v30 = vld [vmem:[#allocation2 + $0x22] sm:$0xff]  ;;  %v1192_v1 = vld [vmem:[#allocation2 + $0x6a] sm:$0xff] }
 0x179   : > { %v10869_v41 = vpack.i.bf16 %v1092_v30, %v1091_v16  ;;  %v1191_v0 = vld [vmem:[#allocation2 + $0x62] sm:$0xff] }
 0x17a   : > { %10860 = vrot.lane.b32.xlu1 %v10859_v13, %s13428_s18  ;;  %v1128_v13 = vld [vmem:[#allocation2 + $0x68] sm:$0xff] }
 0x17b   : > { %10850 = vrot.lane.b32.xlu0 %v10819_v7, %s13429_s19  ;;  %v2961_v25 = vpop.permute.xlu1 %2960  ;;  %v2959_v53 = vpop.permute.xlu0 %2958  ;;  %v10874_v7 = vpack.i.bf16 %v14256_v42, %v14260_v9  ;;  %v3122_v50 = vld [vmem:[#allocation3 + $0x81] sm:$0xff] }
 0x17c   : > { %3052 = vst.msk [vmem:[#allocation3 + $0x6a] sm:$0xff] %vm20096_vm2, %v2961_v25  ;;  %3051 = vst.msk [vmem:[#allocation3 + $0x62] sm:$0xff] %vm20096_vm2, %v2959_v53  ;;  %v10904_v53 = vpack.i.bf16 %v1128_v13, %v1127_v5 }
 0x17e   : > { %10865 = vrot.lane.b32.xlu1 %v10864_v6, %s13428_s18 }
 0x17f   : > { %10855 = vrot.lane.b32.xlu0 %v10824_v24, %s13431_s21  ;;  %v919_v55 = vpop.permute.xlu1 %918  ;;  %v917_v4 = vpop.permute.xlu0 %916  ;;  %v1064_v51 = vld [vmem:[#allocation2 + $0x51] sm:$0xff] }
 0x180   : > { %1004 = vst.msk [vmem:[#allocation2 + $0x99] sm:$0xff] %vm20096_vm2, %v919_v55  ;;  %1003 = vst.msk [vmem:[#allocation2 + $0x91] sm:$0xff] %vm20096_vm2, %v917_v4  ;;  %v1159_v55 = vld [vmem:[#allocation2 + $0x61] sm:$0xff] }
 0x181   : > { %v10909_v4 = vpack.i.bf16 %v1160_v17, %v1159_v55 }
 0x182   : > { %10870 = vrot.lane.b32.xlu1 %v10869_v41, %s13430_s20 }
 0x183   : > { %10875 = vrot.lane.b32.xlu0 %v10874_v7, %s13434_s28  ;;  %v2973_v24 = vpop.permute.xlu1 %2972  ;;  %v2971_v25 = vpop.permute.xlu0 %2970  ;;  %v3116_v7 = vld [vmem:[#allocation3 + $0x39] sm:$0xff] }
 0x184   : > { %3058 = vst.msk [vmem:[#allocation3 + $0xb2] sm:$0xff] %vm20096_vm2, %v2973_v24  ;;  %3057 = vst.msk [vmem:[#allocation3 + $0xaa] sm:$0xff] %vm20096_vm2, %v2971_v25  ;;  %v3115_v24 = vld [vmem:[#allocation3 + $0x31] sm:$0xff]  ;;  %v10914_v25 = vpack.i.bf16 %v1192_v1, %v1191_v0 }
 0x186   : > { %10905 = vrot.lane.b32.xlu1 %v10904_v53, %s13434_s28 }
 0x187   : > { %10880 = vrot.lane.b32.xlu0 %v10864_v6, %s13435_s29  ;;  %v915_v16 = vpop.permute.xlu1 %914  ;;  %v913_v30 = vpop.permute.xlu0 %912  ;;  %v10889_v6 = vpack.i.bf16 %v3116_v7, %v3115_v24  ;;  %v13360_v7 = vld [vmem:[%s19759_s3] sm:$0xff]   ;;  %v13361_v24 = vld [vmem:[%s19759_s3 + $0x8] sm:$0xff]  }
 0x188   : > { %1002 = vst.msk [vmem:[#allocation2 + $0x81] sm:$0xff] %vm20096_vm2, %v915_v16  ;;  %1001 = vst.msk [vmem:[#allocation2 + $0x79] sm:$0xff] %vm20096_vm2, %v913_v30  ;;  %v3121_v16 = vld [vmem:[#allocation3 + $0x79] sm:$0xff]  ;;  %10398 = vmatprep.subr.bf16.mxu1 %v13360_v7 }
 0x189   : > { %v1063_v30 = vld [vmem:[#allocation2 + $0x49] sm:$0xff]  ;;  %10399 = vmatpush3.bf16.msra.mxu1 %v13360_v7 }
 0x18a   : > { %10910 = vrot.lane.b32.xlu1 %v10909_v4, %s13435_s29  ;;  %10400 = vmatprep.subr.bf16.mxu1 %v13361_v24 }
 0x18b   : > { %10885 = vrot.lane.b32.xlu0 %v10869_v41, %s13436_s30  ;;  %v2969_v5 = vpop.permute.xlu1 %2968  ;;  %v2967_v13 = vpop.permute.xlu0 %2966  ;;  %v10934_v41 = vpack.i.bf16 %v3122_v50, %v3121_v16  ;;  %v1095_v50 = vld [vmem:[#allocation2 + $0x4a] sm:$0xff]  ;;  %v3126_v36 = vld [vmem:[#allocation3 + $0xb1] sm:$0xff] }
 0x18c   : > { %3056 = vst.msk [vmem:[#allocation3 + $0x9a] sm:$0xff] %vm20096_vm2, %v2969_v5  ;;  %3055 = vst.msk [vmem:[#allocation3 + $0x92] sm:$0xff] %vm20096_vm2, %v2967_v13  ;;  %v10939_v5 = vpack.i.bf16 %v1064_v51, %v1063_v30  ;;  %v1096_v13 = vld [vmem:[#allocation2 + $0x52] sm:$0xff]  ;;  %v14296_v51 = vld [vmem:[#allocation2 + $0x48] sm:$0xff] }
 0x18d   : > { %10401 = vmatpush3.bf16.msra.mxu1 %v13361_v24 }
 0x18e   : > { %10915 = vrot.lane.b32.xlu1 %v10914_v25, %s13436_s30 }
 0x18f   : > { %10890 = vrot.lane.b32.xlu0 %v10889_v6, %s13428_s18  ;;  %v927_v17 = vpop.permute.xlu1 %926  ;;  %v925_v55 = vpop.permute.xlu0 %924  ;;  %v1068_v37 = vld [vmem:[#allocation2 + $0x81] sm:$0xff] }
 0x190   : > { %1008 = vst.msk [vmem:[#allocation2 + $0xc9] sm:$0xff] %vm20096_vm2, %v927_v17  ;;  %1007 = vst.msk [vmem:[#allocation2 + $0xc1] sm:$0xff] %vm20096_vm2, %v925_v55  ;;  %v10944_v17 = vpack.i.bf16 %v1096_v13, %v1095_v50  ;;  %v14298_v55 = vld [vmem:[#allocation2 + $0x50] sm:$0xff] }
 0x192   : > { %10935 = vrot.lane.b32.xlu1 %v10934_v41, %s13428_s18  ;;  %v13362_v41 = vld [vmem:[%s19759_s3 + $0x10] ss:$0 sps:$4 sm:$0x33]  }
 0x193   : > { %10895 = vrot.lane.b32.xlu0 %v10909_v4, %s13428_s18  ;;  %v2981_v0 = vpop.permute.xlu1 %2980  ;;  %v2979_v1 = vpop.permute.xlu0 %2978  ;;  %10749 = vmatprep.subr.msk.bf16.mxu1 %vm612_vm0, %v13362_v41 }
 0x194   : > { %3062 = vst.msk [vmem:[#allocation3 + $0xe2] sm:$0xff] %vm20096_vm2, %v2981_v0  ;;  %3061 = vst.msk [vmem:[#allocation3 + $0xda] sm:$0xff] %vm20096_vm2, %v2979_v1  ;;  %v2694_v0 = vsel %vm612_vm0, %v13362_v41, 0  ;;  %v10964_v1 = vpack.i.bf16 %v14298_v55, %v14296_v51 }
 0x195   : > { %10403 = vmatpush3.bf16.msra.mxu1 %v2694_v0 }
 0x196   : > { %10940 = vrot.lane.b32.xlu1 %v10939_v5, %s13428_s18 }
 0x197   : > { %10900 = vrot.lane.b32.xlu0 %v10914_v25, %s13430_s20  ;;  %v923_v6 = vpop.permute.xlu1 %922  ;;  %v921_v16 = vpop.permute.xlu0 %920 }
 0x198   : > { %1006 = vst.msk [vmem:[#allocation2 + $0xb1] sm:$0xff] %vm20096_vm2, %v923_v6  ;;  %1005 = vst.msk [vmem:[#allocation2 + $0xa9] sm:$0xff] %vm20096_vm2, %v921_v16  ;;  %v1131_v6 = vld [vmem:[#allocation2 + $0x90] sm:$0xff] }
 0x19a   : > { %10945 = vrot.lane.b32.xlu1 %v10944_v17, %s13430_s20 }
 0x19b   : > { %10920 = vrot.lane.b32.xlu0 %v10904_v53, %s13427_s17  ;;  %v2977_v30 = vpop.permute.xlu1 %2976  ;;  %v2975_v7 = vpop.permute.xlu0 %2974  ;;  %v3130_v22 = vld [vmem:[#allocation3 + $0xe1] sm:$0xff] }
 0x19c   : > { %3060 = vst.msk [vmem:[#allocation3 + $0xca] sm:$0xff] %vm20096_vm2, %v2977_v30  ;;  %3059 = vst.msk [vmem:[#allocation3 + $0xc2] sm:$0xff] %vm20096_vm2, %v2975_v7  ;;  %v1163_v30 = vld [vmem:[#allocation2 + $0x91] sm:$0xff]  ;;  %v1164_v7 = vld [vmem:[#allocation2 + $0x99] sm:$0xff] }
 0x19e   : > { %10965 = vrot.lane.b32.xlu1 %v10964_v1, %s13427_s17 }
 0x19f   : > { %10925 = vrot.lane.b32.xlu0 %v10909_v4, %s13429_s19  ;;  %v935_v53 = vpop.permute.xlu1 %934  ;;  %v933_v50 = vpop.permute.xlu0 %932  ;;  %v1132_v4 = vld [vmem:[#allocation2 + $0x98] sm:$0xff] }
 0x1a0   : > { %1012 = vst.msk [vmem:[#allocation2 + $0xf9] sm:$0xff] %vm20096_vm2, %v935_v53  ;;  %1011 = vst.msk [vmem:[#allocation2 + $0xf1] sm:$0xff] %vm20096_vm2, %v933_v50  ;;  %v3119_v50 = vld [vmem:[#allocation3 + $0x61] sm:$0xff] }
 0x1a1   : > { %v1072_v23 = vld [vmem:[#allocation2 + $0xb1] sm:$0xff] }
 0x1a2   : > { %10970 = vrot.lane.b32.xlu1 %v10939_v5, %s13429_s19 }
 0x1a3   : > { %10930 = vrot.lane.b32.xlu0 %v10914_v25, %s13431_s21  ;;  %v2989_v13 = vpop.permute.xlu1 %2988  ;;  %v2987_v24 = vpop.permute.xlu0 %2986  ;;  %v10994_v25 = vpack.i.bf16 %v1132_v4, %v1131_v6  ;;  %v3128_v2 = vld [vmem:[#allocation3 + $0xc9] sm:$0xff] }
 0x1a4   : > { %3066 = vst.msk [vmem:[#allocation3 + $0x112] sm:$0xff] %vm20096_vm2, %v2989_v13  ;;  %3065 = vst.msk [vmem:[#allocation3 + $0x10a] sm:$0xff] %vm20096_vm2, %v2987_v24  ;;  %v3120_v13 = vld [vmem:[#allocation3 + $0x69] sm:$0xff] }
 0x1a5   : > { %v1195_v24 = vld [vmem:[#allocation2 + $0x92] sm:$0xff] }
 0x1a6   : > { %10975 = vrot.lane.b32.xlu1 %v10944_v17, %s13431_s21 }
 0x1a7   : > { %10950 = vrot.lane.b32.xlu0 %v10964_v1, %s13434_s28  ;;  %v931_v16 = vpop.permute.xlu1 %930  ;;  %v929_v41 = vpop.permute.xlu0 %928  ;;  %v10999_v1 = vpack.i.bf16 %v1164_v7, %v1163_v30  ;;  %v1171_v52 = vld [vmem:[#allocation2 + $0xf1] sm:$0xff]  ;;  %v1172_v47 = vld [vmem:[#allocation2 + $0xf9] sm:$0xff] }
 0x1a8   : > { %1010 = vst.msk [vmem:[#allocation2 + $0xe1] sm:$0xff] %vm20096_vm2, %v931_v16  ;;  %1009 = vst.msk [vmem:[#allocation2 + $0xd9] sm:$0xff] %vm20096_vm2, %v929_v41  ;;  %v1196_v16 = vld [vmem:[#allocation2 + $0x9a] sm:$0xff]  ;;  %v14420_v61 = vpack.i.bf16 %v1172_v47, %v1171_v52 }
 0x1a9   : > { %v11004_v41 = vpack.i.bf16 %v1196_v16, %v1195_v24  ;;  %v1099_v16 = vld [vmem:[#allocation2 + $0x7a] sm:$0xff] }
 0x1aa   : > { %10995 = vrot.lane.b32.xlu1 %v10994_v25, %s13434_s28  ;;  %v1204_v58 = vld [vmem:[#allocation2 + $0xfa] sm:$0xff] }
 0x1ab   : > { %10955 = vrot.lane.b32.xlu0 %v10939_v5, %s13435_s29  ;;  %v2985_v0 = vpop.permute.xlu1 %2984  ;;  %v2983_v53 = vpop.permute.xlu0 %2982  ;;  %v10979_v5 = vpack.i.bf16 %v3120_v13, %v3119_v50  ;;  %v3133_v8 = vld [vmem:[#allocation3 + $0x109] sm:$0xff]  ;;  %v3134_v3 = vld [vmem:[#allocation3 + $0x111] sm:$0xff] }
 0x1ac   : > { %3064 = vst.msk [vmem:[#allocation3 + $0xfa] sm:$0xff] %vm20096_vm2, %v2985_v0  ;;  %3063 = vst.msk [vmem:[#allocation3 + $0xf2] sm:$0xff] %vm20096_vm2, %v2983_v53  ;;  %v3125_v0 = vld [vmem:[#allocation3 + $0xa9] sm:$0xff] }
 0x1ad   : > { %v1067_v53 = vld [vmem:[#allocation2 + $0x79] sm:$0xff] }
 0x1ae   : > { %11000 = vrot.lane.b32.xlu1 %v10999_v1, %s13435_s29  ;;  %v11029_v24 = vpack.i.bf16 %v1068_v37, %v1067_v53 }
 0x1af   : > { %10960 = vrot.lane.b32.xlu0 %v10944_v17, %s13436_s30  ;;  %v943_v6 = vpop.permute.xlu1 %942  ;;  %v941_v4 = vpop.permute.xlu0 %940  ;;  %v11024_v17 = vpack.i.bf16 %v3126_v36, %v3125_v0  ;;  %v14343_v0 = vld [vmem:[#allocation2 + $0x78] sm:$0xff] }
 0x1b0   : > { %1016 = vst.msk [vmem:[#allocation2 + $0x129] sm:$0xff] %vm20096_vm2, %v943_v6  ;;  %1015 = vst.msk [vmem:[#allocation2 + $0x121] sm:$0xff] %vm20096_vm2, %v941_v4  ;;  %v1100_v6 = vld [vmem:[#allocation2 + $0x82] sm:$0xff] }
 0x1b2   : > { %11005 = vrot.lane.b32.xlu1 %v11004_v41, %s13436_s30 }
 0x1b3   : > { %10980 = vrot.lane.b32.xlu0 %v10979_v5, %s13428_s18  ;;  %v2997_v30 = vpop.permute.xlu1 %2996  ;;  %v2995_v7 = vpop.permute.xlu0 %2994  ;;  %v11034_v5 = vpack.i.bf16 %v1100_v6, %v1099_v16  ;;  %v1135_v16 = vld [vmem:[#allocation2 + $0xc0] sm:$0xff] }
 0x1b4   : > { %3070 = vst.msk [vmem:[#allocation3 + $0x142] sm:$0xff] %vm20096_vm2, %v2997_v30  ;;  %3069 = vst.msk [vmem:[#allocation3 + $0x13a] sm:$0xff] %vm20096_vm2, %v2995_v7  ;;  %v14345_v30 = vld [vmem:[#allocation2 + $0x80] sm:$0xff] }
 0x1b6   : > { %11025 = vrot.lane.b32.xlu1 %v11024_v17, %s13428_s18  ;;  %v11054_v17 = vpack.i.bf16 %v14345_v30, %v14343_v0 }
 0x1b7   : > { %10985 = vrot.lane.b32.xlu0 %v10999_v1, %s13428_s18  ;;  %v939_v50 = vpop.permute.xlu1 %938  ;;  %v937_v13 = vpop.permute.xlu0 %936 }
 0x1b8   : > { %1014 = vst.msk [vmem:[#allocation2 + $0x111] sm:$0xff] %vm20096_vm2, %v939_v50  ;;  %1013 = vst.msk [vmem:[#allocation2 + $0x109] sm:$0xff] %vm20096_vm2, %v937_v13 }
 0x1ba   : > { %11030 = vrot.lane.b32.xlu1 %v11029_v24, %s13428_s18 }
 0x1bb   : > { %10990 = vrot.lane.b32.xlu0 %v11004_v41, %s13430_s20  ;;  %v2993_v36 = vpop.permute.xlu1 %2992  ;;  %v2991_v4 = vpop.permute.xlu0 %2990 }
 0x1bc   : > { %3068 = vst.msk [vmem:[#allocation3 + $0x12a] sm:$0xff] %vm20096_vm2, %v2993_v36  ;;  %3067 = vst.msk [vmem:[#allocation3 + $0x122] sm:$0xff] %vm20096_vm2, %v2991_v4  ;;  %v1167_v4 = vld [vmem:[#allocation2 + $0xc1] sm:$0xff] }
 0x1be   : > { %11035 = vrot.lane.b32.xlu1 %v11034_v5, %s13430_s20 }
 0x1bf   : > { %11010 = vrot.lane.b32.xlu0 %v10994_v25, %s13427_s17  ;;  %v951_v37 = vpop.permute.xlu1 %950  ;;  %v949_v7 = vpop.permute.xlu0 %948 }
 0x1c0   : > { %1020 = vst.msk [vmem:[#allocation2 + $0x159] sm:$0xff] %vm20096_vm2, %v951_v37  ;;  %1019 = vst.msk [vmem:[#allocation2 + $0x151] sm:$0xff] %vm20096_vm2, %v949_v7  ;;  %v1168_v37 = vld [vmem:[#allocation2 + $0xc9] sm:$0xff] }
 0x1c2   : > { %11055 = vrot.lane.b32.xlu1 %v11054_v17, %s13427_s17 }
 0x1c3   : > { %11015 = vrot.lane.b32.xlu0 %v10999_v1, %s13429_s19  ;;  %v3005_v53 = vpop.permute.xlu1 %3004  ;;  %v3003_v50 = vpop.permute.xlu0 %3002  ;;  %v1136_v1 = vld [vmem:[#allocation2 + $0xc8] sm:$0xff] }
 0x1c4   : > { %3074 = vst.msk [vmem:[#allocation3 + $0x172] sm:$0xff] %vm20096_vm2, %v3005_v53  ;;  %3073 = vst.msk [vmem:[#allocation3 + $0x16a] sm:$0xff] %vm20096_vm2, %v3003_v50  ;;  %v3123_v50 = vld [vmem:[#allocation3 + $0x91] sm:$0xff] }
 0x1c6   : > { %11060 = vrot.lane.b32.xlu1 %v11029_v24, %s13429_s19 }
 0x1c7   : > { %11020 = vrot.lane.b32.xlu0 %v11004_v41, %s13431_s21  ;;  %v947_v25 = vpop.permute.xlu1 %946  ;;  %v945_v13 = vpop.permute.xlu0 %944  ;;  %v11084_v41 = vpack.i.bf16 %v1136_v1, %v1135_v16 }
 0x1c8   : > { %1018 = vst.msk [vmem:[#allocation2 + $0x141] sm:$0xff] %vm20096_vm2, %v947_v25  ;;  %1017 = vst.msk [vmem:[#allocation2 + $0x139] sm:$0xff] %vm20096_vm2, %v945_v13  ;;  %v3124_v25 = vld [vmem:[#allocation3 + $0x99] sm:$0xff] }
 0x1c9   : > { %v1199_v13 = vld [vmem:[#allocation2 + $0xc2] sm:$0xff] }
 0x1ca   : > { %11065 = vrot.lane.b32.xlu1 %v11034_v5, %s13431_s21 }
 0x1cb   : > { %11040 = vrot.lane.b32.xlu0 %v11054_v17, %s13434_s28  ;;  %v3001_v6 = vpop.permute.xlu1 %3000  ;;  %v2999_v36 = vpop.permute.xlu0 %2998  ;;  %v11089_v17 = vpack.i.bf16 %v1168_v37, %v1167_v4 }
 0x1cc   : > { %3072 = vst.msk [vmem:[#allocation3 + $0x15a] sm:$0xff] %vm20096_vm2, %v3001_v6  ;;  %3071 = vst.msk [vmem:[#allocation3 + $0x152] sm:$0xff] %vm20096_vm2, %v2999_v36  ;;  %v1200_v6 = vld [vmem:[#allocation2 + $0xca] sm:$0xff] }
 0x1cd   : > { %v11094_v36 = vpack.i.bf16 %v1200_v6, %v1199_v13  ;;  %v1103_v6 = vld [vmem:[#allocation2 + $0xaa] sm:$0xff] }
 0x1ce   : > { %11085 = vrot.lane.b32.xlu1 %v11084_v41, %s13434_s28 }
 0x1cf   : > { %11045 = vrot.lane.b32.xlu0 %v11029_v24, %s13435_s29  ;;  %v959_v7 = vpop.permute.xlu1 %958  ;;  %v957_v53 = vpop.permute.xlu0 %956  ;;  %v11069_v24 = vpack.i.bf16 %v3124_v25, %v3123_v50 }
 0x1d0   : > { %1024 = vst.msk [vmem:[#allocation2 + $0x189] sm:$0xff] %vm20096_vm2, %v959_v7  ;;  %1023 = vst.msk [vmem:[#allocation2 + $0x181] sm:$0xff] %vm20096_vm2, %v957_v53  ;;  %v3129_v7 = vld [vmem:[#allocation3 + $0xd9] sm:$0xff] }
 0x1d1   : > { %v1071_v53 = vld [vmem:[#allocation2 + $0xa9] sm:$0xff] }
 0x1d2   : > { %11090 = vrot.lane.b32.xlu1 %v11089_v17, %s13435_s29  ;;  %v11119_v13 = vpack.i.bf16 %v1072_v23, %v1071_v53 }
 0x1d3   : > { %11050 = vrot.lane.b32.xlu0 %v11034_v5, %s13436_s30  ;;  %v3013_v16 = vpop.permute.xlu1 %3012  ;;  %v3011_v1 = vpop.permute.xlu0 %3010  ;;  %v11114_v5 = vpack.i.bf16 %v3130_v22, %v3129_v7  ;;  %v1228_v7 = vld [vmem:[#allocation2 + $0xa8] sm:$0xff] }
 0x1d4   : > { %3078 = vst.msk [vmem:[#allocation3 + $0x1a2] sm:$0xff] %vm20096_vm2, %v3013_v16  ;;  %3077 = vst.msk [vmem:[#allocation3 + $0x19a] sm:$0xff] %vm20096_vm2, %v3011_v1  ;;  %v1104_v16 = vld [vmem:[#allocation2 + $0xb2] sm:$0xff] }
 0x1d6   : > { %11095 = vrot.lane.b32.xlu1 %v11094_v36, %s13436_s30 }
 0x1d7   : > { %11070 = vrot.lane.b32.xlu0 %v11069_v24, %s13428_s18  ;;  %v955_v4 = vpop.permute.xlu1 %954  ;;  %v953_v37 = vpop.permute.xlu0 %952  ;;  %v11124_v24 = vpack.i.bf16 %v1104_v16, %v1103_v6  ;;  %v1139_v6 = vld [vmem:[#allocation2 + $0xf0] sm:$0xff]  ;;  %v1140_v16 = vld [vmem:[#allocation2 + $0xf8] sm:$0xff] }
 0x1d8   : > { %1022 = vst.msk [vmem:[#allocation2 + $0x171] sm:$0xff] %vm20096_vm2, %v955_v4  ;;  %1021 = vst.msk [vmem:[#allocation2 + $0x169] sm:$0xff] %vm20096_vm2, %v953_v37  ;;  %v1229_v4 = vld [vmem:[#allocation2 + $0xb0] sm:$0xff] }
 0x1da   : > { %11115 = vrot.lane.b32.xlu1 %v11114_v5, %s13428_s18  ;;  %v11144_v5 = vpack.i.bf16 %v1229_v4, %v1228_v7  ;;  %v14411_v4 = vpack.i.bf16 %v1140_v16, %v1139_v6  ;;  %v3127_v6 = vld [vmem:[#allocation3 + $0xc1] sm:$0xff] }
 0x1db   : > { %11075 = vrot.lane.b32.xlu0 %v11089_v17, %s13428_s18  ;;  %v3009_v50 = vpop.permute.xlu1 %3008  ;;  %v3007_v25 = vpop.permute.xlu0 %3006  ;;  %v1203_v16 = vld [vmem:[#allocation2 + $0xf2] sm:$0xff]  ;;  %v11159_v56 = vpack.i.bf16 %v3128_v2, %v3127_v6  ;;  %v11204_v2 = vpack.i.bf16 %v3134_v3, %v3133_v8 }
 0x1dc   : > { %3076 = vst.msk [vmem:[#allocation3 + $0x18a] sm:$0xff] %vm20096_vm2, %v3009_v50  ;;  %3075 = vst.msk [vmem:[#allocation3 + $0x182] sm:$0xff] %vm20096_vm2, %v3007_v25  ;;  %v14431_v59 = vpack.i.bf16 %v1204_v58, %v1203_v16 }
 0x1de   : > { %11120 = vrot.lane.b32.xlu1 %v11119_v13, %s13428_s18 }
 0x1df   : > { %11080 = vrot.lane.b32.xlu0 %v11094_v36, %s13430_s20 }
 0x1e0   : > { %v14383_v22 = vpop.permute.xlu1 %10830 }
 0x1e1   : > { %v14385_v1 = vpop.permute.xlu0 %10820 }
 0x1e2   : > { %11125 = vrot.lane.b32.xlu1 %v11124_v24, %s13430_s20 }
 0x1e3   : > { %11100 = vrot.lane.b32.xlu0 %v11084_v41, %s13427_s17 }
 0x1e4   : > { %v14389_v37 = vpop.permute.xlu1 %10835 }
 0x1e5   : > { %v14391_v23 = vpop.permute.xlu0 %10825 }
 0x1e6   : > { %11145 = vrot.lane.b32.xlu1 %v11144_v5, %s13427_s17 }
 0x1e7   : > { %11105 = vrot.lane.b32.xlu0 %v11089_v17, %s13429_s19 }
 0x1e8   : > { %v14395_v53 = vpop.permute.xlu1 %10840 }
 0x1e9   : > { %v14397_v50 = vpop.permute.xlu0 %10845 }
 0x1ea   : > { %11150 = vrot.lane.b32.xlu1 %v11119_v13, %s13429_s19 }
 0x1eb   : > { %11110 = vrot.lane.b32.xlu0 %v11094_v36, %s13431_s21  ;;  %v10788_v36 = vunpack.i.h.bf16 %v14184_v38  ;;  %v10792_v38 = vunpack.i.l.bf16 %v14192_v45  ;;  %v1075_v45 = vld [vmem:[#allocation2 + $0xd9] sm:$0xff] }
 0x1ec   : > { %v14401_v41 = vpop.permute.xlu1 %10860 }
 0x1ed   : > { %20115 = vst [vmem:[#allocation23_spill] sm:$0xff] %v14401_v41  ;;  %v14403_v25 = vpop.permute.xlu0 %10850  ;;  %v1026_v41 = vld [vmem:[#allocation2 + $0x8] sm:$0xff]  ;;  %v2371_v18 = vsel %vm20095_vm4, %v2338_v39, %v10792_v38  ;;  %v10848_v39 = vunpack.i.h.bf16 %v14397_v50 }
 0x1ee   : > { %11155 = vrot.lane.b32.xlu1 %v11124_v24, %s13431_s21 }
 0x1ef   : > { %11130 = vrot.lane.b32.xlu0 %v11144_v5, %s13434_s28 }
 0x1f0   : > { %v14407_v17 = vpop.permute.xlu1 %10865 }
 0x1f1   : > { %v14409_v7 = vpop.permute.xlu0 %10855 }
 0x1f2   : > { %11175 = vrot.lane.b32.xlu1 %v14411_v4, %s13434_s28 }
 0x1f3   : > { %11135 = vrot.lane.b32.xlu0 %v11119_v13, %s13435_s29  ;;  %v2339_v13 = vsel %vm20096_vm2, %v1026_v41, %v10788_v36  ;;  %v1076_v36 = vld [vmem:[#allocation2 + $0xe1] sm:$0xff] }
 0x1f4   : > { %v14418_v5 = vpop.permute.xlu1 %10870  ;;  %v2372_v27 = vsel %vm20095_vm4, %v2339_v13, %v10793_v28  ;;  %v10847_v28 = vunpack.i.l.bf16 %v14397_v50  ;;  %v10852_v50 = vunpack.i.l.bf16 %v14403_v25 }
 0x1f5   : > { %v10876_v54 = vpop.permute.xlu0 %10875 }
 0x1f6   : > { %11180 = vrot.lane.b32.xlu1 %v14420_v61, %s13435_s29  ;;  %v10878_v33 = vunpack.i.h.bf16 %v10876_v54  ;;  %v10877_v40 = vunpack.i.l.bf16 %v10876_v54 }
 0x1f7   : > { %11140 = vrot.lane.b32.xlu0 %v11124_v24, %s13436_s30 }
 0x1f8   : > { %v14429_v47 = vpop.permute.xlu1 %10905  ;;  %v2405_v6 = vsel %vm2403_vm5, %v2372_v27, %v10878_v33  ;;  %v2404_v16 = vsel %vm2403_vm5, %v2371_v18, %v10877_v40  ;;  %v14451_v33 = vpack.i.bf16 %v1076_v36, %v1075_v45  ;;  %v10853_v40 = vunpack.i.h.bf16 %v14403_v25  ;;  %v1108_v45 = vld [vmem:[#allocation2 + $0xe2] sm:$0xff] }
 0x1f9   : > { %v10881_v52 = vpop.permute.xlu0 %10880 }
 0x1fa   : > { %v10883_v24 = vunpack.i.h.bf16 %v10881_v52  ;;  %v10882_v41 = vunpack.i.l.bf16 %v10881_v52  ;;  %11185 = vrot.lane.b32.xlu1 %v14431_v59, %s13436_s30 }
 0x1fb   : > { %11160 = vrot.lane.b32.xlu0 %v11159_v56, %s13428_s18 }
 0x1fc   : > { %v14438_v58 = vpop.permute.xlu1 %10910  ;;  %v2437_v13 = vsel %vm2436_vm6, %v2404_v16, %v10882_v41  ;;  %v2438_v38 = vsel %vm2436_vm6, %v2405_v6, %v10883_v24  ;;  %v1107_v6 = vld [vmem:[#allocation2 + $0xda] sm:$0xff] }
 0x1fd   : > { %v10886_v54 = vpop.permute.xlu0 %10885 }
 0x1fe   : > { %v10888_v52 = vunpack.i.h.bf16 %v10886_v54  ;;  %v10887_v56 = vunpack.i.l.bf16 %v10886_v54  ;;  %11205 = vrot.lane.b32.xlu1 %v11204_v2, %s13428_s18  ;;  %v10858_v54 = vunpack.i.h.bf16 %v14409_v7  ;;  %v10857_v2 = vunpack.i.l.bf16 %v14409_v7 }
 0x1ff   : > { %11165 = vrot.lane.b32.xlu0 %v14420_v61, %s13428_s18 }
 0x200   : > { %v2470_v8 = vsel %vm2469_vm7, %v2437_v13, %v10887_v56  ;;  %v2471_v3 = vsel %vm2469_vm7, %v2438_v38, %v10888_v52  ;;  %v14457_v18 = vpop.permute.xlu1 %10915  ;;  %v1232_v13 = vld [vmem:[#allocation2 + $0xd8] sm:$0xff]  ;;  %v1233_v38 = vld [vmem:[#allocation2 + $0xe0] sm:$0xff] }
 0x201   : > { %v2503_v41 = vsel %vm2502_vm8, %v2470_v8, %v10847_v28  ;;  %v2504_v24 = vsel %vm2502_vm8, %v2471_v3, %v10848_v39  ;;  %v14459_v27 = vpop.permute.xlu0 %10890  ;;  %v14475_v28 = vpack.i.bf16 %v1108_v45, %v1107_v6 }
 0x202   : > { %20116 = vst [vmem:[#allocation24_spill] sm:$0xff] %v14459_v27  ;;  %11210 = vrot.lane.b32.xlu1 %v14451_v33, %s13428_s18  ;;  %v2536_v25 = vsel %vm2535_vm9, %v2503_v41, %v10852_v50  ;;  %v2537_v36 = vsel %vm2535_vm9, %v2504_v24, %v10853_v40  ;;  %v11234_v40 = vpack.i.bf16 %v1233_v38, %v1232_v13  ;;  %v10868_v50 = vunpack.i.h.bf16 %v14407_v17 }
 0x203   : > { %11170 = vrot.lane.b32.xlu0 %v14431_v59, %s13430_s20  ;;  %v2569_v16 = vsel %vm2568_vm10, %v2536_v25, %v10857_v2  ;;  %v2570_v52 = vsel %vm2568_vm10, %v2537_v36, %v10858_v54  ;;  %v10867_v41 = vunpack.i.l.bf16 %v14407_v17  ;;  %v10873_v24 = vunpack.i.h.bf16 %v14418_v5 }
 0x204   : > { %v14471_v56 = vpop.permute.xlu1 %10935  ;;  %v2601_v39 = vpack.c.bf16 %v2570_v52, %v2569_v16  ;;  %v10872_v54 = vunpack.i.l.bf16 %v14418_v5  ;;  %v2341_v45 = vsel %vm20096_vm2, %v14256_v42, %v10868_v50  ;;  %v10832_v25 = vunpack.i.l.bf16 %v14383_v22  ;;  %v1144_v52 = vld [vmem:[#allocation2 + $0x128] sm:$0xff] }
 0x205   : > { %20117 = vst [vmem:[#allocation25_spill] sm:$0xff] %v14471_v56  ;;  %v14473_v7 = vpop.permute.xlu0 %10895  ;;  %v2340_v6 = vsel %vm20096_vm2, %v14260_v9, %v10867_v41  ;;  %v2374_v5 = vsel %vm20095_vm4, %v2341_v45, %v10873_v24  ;;  %v1143_v9 = vld [vmem:[#allocation2 + $0x120] sm:$0xff]  ;;  %v10838_v13 = vunpack.i.h.bf16 %v14389_v37  ;;  %v1208_v56 = vld [vmem:[#allocation2 + $0x12a] sm:$0xff] }
 0x206   : > { %10404 = vmatprep.mubr.msk.bf16.mxu1 %vm2644_vm11, %v2601_v39  ;;  %11215 = vrot.lane.b32.xlu1 %v14475_v28, %s13430_s20  ;;  %v2373_v17 = vsel %vm20095_vm4, %v2340_v6, %v10872_v54  ;;  %v14520_v50 = vpack.i.bf16 %v1144_v52, %v1143_v9  ;;  %v1175_v45 = vld [vmem:[#allocation2 + $0x121] sm:$0xff] }
 0x207   : > { %11190 = vrot.lane.b32.xlu0 %v14411_v4, %s13427_s17  ;;  %v2406_v42 = vsel %vm2403_vm5, %v2373_v17, %v10832_v25  ;;  %v1176_v17 = vld [vmem:[#allocation2 + $0x129] sm:$0xff] }
 0x208   : > { %v14482_v8 = vpop.permute.xlu1 %10940 }
 0x209   : > { %v14484_v3 = vpop.permute.xlu0 %10900 }
 0x20a   : > { %11235 = vrot.lane.b32.xlu1 %v11234_v40, %s13427_s17 }
 0x20b   : > { %11195 = vrot.lane.b32.xlu0 %v14420_v61, %s13429_s19  ;;  %v10833_v61 = vunpack.i.h.bf16 %v14383_v22 }
 0x20c   : > { %v14493_v2 = vpop.permute.xlu1 %10945 }
 0x20d   : > { %v14495_v4 = vpop.permute.xlu0 %10920  ;;  %v2407_v39 = vsel %vm2403_vm5, %v2374_v5, %v10833_v61  ;;  %v10843_v5 = vunpack.i.h.bf16 %v14395_v53  ;;  %v10842_v61 = vunpack.i.l.bf16 %v14395_v53 }
 0x20e   : > { %11240 = vrot.lane.b32.xlu1 %v14451_v33, %s13429_s19  ;;  %v2440_v24 = vsel %vm2436_vm6, %v2407_v39, %v10838_v13 }
 0x20f   : > { %11200 = vrot.lane.b32.xlu0 %v14431_v59, %s13431_s21  ;;  %v10837_v59 = vunpack.i.l.bf16 %v14389_v37  ;;  %v2473_v9 = vsel %vm2469_vm7, %v2440_v24, %v10843_v5  ;;  %v3132_v24 = vld [vmem:[#allocation3 + $0xf9] sm:$0xff]  ;;  %v10828_v5 = vunpack.i.h.bf16 %v14391_v23 }
 0x210   : > { %v10966_v36 = vpop.permute.xlu1 %10965 }
 0x211   : > { %v14509_v16 = vpop.permute.xlu0 %10925  ;;  %v2439_v41 = vsel %vm2436_vm6, %v2406_v42, %v10837_v59  ;;  %v10968_v54 = vunpack.i.h.bf16 %v10966_v36  ;;  %v10967_v6 = vunpack.i.l.bf16 %v10966_v36  ;;  %v14532_v42 = vpack.i.bf16 %v1176_v17, %v1175_v45 }
 0x212   : > { %11245 = vrot.lane.b32.xlu1 %v14475_v28, %s13431_s21  ;;  %v10823_v45 = vunpack.i.h.bf16 %v14385_v1  ;;  %v10822_v17 = vunpack.i.l.bf16 %v14385_v1 }
 0x213   : > { %11220 = vrot.lane.b32.xlu0 %v11234_v40, %s13434_s28  ;;  %v2472_v40 = vsel %vm2469_vm7, %v2439_v41, %v10842_v61  ;;  %v2506_v39 = vsel %vm2502_vm8, %v2473_v9, %v10968_v54  ;;  %v3131_v41 = vld [vmem:[#allocation3 + $0xf1] sm:$0xff]  ;;  %v10827_v61 = vunpack.i.l.bf16 %v14391_v23 }
 0x214   : > { %v10971_v38 = vpop.permute.xlu1 %10970  ;;  %v2505_v53 = vsel %vm2502_vm8, %v2472_v40, %v10967_v6  ;;  %v11249_v1 = vpack.i.bf16 %v3132_v24, %v3131_v41  ;;  %v2343_v23 = vsel %vm20096_vm2, %v14234_v26, %v10823_v45  ;;  %v1079_v24 = vld [vmem:[#allocation2 + $0x109] sm:$0xff] }
 0x215   : > { %v14518_v22 = vpop.permute.xlu0 %10930  ;;  %v10973_v37 = vunpack.i.h.bf16 %v10971_v38  ;;  %v10972_v25 = vunpack.i.l.bf16 %v10971_v38  ;;  %v1207_v38 = vld [vmem:[#allocation2 + $0x122] sm:$0xff] }
 0x216   : > { %11265 = vrot.lane.b32.xlu1 %v14520_v50, %s13434_s28  ;;  %v14550_v9 = vpack.i.bf16 %v1208_v56, %v1207_v38 }
 0x217   : > { %11225 = vrot.lane.b32.xlu0 %v14451_v33, %s13435_s29  ;;  %v2538_v27 = vsel %vm2535_vm9, %v2505_v53, %v10972_v25  ;;  %v2539_v33 = vsel %vm2535_vm9, %v2506_v39, %v10973_v37  ;;  %v3137_v53 = vld [vmem:[#allocation3 + $0x139] sm:$0xff] }
 0x218   : > { %v10976_v52 = vpop.permute.xlu1 %10975 }
 0x219   : > { %v10951_v36 = vpop.permute.xlu0 %10950  ;;  %v10978_v13 = vunpack.i.h.bf16 %v10976_v52  ;;  %v10977_v59 = vunpack.i.l.bf16 %v10976_v52 }
 0x21a   : > { %11270 = vrot.lane.b32.xlu1 %v14532_v42, %s13435_s29  ;;  %v10953_v52 = vunpack.i.h.bf16 %v10951_v36  ;;  %v10952_v39 = vunpack.i.l.bf16 %v10951_v36  ;;  %v2376_v36 = vsel %vm20095_vm4, %v2343_v23, %v10828_v5  ;;  %v10933_v23 = vunpack.i.h.bf16 %v14518_v22 }
 0x21b   : > { %v2571_v54 = vsel %vm2568_vm10, %v2538_v27, %v10977_v59  ;;  %v2572_v6 = vsel %vm2568_vm10, %v2539_v33, %v10978_v13  ;;  %11230 = vrot.lane.b32.xlu0 %v14475_v28, %s13436_s30  ;;  %v3138_v27 = vld [vmem:[#allocation3 + $0x141] sm:$0xff]  ;;  %v2342_v28 = vsel %vm20096_vm2, %v14232_v11, %v10822_v17  ;;  %v10923_v11 = vunpack.i.h.bf16 %v14495_v4 }
 0x21c   : > { %v2602_v37 = vpack.c.bf16 %v2572_v6, %v2571_v54  ;;  %v14548_v25 = vpop.permute.xlu1 %10995  ;;  %v2375_v56 = vsel %vm20095_vm4, %v2342_v28, %v10827_v61  ;;  %v11294_v41 = vpack.i.bf16 %v3138_v27, %v3137_v53  ;;  %v1080_v54 = vld [vmem:[#allocation2 + $0x111] sm:$0xff]  ;;  %v10922_v17 = vunpack.i.l.bf16 %v14495_v4 }
 0x21d   : > { %v10956_v40 = vpop.permute.xlu0 %10955  ;;  %v2408_v6 = vsel %vm2403_vm5, %v2375_v56, %v10952_v39  ;;  %v10928_v39 = vunpack.i.h.bf16 %v14509_v16  ;;  %v10927_v53 = vunpack.i.l.bf16 %v14509_v16  ;;  %v10932_v28 = vunpack.i.l.bf16 %v14518_v22  ;;  %v1111_v56 = vld [vmem:[#allocation2 + $0x10a] sm:$0xff] }
 0x21e   : > { %v10958_v59 = vunpack.i.h.bf16 %v10956_v40  ;;  %v10957_v13 = vunpack.i.l.bf16 %v10956_v40  ;;  %11275 = vrot.lane.b32.xlu1 %v14550_v9, %s13436_s30  ;;  %10405 = vmatmul.mubr.msk.bf16.vlgmr.msra.gmra.mrb[32].mxu1 %vm2644_vm11, %v2602_v37  ;;  %v2409_v37 = vsel %vm2403_vm5, %v2376_v36, %v10953_v52  ;;  %v14575_v52 = vpack.i.bf16 %v1080_v54, %v1079_v24  ;;  %v1112_v36 = vld [vmem:[#allocation2 + $0x112] sm:$0xff] }
 0x21f   : > { %11250 = vrot.lane.b32.xlu0 %v11249_v1, %s13428_s18 }
 0x220   : > { %v14562_v38 = vpop.permute.xlu1 %11000  ;;  %v2441_v61 = vsel %vm2436_vm6, %v2408_v6, %v10957_v13  ;;  %v2442_v5 = vsel %vm2436_vm6, %v2409_v37, %v10958_v59  ;;  %v14599_v37 = vpack.i.bf16 %v1112_v36, %v1111_v56  ;;  %v1148_v36 = vld [vmem:[#allocation2 + $0x158] sm:$0xff] }
 0x221   : > { %v10961_v33 = vpop.permute.xlu0 %10960 }
 0x222   : > { %v10963_v26 = vunpack.i.h.bf16 %v10961_v33  ;;  %v10962_v45 = vunpack.i.l.bf16 %v10961_v33  ;;  %11295 = vrot.lane.b32.xlu1 %v11294_v41, %s13428_s18 }
 0x223   : > { %11255 = vrot.lane.b32.xlu0 %v14532_v42, %s13428_s18 }
 0x224   : > { %v2474_v40 = vsel %vm2469_vm7, %v2441_v61, %v10962_v45  ;;  %v2475_v1 = vsel %vm2469_vm7, %v2442_v5, %v10963_v26  ;;  %v14581_v59 = vpop.permute.xlu1 %11005  ;;  %v1236_v26 = vld [vmem:[#allocation2 + $0x108] sm:$0xff]  ;;  %v1237_v45 = vld [vmem:[#allocation2 + $0x110] sm:$0xff]  ;;  %v10943_v5 = vunpack.i.h.bf16 %v14482_v8 }
 0x225   : > { %v2507_v4 = vsel %vm2502_vm8, %v2474_v40, %v10922_v17  ;;  %v2508_v27 = vsel %vm2502_vm8, %v2475_v1, %v10923_v11  ;;  %v14583_v13 = vpop.permute.xlu0 %10980  ;;  %v11324_v61 = vpack.i.bf16 %v1237_v45, %v1236_v26  ;;  %v10942_v40 = vunpack.i.l.bf16 %v14482_v8 }
 0x226   : > { %20118 = vst [vmem:[#allocation26_spill] sm:$0xff] %v14583_v13  ;;  %11300 = vrot.lane.b32.xlu1 %v14575_v52, %s13428_s18  ;;  %v2540_v33 = vsel %vm2535_vm9, %v2507_v4, %v10927_v53  ;;  %v2541_v16 = vsel %vm2535_vm9, %v2508_v27, %v10928_v39  ;;  %v10948_v1 = vunpack.i.h.bf16 %v14493_v2  ;;  %v10947_v39 = vunpack.i.l.bf16 %v14493_v2 }
 0x227   : > { %11260 = vrot.lane.b32.xlu0 %v14550_v9, %s13430_s20  ;;  %v2573_v41 = vsel %vm2568_vm10, %v2540_v33, %v10932_v28  ;;  %v2574_v24 = vsel %vm2568_vm10, %v2541_v16, %v10933_v23  ;;  %v2344_v4 = vsel %vm20096_vm2, %v14296_v51, %v10942_v40  ;;  %v2345_v27 = vsel %vm20096_vm2, %v14298_v55, %v10943_v5  ;;  %v1147_v51 = vld [vmem:[#allocation2 + $0x150] sm:$0xff] }
 0x228   : > { %v14595_v54 = vpop.permute.xlu1 %11025  ;;  %v2603_v22 = vpack.c.bf16 %v2574_v24, %v2573_v41  ;;  %v2377_v8 = vsel %vm20095_vm4, %v2344_v4, %v10947_v39  ;;  %v2378_v2 = vsel %vm20095_vm4, %v2345_v27, %v10948_v1  ;;  %v10907_v23 = vunpack.i.l.bf16 %v14429_v47  ;;  %v1179_v40 = vld [vmem:[#allocation2 + $0x151] sm:$0xff]  ;;  %v1180_v1 = vld [vmem:[#allocation2 + $0x159] sm:$0xff] }
 0x229   : > { %20119 = vst [vmem:[#allocation27_spill] sm:$0xff] %v14595_v54  ;;  %v14597_v6 = vpop.permute.xlu0 %10985  ;;  %v10913_v16 = vunpack.i.h.bf16 %v14438_v58  ;;  %v14644_v24 = vpack.i.bf16 %v1148_v36, %v1147_v51  ;;  %v10918_v39 = vunpack.i.h.bf16 %v14457_v18  ;;  %v10917_v4 = vunpack.i.l.bf16 %v14457_v18 }
 0x22a   : > { %10408 = vmatprep.mubr.msk.bf16.mxu1 %vm2644_vm11, %v2603_v22  ;;  %11305 = vrot.lane.b32.xlu1 %v14599_v37, %s13430_s20  ;;  %v2410_v55 = vsel %vm2403_vm5, %v2377_v8, %v10907_v23  ;;  %v14656_v23 = vpack.i.bf16 %v1180_v1, %v1179_v40  ;;  %v10903_v40 = vunpack.i.h.bf16 %v14484_v3  ;;  %v10902_v1 = vunpack.i.l.bf16 %v14484_v3 }
 0x22b   : > { %11280 = vrot.lane.b32.xlu0 %v14520_v50, %s13427_s17 }
 0x22c   : > { %v14606_v11 = vpop.permute.xlu1 %11030 }
 0x22d   : > { %v14608_v17 = vpop.permute.xlu0 %10990 }
 0x22e   : > { %11325 = vrot.lane.b32.xlu1 %v11324_v61, %s13427_s17 }
 0x22f   : > { %11285 = vrot.lane.b32.xlu0 %v14532_v42, %s13429_s19  ;;  %v10908_v42 = vunpack.i.h.bf16 %v14429_v47 }
 0x230   : > { %v14617_v53 = vpop.permute.xlu1 %11035 }
 0x231   : > { %v14619_v50 = vpop.permute.xlu0 %11010  ;;  %v2411_v33 = vsel %vm2403_vm5, %v2378_v2, %v10908_v42 }
 0x232   : > { %11330 = vrot.lane.b32.xlu1 %v14575_v52, %s13429_s19  ;;  %v2444_v26 = vsel %vm2436_vm6, %v2411_v33, %v10913_v16  ;;  %v1212_v33 = vld [vmem:[#allocation2 + $0x15a] sm:$0xff] }
 0x233   : > { %11290 = vrot.lane.b32.xlu0 %v14550_v9, %s13431_s21  ;;  %v10912_v9 = vunpack.i.l.bf16 %v14438_v58  ;;  %v2477_v8 = vsel %vm2469_vm7, %v2444_v26, %v10918_v39  ;;  %v10897_v26 = vunpack.i.l.bf16 %v14473_v7 }
 0x234   : > { %v11056_v28 = vpop.permute.xlu1 %11055 }
 0x235   : > { %v14633_v56 = vpop.permute.xlu0 %11015  ;;  %v2443_v22 = vsel %vm2436_vm6, %v2410_v55, %v10912_v9  ;;  %v11058_v45 = vunpack.i.h.bf16 %v11056_v28  ;;  %v11057_v5 = vunpack.i.l.bf16 %v11056_v28  ;;  %v1211_v55 = vld [vmem:[#allocation2 + $0x152] sm:$0xff] }
 0x236   : > { %11335 = vrot.lane.b32.xlu1 %v14599_v37, %s13431_s21  ;;  %v3135_v9 = vld [vmem:[#allocation3 + $0x121] sm:$0xff] }
 0x237   : > { %11310 = vrot.lane.b32.xlu0 %v11324_v61, %s13434_s28  ;;  %v2476_v61 = vsel %vm2469_vm7, %v2443_v22, %v10917_v4  ;;  %v2510_v28 = vsel %vm2502_vm8, %v2477_v8, %v11058_v45  ;;  %v10898_v22 = vunpack.i.h.bf16 %v14473_v7 }
 0x238   : > { %v11061_v41 = vpop.permute.xlu1 %11060  ;;  %v2509_v18 = vsel %vm2502_vm8, %v2476_v61, %v11057_v5 }
 0x239   : > { %v14642_v47 = vpop.permute.xlu0 %11020  ;;  %v11063_v58 = vunpack.i.h.bf16 %v11061_v41  ;;  %v11062_v27 = vunpack.i.l.bf16 %v11061_v41  ;;  %v3136_v41 = vld [vmem:[#allocation3 + $0x129] sm:$0xff] }
 0x23a   : > { %11355 = vrot.lane.b32.xlu1 %v14644_v24, %s13434_s28  ;;  %v11339_v7 = vpack.i.bf16 %v3136_v41, %v3135_v9  ;;  %v1115_v41 = vld [vmem:[#allocation2 + $0x13a] sm:$0xff] }
 0x23b   : > { %11315 = vrot.lane.b32.xlu0 %v14575_v52, %s13435_s29  ;;  %v2542_v16 = vsel %vm2535_vm9, %v2509_v18, %v11062_v27  ;;  %v2543_v52 = vsel %vm2535_vm9, %v2510_v28, %v11063_v58  ;;  %v14674_v58 = vpack.i.bf16 %v1212_v33, %v1211_v55  ;;  %v1084_v28 = vld [vmem:[#allocation2 + $0x141] sm:$0xff] }
 0x23c   : > { %v11066_v2 = vpop.permute.xlu1 %11065 }
 0x23d   : > { %v11041_v42 = vpop.permute.xlu0 %11040  ;;  %v11068_v51 = vunpack.i.h.bf16 %v11066_v2  ;;  %v11067_v36 = vunpack.i.l.bf16 %v11066_v2  ;;  %v1083_v2 = vld [vmem:[#allocation2 + $0x139] sm:$0xff] }
 0x23e   : > { %11360 = vrot.lane.b32.xlu1 %v14656_v23, %s13435_s29  ;;  %v11043_v61 = vunpack.i.h.bf16 %v11041_v42  ;;  %v11042_v8 = vunpack.i.l.bf16 %v11041_v42  ;;  %v14686_v9 = vpack.i.bf16 %v1084_v28, %v1083_v2 }
 0x23f   : > { %v2575_v45 = vsel %vm2568_vm10, %v2542_v16, %v11067_v36  ;;  %v2576_v5 = vsel %vm2568_vm10, %v2543_v52, %v11068_v51  ;;  %11320 = vrot.lane.b32.xlu0 %v14599_v37, %s13436_s30  ;;  %v13386_v37 = vld [vmem:[#allocation2 + $0x68] sm:$0xff]  ;;  %v13387_v36 = vld [vmem:[#allocation2 + $0x60] sm:$0xff] }
 0x240   : > { %v14672_v39 = vpop.permute.xlu1 %11085  ;;  %v2604_v27 = vpack.c.bf16 %v2576_v5, %v2575_v45  ;;  %v2347_v3 = vsel %vm20096_vm2, %v13386_v37, %v10898_v22  ;;  %v2346_v55 = vsel %vm20096_vm2, %v13387_v36, %v10897_v26  ;;  %v1116_v45 = vld [vmem:[#allocation2 + $0x142] sm:$0xff]  ;;  %v11013_v26 = vunpack.i.h.bf16 %v14619_v50 }
 0x241   : > { %v11046_v4 = vpop.permute.xlu0 %11045  ;;  %v2379_v42 = vsel %vm20095_vm4, %v2346_v55, %v10902_v1  ;;  %v2380_v33 = vsel %vm20095_vm4, %v2347_v3, %v10903_v40  ;;  %v11023_v36 = vunpack.i.h.bf16 %v14642_v47  ;;  %v11022_v55 = vunpack.i.l.bf16 %v14642_v47 }
 0x242   : > { %v11048_v18 = vunpack.i.h.bf16 %v11046_v4  ;;  %v11047_v51 = vunpack.i.l.bf16 %v11046_v4  ;;  %11365 = vrot.lane.b32.xlu1 %v14674_v58, %s13436_s30  ;;  %10409 = vmatmul.mubr.msk.bf16.gmra.mrb[36].mxu1 %vm2644_vm11, %v2604_v27  ;;  %v2412_v5 = vsel %vm2403_vm5, %v2379_v42, %v11042_v8  ;;  %v2413_v22 = vsel %vm2403_vm5, %v2380_v33, %v11043_v61  ;;  %v1240_v42 = vld [vmem:[#allocation2 + $0x138] sm:$0xff]  ;;  %v1241_v33 = vld [vmem:[#allocation2 + $0x140] sm:$0xff] }
 0x243   : > { %11340 = vrot.lane.b32.xlu0 %v11339_v7, %s13428_s18  ;;  %v11012_v7 = vunpack.i.l.bf16 %v14619_v50  ;;  %v14700_v61 = vpack.i.bf16 %v1116_v45, %v1115_v41  ;;  %v11018_v8 = vunpack.i.h.bf16 %v14633_v56  ;;  %v11017_v50 = vunpack.i.l.bf16 %v14633_v56 }
 0x244   : > { %v14684_v16 = vpop.permute.xlu1 %11090  ;;  %v2445_v1 = vsel %vm2436_vm6, %v2412_v5, %v11047_v51  ;;  %v2446_v40 = vsel %vm2436_vm6, %v2413_v22, %v11048_v18 }
 0x245   : > { %v11051_v52 = vpop.permute.xlu0 %11050 }
 0x246   : > { %v11053_v4 = vunpack.i.h.bf16 %v11051_v52  ;;  %v11052_v27 = vunpack.i.l.bf16 %v11051_v52  ;;  %11385 = vrot.lane.b32.xlu1 %v14686_v9, %s13428_s18 }
 0x247   : > { %11345 = vrot.lane.b32.xlu0 %v14656_v23, %s13428_s18 }
 0x248   : > { %v2478_v2 = vsel %vm2469_vm7, %v2445_v1, %v11052_v27  ;;  %v2479_v28 = vsel %vm2469_vm7, %v2446_v40, %v11053_v4  ;;  %v14706_v37 = vpop.permute.xlu1 %11095  ;;  %v11409_v4 = vpack.i.bf16 %v1241_v33, %v1240_v42  ;;  %v11032_v1 = vunpack.i.l.bf16 %v14606_v11  ;;  %v1183_v33 = vld [vmem:[#allocation2 + $0x181] sm:$0xff] }
 0x249   : > { %v2511_v51 = vsel %vm2502_vm8, %v2478_v2, %v11012_v7  ;;  %v2512_v18 = vsel %vm2502_vm8, %v2479_v28, %v11013_v26  ;;  %v14708_v3 = vpop.permute.xlu0 %11070  ;;  %v11033_v7 = vunpack.i.h.bf16 %v14606_v11  ;;  %v11038_v40 = vunpack.i.h.bf16 %v14617_v53 }
 0x24a   : > { %20120 = vst [vmem:[#allocation28_spill] sm:$0xff] %v14708_v3  ;;  %11390 = vrot.lane.b32.xlu1 %v14700_v61, %s13430_s20  ;;  %v2544_v52 = vsel %vm2535_vm9, %v2511_v51, %v11017_v50  ;;  %v2545_v56 = vsel %vm2535_vm9, %v2512_v18, %v11018_v8  ;;  %v11037_v2 = vunpack.i.l.bf16 %v14617_v53  ;;  %v1151_v8 = vld [vmem:[#allocation2 + $0x180] sm:$0xff]  ;;  %v1152_v50 = vld [vmem:[#allocation2 + $0x188] sm:$0xff]  ;;  %v2348_v51 = vsel %vm20096_vm2, %v14343_v0, %v11032_v1 }
 0x24b   : > { %11350 = vrot.lane.b32.xlu0 %v14674_v58, %s13430_s20  ;;  %v2577_v41 = vsel %vm2568_vm10, %v2544_v52, %v11022_v55  ;;  %v2578_v45 = vsel %vm2568_vm10, %v2545_v56, %v11023_v36  ;;  %v2349_v11 = vsel %vm20096_vm2, %v14345_v30, %v11033_v7  ;;  %v10997_v36 = vunpack.i.l.bf16 %v14548_v25  ;;  %v1184_v30 = vld [vmem:[#allocation2 + $0x189] sm:$0xff] }
 0x24c   : > { %v14720_v5 = vpop.permute.xlu1 %11115  ;;  %v2605_v47 = vpack.c.bf16 %v2578_v45, %v2577_v41  ;;  %v2381_v53 = vsel %vm20095_vm4, %v2348_v51, %v11037_v2  ;;  %v2382_v18 = vsel %vm20095_vm4, %v2349_v11, %v11038_v40  ;;  %v11424_v0 = vpack.i.bf16 %v1152_v50, %v1151_v8  ;;  %v1215_v8 = vld [vmem:[#allocation2 + $0x182] sm:$0xff]  ;;  %v1216_v50 = vld [vmem:[#allocation2 + $0x18a] sm:$0xff] }
 0x24d   : > { %20121 = vst [vmem:[#allocation29_spill] sm:$0xff] %v14720_v5  ;;  %v14722_v22 = vpop.permute.xlu0 %11075  ;;  %v2414_v52 = vsel %vm2403_vm5, %v2381_v53, %v10997_v36  ;;  %v11003_v41 = vunpack.i.h.bf16 %v14562_v38  ;;  %v11008_v51 = vunpack.i.h.bf16 %v14581_v59  ;;  %v11007_v11 = vunpack.i.l.bf16 %v14581_v59 }
 0x24e   : > { %10412 = vmatprep.mubr.msk.bf16.mxu1 %vm2644_vm11, %v2605_v47  ;;  %11410 = vrot.lane.b32.xlu1 %v11409_v4, %s13427_s17  ;;  %v14766_v47 = vpack.i.bf16 %v1184_v30, %v1183_v33 }
 0x24f   : > { %11370 = vrot.lane.b32.xlu0 %v14644_v24, %s13427_s17 }
 0x250   : > { %v14728_v27 = vpop.permute.xlu1 %11120 }
 0x251   : > { %v14730_v26 = vpop.permute.xlu0 %11080 }
 0x252   : > { %11415 = vrot.lane.b32.xlu1 %v14686_v9, %s13429_s19 }
 0x253   : > { %11375 = vrot.lane.b32.xlu0 %v14656_v23, %s13429_s19  ;;  %v10998_v23 = vunpack.i.h.bf16 %v14548_v25 }
 0x254   : > { %v14740_v28 = vpop.permute.xlu1 %11125 }
 0x255   : > { %v14742_v24 = vpop.permute.xlu0 %11100  ;;  %v2415_v56 = vsel %vm2403_vm5, %v2382_v18, %v10998_v23 }
 0x256   : > { %11420 = vrot.lane.b32.xlu1 %v14700_v61, %s13431_s21  ;;  %v2448_v1 = vsel %vm2436_vm6, %v2415_v56, %v11003_v41  ;;  %v1087_v56 = vld [vmem:[#allocation2 + $0x169] sm:$0xff]  ;;  %v1088_v41 = vld [vmem:[#allocation2 + $0x171] sm:$0xff] }
 0x257   : > { %11380 = vrot.lane.b32.xlu0 %v14674_v58, %s13431_s21  ;;  %v11002_v58 = vunpack.i.l.bf16 %v14562_v38  ;;  %v2481_v18 = vsel %vm2469_vm7, %v2448_v1, %v11008_v51 }
 0x258   : > { %v11146_v55 = vpop.permute.xlu1 %11145 }
 0x259   : > { %v14756_v42 = vpop.permute.xlu0 %11105  ;;  %v2447_v7 = vsel %vm2436_vm6, %v2414_v52, %v11002_v58  ;;  %v11148_v40 = vunpack.i.h.bf16 %v11146_v55  ;;  %v11147_v2 = vunpack.i.l.bf16 %v11146_v55  ;;  %v14778_v55 = vpack.i.bf16 %v1216_v50, %v1215_v8 }
 0x25a   : > { %11425 = vrot.lane.b32.xlu1 %v11424_v0, %s13434_s28  ;;  %v10992_v8 = vunpack.i.l.bf16 %v14608_v17 }
 0x25b   : > { %11395 = vrot.lane.b32.xlu0 %v11409_v4, %s13434_s28  ;;  %v2480_v4 = vsel %vm2469_vm7, %v2447_v7, %v11007_v11  ;;  %v2514_v33 = vsel %vm2502_vm8, %v2481_v18, %v11148_v40  ;;  %v10987_v7 = vunpack.i.l.bf16 %v14597_v6  ;;  %v14796_v11 = vpack.i.bf16 %v1088_v41, %v1087_v56  ;;  %v1120_v18 = vld [vmem:[#allocation2 + $0x172] sm:$0xff] }
 0x25c   : > { %v11151_v45 = vpop.permute.xlu1 %11150  ;;  %v2513_v59 = vsel %vm2502_vm8, %v2480_v4, %v11147_v2  ;;  %v10993_v2 = vunpack.i.h.bf16 %v14608_v17 }
 0x25d   : > { %v14764_v25 = vpop.permute.xlu0 %11110  ;;  %v11153_v38 = vunpack.i.h.bf16 %v11151_v45  ;;  %v11152_v53 = vunpack.i.l.bf16 %v11151_v45  ;;  %v10988_v45 = vunpack.i.h.bf16 %v14597_v6  ;;  %v1119_v6 = vld [vmem:[#allocation2 + $0x16a] sm:$0xff] }
 0x25e   : > { %11430 = vrot.lane.b32.xlu1 %v14766_v47, %s13435_s29 }
 0x25f   : > { %11400 = vrot.lane.b32.xlu0 %v14686_v9, %s13435_s29  ;;  %v2546_v58 = vsel %vm2535_vm9, %v2513_v59, %v11152_v53  ;;  %v2547_v9 = vsel %vm2535_vm9, %v2514_v33, %v11153_v38  ;;  %v1038_v33 = vld [vmem:[#allocation2 + $0x98] sm:$0xff] }
 0x260   : > { %v11156_v23 = vpop.permute.xlu1 %11155  ;;  %v2351_v17 = vsel %vm20096_vm2, %v1038_v33, %v10988_v45 }
 0x261   : > { %v11131_v36 = vpop.permute.xlu0 %11130  ;;  %v11158_v30 = vunpack.i.h.bf16 %v11156_v23  ;;  %v11157_v52 = vunpack.i.l.bf16 %v11156_v23  ;;  %v1037_v23 = vld [vmem:[#allocation2 + $0x90] sm:$0xff] }
 0x262   : > { %11435 = vrot.lane.b32.xlu1 %v14778_v55, %s13436_s30  ;;  %v11133_v53 = vunpack.i.h.bf16 %v11131_v36  ;;  %v11132_v4 = vunpack.i.l.bf16 %v11131_v36  ;;  %v2384_v36 = vsel %vm20095_vm4, %v2351_v17, %v10993_v2  ;;  %v11113_v17 = vunpack.i.h.bf16 %v14764_v25 }
 0x263   : > { %v2579_v1 = vsel %vm2568_vm10, %v2546_v58, %v11157_v52  ;;  %v2580_v40 = vsel %vm2568_vm10, %v2547_v9, %v11158_v30  ;;  %11405 = vrot.lane.b32.xlu0 %v14700_v61, %s13436_s30  ;;  %v2350_v61 = vsel %vm20096_vm2, %v1037_v23, %v10987_v7  ;;  %v11459_v58 = vpack.i.bf16 %v1120_v18, %v1119_v6  ;;  %v1244_v9 = vld [vmem:[#allocation2 + $0x168] sm:$0xff] }
 0x264   : > { %v14794_v50 = vpop.permute.xlu1 %11175  ;;  %v2606_v38 = vpack.c.bf16 %v2580_v40, %v2579_v1  ;;  %v2383_v52 = vsel %vm20095_vm4, %v2350_v61, %v10992_v8  ;;  %v1245_v1 = vld [vmem:[#allocation2 + $0x170] sm:$0xff]  ;;  %v11103_v7 = vunpack.i.h.bf16 %v14742_v24  ;;  %v11107_v23 = vunpack.i.l.bf16 %v14756_v42 }
 0x265   : > { %v11136_v51 = vpop.permute.xlu0 %11135  ;;  %v2416_v40 = vsel %vm2403_vm5, %v2383_v52, %v11132_v4  ;;  %v11108_v4 = vunpack.i.h.bf16 %v14756_v42  ;;  %v11112_v61 = vunpack.i.l.bf16 %v14764_v25 }
 0x266   : > { %v11138_v59 = vunpack.i.h.bf16 %v11136_v51  ;;  %v11137_v30 = vunpack.i.l.bf16 %v11136_v51  ;;  %11455 = vrot.lane.b32.xlu1 %v14796_v11, %s13428_s18  ;;  %10413 = vmatmul.mubr.msk.bf16.gmra.mrb[40].mxu1 %vm2644_vm11, %v2606_v38  ;;  %v2417_v51 = vsel %vm2403_vm5, %v2384_v36, %v11133_v53  ;;  %v11484_v53 = vpack.i.bf16 %v1245_v1, %v1244_v9 }
 0x267   : > { %11440 = vrot.lane.b32.xlu0 %v11424_v0, %s13427_s17  ;;  %v11102_v0 = vunpack.i.l.bf16 %v14742_v24 }
 0x268   : > { %v14806_v56 = vpop.permute.xlu1 %11180  ;;  %v2449_v8 = vsel %vm2436_vm6, %v2416_v40, %v11137_v30  ;;  %v2450_v2 = vsel %vm2436_vm6, %v2417_v51, %v11138_v59  ;;  %v3142_v51 = vld [vmem:[#allocation3 + $0x171] sm:$0xff] }
 0x269   : > { %v11141_v41 = vpop.permute.xlu0 %11140 }
 0x26a   : > { %v11143_v38 = vunpack.i.h.bf16 %v11141_v41  ;;  %v11142_v45 = vunpack.i.l.bf16 %v11141_v41  ;;  %11460 = vrot.lane.b32.xlu1 %v11459_v58, %s13430_s20 }
 0x26b   : > { %11445 = vrot.lane.b32.xlu0 %v14766_v47, %s13429_s19 }
 0x26c   : > { %v2482_v6 = vsel %vm2469_vm7, %v2449_v8, %v11142_v45  ;;  %v2483_v18 = vsel %vm2469_vm7, %v2450_v2, %v11143_v38  ;;  %v14823_v30 = vpop.permute.xlu1 %11185  ;;  %v11123_v38 = vunpack.i.h.bf16 %v14728_v27  ;;  %v11122_v45 = vunpack.i.l.bf16 %v14728_v27  ;;  %v3145_v8 = vld [vmem:[#allocation3 + $0x1a] sm:$0xff]  ;;  %v3146_v2 = vld [vmem:[#allocation3 + $0x22] sm:$0xff] }
 0x26d   : > { %v2515_v24 = vsel %vm2502_vm8, %v2482_v6, %v11102_v0  ;;  %v2516_v33 = vsel %vm2502_vm8, %v2483_v18, %v11103_v7  ;;  %v14825_v59 = vpop.permute.xlu0 %11160  ;;  %v11128_v7 = vunpack.i.h.bf16 %v14740_v28  ;;  %v11127_v0 = vunpack.i.l.bf16 %v14740_v28  ;;  %v3139_v28 = vld [vmem:[#allocation3 + $0x151] sm:$0xff] }
 0x26e   : > { %20122 = vst [vmem:[#allocation30_spill] sm:$0xff] %v14825_v59  ;;  %11485 = vrot.lane.b32.xlu1 %v11484_v53, %s13427_s17  ;;  %v2548_v47 = vsel %vm2535_vm9, %v2515_v24, %v11107_v23  ;;  %v2549_v52 = vsel %vm2535_vm9, %v2516_v33, %v11108_v4  ;;  %v1040_v4 = vld [vmem:[#allocation2 + $0xb0] sm:$0xff]  ;;  %v11509_v33 = vpack.i.bf16 %v3146_v2, %v3145_v8  ;;  %v11092_v8 = vunpack.i.l.bf16 %v14684_v16  ;;  %v3149_v2 = vld [vmem:[#allocation3 + $0x4a] sm:$0xff] }
 0x26f   : > { %11450 = vrot.lane.b32.xlu0 %v14778_v55, %s13431_s21  ;;  %v2581_v42 = vsel %vm2568_vm10, %v2548_v47, %v11112_v61  ;;  %v2582_v36 = vsel %vm2568_vm10, %v2549_v52, %v11113_v17  ;;  %v3141_v55 = vld [vmem:[#allocation3 + $0x169] sm:$0xff]  ;;  %v2353_v24 = vsel %vm20096_vm2, %v1040_v4, %v11123_v38  ;;  %v3140_v17 = vld [vmem:[#allocation3 + $0x159] sm:$0xff]  ;;  %v11088_v52 = vunpack.i.h.bf16 %v14672_v39 }
 0x270   : > { %v14836_v41 = vpop.permute.xlu1 %11205  ;;  %v2607_v1 = vpack.c.bf16 %v2582_v36, %v2581_v42  ;;  %v11499_v18 = vpack.i.bf16 %v3142_v51, %v3141_v55  ;;  %v2386_v61 = vsel %vm20095_vm4, %v2353_v24, %v11128_v7  ;;  %v9014_v47 = vld [vmem:[%s19766_s10] sm:$0xf]  ;;  %v11087_v42 = vunpack.i.l.bf16 %v14672_v39 }
 0x271   : > { %20123 = vst [vmem:[#allocation31_spill] sm:$0xff] %v14836_v41  ;;  %v14838_v9 = vpop.permute.xlu0 %11165  ;;  %v3144_v55 = vld [vmem:[#allocation3 + $0xa] sm:$0xff]  ;;  %10752 = vmatprep.subr.msk.bf16.mxu0 %vm9063_vm12, %v9014_v47  ;;  %v9065_v51 = vsel %vm9063_vm12, %v9014_v47, 0  ;;  %v11093_v39 = vunpack.i.h.bf16 %v14684_v16  ;;  %v3148_v47 = vld [vmem:[#allocation3 + $0x3a] sm:$0xff]  ;;  %v11097_v16 = vunpack.i.l.bf16 %v14706_v37  ;;  %v3158_v41 = vld [vmem:[#allocation3 + $0xb2] sm:$0xff] }
 0x272   : > { %10416 = vmatprep.mubr.msk.bf16.mxu1 %vm2644_vm11, %v2607_v1  ;;  %11490 = vrot.lane.b32.xlu1 %v14796_v11, %s13429_s19  ;;  %v3143_v1 = vld [vmem:[#allocation3 + $0x2] sm:$0xff] }
 0x273   : > { %11465 = vrot.lane.b32.xlu0 %v11484_v53, %s13434_s28  ;;  %v1039_v53 = vld [vmem:[#allocation2 + $0xa8] sm:$0xff]  ;;  %10517 = vmatpush3.bf16.msra.mxu0 %v9065_v51 }
 0x274   : > { %v14844_v25 = vpop.permute.xlu1 %11210  ;;  %v2352_v27 = vsel %vm20096_vm2, %v1039_v53, %v11122_v45  ;;  %v11479_v45 = vpack.i.bf16 %v3140_v17, %v3139_v28 }
 0x275   : > { %v14846_v40 = vpop.permute.xlu0 %11170 }
 0x276   : > { %11495 = vrot.lane.b32.xlu1 %v11459_v58, %s13431_s21 }
 0x277   : > { %11470 = vrot.lane.b32.xlu0 %v14796_v11, %s13435_s29  ;;  %v2385_v11 = vsel %vm20095_vm4, %v2352_v27, %v11127_v0  ;;  %v2419_v0 = vsel %vm2403_vm5, %v2386_v61, %v11088_v52  ;;  %v3153_v61 = vld [vmem:[#allocation3 + $0x7a] sm:$0xff]  ;;  %v11098_v52 = vunpack.i.h.bf16 %v14706_v37 }
 0x278   : > { %v14855_v6 = vpop.permute.xlu1 %11215  ;;  %v2418_v7 = vsel %vm2403_vm5, %v2385_v11, %v11087_v42  ;;  %v2452_v24 = vsel %vm2436_vm6, %v2419_v0, %v11093_v39 }
 0x279   : > { %v14857_v23 = vpop.permute.xlu0 %11190  ;;  %v2451_v27 = vsel %vm2436_vm6, %v2418_v7, %v11092_v8 }
 0x27a   : > { %11500 = vrot.lane.b32.xlu1 %v11499_v18, %s13428_s18  ;;  %v11504_v18 = vpack.i.bf16 %v3144_v55, %v3143_v1  ;;  %v3147_v1 = vld [vmem:[#allocation3 + $0x32] sm:$0xff]  ;;  %v2484_v55 = vsel %vm2469_vm7, %v2451_v27, %v11097_v16  ;;  %v3151_v27 = vld [vmem:[#allocation3 + $0x62] sm:$0xff] }
 0x27b   : > { %11475 = vrot.lane.b32.xlu0 %v11459_v58, %s13436_s30  ;;  %v3150_v58 = vld [vmem:[#allocation3 + $0x52] sm:$0xff]  ;;  %v11514_v7 = vpack.i.bf16 %v3148_v47, %v3147_v1  ;;  %v11083_v1 = vunpack.i.h.bf16 %v14730_v26 }
 0x27c   : > { %v11236_v36 = vpop.permute.xlu1 %11235  ;;  %v11519_v4 = vpack.i.bf16 %v3150_v58, %v3149_v2 }
 0x27d   : > { %v14872_v38 = vpop.permute.xlu0 %11195  ;;  %v11238_v28 = vunpack.i.h.bf16 %v11236_v36  ;;  %v11237_v17 = vunpack.i.l.bf16 %v11236_v36  ;;  %v2485_v36 = vsel %vm2469_vm7, %v2452_v24, %v11098_v52  ;;  %v3152_v24 = vld [vmem:[#allocation3 + $0x6a] sm:$0xff] }
 0x27e   : > { %11510 = vrot.lane.b32.xlu1 %v11509_v33, %s13430_s20  ;;  %v3154_v33 = vld [vmem:[#allocation3 + $0x82] sm:$0xff] }
 0x27f   : > { %11480 = vrot.lane.b32.xlu0 %v11479_v45, %s13428_s18  ;;  %v11529_v58 = vpack.i.bf16 %v3154_v33, %v3153_v61  ;;  %v2518_v0 = vsel %vm2502_vm8, %v2485_v36, %v11238_v28  ;;  %v2517_v39 = vsel %vm2502_vm8, %v2484_v55, %v11237_v17  ;;  %v11078_v28 = vunpack.i.h.bf16 %v14722_v22 }
 0x280   : > { %v11241_v53 = vpop.permute.xlu1 %11240  ;;  %v11077_v17 = vunpack.i.l.bf16 %v14722_v22  ;;  %v11082_v55 = vunpack.i.l.bf16 %v14730_v26  ;;  %v3165_v22 = vld [vmem:[#allocation3 + $0x10a] sm:$0xff] }
 0x281   : > { %v14882_v11 = vpop.permute.xlu0 %11200  ;;  %v11243_v42 = vunpack.i.h.bf16 %v11241_v53  ;;  %v11242_v51 = vunpack.i.l.bf16 %v11241_v53  ;;  %v3157_v53 = vld [vmem:[#allocation3 + $0xaa] sm:$0xff] }
 0x282   : > { %11520 = vrot.lane.b32.xlu1 %v11519_v4, %s13430_s20  ;;  %v11539_v52 = vpack.i.bf16 %v3158_v41, %v3157_v53  ;;  %v3166_v41 = vld [vmem:[#allocation3 + $0x112] sm:$0xff] }
 0x283   : > { %11505 = vrot.lane.b32.xlu0 %v11504_v18, %s13430_s20  ;;  %v2550_v4 = vsel %vm2535_vm9, %v2517_v39, %v11242_v51  ;;  %v2551_v18 = vsel %vm2535_vm9, %v2518_v0, %v11243_v42  ;;  %v3155_v51 = vld [vmem:[#allocation3 + $0x92] sm:$0xff]  ;;  %v3156_v42 = vld [vmem:[#allocation3 + $0x9a] sm:$0xff]  ;;  %v3162_v0 = vld [vmem:[#allocation3 + $0xe2] sm:$0xff]  ;;  %v11559_v5 = vpack.i.bf16 %v3166_v41, %v3165_v22 }
 0x284   : > { %v11246_v45 = vpop.permute.xlu1 %11245  ;;  %v3159_v39 = vld [vmem:[#allocation3 + $0xc2] sm:$0xff]  ;;  %v1041_v53 = vld [vmem:[#allocation2 + $0xc0] sm:$0xff]  ;;  %v3169_v22 = vld [vmem:[#allocation3 + $0x13a] sm:$0xff] }
 0x285   : > { %v11248_v8 = vunpack.i.h.bf16 %v11246_v45  ;;  %v11247_v37 = vunpack.i.l.bf16 %v11246_v45  ;;  %v11221_v2 = vpop.permute.xlu0 %11220  ;;  %v11524_v45 = vpack.i.bf16 %v3152_v24, %v3151_v27  ;;  %v2354_v27 = vsel %vm20096_vm2, %v1041_v53, %v11077_v17  ;;  %v3170_v41 = vld [vmem:[#allocation3 + $0x142] sm:$0xff]  ;;  %v3164_v53 = vld [vmem:[#allocation3 + $0xfa] sm:$0xff] }
 0x286   : > { %11530 = vrot.lane.b32.xlu1 %v11529_v58, %s13430_s20  ;;  %v3161_v58 = vld [vmem:[#allocation3 + $0xda] sm:$0xff]  ;;  %v11192_v17 = vunpack.i.l.bf16 %v14857_v23 }
 0x287   : > { %v2583_v61 = vsel %vm2568_vm10, %v2550_v4, %v11247_v37  ;;  %v2584_v33 = vsel %vm2568_vm10, %v2551_v18, %v11248_v8  ;;  %11515 = vrot.lane.b32.xlu0 %v11514_v7, %s13430_s20  ;;  %v11223_v7 = vunpack.i.h.bf16 %v11221_v2  ;;  %v11222_v8 = vunpack.i.l.bf16 %v11221_v2  ;;  %v3160_v37 = vld [vmem:[#allocation3 + $0xca] sm:$0xff]  ;;  %v1042_v4 = vld [vmem:[#allocation2 + $0xc8] sm:$0xff] }
 0x288   : > { %v14900_v47 = vpop.permute.xlu1 %11265  ;;  %v2608_v16 = vpack.c.bf16 %v2584_v33, %v2583_v61  ;;  %v2355_v26 = vsel %vm20096_vm2, %v1042_v4, %v11078_v28  ;;  %v11549_v2 = vpack.i.bf16 %v3162_v0, %v3161_v58  ;;  %v11534_v33 = vpack.i.bf16 %v3156_v42, %v3155_v51 }
 0x289   : > { %v11226_v36 = vpop.permute.xlu0 %11225  ;;  %v11544_v3 = vpack.i.bf16 %v3160_v37, %v3159_v39  ;;  %v11193_v28 = vunpack.i.h.bf16 %v14857_v23  ;;  %v11203_v39 = vunpack.i.h.bf16 %v14882_v11  ;;  %v11202_v23 = vunpack.i.l.bf16 %v14882_v11  ;;  %v3163_v37 = vld [vmem:[#allocation3 + $0xf2] sm:$0xff] }
 0x28a   : > { %11540 = vrot.lane.b32.xlu1 %v11539_v52, %s13430_s20  ;;  %10417 = vmatmul.mubr.msk.bf16.gmra.mrb[44].mxu1 %vm2644_vm11, %v2608_v16  ;;  %v11228_v18 = vunpack.i.h.bf16 %v11226_v36  ;;  %v11227_v61 = vunpack.i.l.bf16 %v11226_v36  ;;  %v2387_v52 = vsel %vm20095_vm4, %v2354_v27, %v11082_v55  ;;  %v2388_v16 = vsel %vm20095_vm4, %v2355_v26, %v11083_v1 }
 0x28b   : > { %11525 = vrot.lane.b32.xlu0 %v11524_v45, %s13430_s20  ;;  %v2420_v54 = vsel %vm2403_vm5, %v2387_v52, %v11222_v8  ;;  %v2421_v36 = vsel %vm2403_vm5, %v2388_v16, %v11223_v7  ;;  %v11198_v1 = vunpack.i.h.bf16 %v14872_v38  ;;  %v11197_v55 = vunpack.i.l.bf16 %v14872_v38  ;;  %v3167_v52 = vld [vmem:[#allocation3 + $0x122] sm:$0xff]  ;;  %v3168_v16 = vld [vmem:[#allocation3 + $0x12a] sm:$0xff] }
 0x28c   : > { %v14909_v24 = vpop.permute.xlu1 %11270  ;;  %v2453_v51 = vsel %vm2436_vm6, %v2420_v54, %v11227_v61  ;;  %v2454_v42 = vsel %vm2436_vm6, %v2421_v36, %v11228_v18  ;;  %v11569_v26 = vpack.i.bf16 %v3170_v41, %v3169_v22  ;;  %v3178_v36 = vld [vmem:[#allocation3 + $0x23] sm:$0xff]  ;;  %v3176_v41 = vld [vmem:[#allocation3 + $0xb] sm:$0xff] }
 0x28d   : > { %v11231_v59 = vpop.permute.xlu0 %11230  ;;  %v3175_v22 = vld [vmem:[#allocation3 + $0x3] sm:$0xff] }
 0x28e   : > { %v11233_v45 = vunpack.i.h.bf16 %v11231_v59  ;;  %v11232_v13 = vunpack.i.l.bf16 %v11231_v59  ;;  %11550 = vrot.lane.b32.xlu1 %v11549_v2, %s13430_s20  ;;  %v11554_v2 = vpack.i.bf16 %v3164_v53, %v3163_v37  ;;  %v3182_v53 = vld [vmem:[#allocation3 + $0x53] sm:$0xff] }
 0x28f   : > { %11535 = vrot.lane.b32.xlu0 %v11534_v33, %s13430_s20  ;;  %v3174_v33 = vld [vmem:[#allocation3 + $0x172] sm:$0xff] }
 0x290   : > { %v2486_v58 = vsel %vm2469_vm7, %v2453_v51, %v11232_v13  ;;  %v2487_v59 = vsel %vm2469_vm7, %v2454_v42, %v11233_v45  ;;  %v14925_v0 = vpop.permute.xlu1 %11275  ;;  %v11564_v51 = vpack.i.bf16 %v3168_v16, %v3167_v52  ;;  %v11213_v42 = vunpack.i.h.bf16 %v14844_v25  ;;  %v3179_v16 = vld [vmem:[#allocation3 + $0x33] sm:$0xff] }
 0x291   : > { %v2519_v54 = vsel %vm2502_vm8, %v2486_v58, %v11192_v17  ;;  %v2520_v7 = vsel %vm2502_vm8, %v2487_v59, %v11193_v28  ;;  %v14931_v8 = vpop.permute.xlu0 %11250  ;;  %v3171_v58 = vld [vmem:[#allocation3 + $0x152] sm:$0xff]  ;;  %v3172_v59 = vld [vmem:[#allocation3 + $0x15a] sm:$0xff] }
 0x292   : > { %20124 = vst [vmem:[#allocation32_spill] sm:$0xff] %v14931_v8  ;;  %11560 = vrot.lane.b32.xlu1 %v11559_v5, %s13430_s20  ;;  %v2552_v13 = vsel %vm2535_vm9, %v2519_v54, %v11197_v55  ;;  %v2553_v38 = vsel %vm2535_vm9, %v2520_v7, %v11198_v1  ;;  %v3173_v5 = vld [vmem:[#allocation3 + $0x16a] sm:$0xff]  ;;  %v11212_v1 = vunpack.i.l.bf16 %v14844_v25  ;;  %v11574_v25 = vpack.i.bf16 %v3172_v59, %v3171_v58 }
 0x293   : > { %11545 = vrot.lane.b32.xlu0 %v11544_v3, %s13430_s20  ;;  %v2585_v11 = vsel %vm2568_vm10, %v2552_v13, %v11202_v23  ;;  %v2586_v4 = vsel %vm2568_vm10, %v2553_v38, %v11203_v39  ;;  %v3177_v3 = vld [vmem:[#allocation3 + $0x1b] sm:$0xff]  ;;  %v11579_v28 = vpack.i.bf16 %v3174_v33, %v3173_v5  ;;  %v11218_v39 = vunpack.i.h.bf16 %v14855_v6  ;;  %v3181_v7 = vld [vmem:[#allocation3 + $0x4b] sm:$0xff] }
 0x294   : > { %v14939_v18 = vpop.permute.xlu1 %11295  ;;  %v2609_v61 = vpack.c.bf16 %v2586_v4, %v2585_v11  ;;  %v11589_v55 = vpack.i.bf16 %v3178_v36, %v3177_v3  ;;  %v11217_v23 = vunpack.i.l.bf16 %v14855_v6  ;;  %v1043_v13 = vld [vmem:[#allocation2 + $0xd8] sm:$0xff]  ;;  %v1044_v38 = vld [vmem:[#allocation2 + $0xe0] sm:$0xff]  ;;  %v11177_v5 = vunpack.i.l.bf16 %v14794_v50  ;;  %v3185_v36 = vld [vmem:[#allocation3 + $0x7b] sm:$0xff] }
 0x295   : > { %20125 = vst [vmem:[#allocation33_spill] sm:$0xff] %v14939_v18  ;;  %v14941_v27 = vpop.permute.xlu0 %11255  ;;  %v2356_v11 = vsel %vm20096_vm2, %v1043_v13, %v11212_v1  ;;  %v2357_v4 = vsel %vm20096_vm2, %v1044_v38, %v11213_v42  ;;  %v11599_v52 = vpack.i.bf16 %v3182_v53, %v3181_v7  ;;  %v11182_v58 = vunpack.i.l.bf16 %v14806_v56  ;;  %v3190_v53 = vld [vmem:[#allocation3 + $0xb3] sm:$0xff] }
 0x296   : > { %10420 = vmatprep.mubr.msk.bf16.mxu1 %vm2644_vm11, %v2609_v61  ;;  %11570 = vrot.lane.b32.xlu1 %v11569_v26, %s13430_s20  ;;  %v2389_v6 = vsel %vm20095_vm4, %v2356_v11, %v11217_v23  ;;  %v2390_v61 = vsel %vm20095_vm4, %v2357_v4, %v11218_v39  ;;  %v11584_v26 = vpack.i.bf16 %v3176_v41, %v3175_v22  ;;  %v3183_v23 = vld [vmem:[#allocation3 + $0x63] sm:$0xff]  ;;  %v3184_v11 = vld [vmem:[#allocation3 + $0x6b] sm:$0xff]  ;;  %v11188_v4 = vunpack.i.h.bf16 %v14823_v30 }
 0x297   : > { %11555 = vrot.lane.b32.xlu0 %v11554_v2, %s13430_s20  ;;  %v11178_v2 = vunpack.i.h.bf16 %v14794_v50  ;;  %v2422_v42 = vsel %vm2403_vm5, %v2389_v6, %v11177_v5 }
 0x298   : > { %v14946_v45 = vpop.permute.xlu1 %11300  ;;  %v2455_v7 = vsel %vm2436_vm6, %v2422_v42, %v11182_v58  ;;  %v3193_v42 = vld [vmem:[#allocation3 + $0xdb] sm:$0xff] }
 0x299   : > { %v14948_v17 = vpop.permute.xlu0 %11260  ;;  %v2423_v1 = vsel %vm2403_vm5, %v2390_v61, %v11178_v2 }
 0x29a   : > { %11580 = vrot.lane.b32.xlu1 %v11579_v28, %s13430_s20  ;;  %v3186_v28 = vld [vmem:[#allocation3 + $0x83] sm:$0xff] }
 0x29b   : > { %11565 = vrot.lane.b32.xlu0 %v11564_v51, %s13430_s20  ;;  %v3180_v51 = vld [vmem:[#allocation3 + $0x3b] sm:$0xff]  ;;  %v11609_v59 = vpack.i.bf16 %v3186_v28, %v3185_v36 }
 0x29c   : > { %v14956_v54 = vpop.permute.xlu1 %11305  ;;  %v11594_v39 = vpack.i.bf16 %v3180_v51, %v3179_v16 }
 0x29d   : > { %v14958_v37 = vpop.permute.xlu0 %11280 }
 0x29e   : > { %11590 = vrot.lane.b32.xlu1 %v11589_v55, %s13434_s28  ;;  %v11183_v55 = vunpack.i.h.bf16 %v14806_v56  ;;  %v11187_v56 = vunpack.i.l.bf16 %v14823_v30 }
 0x29f   : > { %11575 = vrot.lane.b32.xlu0 %v11574_v25, %s13430_s20  ;;  %v3189_v25 = vld [vmem:[#allocation3 + $0xab] sm:$0xff] }
 0x2a0   : > { %v11326_v33 = vpop.permute.xlu1 %11325  ;;  %v2456_v22 = vsel %vm2436_vm6, %v2423_v1, %v11183_v55  ;;  %v3194_v1 = vld [vmem:[#allocation3 + $0xe3] sm:$0xff] }
 0x2a1   : > { %v14968_v3 = vpop.permute.xlu0 %11285  ;;  %v11328_v41 = vunpack.i.h.bf16 %v11326_v33  ;;  %v11327_v13 = vunpack.i.l.bf16 %v11326_v33  ;;  %v2489_v2 = vsel %vm2469_vm7, %v2456_v22, %v11188_v4  ;;  %v11619_v33 = vpack.i.bf16 %v3190_v53, %v3189_v25  ;;  %v3191_v53 = vld [vmem:[#allocation3 + $0xc3] sm:$0xff] }
 0x2a2   : > { %11600 = vrot.lane.b32.xlu1 %v11599_v52, %s13434_s28  ;;  %v11604_v52 = vpack.i.bf16 %v3184_v11, %v3183_v23  ;;  %v11167_v22 = vunpack.i.l.bf16 %v14838_v9  ;;  %v3192_v11 = vld [vmem:[#allocation3 + $0xcb] sm:$0xff]  ;;  %v11173_v4 = vunpack.i.h.bf16 %v14846_v40 }
 0x2a3   : > { %11585 = vrot.lane.b32.xlu0 %v11584_v26, %s13434_s28  ;;  %v2488_v26 = vsel %vm2469_vm7, %v2455_v7, %v11187_v56  ;;  %v2522_v16 = vsel %vm2502_vm8, %v2489_v2, %v11328_v41  ;;  %v11168_v7 = vunpack.i.h.bf16 %v14838_v9  ;;  %v11172_v56 = vunpack.i.l.bf16 %v14846_v40  ;;  %v3198_v2 = vld [vmem:[#allocation3 + $0x113] sm:$0xff]  ;;  %v3201_v9 = vld [vmem:[#allocation3 + $0x13b] sm:$0xff] }
 0x2a4   : > { %v11331_v50 = vpop.permute.xlu1 %11330  ;;  %v2521_v36 = vsel %vm2502_vm8, %v2488_v26, %v11327_v13  ;;  %v11629_v13 = vpack.i.bf16 %v3194_v1, %v3193_v42  ;;  %v3197_v26 = vld [vmem:[#allocation3 + $0x10b] sm:$0xff] }
 0x2a5   : > { %v14978_v38 = vpop.permute.xlu0 %11290  ;;  %v11333_v6 = vunpack.i.h.bf16 %v11331_v50  ;;  %v11332_v61 = vunpack.i.l.bf16 %v11331_v50  ;;  %v3187_v50 = vld [vmem:[#allocation3 + $0x93] sm:$0xff] }
 0x2a6   : > { %11610 = vrot.lane.b32.xlu1 %v11609_v59, %s13434_s28  ;;  %v3188_v59 = vld [vmem:[#allocation3 + $0x9b] sm:$0xff] }
 0x2a7   : > { %11595 = vrot.lane.b32.xlu0 %v11594_v39, %s13434_s28  ;;  %v2554_v55 = vsel %vm2535_vm9, %v2521_v36, %v11332_v61  ;;  %v2555_v58 = vsel %vm2535_vm9, %v2522_v16, %v11333_v6  ;;  %v11614_v61 = vpack.i.bf16 %v3188_v59, %v3187_v50  ;;  %v3202_v16 = vld [vmem:[#allocation3 + $0x143] sm:$0xff]  ;;  %v3196_v36 = vld [vmem:[#allocation3 + $0xfb] sm:$0xff]  ;;  %v11624_v50 = vpack.i.bf16 %v3192_v11, %v3191_v53 }
 0x2a8   : > { %v11336_v5 = vpop.permute.xlu1 %11335 }
 0x2a9   : > { %v11338_v28 = vunpack.i.h.bf16 %v11336_v5  ;;  %v11337_v51 = vunpack.i.l.bf16 %v11336_v5  ;;  %v11311_v30 = vpop.permute.xlu0 %11310  ;;  %v3195_v5 = vld [vmem:[#allocation3 + $0xf3] sm:$0xff] }
 0x2aa   : > { %11620 = vrot.lane.b32.xlu1 %v11619_v33, %s13434_s28  ;;  %v11313_v33 = vunpack.i.h.bf16 %v11311_v30 }
 0x2ab   : > { %v2587_v39 = vsel %vm2568_vm10, %v2554_v55, %v11337_v51  ;;  %v2588_v23 = vsel %vm2568_vm10, %v2555_v58, %v11338_v28  ;;  %11605 = vrot.lane.b32.xlu0 %v11604_v52, %s13434_s28  ;;  %v11312_v52 = vunpack.i.l.bf16 %v11311_v30  ;;  %v1045_v28 = vld [vmem:[#allocation2 + $0xf0] sm:$0xff]  ;;  %v1046_v51 = vld [vmem:[#allocation2 + $0xf8] sm:$0xff]  ;;  %v11639_v30 = vpack.i.bf16 %v3198_v2, %v3197_v26 }
 0x2ac   : > { %v14996_v41 = vpop.permute.xlu1 %11355  ;;  %v2610_v25 = vpack.c.bf16 %v2588_v23, %v2587_v39  ;;  %v2359_v40 = vsel %vm20096_vm2, %v1046_v51, %v11168_v7  ;;  %v2358_v55 = vsel %vm20096_vm2, %v1045_v28, %v11167_v22  ;;  %v11283_v7 = vunpack.i.h.bf16 %v14958_v37  ;;  %v3199_v28 = vld [vmem:[#allocation3 + $0x123] sm:$0xff]  ;;  %v3200_v51 = vld [vmem:[#allocation3 + $0x12b] sm:$0xff] }
 0x2ad   : > { %v11316_v6 = vpop.permute.xlu0 %11315  ;;  %v2391_v59 = vsel %vm20095_vm4, %v2358_v55, %v11172_v56  ;;  %v2392_v39 = vsel %vm20095_vm4, %v2359_v40, %v11173_v4  ;;  %v11282_v22 = vunpack.i.l.bf16 %v14958_v37  ;;  %v11288_v4 = vunpack.i.h.bf16 %v14968_v3  ;;  %v3210_v40 = vld [vmem:[#allocation3 + $0x24] sm:$0xff] }
 0x2ae   : > { %11630 = vrot.lane.b32.xlu1 %v11629_v13, %s13434_s28  ;;  %10421 = vmatmul.mubr.msk.bf16.gmra.mrb[48].mxu1 %vm2644_vm11, %v2610_v25  ;;  %v11318_v42 = vunpack.i.h.bf16 %v11316_v6  ;;  %v11317_v1 = vunpack.i.l.bf16 %v11316_v6  ;;  %v11649_v13 = vpack.i.bf16 %v3202_v16, %v3201_v9  ;;  %v11634_v25 = vpack.i.bf16 %v3196_v36, %v3195_v5  ;;  %v3205_v16 = vld [vmem:[#allocation3 + $0x16b] sm:$0xff]  ;;  %v3206_v36 = vld [vmem:[#allocation3 + $0x173] sm:$0xff] }
 0x2af   : > { %11615 = vrot.lane.b32.xlu0 %v11614_v61, %s13434_s28  ;;  %v2424_v8 = vsel %vm2403_vm5, %v2391_v59, %v11312_v52  ;;  %v2425_v6 = vsel %vm2403_vm5, %v2392_v39, %v11313_v33  ;;  %v11287_v56 = vunpack.i.l.bf16 %v14968_v3  ;;  %v11293_v33 = vunpack.i.h.bf16 %v14978_v38 }
 0x2b0   : > { %v15005_v58 = vpop.permute.xlu1 %11360  ;;  %v2457_v53 = vsel %vm2436_vm6, %v2424_v8, %v11317_v1  ;;  %v2458_v11 = vsel %vm2436_vm6, %v2425_v6, %v11318_v42  ;;  %v11292_v37 = vunpack.i.l.bf16 %v14978_v38  ;;  %v3209_v1 = vld [vmem:[#allocation3 + $0x1c] sm:$0xff]  ;;  %v11644_v39 = vpack.i.bf16 %v3200_v51, %v3199_v28  ;;  %v3203_v6 = vld [vmem:[#allocation3 + $0x153] sm:$0xff] }
 0x2b1   : > { %v11321_v23 = vpop.permute.xlu0 %11320 }
 0x2b2   : > { %v11323_v61 = vunpack.i.h.bf16 %v11321_v23  ;;  %v11322_v18 = vunpack.i.l.bf16 %v11321_v23  ;;  %11640 = vrot.lane.b32.xlu1 %v11639_v30, %s13434_s28  ;;  %v11303_v23 = vunpack.i.h.bf16 %v14946_v45 }
 0x2b3   : > { %11625 = vrot.lane.b32.xlu0 %v11624_v50, %s13434_s28  ;;  %v11659_v50 = vpack.i.bf16 %v3206_v36, %v3205_v16 }
 0x2b4   : > { %v2490_v26 = vsel %vm2469_vm7, %v2457_v53, %v11322_v18  ;;  %v2491_v2 = vsel %vm2469_vm7, %v2458_v11, %v11323_v61  ;;  %v15021_v5 = vpop.permute.xlu1 %11365  ;;  %v3204_v61 = vld [vmem:[#allocation3 + $0x15b] sm:$0xff]  ;;  %v3213_v11 = vld [vmem:[#allocation3 + $0x4c] sm:$0xff] }
 0x2b5   : > { %v2523_v8 = vsel %vm2502_vm8, %v2490_v26, %v11282_v22  ;;  %v2524_v52 = vsel %vm2502_vm8, %v2491_v2, %v11283_v7  ;;  %v15027_v9 = vpop.permute.xlu0 %11340  ;;  %v11308_v7 = vunpack.i.h.bf16 %v14956_v54  ;;  %v11307_v22 = vunpack.i.l.bf16 %v14956_v54  ;;  %v1047_v26 = vld [vmem:[#allocation2 + $0x108] sm:$0xff] }
 0x2b6   : > { %20126 = vst [vmem:[#allocation34_spill] sm:$0xff] %v15027_v9  ;;  %11650 = vrot.lane.b32.xlu1 %v11649_v13, %s13434_s28  ;;  %v2556_v18 = vsel %vm2535_vm9, %v2523_v8, %v11287_v56  ;;  %v2557_v3 = vsel %vm2535_vm9, %v2524_v52, %v11288_v4  ;;  %v11302_v13 = vunpack.i.l.bf16 %v14946_v45  ;;  %v3207_v4 = vld [vmem:[#allocation3 + $0x4] sm:$0xff]  ;;  %v3208_v56 = vld [vmem:[#allocation3 + $0xc] sm:$0xff] }
 0x2b7   : > { %11635 = vrot.lane.b32.xlu0 %v11634_v25, %s13434_s28  ;;  %v2589_v38 = vsel %vm2568_vm10, %v2556_v18, %v11292_v37  ;;  %v2590_v42 = vsel %vm2568_vm10, %v2557_v3, %v11293_v33  ;;  %v11669_v25 = vpack.i.bf16 %v3210_v40, %v3209_v1  ;;  %v1048_v45 = vld [vmem:[#allocation2 + $0x110] sm:$0xff]  ;;  %v11654_v33 = vpack.i.bf16 %v3204_v61, %v3203_v6  ;;  %v3214_v37 = vld [vmem:[#allocation3 + $0x54] sm:$0xff] }
 0x2b8   : > { %v15035_v55 = vpop.permute.xlu1 %11385  ;;  %v2611_v30 = vpack.c.bf16 %v2590_v42, %v2589_v38  ;;  %v2360_v8 = vsel %vm20096_vm2, %v1047_v26, %v11302_v13  ;;  %v2361_v52 = vsel %vm20096_vm2, %v1048_v45, %v11303_v23  ;;  %v11664_v36 = vpack.i.bf16 %v3208_v56, %v3207_v4  ;;  %v3211_v38 = vld [vmem:[#allocation3 + $0x34] sm:$0xff]  ;;  %v3217_v1 = vld [vmem:[#allocation3 + $0x7c] sm:$0xff]  ;;  %v3218_v40 = vld [vmem:[#allocation3 + $0x84] sm:$0xff] }
 0x2b9   : > { %v15037_v59 = vpop.permute.xlu0 %11345  ;;  %v2393_v54 = vsel %vm20095_vm4, %v2360_v8, %v11307_v22  ;;  %v2394_v16 = vsel %vm20095_vm4, %v2361_v52, %v11308_v7  ;;  %v11268_v18 = vunpack.i.h.bf16 %v14900_v47  ;;  %v11267_v3 = vunpack.i.l.bf16 %v14900_v47  ;;  %v3215_v61 = vld [vmem:[#allocation3 + $0x64] sm:$0xff]  ;;  %v3221_v26 = vld [vmem:[#allocation3 + $0xac] sm:$0xff]  ;;  %v3222_v45 = vld [vmem:[#allocation3 + $0xb4] sm:$0xff] }
 0x2ba   : > { %10424 = vmatprep.mubr.msk.bf16.mxu1 %vm2644_vm11, %v2611_v30  ;;  %11660 = vrot.lane.b32.xlu1 %v11659_v50, %s13434_s28  ;;  %v11679_v51 = vpack.i.bf16 %v3214_v37, %v3213_v11  ;;  %v3212_v30 = vld [vmem:[#allocation3 + $0x3c] sm:$0xff]  ;;  %v11273_v23 = vunpack.i.h.bf16 %v14909_v24  ;;  %v11272_v13 = vunpack.i.l.bf16 %v14909_v24  ;;  %v11278_v37 = vunpack.i.h.bf16 %v14925_v0  ;;  %v13389_v9 = vld [vmem:[#allocation2 + $0x140] sm:$0xff] }
 0x2bb   : > { %11645 = vrot.lane.b32.xlu0 %v11644_v39, %s13434_s28  ;;  %v2426_v50 = vsel %vm2403_vm5, %v2393_v54, %v11267_v3  ;;  %v2427_v39 = vsel %vm2403_vm5, %v2394_v16, %v11268_v18  ;;  %v11674_v6 = vpack.i.bf16 %v3212_v30, %v3211_v38  ;;  %v11277_v24 = vunpack.i.l.bf16 %v14925_v0  ;;  %v3226_v30 = vld [vmem:[#allocation3 + $0xe4] sm:$0xff] }
 0x2bc   : > { %v15046_v53 = vpop.permute.xlu1 %11390  ;;  %v2459_v7 = vsel %vm2436_vm6, %v2426_v50, %v11272_v13  ;;  %v2460_v22 = vsel %vm2436_vm6, %v2427_v39, %v11273_v23  ;;  %v11699_v18 = vpack.i.bf16 %v3222_v45, %v3221_v26  ;;  %v3219_v23 = vld [vmem:[#allocation3 + $0x94] sm:$0xff]  ;;  %v3220_v13 = vld [vmem:[#allocation3 + $0x9c] sm:$0xff]  ;;  %v3223_v45 = vld [vmem:[#allocation3 + $0xc4] sm:$0xff] }
 0x2bd   : > { %v15048_v2 = vpop.permute.xlu0 %11350  ;;  %v2492_v54 = vsel %vm2469_vm7, %v2459_v7, %v11277_v24  ;;  %v2493_v16 = vsel %vm2469_vm7, %v2460_v22, %v11278_v37  ;;  %v3230_v26 = vld [vmem:[#allocation3 + $0x114] sm:$0xff]  ;;  %v3228_v24 = vld [vmem:[#allocation3 + $0xfc] sm:$0xff] }
 0x2be   : > { %11670 = vrot.lane.b32.xlu1 %v11669_v25, %s13435_s29  ;;  %v11689_v25 = vpack.i.bf16 %v3218_v40, %v3217_v1  ;;  %v3225_v40 = vld [vmem:[#allocation3 + $0xdc] sm:$0xff]  ;;  %v3227_v37 = vld [vmem:[#allocation3 + $0xf4] sm:$0xff] }
 0x2bf   : > { %11655 = vrot.lane.b32.xlu0 %v11654_v33, %s13434_s28  ;;  %v3216_v33 = vld [vmem:[#allocation3 + $0x6c] sm:$0xff] }
 0x2c0   : > { %v11411_v28 = vpop.permute.xlu1 %11410  ;;  %v11684_v3 = vpack.i.bf16 %v3216_v33, %v3215_v61  ;;  %v11709_v61 = vpack.i.bf16 %v3226_v30, %v3225_v40  ;;  %v3224_v33 = vld [vmem:[#allocation3 + $0xcc] sm:$0xff] }
 0x2c1   : > { %v15058_v42 = vpop.permute.xlu0 %11370  ;;  %v11413_v11 = vunpack.i.h.bf16 %v11411_v28  ;;  %v11412_v4 = vunpack.i.l.bf16 %v11411_v28  ;;  %v11704_v40 = vpack.i.bf16 %v3224_v33, %v3223_v45  ;;  %v3237_v30 = vld [vmem:[#allocation3 + $0x16c] sm:$0xff] }
 0x2c2   : > { %11680 = vrot.lane.b32.xlu1 %v11679_v51, %s13435_s29 }
 0x2c3   : > { %11665 = vrot.lane.b32.xlu0 %v11664_v36, %s13435_s29  ;;  %v2526_v28 = vsel %vm2502_vm8, %v2493_v16, %v11413_v11  ;;  %v2525_v51 = vsel %vm2502_vm8, %v2492_v54, %v11412_v4  ;;  %v11694_v11 = vpack.i.bf16 %v3220_v13, %v3219_v23  ;;  %v3229_v4 = vld [vmem:[#allocation3 + $0x10c] sm:$0xff] }
 0x2c4   : > { %v11416_v47 = vpop.permute.xlu1 %11415  ;;  %v11719_v16 = vpack.i.bf16 %v3230_v26, %v3229_v4  ;;  %v11714_v4 = vpack.i.bf16 %v3228_v24, %v3227_v37 }
 0x2c5   : > { %v15068_v56 = vpop.permute.xlu0 %11375  ;;  %v11418_v8 = vunpack.i.h.bf16 %v11416_v47  ;;  %v11417_v52 = vunpack.i.l.bf16 %v11416_v47 }
 0x2c6   : > { %11690 = vrot.lane.b32.xlu1 %v11689_v25, %s13435_s29 }
 0x2c7   : > { %11675 = vrot.lane.b32.xlu0 %v11674_v6, %s13435_s29  ;;  %v2558_v50 = vsel %vm2535_vm9, %v2525_v51, %v11417_v52  ;;  %v2559_v39 = vsel %vm2535_vm9, %v2526_v28, %v11418_v8  ;;  %v11258_v8 = vunpack.i.h.bf16 %v14941_v27  ;;  %v11257_v52 = vunpack.i.l.bf16 %v14941_v27 }
 0x2c8   : > { %v11421_v36 = vpop.permute.xlu1 %11420  ;;  %v11263_v51 = vunpack.i.h.bf16 %v14948_v17  ;;  %v11388_v27 = vunpack.i.h.bf16 %v15035_v55 }
 0x2c9   : > { %v11423_v38 = vunpack.i.h.bf16 %v11421_v36  ;;  %v11422_v1 = vunpack.i.l.bf16 %v11421_v36  ;;  %v15078_v0 = vpop.permute.xlu0 %11380  ;;  %v3233_v36 = vld [vmem:[#allocation3 + $0x13c] sm:$0xff] }
 0x2ca   : > { %11700 = vrot.lane.b32.xlu1 %v11699_v18, %s13435_s29  ;;  %v3234_v18 = vld [vmem:[#allocation3 + $0x144] sm:$0xff]  ;;  %v2365_v12 = vsel %vm20096_vm2, %v13389_v9, %v11388_v27  ;;  %v11358_v9 = vunpack.i.h.bf16 %v14996_v41  ;;  %v11357_v27 = vunpack.i.l.bf16 %v14996_v41 }
 0x2cb   : > { %v2591_v47 = vsel %vm2568_vm10, %v2558_v50, %v11422_v1  ;;  %v2592_v25 = vsel %vm2568_vm10, %v2559_v39, %v11423_v38  ;;  %11685 = vrot.lane.b32.xlu0 %v11684_v3, %s13435_s29  ;;  %v15095_v3 = vld [vmem:[#allocation3 + $0x124] sm:$0xff]  ;;  %v11262_v38 = vunpack.i.l.bf16 %v14948_v17  ;;  %v3238_v50 = vld [vmem:[#allocation3 + $0x174] sm:$0xff]  ;;  %v3232_v39 = vld [vmem:[#allocation3 + $0x12c] sm:$0xff]  ;;  %v11729_v17 = vpack.i.bf16 %v3234_v18, %v3233_v36 }
 0x2cc   : > { %v15086_v6 = vpop.permute.xlu1 %11425  ;;  %v2612_v7 = vpack.c.bf16 %v2592_v25, %v2591_v47  ;;  %v1049_v25 = vld [vmem:[#allocation2 + $0x120] sm:$0xff]  ;;  %v11739_v28 = vpack.i.bf16 %v3238_v50, %v3237_v30  ;;  %v11724_v23 = vpack.i.bf16 %v3232_v39, %v15095_v3  ;;  %v11373_v36 = vunpack.i.h.bf16 %v15058_v42 }
 0x2cd   : > { %v11396_v22 = vpop.permute.xlu0 %11395  ;;  %v2362_v45 = vsel %vm20096_vm2, %v1049_v25, %v11257_v52  ;;  %v11372_v18 = vunpack.i.l.bf16 %v15058_v42  ;;  %v15129_v42 = vld [vmem:[#allocation3 + $0x50] sm:$0xff]  ;;  %v15131_v25 = vld [vmem:[#allocation3 + $0x78] sm:$0xff] }
 0x2ce   : > { %11710 = vrot.lane.b32.xlu1 %v11709_v61, %s13435_s29  ;;  %10425 = vmatmul.mubr.msk.bf16.gmra.mrb[52].mxu1 %vm2644_vm11, %v2612_v7  ;;  %v11398_v13 = vunpack.i.h.bf16 %v11396_v22  ;;  %v11397_v47 = vunpack.i.l.bf16 %v11396_v22  ;;  %v1050_v61 = vld [vmem:[#allocation2 + $0x128] sm:$0xff]  ;;  %v2395_v22 = vsel %vm20095_vm4, %v2362_v45, %v11262_v38  ;;  %v11377_v38 = vunpack.i.l.bf16 %v15068_v56  ;;  %v15139_v45 = vld [vmem:[#allocation3 + $0x80] sm:$0xff] }
 0x2cf   : > { %11695 = vrot.lane.b32.xlu0 %v11694_v11, %s13435_s29  ;;  %v2363_v26 = vsel %vm20096_vm2, %v1050_v61, %v11258_v8  ;;  %v11383_v61 = vunpack.i.h.bf16 %v15078_v0 }
 0x2d0   : > { %v15093_v54 = vpop.permute.xlu1 %11430  ;;  %v2428_v37 = vsel %vm2403_vm5, %v2395_v22, %v11397_v47  ;;  %v15127_v47 = vld [vmem:[#allocation3 + $0x48] sm:$0xff]  ;;  %v11393_v22 = vunpack.i.h.bf16 %v15046_v53 }
 0x2d1   : > { %v11401_v1 = vpop.permute.xlu0 %11400 }
 0x2d2   : > { %11720 = vrot.lane.b32.xlu1 %v11719_v16, %s13435_s29  ;;  %v11403_v7 = vunpack.i.h.bf16 %v11401_v1  ;;  %v11402_v11 = vunpack.i.l.bf16 %v11401_v1  ;;  %v2396_v16 = vsel %vm20095_vm4, %v2363_v26, %v11263_v51  ;;  %v11387_v1 = vunpack.i.l.bf16 %v15035_v55  ;;  %v3236_v26 = vld [vmem:[#allocation3 + $0x15c] sm:$0xff] }
 0x2d3   : > { %11705 = vrot.lane.b32.xlu0 %v11704_v40, %s13435_s29  ;;  %v2429_v24 = vsel %vm2403_vm5, %v2396_v16, %v11398_v13  ;;  %v11378_v55 = vunpack.i.h.bf16 %v15068_v56  ;;  %v3243_v13 = vld [vmem:[#allocation3 + $0x38] sm:$0xff]  ;;  %v11392_v16 = vunpack.i.l.bf16 %v15046_v53 }
 0x2d4   : > { %v15106_v33 = vpop.permute.xlu1 %11435  ;;  %v2461_v3 = vsel %vm2436_vm6, %v2428_v37, %v11402_v11  ;;  %v2462_v51 = vsel %vm2436_vm6, %v2429_v24, %v11403_v7  ;;  %v11382_v7 = vunpack.i.l.bf16 %v15078_v0  ;;  %v3242_v37 = vld [vmem:[#allocation3 + $0x30] sm:$0xff]  ;;  %v3246_v24 = vld [vmem:[#allocation3 + $0x60] sm:$0xff]  ;;  %v15152_v53 = vld [vmem:[#allocation3 + $0x98] sm:$0xff] }
 0x2d5   : > { %v11406_v40 = vpop.permute.xlu0 %11405 }
 0x2d6   : > { %v11408_v8 = vunpack.i.h.bf16 %v11406_v40  ;;  %v11407_v52 = vunpack.i.l.bf16 %v11406_v40  ;;  %11730 = vrot.lane.b32.xlu1 %v11729_v17, %s13435_s29 }
 0x2d7   : > { %11715 = vrot.lane.b32.xlu0 %v11714_v4, %s13435_s29  ;;  %v3235_v4 = vld [vmem:[#allocation3 + $0x154] sm:$0xff] }
 0x2d8   : > { %v2494_v30 = vsel %vm2469_vm7, %v2461_v3, %v11407_v52  ;;  %v2495_v50 = vsel %vm2469_vm7, %v2462_v51, %v11408_v8  ;;  %v15125_v39 = vpop.permute.xlu1 %11455  ;;  %v3247_v8 = vld [vmem:[#allocation3 + $0x68] sm:$0xff]  ;;  %v15150_v3 = vld [vmem:[#allocation3 + $0x90] sm:$0xff] }
 0x2d9   : > { %v2527_v11 = vsel %vm2502_vm8, %v2494_v30, %v11372_v18  ;;  %v2528_v56 = vsel %vm2502_vm8, %v2495_v50, %v11373_v36  ;;  %v15137_v17 = vpop.permute.xlu0 %11440  ;;  %v15156_v51 = vld [vmem:[#allocation3 + $0xa8] sm:$0xff]  ;;  %v11749_v50 = vpack.i.bf16 %v3243_v13, %v3242_v37  ;;  %v11458_v13 = vunpack.i.h.bf16 %v15125_v39 }
 0x2da   : > { %11740 = vrot.lane.b32.xlu1 %v11739_v28, %s13435_s29  ;;  %v2560_v40 = vsel %vm2535_vm9, %v2527_v11, %v11377_v38  ;;  %v2561_v0 = vsel %vm2535_vm9, %v2528_v56, %v11378_v55  ;;  %v15158_v55 = vld [vmem:[#allocation3 + $0xb0] sm:$0xff]  ;;  %v11734_v11 = vpack.i.bf16 %v3236_v26, %v3235_v4  ;;  %v3241_v56 = vld [vmem:[#allocation3 + $0x20] sm:$0xff]  ;;  %v13388_v52 = vld [vmem:[#allocation2 + $0x138] sm:$0xff]  ;;  %v11457_v4 = vunpack.i.l.bf16 %v15125_v39 }
 0x2db   : > { %11725 = vrot.lane.b32.xlu0 %v11724_v23, %s13435_s29  ;;  %v2593_v36 = vsel %vm2568_vm10, %v2560_v40, %v11382_v7  ;;  %v2594_v18 = vsel %vm2568_vm10, %v2561_v0, %v11383_v61  ;;  %v3240_v23 = vld [vmem:[#allocation3 + $0x18] sm:$0xff]  ;;  %v15160_v7 = vld [vmem:[#allocation3 + $0xc0] sm:$0xff]  ;;  %v15164_v40 = vld [vmem:[#allocation3 + $0xf0] sm:$0xff]  ;;  %v2364_v28 = vsel %vm20096_vm2, %v13388_v52, %v11387_v1  ;;  %v11759_v1 = vpack.i.bf16 %v3247_v8, %v3246_v24 }
 0x2dc   : > { %v11461_v38 = vpop.permute.xlu1 %11460  ;;  %v2613_v30 = vpack.c.bf16 %v2594_v18, %v2593_v36  ;;  %v15166_v0 = vld [vmem:[#allocation3 + $0xf8] sm:$0xff]  ;;  %v15174_v37 = vld [vmem:[#allocation3 + $0xc8] sm:$0xff]  ;;  %v2397_v36 = vsel %vm20095_vm4, %v2364_v28, %v11392_v16  ;;  %v2398_v18 = vsel %vm20095_vm4, %v2365_v12, %v11393_v22  ;;  %v11744_v39 = vpack.i.bf16 %v3241_v56, %v3240_v23  ;;  %v13391_v8 = vld [vmem:[#allocation2 + $0x170] sm:$0xff] }
 0x2dd   : > { %v15172_v26 = vpop.permute.xlu0 %11445  ;;  %v11463_v61 = vunpack.i.h.bf16 %v11461_v38  ;;  %v11462_v14 = vunpack.i.l.bf16 %v11461_v38  ;;  %v11769_v16 = vpack.i.bf16 %v15152_v53, %v15150_v3  ;;  %v11779_v12 = vpack.i.bf16 %v15174_v37, %v15160_v7 }
 0x2de   : > { %10428 = vmatprep.mubr.msk.bf16.mxu1 %vm2644_vm11, %v2613_v30  ;;  %11750 = vrot.lane.b32.xlu1 %v11749_v50, %s13436_s30  ;;  %v11789_v22 = vpack.i.bf16 %v15166_v0, %v15164_v40  ;;  %v11774_v28 = vpack.i.bf16 %v15158_v55, %v15156_v51  ;;  %v2430_v38 = vsel %vm2403_vm5, %v2397_v36, %v11357_v27  ;;  %v13390_v30 = vld [vmem:[#allocation2 + $0x168] sm:$0xff]  ;;  %v11363_v53 = vunpack.i.h.bf16 %v15005_v58  ;;  %v15265_v40 = vld [vmem:[%s19760_s4] ss:$0 sm:$0xff] }
 0x2df   : > { %11735 = vrot.lane.b32.xlu0 %v11734_v11, %s13435_s29  ;;  %v2431_v41 = vsel %vm2403_vm5, %v2398_v18, %v11358_v9  ;;  %v2368_v24 = vsel %vm20096_vm2, %v13390_v30, %v11457_v4  ;;  %v2369_v50 = vsel %vm20096_vm2, %v13391_v8, %v11458_v13  ;;  %v11362_v11 = vunpack.i.l.bf16 %v15005_v58 }
 0x2e0   : > { %v11486_v52 = vpop.permute.xlu1 %11485  ;;  %v2401_v23 = vsel %vm20095_vm4, %v2368_v24, %v11462_v14  ;;  %v2402_v56 = vsel %vm20095_vm4, %v2369_v50, %v11463_v61  ;;  %v11368_v7 = vunpack.i.h.bf16 %v15021_v5  ;;  %v11367_v37 = vunpack.i.l.bf16 %v15021_v5 }
 0x2e1   : > { %v15195_v3 = vpop.permute.xlu0 %11450  ;;  %v11428_v4 = vunpack.i.h.bf16 %v15086_v6  ;;  %v11427_v13 = vunpack.i.l.bf16 %v15086_v6  ;;  %v11348_v36 = vunpack.i.h.bf16 %v15037_v59  ;;  %v11347_v58 = vunpack.i.l.bf16 %v15037_v59 }
 0x2e2   : > { %11760 = vrot.lane.b32.xlu1 %v11759_v1, %s13436_s30  ;;  %v2463_v14 = vsel %vm2436_vm6, %v2430_v38, %v11362_v11  ;;  %v2464_v61 = vsel %vm2436_vm6, %v2431_v41, %v11363_v53  ;;  %v11488_v5 = vunpack.i.h.bf16 %v11486_v52  ;;  %v11487_v1 = vunpack.i.l.bf16 %v11486_v52 }
 0x2e3   : > { %11745 = vrot.lane.b32.xlu0 %v11744_v39, %s13436_s30  ;;  %v2434_v9 = vsel %vm2403_vm5, %v2401_v23, %v11427_v13  ;;  %v2435_v27 = vsel %vm2403_vm5, %v2402_v56, %v11428_v4  ;;  %v11433_v6 = vunpack.i.h.bf16 %v15093_v54  ;;  %v11432_v39 = vunpack.i.l.bf16 %v15093_v54 }
 0x2e4   : > { %v11491_v18 = vpop.permute.xlu1 %11490  ;;  %v11353_v59 = vunpack.i.h.bf16 %v15048_v2  ;;  %v11352_v38 = vunpack.i.l.bf16 %v15048_v2  ;;  %v2496_v41 = vsel %vm2469_vm7, %v2463_v14, %v11367_v37  ;;  %v2497_v50 = vsel %vm2469_vm7, %v2464_v61, %v11368_v7  ;;  %v1054_v61 = vld [vmem:[#allocation2 + $0x158] sm:$0xff] }
 0x2e5   : > { %v11466_v30 = vpop.permute.xlu0 %11465  ;;  %v11493_v24 = vunpack.i.h.bf16 %v11491_v18  ;;  %v11492_v8 = vunpack.i.l.bf16 %v11491_v18  ;;  %v20127_v52 = vpack.i.bf16 %v15129_v42, %v15127_v47  ;;  %v11438_v53 = vunpack.i.h.bf16 %v15106_v33 }
 0x2e6   : > { %11770 = vrot.lane.b32.xlu1 %v11769_v16, %s13436_s30  ;;  %v11437_v54 = vunpack.i.l.bf16 %v15106_v33  ;;  %v2467_v11 = vsel %vm2436_vm6, %v2434_v9, %v11432_v39  ;;  %v2468_v16 = vsel %vm2436_vm6, %v2435_v27, %v11433_v6  ;;  %v2530_v2 = vsel %vm2502_vm8, %v2497_v50, %v11488_v5  ;;  %v1053_v33 = vld [vmem:[#allocation2 + $0x150] sm:$0xff] }
 0x2e7   : > { %11755 = vrot.lane.b32.xlu0 %v20127_v52, %s13436_s30  ;;  %v2529_v56 = vsel %vm2502_vm8, %v2496_v41, %v11487_v1  ;;  %v2563_v47 = vsel %vm2535_vm9, %v2530_v2, %v11493_v24  ;;  %v11468_v42 = vunpack.i.h.bf16 %v11466_v30  ;;  %v11467_v14 = vunpack.i.l.bf16 %v11466_v30  ;;  %v3104_v41 = vld [vmem:[#allocation3 + $0x128] sm:$0xff] }
 0x2e8   : > { %v11496_v23 = vpop.permute.xlu1 %11495  ;;  %v2562_v13 = vsel %vm2535_vm9, %v2529_v56, %v11492_v8  ;;  %v20128_v1 = vpack.i.bf16 %v15139_v45, %v15131_v25  ;;  %v2367_v6 = vsel %vm20096_vm2, %v1054_v61, %v11348_v36  ;;  %v2366_v39 = vsel %vm20096_vm2, %v1053_v33, %v11347_v58  ;;  %v3103_v8 = vld [vmem:[#allocation3 + $0x120] sm:$0xff] }
 0x2e9   : > { %v11498_v37 = vunpack.i.h.bf16 %v11496_v23  ;;  %v11497_v7 = vunpack.i.l.bf16 %v11496_v23  ;;  %v11471_v4 = vpop.permute.xlu0 %11470  ;;  %v2500_v30 = vsel %vm2469_vm7, %v2467_v11, %v11437_v54  ;;  %v2399_v50 = vsel %vm20095_vm4, %v2366_v39, %v11352_v38  ;;  %v3256_v38 = vld [vmem:[#allocation3 + $0xd8] sm:$0xff] }
 0x2ea   : > { %11780 = vrot.lane.b32.xlu1 %v11779_v12, %s13436_s30  ;;  %v11473_v27 = vunpack.i.h.bf16 %v11471_v4  ;;  %v11472_v5 = vunpack.i.l.bf16 %v11471_v4  ;;  %v2400_v52 = vsel %vm20095_vm4, %v2367_v6, %v11353_v59  ;;  %v11443_v23 = vunpack.i.h.bf16 %v15137_v17  ;;  %v3257_v59 = vld [vmem:[#allocation3 + $0xe0] sm:$0xff] }
 0x2eb   : > { %v2595_v18 = vsel %vm2568_vm10, %v2562_v13, %v11497_v7  ;;  %v2596_v9 = vsel %vm2568_vm10, %v2563_v47, %v11498_v37  ;;  %11765 = vrot.lane.b32.xlu0 %v20128_v1, %s13436_s30  ;;  %v2501_v25 = vsel %vm2469_vm7, %v2468_v16, %v11438_v53  ;;  %v2432_v36 = vsel %vm2403_vm5, %v2399_v50, %v11467_v14  ;;  %v3107_v47 = vld [vmem:[#allocation3 + $0x150] sm:$0xff] }
 0x2ec   : > { %v15242_v12 = vpop.permute.xlu1 %11500  ;;  %v2614_v24 = vpack.c.bf16 %v2596_v9, %v2595_v18  ;;  %v2433_v58 = vsel %vm2403_vm5, %v2400_v52, %v11468_v42  ;;  %v11442_v11 = vunpack.i.l.bf16 %v15137_v17  ;;  %v2465_v53 = vsel %vm2436_vm6, %v2432_v36, %v11472_v5  ;;  %v3108_v42 = vld [vmem:[#allocation3 + $0x158] sm:$0xff]  ;;  %v3260_v5 = vld [vmem:[#allocation3 + $0x108] sm:$0xff]  ;;  %v3261_v1 = vld [vmem:[#allocation3 + $0x110] sm:$0xff] }
 0x2ed   : > { %v11476_v45 = vpop.permute.xlu0 %11475  ;;  %v2466_v16 = vsel %vm2436_vm6, %v2433_v58, %v11473_v27  ;;  %v20129_v0 = vunpack.i.l.bf16 %v14172_v10  ;;  %v11799_v7 = vpack.i.bf16 %v3104_v41, %v3103_v8  ;;  %v20131_v4 = vunpack.i.h.bf16 %v14172_v10 }
 0x2ee   : > { %v11478_v2 = vunpack.i.h.bf16 %v11476_v45  ;;  %v11477_v54 = vunpack.i.l.bf16 %v11476_v45  ;;  %11790 = vrot.lane.b32.xlu1 %v11789_v22, %s13436_s30  ;;  %10429 = vmatmul.mubr.msk.bf16.gmra.mrb[56].mxu1 %vm2644_vm11, %v2614_v24  ;;  %v11447_v55 = vunpack.i.l.bf16 %v15172_v26  ;;  %v11784_v61 = vpack.i.bf16 %v3257_v59, %v3256_v38  ;;  %v3270_v59 = vld [vmem:[#allocation3 + $0x180] sm:$0xff] }
 0x2ef   : > { %11775 = vrot.lane.b32.xlu0 %v11774_v28, %s13436_s30  ;;  %v2533_v22 = vsel %vm2502_vm8, %v2500_v30, %v20129_v0  ;;  %v2534_v51 = vsel %vm2502_vm8, %v2501_v25, %v20131_v4  ;;  %v10808_v18 = vunpack.i.h.bf16 %v14190_v44  ;;  %v11448_v9 = vunpack.i.h.bf16 %v15172_v26 }
 0x2f0   : > { %v2498_v17 = vsel %vm2469_vm7, %v2465_v53, %v11477_v54  ;;  %v2499_v56 = vsel %vm2469_vm7, %v2466_v16, %v11478_v2  ;;  %v15272_v37 = vpop.permute.xlu1 %11510  ;;  %v20132_v6 = vunpack.i.l.bf16 %v14182_v31  ;;  %v10807_v30 = vunpack.i.l.bf16 %v14190_v44 }
 0x2f1   : > { %20130 = vst [vmem:[#allocation35_spill] sm:$0xff] %v15272_v37  ;;  %v2531_v28 = vsel %vm2502_vm8, %v2498_v17, %v11442_v11  ;;  %v2532_v13 = vsel %vm2502_vm8, %v2499_v56, %v11443_v23  ;;  %v15280_v14 = vpop.permute.xlu0 %11480  ;;  %v10406_v33 = vpop.f32.mrb[32].mxu1  ;;  %v20133_v41 = vunpack.i.h.bf16 %v14182_v31  ;;  %v11452_v52 = vunpack.i.l.bf16 %v15195_v3  ;;  %v3271_v11 = vld [vmem:[#allocation3 + $0x188] sm:$0xff]  ;;  %v3264_v17 = vld [vmem:[#allocation3 + $0x138] sm:$0xff]  ;;  %v3265_v56 = vld [vmem:[#allocation3 + $0x140] sm:$0xff] }
 0x2f2   : > { %v2739_v10 = vadd.f32 %v10406_v33, %v15265_v40  ;;  %11800 = vrot.lane.b32.xlu1 %v11799_v7, %s13436_s30  ;;  %v2730_v27 = vpop.f32.mrb[33].mxu1  ;;  %v2566_v39 = vsel %vm2535_vm9, %v2533_v22, %v20132_v6  ;;  %v2564_v26 = vsel %vm2535_vm9, %v2531_v28, %v11447_v55  ;;  %v2565_v44 = vsel %vm2535_vm9, %v2532_v13, %v11448_v9  ;;  %v3275_v9 = vld [vmem:[#allocation3 + $0x39] sm:$0xff] }
 0x2f3   : > { %11785 = vrot.lane.b32.xlu0 %v11784_v61, %s13436_s30  ;;  %v2731_v24 = vadd.f32 %v15265_v40, %v2730_v27  ;;  %v10407_v8 = vpop.f32.mrb[34].mxu1  ;;  %v2567_v50 = vsel %vm2535_vm9, %v2534_v51, %v20133_v41  ;;  %v11809_v36 = vpack.i.bf16 %v3108_v42, %v3107_v47  ;;  %v11453_v58 = vunpack.i.h.bf16 %v15195_v3  ;;  %v3274_v27 = vld [vmem:[#allocation3 + $0x31] sm:$0xff]  ;;  %v3272_v6 = vld [vmem:[#allocation3 + $0x19] sm:$0xff] }
 0x2f4   : > { %v2742_v23 = vadd.f32 %v10407_v8, %v15265_v40  ;;  %v15298_v25 = vpop.permute.xlu1 %11520  ;;  %v2733_v45 = vpop.f32.mrb[35].mxu1  ;;  %v11794_v38 = vpack.i.bf16 %v3261_v1, %v3260_v5  ;;  %v2599_v31 = vsel %vm2568_vm10, %v2566_v39, %v10807_v30  ;;  %v2859_v53 = vmax.f32 %v2739_v10, 0.0  ;;  %v3110_v10 = vld [vmem:[#allocation3 + $0x170] sm:$0xff]  ;;  %v3273_v39 = vld [vmem:[#allocation3 + $0x21] sm:$0xff] }
 0x2f5   : > { %20134 = vst [vmem:[#allocation36_spill] sm:$0xff] %v15298_v25  ;;  %v15302_v2 = vpop.permute.xlu0 %11505  ;;  %v2734_v54 = vadd.f32 %v15265_v40, %v2733_v45  ;;  %v2597_v0 = vsel %vm2568_vm10, %v2564_v26, %v11452_v52  ;;  %v2600_v22 = vsel %vm2568_vm10, %v2567_v50, %v10808_v18  ;;  %v2857_v3 = vmax.f32 %v2731_v24, 0.0  ;;  %v3109_v18 = vld [vmem:[#allocation3 + $0x168] sm:$0xff]  ;;  %v3282_v45 = vld [vmem:[#allocation3 + $0x91] sm:$0xff] }
 0x2f6   : > { %20135 = vst [vmem:[#allocation37_spill] sm:$0xff] %v15302_v2  ;;  %v2860_v16 = vmax.f32 %v2742_v23, 0.0  ;;  %11810 = vrot.lane.b32.xlu1 %v11809_v36, %s13436_s30  ;;  %v2598_v4 = vsel %vm2568_vm10, %v2565_v44, %v11453_v58  ;;  %v11819_v13 = vpack.i.bf16 %v3271_v11, %v3270_v59  ;;  %v2616_v47 = vpack.c.bf16 %v2600_v22, %v2599_v31  ;;  %v3278_v8 = vld [vmem:[#allocation3 + $0x61] sm:$0xff]  ;;  %v3279_v26 = vld [vmem:[#allocation3 + $0x69] sm:$0xff]  ;;  %v3283_v44 = vld [vmem:[#allocation3 + $0x99] sm:$0xff] }
 0x2f7   : > { %v2858_v7 = vmax.f32 %v2734_v54, 0.0  ;;  %11795 = vrot.lane.b32.xlu0 %v11794_v38, %s13436_s30  ;;  %v2615_v55 = vpack.c.bf16 %v2598_v4, %v2597_v0  ;;  %v11804_v33 = vpack.i.bf16 %v3265_v56, %v3264_v17  ;;  %v11829_v1 = vpack.i.bf16 %v3275_v9, %v3274_v27  ;;  %v3277_v36 = vld [vmem:[#allocation3 + $0x51] sm:$0xff]  ;;  %v3276_v38 = vld [vmem:[#allocation3 + $0x49] sm:$0xff]  ;;  %v3286_v11 = vld [vmem:[#allocation3 + $0xc1] sm:$0xff] }
 0x2f8   : > { %v8999_v51 = vpack.c.bf16 %v2860_v16, %v2859_v53  ;;  %v15311_v28 = vpop.permute.xlu1 %11530  ;;  %v11814_v24 = vpack.i.bf16 %v3110_v10, %v3109_v18  ;;  %v11824_v41 = vpack.i.bf16 %v3273_v39, %v3272_v6  ;;  %v11839_v52 = vpack.i.bf16 %v3279_v26, %v3278_v8  ;;  %v3287_v53 = vld [vmem:[#allocation3 + $0xc9] sm:$0xff]  ;;  %v3280_v16 = vld [vmem:[#allocation3 + $0x79] sm:$0xff]  ;;  %v3281_v0 = vld [vmem:[#allocation3 + $0x81] sm:$0xff] }
 0x2f9   : > { %20136 = vst [vmem:[#allocation38_spill] sm:$0xff] %v15311_v28  ;;  %v15313_v42 = vpop.permute.xlu0 %11515  ;;  %v8998_v61 = vpack.c.bf16 %v2858_v7, %v2857_v3  ;;  %10432 = vmatprep.mubr.msk.bf16.mxu1 %vm2644_vm11, %v2615_v55  ;;  %v11849_v54 = vpack.i.bf16 %v3283_v44, %v3282_v45  ;;  %v11834_v59 = vpack.i.bf16 %v3277_v36, %v3276_v38  ;;  %v3290_v7 = vld [vmem:[#allocation3 + $0xf1] sm:$0xff]  ;;  %v3291_v4 = vld [vmem:[#allocation3 + $0xf9] sm:$0xff]  ;;  %v3294_v9 = vld [vmem:[#allocation3 + $0x121] sm:$0xff] }
 0x2fa   : > { %20137 = vst [vmem:[#allocation39_spill] sm:$0xff] %v15313_v42  ;;  %11820 = vrot.lane.b32.xlu1 %v11819_v13, %s13436_s30  ;;  %10433 = vmatmul.mubr.msk.bf16.gmra.mrb[60].mxu1 %vm2644_vm11, %v2616_v47  ;;  %v11859_v17 = vpack.i.bf16 %v3287_v53, %v3286_v11  ;;  %v11844_v3 = vpack.i.bf16 %v3281_v0, %v3280_v16  ;;  %v3285_v55 = vld [vmem:[#allocation3 + $0xb1] sm:$0xff]  ;;  %v3295_v18 = vld [vmem:[#allocation3 + $0x129] sm:$0xff]  ;;  %v3288_v10 = vld [vmem:[#allocation3 + $0xd9] sm:$0xff] }
 0x2fb   : > { %11805 = vrot.lane.b32.xlu0 %v11804_v33, %s13436_s30  ;;  %10518 = vmatprep.mubr.msk.bf16.mxu0 %vm20095_vm4, %v8998_v61  ;;  %v11869_v47 = vpack.i.bf16 %v3291_v4, %v3290_v7  ;;  %v3289_v27 = vld [vmem:[#allocation3 + $0xe1] sm:$0xff]  ;;  %v11879_v6 = vpack.i.bf16 %v3295_v18, %v3294_v9  ;;  %v3298_v8 = vld [vmem:[#allocation3 + $0x151] sm:$0xff]  ;;  %v3299_v26 = vld [vmem:[#allocation3 + $0x159] sm:$0xff] }
 0x2fc   : > { %v15320_v5 = vpop.permute.xlu1 %11540  ;;  %10519 = vmatmul.mubr.msk.bf16.vlgmr.msra.gmra.mrb[0].mxu0 %vm20095_vm4, %v8999_v51  ;;  %v3284_v51 = vld [vmem:[#allocation3 + $0xa9] sm:$0xff]  ;;  %v11889_v44 = vpack.i.bf16 %v3299_v26, %v3298_v8  ;;  %v3296_v0 = vld [vmem:[#allocation3 + $0x139] sm:$0xff]  ;;  %v3301_v8 = vld [vmem:[#allocation3 + $0x171] sm:$0xff] }
 0x2fd   : > { %20138 = vst [vmem:[#allocation40_spill] sm:$0xff] %v15320_v5  ;;  %v15322_v30 = vpop.permute.xlu0 %11525  ;;  %v11854_v61 = vpack.i.bf16 %v3285_v55, %v3284_v51  ;;  %v3303_v11 = vld [vmem:[#allocation3 + $0x189] sm:$0xff]  ;;  %v3478_v2 = vld [vmem:[#allocation3 + $0xda] sm:$0xff] }
 0x2fe   : > { %20139 = vst [vmem:[#allocation41_spill] sm:$0xff] %v15322_v30  ;;  %11830 = vrot.lane.b32.xlu1 %v11829_v1, %s13427_s17  ;;  %v3479_v25 = vld [vmem:[#allocation3 + $0xe2] sm:$0xff] }
 0x2ff   : > { %11815 = vrot.lane.b32.xlu0 %v11814_v24, %s13436_s30  ;;  %v11864_v24 = vpack.i.bf16 %v3289_v27, %v3288_v10  ;;  %v3307_v10 = vld [vmem:[#allocation3 + $0x3a] sm:$0xff] }
 0x300   : > { %v15327_v50 = vpop.permute.xlu1 %11550 }
 0x301   : > { %20140 = vst [vmem:[#allocation42_spill] sm:$0xff] %v15327_v50  ;;  %v15329_v23 = vpop.permute.xlu0 %11535 }
 0x302   : > { %20141 = vst [vmem:[#allocation43_spill] sm:$0xff] %v15329_v23  ;;  %11840 = vrot.lane.b32.xlu1 %v11839_v52, %s13427_s17  ;;  %v3293_v52 = vld [vmem:[#allocation3 + $0x111] sm:$0xff] }
 0x303   : > { %11825 = vrot.lane.b32.xlu0 %v11824_v41, %s13427_s17  ;;  %v3292_v41 = vld [vmem:[#allocation3 + $0x109] sm:$0xff] }
 0x304   : > { %v15333_v58 = vpop.permute.xlu1 %11560  ;;  %v11874_v38 = vpack.i.bf16 %v3293_v52, %v3292_v41  ;;  %v3306_v52 = vld [vmem:[#allocation3 + $0x32] sm:$0xff] }
 0x305   : > { %20142 = vst [vmem:[#allocation44_spill] sm:$0xff] %v15333_v58  ;;  %v15335_v31 = vpop.permute.xlu0 %11545 }
 0x306   : > { %20143 = vst [vmem:[#allocation45_spill] sm:$0xff] %v15335_v31  ;;  %11850 = vrot.lane.b32.xlu1 %v11849_v54, %s13427_s17 }
 0x307   : > { %11835 = vrot.lane.b32.xlu0 %v11834_v59, %s13427_s17  ;;  %v3302_v59 = vld [vmem:[#allocation3 + $0x181] sm:$0xff] }
 0x308   : > { %v15339_v22 = vpop.permute.xlu1 %11570 }
 0x309   : > { %v15341_v56 = vpop.permute.xlu0 %11555 }
 0x30a   : > { %20144 = vst [vmem:[#allocation46_spill] sm:$0xff] %v15341_v56  ;;  %11860 = vrot.lane.b32.xlu1 %v11859_v17, %s13427_s17  ;;  %v3297_v17 = vld [vmem:[#allocation3 + $0x141] sm:$0xff]  ;;  %v3383_v56 = vld [vmem:[#allocation3 + $0xcc] sm:$0xff] }
 0x30b   : > { %11845 = vrot.lane.b32.xlu0 %v11844_v3, %s13427_s17  ;;  %v11884_v18 = vpack.i.bf16 %v3297_v17, %v3296_v0  ;;  %v3310_v17 = vld [vmem:[#allocation3 + $0x62] sm:$0xff] }
 0x30c   : > { %v15345_v13 = vpop.permute.xlu1 %11580 }
 0x30d   : > { %v15347_v33 = vpop.permute.xlu0 %11565 }
 0x30e   : > { %11870 = vrot.lane.b32.xlu1 %v11869_v47, %s13427_s17  ;;  %v11899_v47 = vpack.i.bf16 %v3303_v11, %v3302_v59  ;;  %v3304_v59 = vld [vmem:[#allocation3 + $0x1a] sm:$0xff]  ;;  %v3305_v11 = vld [vmem:[#allocation3 + $0x22] sm:$0xff] }
 0x30f   : > { %11855 = vrot.lane.b32.xlu0 %v11854_v61, %s13427_s17 }
 0x310   : > { %v15351_v1 = vpop.permute.xlu1 %11590 }
 0x311   : > { %20145 = vst [vmem:[#allocation47_spill] sm:$0xff] %v15351_v1  ;;  %v15353_v39 = vpop.permute.xlu0 %11575 }
 0x312   : > { %11880 = vrot.lane.b32.xlu1 %v11879_v6, %s13427_s17 }
 0x313   : > { %11865 = vrot.lane.b32.xlu0 %v11864_v24, %s13427_s17  ;;  %v3300_v24 = vld [vmem:[#allocation3 + $0x169] sm:$0xff] }
 0x314   : > { %v15357_v45 = vpop.permute.xlu1 %11600 }
 0x315   : > { %20146 = vst [vmem:[#allocation48_spill] sm:$0xff] %v15357_v45  ;;  %v15359_v36 = vpop.permute.xlu0 %11585  ;;  %v10410_v54 = vpop.f32.mrb[36].mxu1 }
 0x316   : > { %20147 = vst [vmem:[#allocation49_spill] sm:$0xff] %v15359_v36  ;;  %v2755_v53 = vadd.f32 %v10410_v54, %v15265_v40  ;;  %11890 = vrot.lane.b32.xlu1 %v11889_v44, %s13427_s17  ;;  %v2746_v16 = vpop.f32.mrb[37].mxu1 }
 0x317   : > { %11875 = vrot.lane.b32.xlu0 %v11874_v38, %s13427_s17  ;;  %v2747_v3 = vadd.f32 %v15265_v40, %v2746_v16  ;;  %v10411_v7 = vpop.f32.mrb[38].mxu1  ;;  %v11909_v38 = vpack.i.bf16 %v3307_v10, %v3306_v52  ;;  %v3309_v10 = vld [vmem:[#allocation3 + $0x52] sm:$0xff]  ;;  %v3319_v52 = vld [vmem:[#allocation3 + $0xca] sm:$0xff] }
 0x318   : > { %v2758_v4 = vadd.f32 %v10411_v7, %v15265_v40  ;;  %v15366_v51 = vpop.permute.xlu1 %11610  ;;  %v2749_v55 = vpop.f32.mrb[39].mxu1  ;;  %v2863_v27 = vmax.f32 %v2755_v53, 0.0  ;;  %v11894_v53 = vpack.i.bf16 %v3301_v8, %v3300_v24  ;;  %v3311_v7 = vld [vmem:[#allocation3 + $0x6a] sm:$0xff] }
 0x319   : > { %20148 = vst [vmem:[#allocation50_spill] sm:$0xff] %v15366_v51  ;;  %v15368_v61 = vpop.permute.xlu0 %11595  ;;  %v2750_v9 = vadd.f32 %v15265_v40, %v2749_v55  ;;  %v2861_v26 = vmax.f32 %v2747_v3, 0.0  ;;  %v11904_v3 = vpack.i.bf16 %v3305_v11, %v3304_v59  ;;  %v11919_v55 = vpack.i.bf16 %v3311_v7, %v3310_v17  ;;  %v3308_v24 = vld [vmem:[#allocation3 + $0x4a] sm:$0xff]  ;;  %v3322_v17 = vld [vmem:[#allocation3 + $0xf2] sm:$0xff]  ;;  %v3323_v7 = vld [vmem:[#allocation3 + $0xfa] sm:$0xff] }
 0x31a   : > { %20149 = vst [vmem:[#allocation51_spill] sm:$0xff] %v15368_v61  ;;  %v2864_v6 = vmax.f32 %v2758_v4, 0.0  ;;  %11900 = vrot.lane.b32.xlu1 %v11899_v47, %s13427_s17 }
 0x31b   : > { %v2862_v41 = vmax.f32 %v2750_v9, 0.0  ;;  %11885 = vrot.lane.b32.xlu0 %v11884_v18, %s13427_s17  ;;  %v3314_v9 = vld [vmem:[#allocation3 + $0x92] sm:$0xff]  ;;  %v3315_v18 = vld [vmem:[#allocation3 + $0x9a] sm:$0xff] }
 0x31c   : > { %v9001_v44 = vpack.c.bf16 %v2864_v6, %v2863_v27  ;;  %v15373_v54 = vpop.permute.xlu1 %11620  ;;  %v11929_v6 = vpack.i.bf16 %v3315_v18, %v3314_v9  ;;  %v11949_v18 = vpack.i.bf16 %v3323_v7, %v3322_v17  ;;  %v3324_v17 = vld [vmem:[#allocation3 + $0x10a] sm:$0xff]  ;;  %v3325_v7 = vld [vmem:[#allocation3 + $0x112] sm:$0xff] }
 0x31d   : > { %20150 = vst [vmem:[#allocation52_spill] sm:$0xff] %v15373_v54  ;;  %v9000_v16 = vpack.c.bf16 %v2862_v41, %v2861_v26  ;;  %v15375_v0 = vpop.permute.xlu0 %11605  ;;  %v11914_v26 = vpack.i.bf16 %v3309_v10, %v3308_v24  ;;  %v3318_v41 = vld [vmem:[#allocation3 + $0xc2] sm:$0xff]  ;;  %v3343_v54 = vld [vmem:[#allocation3 + $0x6b] sm:$0xff] }
 0x31e   : > { %20151 = vst [vmem:[#allocation53_spill] sm:$0xff] %v15375_v0  ;;  %11910 = vrot.lane.b32.xlu1 %v11909_v38, %s13429_s19  ;;  %v3313_v38 = vld [vmem:[#allocation3 + $0x82] sm:$0xff]  ;;  %v11939_v11 = vpack.i.bf16 %v3319_v52, %v3318_v41  ;;  %v3320_v41 = vld [vmem:[#allocation3 + $0xda] sm:$0xff] }
 0x31f   : > { %11895 = vrot.lane.b32.xlu0 %v11894_v53, %s13427_s17  ;;  %10522 = vmatprep.mubr.msk.bf16.mxu0 %vm20095_vm4, %v9000_v16  ;;  %v3326_v24 = vld [vmem:[#allocation3 + $0x122] sm:$0xff] }
 0x320   : > { %v15380_v4 = vpop.permute.xlu1 %11630  ;;  %10523 = vmatmul.mubr.msk.bf16.gmra.mrb[4].mxu0 %vm20095_vm4, %v9001_v44  ;;  %v3312_v44 = vld [vmem:[#allocation3 + $0x7a] sm:$0xff]  ;;  %v3321_v52 = vld [vmem:[#allocation3 + $0xe2] sm:$0xff] }
 0x321   : > { %20152 = vst [vmem:[#allocation54_spill] sm:$0xff] %v15380_v4  ;;  %v15383_v47 = vpop.permute.xlu0 %11615  ;;  %v11924_v53 = vpack.i.bf16 %v3313_v38, %v3312_v44  ;;  %v3342_v0 = vld [vmem:[#allocation3 + $0x63] sm:$0xff] }
 0x322   : > { %20153 = vst [vmem:[#allocation55_spill] sm:$0xff] %v15383_v47  ;;  %11920 = vrot.lane.b32.xlu1 %v11919_v55, %s13429_s19  ;;  %v3317_v55 = vld [vmem:[#allocation3 + $0xb2] sm:$0xff] }
 0x323   : > { %11905 = vrot.lane.b32.xlu0 %v11904_v3, %s13429_s19  ;;  %v3316_v3 = vld [vmem:[#allocation3 + $0xaa] sm:$0xff] }
 0x324   : > { %v15387_v27 = vpop.permute.xlu1 %11640 }
 0x325   : > { %20154 = vst [vmem:[#allocation56_spill] sm:$0xff] %v15387_v27  ;;  %v15389_v8 = vpop.permute.xlu0 %11625  ;;  %v3334_v27 = vld [vmem:[#allocation3 + $0x182] sm:$0xff] }
 0x326   : > { %20155 = vst [vmem:[#allocation57_spill] sm:$0xff] %v15389_v8  ;;  %11930 = vrot.lane.b32.xlu1 %v11929_v6, %s13429_s19  ;;  %v11934_v6 = vpack.i.bf16 %v3317_v55, %v3316_v3  ;;  %v3331_v8 = vld [vmem:[#allocation3 + $0x15a] sm:$0xff] }
 0x327   : > { %11915 = vrot.lane.b32.xlu0 %v11914_v26, %s13429_s19  ;;  %v3327_v26 = vld [vmem:[#allocation3 + $0x12a] sm:$0xff] }
 0x328   : > { %v15393_v59 = vpop.permute.xlu1 %11650  ;;  %v11959_v38 = vpack.i.bf16 %v3327_v26, %v3326_v24  ;;  %v3328_v24 = vld [vmem:[#allocation3 + $0x13a] sm:$0xff]  ;;  %v3329_v26 = vld [vmem:[#allocation3 + $0x142] sm:$0xff] }
 0x329   : > { %v15395_v16 = vpop.permute.xlu0 %11635  ;;  %v11964_v47 = vpack.i.bf16 %v3329_v26, %v3328_v24  ;;  %v3336_v26 = vld [vmem:[#allocation3 + $0x1b] sm:$0xff] }
 0x32a   : > { %20156 = vst [vmem:[#allocation58_spill] sm:$0xff] %v15395_v16  ;;  %11940 = vrot.lane.b32.xlu1 %v11939_v11, %s13429_s19  ;;  %v3330_v16 = vld [vmem:[#allocation3 + $0x152] sm:$0xff] }
 0x32b   : > { %11925 = vrot.lane.b32.xlu0 %v11924_v53, %s13429_s19  ;;  %v11944_v53 = vpack.i.bf16 %v3321_v52, %v3320_v41  ;;  %v11969_v55 = vpack.i.bf16 %v3331_v8, %v3330_v16  ;;  %v3339_v8 = vld [vmem:[#allocation3 + $0x3b] sm:$0xff] }
 0x32c   : > { %v15399_v9 = vpop.permute.xlu1 %11660 }
 0x32d   : > { %v15401_v10 = vpop.permute.xlu0 %11645 }
 0x32e   : > { %11950 = vrot.lane.b32.xlu1 %v11949_v18, %s13429_s19 }
 0x32f   : > { %11935 = vrot.lane.b32.xlu0 %v11934_v6, %s13429_s19  ;;  %v11954_v6 = vpack.i.bf16 %v3325_v7, %v3324_v17  ;;  %v3332_v7 = vld [vmem:[#allocation3 + $0x16a] sm:$0xff] }
 0x330   : > { %v15405_v44 = vpop.permute.xlu1 %11670 }
 0x331   : > { %20157 = vst [vmem:[#allocation59_spill] sm:$0xff] %v15405_v44  ;;  %v15407_v11 = vpop.permute.xlu0 %11655  ;;  %v3335_v44 = vld [vmem:[#allocation3 + $0x18a] sm:$0xff] }
 0x332   : > { %11960 = vrot.lane.b32.xlu1 %v11959_v38, %s13429_s19  ;;  %v11979_v52 = vpack.i.bf16 %v3335_v44, %v3334_v27 }
 0x333   : > { %11945 = vrot.lane.b32.xlu0 %v11944_v53, %s13429_s19 }
 0x334   : > { %v15411_v3 = vpop.permute.xlu1 %11680 }
 0x335   : > { %20158 = vst [vmem:[#allocation60_spill] sm:$0xff] %v15411_v3  ;;  %v15413_v18 = vpop.permute.xlu0 %11665  ;;  %v3338_v3 = vld [vmem:[#allocation3 + $0x33] sm:$0xff] }
 0x336   : > { %20159 = vst [vmem:[#allocation61_spill] sm:$0xff] %v15413_v18  ;;  %11970 = vrot.lane.b32.xlu1 %v11969_v55, %s13429_s19  ;;  %v3333_v55 = vld [vmem:[#allocation3 + $0x172] sm:$0xff]  ;;  %v11989_v24 = vpack.i.bf16 %v3339_v8, %v3338_v3  ;;  %v11999_v8 = vpack.i.bf16 %v3343_v54, %v3342_v0  ;;  %v3350_v54 = vld [vmem:[#allocation3 + $0xc3] sm:$0xff] }
 0x337   : > { %11955 = vrot.lane.b32.xlu0 %v11954_v6, %s13429_s19  ;;  %v3351_v0 = vld [vmem:[#allocation3 + $0xcb] sm:$0xff] }
 0x338   : > { %v15417_v41 = vpop.permute.xlu1 %11690 }
 0x339   : > { %20160 = vst [vmem:[#allocation62_spill] sm:$0xff] %v15417_v41  ;;  %v15419_v38 = vpop.permute.xlu0 %11675  ;;  %v10414_v53 = vpop.f32.mrb[40].mxu1  ;;  %v3337_v41 = vld [vmem:[#allocation3 + $0x23] sm:$0xff] }
 0x33a   : > { %20161 = vst [vmem:[#allocation63_spill] sm:$0xff] %v15419_v38  ;;  %v2771_v16 = vadd.f32 %v10414_v53, %v15265_v40  ;;  %11980 = vrot.lane.b32.xlu1 %v11979_v52, %s13429_s19  ;;  %v2762_v17 = vpop.f32.mrb[41].mxu1  ;;  %v11974_v53 = vpack.i.bf16 %v3333_v55, %v3332_v7  ;;  %v3347_v7 = vld [vmem:[#allocation3 + $0x9b] sm:$0xff]  ;;  %v3341_v55 = vld [vmem:[#allocation3 + $0x53] sm:$0xff] }
 0x33b   : > { %11965 = vrot.lane.b32.xlu0 %v11964_v47, %s13429_s19  ;;  %v2763_v6 = vadd.f32 %v15265_v40, %v2762_v17  ;;  %v10415_v18 = vpop.f32.mrb[42].mxu1 }
 0x33c   : > { %v2774_v27 = vadd.f32 %v10415_v18, %v15265_v40  ;;  %v15426_v44 = vpop.permute.xlu1 %11700  ;;  %v2765_v38 = vpop.f32.mrb[43].mxu1  ;;  %v2867_v61 = vmax.f32 %v2771_v16, 0.0  ;;  %v11984_v18 = vpack.i.bf16 %v3337_v41, %v3336_v26  ;;  %v3340_v16 = vld [vmem:[#allocation3 + $0x4b] sm:$0xff] }
 0x33d   : > { %20162 = vst [vmem:[#allocation64_spill] sm:$0xff] %v15426_v44  ;;  %v15428_v4 = vpop.permute.xlu0 %11685  ;;  %v2766_v52 = vadd.f32 %v15265_v40, %v2765_v38  ;;  %v2865_v17 = vmax.f32 %v2763_v6, 0.0  ;;  %v3346_v38 = vld [vmem:[#allocation3 + $0x93] sm:$0xff] }
 0x33e   : > { %20163 = vst [vmem:[#allocation65_spill] sm:$0xff] %v15428_v4  ;;  %v2868_v47 = vmax.f32 %v2774_v27, 0.0  ;;  %11990 = vrot.lane.b32.xlu1 %v11989_v24, %s13431_s21  ;;  %v3344_v27 = vld [vmem:[#allocation3 + $0x7b] sm:$0xff]  ;;  %v3345_v24 = vld [vmem:[#allocation3 + $0x83] sm:$0xff] }
 0x33f   : > { %v2866_v51 = vmax.f32 %v2766_v52, 0.0  ;;  %11975 = vrot.lane.b32.xlu0 %v11974_v53, %s13429_s19  ;;  %v12019_v52 = vpack.i.bf16 %v3351_v0, %v3350_v54  ;;  %v12004_v53 = vpack.i.bf16 %v3345_v24, %v3344_v27  ;;  %v3353_v54 = vld [vmem:[#allocation3 + $0xe3] sm:$0xff] }
 0x340   : > { %v9003_v44 = vpack.c.bf16 %v2868_v47, %v2867_v61  ;;  %v15433_v3 = vpop.permute.xlu1 %11710  ;;  %v12009_v61 = vpack.i.bf16 %v3347_v7, %v3346_v38  ;;  %v3354_v47 = vld [vmem:[#allocation3 + $0xf3] sm:$0xff] }
 0x341   : > { %20164 = vst [vmem:[#allocation66_spill] sm:$0xff] %v15433_v3  ;;  %v9002_v36 = vpack.c.bf16 %v2866_v51, %v2865_v17  ;;  %v15435_v4 = vpop.permute.xlu0 %11695  ;;  %v11994_v51 = vpack.i.bf16 %v3341_v55, %v3340_v16  ;;  %v3348_v17 = vld [vmem:[#allocation3 + $0xab] sm:$0xff]  ;;  %v3358_v55 = vld [vmem:[#allocation3 + $0x123] sm:$0xff] }
 0x342   : > { %20165 = vst [vmem:[#allocation67_spill] sm:$0xff] %v15435_v4  ;;  %12000 = vrot.lane.b32.xlu1 %v11999_v8, %s13431_s21  ;;  %v3379_v3 = vld [vmem:[#allocation3 + $0x9c] sm:$0xff] }
 0x343   : > { %11985 = vrot.lane.b32.xlu0 %v11984_v18, %s13431_s21  ;;  %10526 = vmatprep.mubr.msk.bf16.mxu0 %vm20095_vm4, %v9002_v36  ;;  %v3349_v18 = vld [vmem:[#allocation3 + $0xb3] sm:$0xff] }
 0x344   : > { %v15440_v6 = vpop.permute.xlu1 %11720  ;;  %10527 = vmatmul.mubr.msk.bf16.gmra.mrb[8].mxu0 %vm20095_vm4, %v9003_v44  ;;  %v3355_v44 = vld [vmem:[#allocation3 + $0xfb] sm:$0xff]  ;;  %v12014_v16 = vpack.i.bf16 %v3349_v18, %v3348_v17 }
 0x345   : > { %20166 = vst [vmem:[#allocation68_spill] sm:$0xff] %v15440_v6  ;;  %v15443_v41 = vpop.permute.xlu0 %11705  ;;  %v12029_v38 = vpack.i.bf16 %v3355_v44, %v3354_v47  ;;  %v3356_v47 = vld [vmem:[#allocation3 + $0x10b] sm:$0xff]  ;;  %v3357_v44 = vld [vmem:[#allocation3 + $0x113] sm:$0xff] }
 0x346   : > { %20167 = vst [vmem:[#allocation69_spill] sm:$0xff] %v15443_v41  ;;  %12010 = vrot.lane.b32.xlu1 %v12009_v61, %s13431_s21  ;;  %v3359_v61 = vld [vmem:[#allocation3 + $0x12b] sm:$0xff]  ;;  %v3366_v41 = vld [vmem:[#allocation3 + $0x183] sm:$0xff]  ;;  %v3370_v6 = vld [vmem:[#allocation3 + $0x34] sm:$0xff] }
 0x347   : > { %11995 = vrot.lane.b32.xlu0 %v11994_v51, %s13431_s21  ;;  %v3352_v51 = vld [vmem:[#allocation3 + $0xdb] sm:$0xff]  ;;  %v12039_v27 = vpack.i.bf16 %v3359_v61, %v3358_v55  ;;  %v3361_v61 = vld [vmem:[#allocation3 + $0x143] sm:$0xff] }
 0x348   : > { %v15447_v26 = vpop.permute.xlu1 %11730  ;;  %v3360_v55 = vld [vmem:[#allocation3 + $0x13b] sm:$0xff] }
 0x349   : > { %v15449_v36 = vpop.permute.xlu0 %11715 }
 0x34a   : > { %20168 = vst [vmem:[#allocation70_spill] sm:$0xff] %v15449_v36  ;;  %12020 = vrot.lane.b32.xlu1 %v12019_v52, %s13431_s21  ;;  %v12024_v52 = vpack.i.bf16 %v3353_v54, %v3352_v51  ;;  %v3363_v36 = vld [vmem:[#allocation3 + $0x15b] sm:$0xff] }
 0x34b   : > { %12005 = vrot.lane.b32.xlu0 %v12004_v53, %s13431_s21  ;;  %v3362_v53 = vld [vmem:[#allocation3 + $0x153] sm:$0xff] }
 0x34c   : > { %v15453_v8 = vpop.permute.xlu1 %11740  ;;  %v12049_v18 = vpack.i.bf16 %v3363_v36, %v3362_v53  ;;  %v3364_v36 = vld [vmem:[#allocation3 + $0x16b] sm:$0xff]  ;;  %v3365_v53 = vld [vmem:[#allocation3 + $0x173] sm:$0xff] }
 0x34d   : > { %v15455_v7 = vpop.permute.xlu0 %11725 }
 0x34e   : > { %12030 = vrot.lane.b32.xlu1 %v12029_v38, %s13431_s21 }
 0x34f   : > { %12015 = vrot.lane.b32.xlu0 %v12014_v16, %s13431_s21  ;;  %v12034_v16 = vpack.i.bf16 %v3357_v44, %v3356_v47  ;;  %v8997_v47 = vld [vmem:[%s19765_s9] sm:$0xf] }
 0x350   : > { %v15459_v0 = vpop.permute.xlu1 %11750  ;;  %10753 = vmatprep.subr.msk.bf16.mxu0 %vm9063_vm12, %v8997_v47 }
 0x351   : > { %20169 = vst [vmem:[#allocation71_spill] sm:$0xff] %v15459_v0  ;;  %v15461_v24 = vpop.permute.xlu0 %11735  ;;  %v3367_v0 = vld [vmem:[#allocation3 + $0x18b] sm:$0xff] }
 0x352   : > { %12040 = vrot.lane.b32.xlu1 %v12039_v27, %s13431_s21  ;;  %v12059_v54 = vpack.i.bf16 %v3367_v0, %v3366_v41  ;;  %v3368_v0 = vld [vmem:[#allocation3 + $0x1c] sm:$0xff] }
 0x353   : > { %12025 = vrot.lane.b32.xlu0 %v12024_v52, %s13431_s21  ;;  %v12044_v52 = vpack.i.bf16 %v3361_v61, %v3360_v55 }
 0x354   : > { %v15465_v17 = vpop.permute.xlu1 %11760 }
 0x355   : > { %20170 = vst [vmem:[#allocation72_spill] sm:$0xff] %v15465_v17  ;;  %v15467_v38 = vpop.permute.xlu0 %11745  ;;  %v3371_v17 = vld [vmem:[#allocation3 + $0x3c] sm:$0xff] }
 0x356   : > { %20171 = vst [vmem:[#allocation73_spill] sm:$0xff] %v15467_v38  ;;  %12050 = vrot.lane.b32.xlu1 %v12049_v18, %s13431_s21  ;;  %v12069_v41 = vpack.i.bf16 %v3371_v17, %v3370_v6  ;;  %v3369_v18 = vld [vmem:[#allocation3 + $0x24] sm:$0xff] }
 0x357   : > { %12035 = vrot.lane.b32.xlu0 %v12034_v16, %s13431_s21  ;;  %v9277_v16 = vsel %vm9063_vm12, %v8997_v47, 0 }
 0x358   : > { %v15471_v51 = vpop.permute.xlu1 %11770  ;;  %10551 = vmatpush3.bf16.msra.mxu0 %v9277_v16 }
 0x359   : > { %20172 = vst [vmem:[#allocation74_spill] sm:$0xff] %v15471_v51  ;;  %v15473_v27 = vpop.permute.xlu0 %11755  ;;  %v3375_v51 = vld [vmem:[#allocation3 + $0x6c] sm:$0xff] }
 0x35a   : > { %20173 = vst [vmem:[#allocation75_spill] sm:$0xff] %v15473_v27  ;;  %12060 = vrot.lane.b32.xlu1 %v12059_v54, %s13431_s21  ;;  %v12054_v54 = vpack.i.bf16 %v3365_v53, %v3364_v36  ;;  %v3374_v27 = vld [vmem:[#allocation3 + $0x64] sm:$0xff] }
 0x35b   : > { %12045 = vrot.lane.b32.xlu0 %v12044_v52, %s13431_s21  ;;  %v12079_v53 = vpack.i.bf16 %v3375_v51, %v3374_v27 }
 0x35c   : > { %v15481_v44 = vpop.permute.xlu1 %11780 }
 0x35d   : > { %20174 = vst [vmem:[#allocation76_spill] sm:$0xff] %v15481_v44  ;;  %v15484_v55 = vpop.permute.xlu0 %11765  ;;  %v10418_v61 = vpop.f32.mrb[44].mxu1  ;;  %v12064_v44 = vpack.i.bf16 %v3369_v18, %v3368_v0 }
 0x35e   : > { %20175 = vst [vmem:[#allocation77_spill] sm:$0xff] %v15484_v55  ;;  %v2787_v38 = vadd.f32 %v10418_v61, %v15265_v40  ;;  %12070 = vrot.lane.b32.xlu1 %v12069_v41, %s13437_s24  ;;  %v2778_v52 = vpop.f32.mrb[45].mxu1  ;;  %v3378_v61 = vld [vmem:[#allocation3 + $0x94] sm:$0xff] }
 0x35f   : > { %12055 = vrot.lane.b32.xlu0 %v12054_v54, %s13431_s21  ;;  %v2779_v6 = vadd.f32 %v15265_v40, %v2778_v52  ;;  %v10419_v17 = vpop.f32.mrb[46].mxu1  ;;  %v3372_v54 = vld [vmem:[#allocation3 + $0x4c] sm:$0xff]  ;;  %v3373_v52 = vld [vmem:[#allocation3 + $0x54] sm:$0xff]  ;;  %v12089_v51 = vpack.i.bf16 %v3379_v3, %v3378_v61 }
 0x360   : > { %v2790_v47 = vadd.f32 %v10419_v17, %v15265_v40  ;;  %v15491_v55 = vpop.permute.xlu1 %11790  ;;  %v2781_v36 = vpop.f32.mrb[47].mxu1  ;;  %v2871_v41 = vmax.f32 %v2787_v38, 0.0  ;;  %v3376_v38 = vld [vmem:[#allocation3 + $0x7c] sm:$0xff]  ;;  %v3381_v61 = vld [vmem:[#allocation3 + $0xb4] sm:$0xff] }
 0x361   : > { %20176 = vst [vmem:[#allocation78_spill] sm:$0xff] %v15491_v55  ;;  %v15493_v4 = vpop.permute.xlu0 %11775  ;;  %v2782_v16 = vadd.f32 %v15265_v40, %v2781_v36  ;;  %v2869_v1 = vmax.f32 %v2779_v6, 0.0  ;;  %v12074_v36 = vpack.i.bf16 %v3373_v52, %v3372_v54  ;;  %v3382_v55 = vld [vmem:[#allocation3 + $0xc4] sm:$0xff] }
 0x362   : > { %20177 = vst [vmem:[#allocation79_spill] sm:$0xff] %v15493_v4  ;;  %v2872_v45 = vmax.f32 %v2790_v47, 0.0  ;;  %12080 = vrot.lane.b32.xlu1 %v12079_v53, %s13437_s24  ;;  %v3377_v47 = vld [vmem:[#allocation3 + $0x84] sm:$0xff]  ;;  %v3387_v53 = vld [vmem:[#allocation3 + $0xfc] sm:$0xff] }
 0x363   : > { %v2870_v0 = vmax.f32 %v2782_v16, 0.0  ;;  %12065 = vrot.lane.b32.xlu0 %v12064_v44, %s13437_s24  ;;  %v3386_v44 = vld [vmem:[#allocation3 + $0xf4] sm:$0xff]  ;;  %v3380_v16 = vld [vmem:[#allocation3 + $0xac] sm:$0xff] }
 0x364   : > { %v9005_v18 = vpack.c.bf16 %v2872_v45, %v2871_v41  ;;  %v15498_v17 = vpop.permute.xlu1 %11800  ;;  %v12099_v45 = vpack.i.bf16 %v3383_v56, %v3382_v55  ;;  %v12109_v54 = vpack.i.bf16 %v3387_v53, %v3386_v44  ;;  %v3384_v56 = vld [vmem:[#allocation3 + $0xdc] sm:$0xff]  ;;  %v3385_v55 = vld [vmem:[#allocation3 + $0xe4] sm:$0xff]  ;;  %v3388_v44 = vld [vmem:[#allocation3 + $0x10c] sm:$0xff] }
 0x365   : > { %20178 = vst [vmem:[#allocation80_spill] sm:$0xff] %v15498_v17  ;;  %v9004_v27 = vpack.c.bf16 %v2870_v0, %v2869_v1  ;;  %v15500_v4 = vpop.permute.xlu0 %11785  ;;  %v12084_v1 = vpack.i.bf16 %v3377_v47, %v3376_v38  ;;  %v12094_v0 = vpack.i.bf16 %v3381_v61, %v3380_v16  ;;  %v12104_v47 = vpack.i.bf16 %v3385_v55, %v3384_v56  ;;  %v3389_v53 = vld [vmem:[#allocation3 + $0x114] sm:$0xff]  ;;  %v3415_v17 = vld [vmem:[#allocation3 + $0xe0] sm:$0xff] }
 0x366   : > { %20179 = vst [vmem:[#allocation81_spill] sm:$0xff] %v15500_v4  ;;  %12090 = vrot.lane.b32.xlu1 %v12089_v51, %s13437_s24  ;;  %v3390_v51 = vld [vmem:[#allocation3 + $0x124] sm:$0xff]  ;;  %v3403_v4 = vld [vmem:[#allocation3 + $0x50] sm:$0xff] }
 0x367   : > { %12075 = vrot.lane.b32.xlu0 %v12074_v36, %s13437_s24  ;;  %10530 = vmatprep.mubr.msk.bf16.mxu0 %vm20095_vm4, %v9004_v27 }
 0x368   : > { %v15505_v6 = vpop.permute.xlu1 %11810  ;;  %10531 = vmatmul.mubr.msk.bf16.gmra.mrb[12].mxu0 %vm20095_vm4, %v9005_v18  ;;  %v3391_v18 = vld [vmem:[#allocation3 + $0x12c] sm:$0xff] }
 0x369   : > { %v15508_v3 = vpop.permute.xlu0 %11795  ;;  %v12119_v36 = vpack.i.bf16 %v3391_v18, %v3390_v51  ;;  %v3392_v51 = vld [vmem:[#allocation3 + $0x13c] sm:$0xff]  ;;  %v3393_v18 = vld [vmem:[#allocation3 + $0x144] sm:$0xff] }
 0x36a   : > { %20180 = vst [vmem:[#allocation82_spill] sm:$0xff] %v15508_v3  ;;  %12100 = vrot.lane.b32.xlu1 %v12099_v45, %s13437_s24  ;;  %v3394_v45 = vld [vmem:[#allocation3 + $0x154] sm:$0xff]  ;;  %v3398_v3 = vld [vmem:[#allocation3 + $0x184] sm:$0xff] }
 0x36b   : > { %12085 = vrot.lane.b32.xlu0 %v12084_v1, %s13437_s24  ;;  %v3395_v1 = vld [vmem:[#allocation3 + $0x15c] sm:$0xff] }
 0x36c   : > { %v15512_v41 = vpop.permute.xlu1 %11820  ;;  %v12129_v61 = vpack.i.bf16 %v3395_v1, %v3394_v45  ;;  %v3396_v45 = vld [vmem:[#allocation3 + $0x16c] sm:$0xff]  ;;  %v3397_v1 = vld [vmem:[#allocation3 + $0x174] sm:$0xff] }
 0x36d   : > { %v15514_v52 = vpop.permute.xlu0 %11805 }
 0x36e   : > { %12110 = vrot.lane.b32.xlu1 %v12109_v54, %s13437_s24 }
 0x36f   : > { %12095 = vrot.lane.b32.xlu0 %v12094_v0, %s13437_s24  ;;  %v12114_v0 = vpack.i.bf16 %v3389_v53, %v3388_v44  ;;  %v3402_v44 = vld [vmem:[#allocation3 + $0x48] sm:$0xff] }
 0x370   : > { %v15518_v27 = vpop.permute.xlu1 %11830 }
 0x371   : > { %20181 = vst [vmem:[#allocation83_spill] sm:$0xff] %v15518_v27  ;;  %v15520_v38 = vpop.permute.xlu0 %11815  ;;  %v3399_v27 = vld [vmem:[#allocation3 + $0x18c] sm:$0xff] }
 0x372   : > { %12120 = vrot.lane.b32.xlu1 %v12119_v36, %s13437_s24  ;;  %v12139_v55 = vpack.i.bf16 %v3399_v27, %v3398_v3  ;;  %v3401_v3 = vld [vmem:[#allocation3 + $0x38] sm:$0xff] }
 0x373   : > { %12105 = vrot.lane.b32.xlu0 %v12104_v47, %s13437_s24  ;;  %v12124_v47 = vpack.i.bf16 %v3393_v18, %v3392_v51  ;;  %v3400_v18 = vld [vmem:[#allocation3 + $0x30] sm:$0xff] }
 0x374   : > { %v15524_v16 = vpop.permute.xlu1 %11840 }
 0x375   : > { %20182 = vst [vmem:[#allocation84_spill] sm:$0xff] %v15524_v16  ;;  %v15526_v54 = vpop.permute.xlu0 %11825  ;;  %v3406_v16 = vld [vmem:[#allocation3 + $0x78] sm:$0xff] }
 0x376   : > { %20183 = vst [vmem:[#allocation85_spill] sm:$0xff] %v15526_v54  ;;  %12130 = vrot.lane.b32.xlu1 %v12129_v61, %s13437_s24  ;;  %v12149_v61 = vpack.i.bf16 %v3403_v4, %v3402_v44  ;;  %v3410_v4 = vld [vmem:[#allocation3 + $0xa8] sm:$0xff]  ;;  %v3411_v44 = vld [vmem:[#allocation3 + $0xb0] sm:$0xff] }
 0x377   : > { %12115 = vrot.lane.b32.xlu0 %v12114_v0, %s13437_s24  ;;  %v12134_v0 = vpack.i.bf16 %v3397_v1, %v3396_v45 }
 0x378   : > { %v15530_v56 = vpop.permute.xlu1 %11850 }
 0x379   : > { %20184 = vst [vmem:[#allocation86_spill] sm:$0xff] %v15530_v56  ;;  %v15532_v36 = vpop.permute.xlu0 %11835  ;;  %v3407_v56 = vld [vmem:[#allocation3 + $0x80] sm:$0xff] }
 0x37a   : > { %20185 = vst [vmem:[#allocation87_spill] sm:$0xff] %v15532_v36  ;;  %12140 = vrot.lane.b32.xlu1 %v12139_v55, %s13437_s24  ;;  %v12159_v51 = vpack.i.bf16 %v3407_v56, %v3406_v16 }
 0x37b   : > { %12125 = vrot.lane.b32.xlu0 %v12124_v47, %s13437_s24 }
 0x37c   : > { %v15536_v53 = vpop.permute.xlu1 %11860 }
 0x37d   : > { %20186 = vst [vmem:[#allocation88_spill] sm:$0xff] %v15536_v53  ;;  %v15538_v54 = vpop.permute.xlu0 %11845  ;;  %v12144_v53 = vpack.i.bf16 %v3401_v3, %v3400_v18  ;;  %v12169_v3 = vpack.i.bf16 %v3411_v44, %v3410_v4 }
 0x37e   : > { %20187 = vst [vmem:[#allocation89_spill] sm:$0xff] %v15538_v54  ;;  %12150 = vrot.lane.b32.xlu1 %v12149_v61, %s13438_s27  ;;  %v3404_v54 = vld [vmem:[#allocation3 + $0x60] sm:$0xff]  ;;  %v3405_v61 = vld [vmem:[#allocation3 + $0x68] sm:$0xff] }
 0x37f   : > { %12135 = vrot.lane.b32.xlu0 %v12134_v0, %s13437_s24  ;;  %v12154_v36 = vpack.i.bf16 %v3405_v61, %v3404_v54  ;;  %v3418_v54 = vld [vmem:[#allocation3 + $0x108] sm:$0xff]  ;;  %s13442_s24 = smov 56  }
 0x380   : > { %v15542_v27 = vpop.permute.xlu1 %11870  ;;  %v3413_v61 = vld [vmem:[#allocation3 + $0xc8] sm:$0xff] }
 0x381   : > { %20188 = vst [vmem:[#allocation90_spill] sm:$0xff] %v15542_v27  ;;  %v15544_v55 = vpop.permute.xlu0 %11855  ;;  %v10422_v47 = vpop.f32.mrb[48].mxu1 }
 0x382   : > { %20189 = vst [vmem:[#allocation91_spill] sm:$0xff] %v15544_v55  ;;  %v2803_v45 = vadd.f32 %v10422_v47, %v15265_v40  ;;  %12160 = vrot.lane.b32.xlu1 %v12159_v51, %s13438_s27  ;;  %v2794_v1 = vpop.f32.mrb[49].mxu1  ;;  %v3414_v51 = vld [vmem:[#allocation3 + $0xd8] sm:$0xff] }
 0x383   : > { %12145 = vrot.lane.b32.xlu0 %v12144_v53, %s13438_s27  ;;  %v2795_v0 = vadd.f32 %v15265_v40, %v2794_v1  ;;  %v10423_v27 = vpop.f32.mrb[50].mxu1  ;;  %v3408_v53 = vld [vmem:[#allocation3 + $0x90] sm:$0xff]  ;;  %v3409_v1 = vld [vmem:[#allocation3 + $0x98] sm:$0xff]  ;;  %v12179_v4 = vpack.i.bf16 %v3415_v17, %v3414_v51  ;;  %v3423_v17 = vld [vmem:[#allocation3 + $0x140] sm:$0xff] }
 0x384   : > { %v2806_v16 = vadd.f32 %v10423_v27, %v15265_v40  ;;  %v15551_v56 = vpop.permute.xlu1 %11880  ;;  %v2797_v55 = vpop.f32.mrb[51].mxu1  ;;  %v2875_v31 = vmax.f32 %v2803_v45, 0.0  ;;  %v3412_v45 = vld [vmem:[#allocation3 + $0xc0] sm:$0xff] }
 0x385   : > { %20190 = vst [vmem:[#allocation92_spill] sm:$0xff] %v15551_v56  ;;  %v15553_v18 = vpop.permute.xlu0 %11865  ;;  %v2798_v47 = vadd.f32 %v15265_v40, %v2797_v55  ;;  %v2873_v23 = vmax.f32 %v2795_v0, 0.0  ;;  %v12164_v40 = vpack.i.bf16 %v3409_v1, %v3408_v53  ;;  %v3419_v55 = vld [vmem:[#allocation3 + $0x110] sm:$0xff]  ;;  %v3426_v1 = vld [vmem:[#allocation3 + $0x168] sm:$0xff] }
 0x386   : > { %20191 = vst [vmem:[#allocation93_spill] sm:$0xff] %v15553_v18  ;;  %v2876_v58 = vmax.f32 %v2806_v16, 0.0  ;;  %12170 = vrot.lane.b32.xlu1 %v12169_v3, %s13438_s27  ;;  %v3417_v16 = vld [vmem:[#allocation3 + $0xf8] sm:$0xff] }
 0x387   : > { %v2874_v50 = vmax.f32 %v2798_v47, 0.0  ;;  %12155 = vrot.lane.b32.xlu0 %v12154_v36, %s13438_s27  ;;  %v3416_v36 = vld [vmem:[#allocation3 + $0xf0] sm:$0xff] }
 0x388   : > { %v9007_v27 = vpack.c.bf16 %v2876_v58, %v2875_v31  ;;  %v15558_v56 = vpop.permute.xlu1 %11890  ;;  %v12189_v58 = vpack.i.bf16 %v3419_v55, %v3418_v54  ;;  %v12184_v53 = vpack.i.bf16 %v3417_v16, %v3416_v36 }
 0x389   : > { %v9006_v44 = vpack.c.bf16 %v2874_v50, %v2873_v23  ;;  %v15560_v18 = vpop.permute.xlu0 %11875  ;;  %v12174_v50 = vpack.i.bf16 %v3413_v61, %v3412_v45  ;;  %v3422_v23 = vld [vmem:[#allocation3 + $0x138] sm:$0xff] }
 0x38a   : > { %20192 = vst [vmem:[#allocation94_spill] sm:$0xff] %v15560_v18  ;;  %12180 = vrot.lane.b32.xlu1 %v12179_v4, %s13438_s27  ;;  %v12199_v47 = vpack.i.bf16 %v3423_v17, %v3422_v23  ;;  %v3420_v4 = vld [vmem:[#allocation3 + $0x120] sm:$0xff]  ;;  %v3430_v61 = vld [vmem:[#allocation3 + $0x198] sm:$0xff] }
 0x38b   : > { %12165 = vrot.lane.b32.xlu0 %v12164_v40, %s13438_s27  ;;  %10534 = vmatprep.mubr.msk.bf16.mxu0 %vm20095_vm4, %v9006_v44  ;;  %v3421_v44 = vld [vmem:[#allocation3 + $0x128] sm:$0xff]  ;;  %v3425_v23 = vld [vmem:[#allocation3 + $0x158] sm:$0xff] }
 0x38c   : > { %v15565_v0 = vpop.permute.xlu1 %11900  ;;  %10535 = vmatmul.mubr.msk.bf16.gmra.mrb[16].mxu0 %vm20095_vm4, %v9007_v27  ;;  %v3427_v27 = vld [vmem:[#allocation3 + $0x170] sm:$0xff]  ;;  %v12194_v45 = vpack.i.bf16 %v3421_v44, %v3420_v4  ;;  %v3447_v18 = vld [vmem:[#allocation3 + $0xe1] sm:$0xff] }
 0x38d   : > { %v15568_v31 = vpop.permute.xlu0 %11885  ;;  %v12209_v54 = vpack.i.bf16 %v3427_v27, %v3426_v1  ;;  %v3428_v1 = vld [vmem:[#allocation3 + $0x180] sm:$0xff]  ;;  %v3429_v27 = vld [vmem:[#allocation3 + $0x188] sm:$0xff] }
 0x38e   : > { %12190 = vrot.lane.b32.xlu1 %v12189_v58, %s13438_s27  ;;  %v3431_v58 = vld [vmem:[#allocation3 + $0x1a0] sm:$0xff]  ;;  %v3434_v4 = vld [vmem:[#allocation3 + $0x49] sm:$0xff] }
 0x38f   : > { %12175 = vrot.lane.b32.xlu0 %v12174_v50, %s13438_s27  ;;  %v3424_v50 = vld [vmem:[#allocation3 + $0x150] sm:$0xff]  ;;  %v12219_v36 = vpack.i.bf16 %v3431_v58, %v3430_v61  ;;  %v3433_v61 = vld [vmem:[#allocation3 + $0x39] sm:$0xff] }
 0x390   : > { %v15572_v3 = vpop.permute.xlu1 %11910 }
 0x391   : > { %20193 = vst [vmem:[#allocation95_spill] sm:$0xff] %v15572_v3  ;;  %v15574_v51 = vpop.permute.xlu0 %11895 }
 0x392   : > { %12200 = vrot.lane.b32.xlu1 %v12199_v47, %s13438_s27  ;;  %v12204_v47 = vpack.i.bf16 %v3425_v23, %v3424_v50  ;;  %v3432_v23 = vld [vmem:[#allocation3 + $0x31] sm:$0xff] }
 0x393   : > { %12185 = vrot.lane.b32.xlu0 %v12184_v53, %s13438_s27  ;;  %v3435_v53 = vld [vmem:[#allocation3 + $0x51] sm:$0xff] }
 0x394   : > { %v15578_v40 = vpop.permute.xlu1 %11920 }
 0x395   : > { %20194 = vst [vmem:[#allocation96_spill] sm:$0xff] %v15578_v40  ;;  %v15580_v55 = vpop.permute.xlu0 %11905  ;;  %v3438_v40 = vld [vmem:[#allocation3 + $0x79] sm:$0xff] }
 0x396   : > { %20195 = vst [vmem:[#allocation97_spill] sm:$0xff] %v15580_v55  ;;  %12210 = vrot.lane.b32.xlu1 %v12209_v54, %s13438_s27  ;;  %v12229_v54 = vpack.i.bf16 %v3435_v53, %v3434_v4  ;;  %v3442_v53 = vld [vmem:[#allocation3 + $0xa9] sm:$0xff]  ;;  %v3443_v4 = vld [vmem:[#allocation3 + $0xb1] sm:$0xff] }
 0x397   : > { %12195 = vrot.lane.b32.xlu0 %v12194_v45, %s13438_s27  ;;  %v12214_v45 = vpack.i.bf16 %v3429_v27, %v3428_v1  ;;  %v15603_v1 = vld [vmem:[%s19760_s4] ss:$0 sm:$0xff] }
 0x398   : > { %v15584_v17 = vpop.permute.xlu1 %11930 }
 0x399   : > { %20196 = vst [vmem:[#allocation98_spill] sm:$0xff] %v15584_v17  ;;  %v15586_v16 = vpop.permute.xlu0 %11915  ;;  %v3439_v17 = vld [vmem:[#allocation3 + $0x81] sm:$0xff] }
 0x39a   : > { %20197 = vst [vmem:[#allocation99_spill] sm:$0xff] %v15586_v16  ;;  %12220 = vrot.lane.b32.xlu1 %v12219_v36, %s13438_s27  ;;  %v12239_v50 = vpack.i.bf16 %v3439_v17, %v3438_v40 }
 0x39b   : > { %12205 = vrot.lane.b32.xlu0 %v12204_v47, %s13438_s27 }
 0x39c   : > { %v15590_v44 = vpop.permute.xlu1 %11940 }
 0x39d   : > { %20198 = vst [vmem:[#allocation100_spill] sm:$0xff] %v15590_v44  ;;  %v15592_v55 = vpop.permute.xlu0 %11925  ;;  %v12224_v44 = vpack.i.bf16 %v3433_v61, %v3432_v23 }
 0x39e   : > { %20199 = vst [vmem:[#allocation101_spill] sm:$0xff] %v15592_v55  ;;  %12230 = vrot.lane.b32.xlu1 %v12229_v54, %s13439_s14  ;;  %v12249_v55 = vpack.i.bf16 %v3443_v4, %v3442_v53 }
 0x39f   : > { %12215 = vrot.lane.b32.xlu0 %v12214_v45, %s13438_s27  ;;  %v3436_v45 = vld [vmem:[#allocation3 + $0x61] sm:$0xff]  ;;  %s10057_s27 = sshll.u32 %s13521_s26, 5 }
 0x3a0   : > { %v15596_v58 = vpop.permute.xlu1 %11950  ;;  %p437_p4 = scmp.lt.s32.totalorder %s10057_s27, 63 }
 0x3a1   : > { %20200 = vst [vmem:[#allocation102_spill] sm:$0xff] %v15596_v58  ;;  %v15598_v36 = vpop.permute.xlu0 %11935  ;;  %v10426_v47 = vpop.f32.mrb[52].mxu1  ;;  %v3437_v58 = vld [vmem:[#allocation3 + $0x69] sm:$0xff] }
 0x3a2   : > { %20201 = vst [vmem:[#allocation103_spill] sm:$0xff] %v15598_v36  ;;  %v2819_v27 = vadd.f32 %v15603_v1, %v10426_v47  ;;  %12240 = vrot.lane.b32.xlu1 %v12239_v50, %s13439_s14  ;;  %v2810_v54 = vpop.f32.mrb[53].mxu1  ;;  %v12234_v3 = vpack.i.bf16 %v3437_v58, %v3436_v45  ;;  %v3446_v50 = vld [vmem:[#allocation3 + $0xd9] sm:$0xff]  ;;  %v3451_v45 = vld [vmem:[#allocation3 + $0x111] sm:$0xff]  ;;  %s21004_s27 = smov (!%p437_p4, %s10057_s27), 63 }
 0x3a3   : > { %12225 = vrot.lane.b32.xlu0 %v12224_v44, %s13439_s14  ;;  %v2811_v40 = vadd.f32 %v15603_v1, %v2810_v54  ;;  %v10427_v17 = vpop.f32.mrb[54].mxu1  ;;  %v3440_v44 = vld [vmem:[#allocation3 + $0x91] sm:$0xff]  ;;  %v3441_v54 = vld [vmem:[#allocation3 + $0x99] sm:$0xff]  ;;  %v12259_v53 = vpack.i.bf16 %v3447_v18, %v3446_v50  ;;  %v3455_v18 = vld [vmem:[#allocation3 + $0x141] sm:$0xff] }
 0x3a4   : > { %v2822_v61 = vadd.f32 %v15603_v1, %v10427_v17  ;;  %v15610_v23 = vpop.permute.xlu1 %11960  ;;  %v2813_v36 = vpop.f32.mrb[55].mxu1  ;;  %v2879_v30 = vmax.f32 %v2819_v27, 0.0  ;;  %v12244_v58 = vpack.i.bf16 %v3441_v54, %v3440_v44  ;;  %v3444_v27 = vld [vmem:[#allocation3 + $0xc1] sm:$0xff] }
 0x3a5   : > { %20202 = vst [vmem:[#allocation104_spill] sm:$0xff] %v15610_v23  ;;  %v15612_v16 = vpop.permute.xlu0 %11945  ;;  %v2814_v47 = vadd.f32 %v15603_v1, %v2813_v36  ;;  %v2877_v42 = vmax.f32 %v2811_v40, 0.0  ;;  %v3450_v36 = vld [vmem:[#allocation3 + $0x109] sm:$0xff] }
 0x3a6   : > { %20203 = vst [vmem:[#allocation105_spill] sm:$0xff] %v15612_v16  ;;  %v2880_v5 = vmax.f32 %v2822_v61, 0.0  ;;  %12250 = vrot.lane.b32.xlu1 %v12249_v55, %s13439_s14  ;;  %v3445_v55 = vld [vmem:[#allocation3 + $0xc9] sm:$0xff]  ;;  %v3449_v61 = vld [vmem:[#allocation3 + $0xf9] sm:$0xff] }
 0x3a7   : > { %v2878_v28 = vmax.f32 %v2814_v47, 0.0  ;;  %12235 = vrot.lane.b32.xlu0 %v12234_v3, %s13439_s14  ;;  %v3448_v3 = vld [vmem:[#allocation3 + $0xf1] sm:$0xff] }
 0x3a8   : > { %v9009_v17 = vpack.c.bf16 %v2880_v5, %v2879_v30  ;;  %v15617_v23 = vpop.permute.xlu1 %11970  ;;  %v12269_v5 = vpack.i.bf16 %v3451_v45, %v3450_v36  ;;  %v12264_v54 = vpack.i.bf16 %v3449_v61, %v3448_v3 }
 0x3a9   : > { %v9008_v4 = vpack.c.bf16 %v2878_v28, %v2877_v42  ;;  %v15619_v16 = vpop.permute.xlu0 %11955  ;;  %v12254_v28 = vpack.i.bf16 %v3445_v55, %v3444_v27  ;;  %v3454_v42 = vld [vmem:[#allocation3 + $0x139] sm:$0xff] }
 0x3aa   : > { %20204 = vst [vmem:[#allocation106_spill] sm:$0xff] %v15619_v16  ;;  %12260 = vrot.lane.b32.xlu1 %v12259_v53, %s13439_s14  ;;  %v12279_v50 = vpack.i.bf16 %v3455_v18, %v3454_v42  ;;  %v3458_v53 = vld [vmem:[#allocation3 + $0x169] sm:$0xff]  ;;  %v3456_v42 = vld [vmem:[#allocation3 + $0x151] sm:$0xff]  ;;  %v3457_v18 = vld [vmem:[#allocation3 + $0x159] sm:$0xff] }
 0x3ab   : > { %12245 = vrot.lane.b32.xlu0 %v12244_v58, %s13439_s14  ;;  %10538 = vmatprep.mubr.msk.bf16.mxu0 %vm20095_vm4, %v9008_v4  ;;  %v3452_v4 = vld [vmem:[#allocation3 + $0x121] sm:$0xff]  ;;  %v3453_v58 = vld [vmem:[#allocation3 + $0x129] sm:$0xff] }
 0x3ac   : > { %v15624_v40 = vpop.permute.xlu1 %11980  ;;  %10539 = vmatmul.mubr.msk.bf16.gmra.mrb[20].mxu0 %vm20095_vm4, %v9009_v17  ;;  %v3459_v17 = vld [vmem:[#allocation3 + $0x171] sm:$0xff]  ;;  %v12274_v55 = vpack.i.bf16 %v3453_v58, %v3452_v4 }
 0x3ad   : > { %20205 = vst [vmem:[#allocation107_spill] sm:$0xff] %v15624_v40  ;;  %v15627_v30 = vpop.permute.xlu0 %11965  ;;  %v12289_v45 = vpack.i.bf16 %v3459_v17, %v3458_v53  ;;  %v3460_v53 = vld [vmem:[#allocation3 + $0x181] sm:$0xff]  ;;  %v3461_v17 = vld [vmem:[#allocation3 + $0x189] sm:$0xff] }
 0x3ae   : > { %20206 = vst [vmem:[#allocation108_spill] sm:$0xff] %v15627_v30  ;;  %12270 = vrot.lane.b32.xlu1 %v12269_v5, %s13439_s14  ;;  %v3462_v5 = vld [vmem:[#allocation3 + $0x199] sm:$0xff]  ;;  %v3466_v4 = vld [vmem:[#allocation3 + $0x4a] sm:$0xff]  ;;  %v3495_v40 = vld [vmem:[#allocation3 + $0x1a2] sm:$0xff] }
 0x3af   : > { %12255 = vrot.lane.b32.xlu0 %v12254_v28, %s13439_s14  ;;  %v3463_v28 = vld [vmem:[#allocation3 + $0x1a1] sm:$0xff] }
 0x3b0   : > { %v15631_v47 = vpop.permute.xlu1 %11990  ;;  %v12299_v61 = vpack.i.bf16 %v3463_v28, %v3462_v5  ;;  %v3471_v5 = vld [vmem:[#allocation3 + $0x82] sm:$0xff]  ;;  %v3465_v28 = vld [vmem:[#allocation3 + $0x3a] sm:$0xff] }
 0x3b1   : > { %20207 = vst [vmem:[#allocation109_spill] sm:$0xff] %v15631_v47  ;;  %v15633_v44 = vpop.permute.xlu0 %11975  ;;  %v3467_v47 = vld [vmem:[#allocation3 + $0x52] sm:$0xff] }
 0x3b2   : > { %20208 = vst [vmem:[#allocation110_spill] sm:$0xff] %v15633_v44  ;;  %12280 = vrot.lane.b32.xlu1 %v12279_v50, %s13439_s14 }
 0x3b3   : > { %12265 = vrot.lane.b32.xlu0 %v12264_v54, %s13439_s14  ;;  %v12284_v54 = vpack.i.bf16 %v3457_v18, %v3456_v42 }
 0x3b4   : > { %v15637_v36 = vpop.permute.xlu1 %12000 }
 0x3b5   : > { %20209 = vst [vmem:[#allocation111_spill] sm:$0xff] %v15637_v36  ;;  %v15639_v27 = vpop.permute.xlu0 %11985  ;;  %v3469_v36 = vld [vmem:[#allocation3 + $0x6a] sm:$0xff] }
 0x3b6   : > { %20210 = vst [vmem:[#allocation112_spill] sm:$0xff] %v15639_v27  ;;  %12290 = vrot.lane.b32.xlu1 %v12289_v45, %s13439_s14  ;;  %v15651_v45 = vpack.i.bf16 %v3467_v47, %v3466_v4 }
 0x3b7   : > { %12275 = vrot.lane.b32.xlu0 %v12274_v55, %s13439_s14  ;;  %v12294_v55 = vpack.i.bf16 %v3461_v17, %v3460_v53  ;;  %v3475_v53 = vld [vmem:[#allocation3 + $0xb2] sm:$0xff] }
 0x3b8   : > { %v15643_v3 = vpop.permute.xlu1 %12010 }
 0x3b9   : > { %20211 = vst [vmem:[#allocation113_spill] sm:$0xff] %v15643_v3  ;;  %v15645_v50 = vpop.permute.xlu0 %11995  ;;  %v3470_v3 = vld [vmem:[#allocation3 + $0x7a] sm:$0xff] }
 0x3ba   : > { %20212 = vst [vmem:[#allocation114_spill] sm:$0xff] %v15645_v50  ;;  %12300 = vrot.lane.b32.xlu1 %v12299_v61, %s13439_s14  ;;  %v15660_v18 = vpack.i.bf16 %v3471_v5, %v3470_v3  ;;  %v3464_v61 = vld [vmem:[#allocation3 + $0x32] sm:$0xff]  ;;  %v3468_v50 = vld [vmem:[#allocation3 + $0x62] sm:$0xff] }
 0x3bb   : > { %12285 = vrot.lane.b32.xlu0 %v12284_v54, %s13439_s14  ;;  %v12304_v4 = vpack.i.bf16 %v3465_v28, %v3464_v61  ;;  %v15675_v16 = vpack.i.bf16 %v3469_v36, %v3468_v50 }
 0x3bc   : > { %v15649_v58 = vpop.permute.xlu1 %12020  ;;  %20216 = vst [vmem:[#allocation118_spill] sm:$0xff] %v15660_v18 }
 0x3bd   : > { %20213 = vst [vmem:[#allocation115_spill] sm:$0xff] %v15649_v58  ;;  %v15653_v27 = vpop.permute.xlu0 %12005 }
 0x3be   : > { %20214 = vst [vmem:[#allocation116_spill] sm:$0xff] %v15653_v27  ;;  %12310 = vrot.lane.b32.xlu1 %v15651_v45, %s13440_s22  ;;  %v3474_v27 = vld [vmem:[#allocation3 + $0xaa] sm:$0xff] }
 0x3bf   : > { %12295 = vrot.lane.b32.xlu0 %v12294_v55, %s13439_s14  ;;  %v12329_v61 = vpack.i.bf16 %v3475_v53, %v3474_v27 }
 0x3c0   : > { %v15658_v42 = vpop.permute.xlu1 %12030 }
 0x3c1   : > { %20215 = vst [vmem:[#allocation117_spill] sm:$0xff] %v15658_v42  ;;  %v15662_v54 = vpop.permute.xlu0 %12015  ;;  %v10430_v47 = vpop.f32.mrb[56].mxu1 }
 0x3c2   : > { %20217 = vst [vmem:[#allocation119_spill] sm:$0xff] %v15662_v54  ;;  %v2835_v17 = vadd.f32 %v15603_v1, %v10430_v47  ;;  %12320 = vrot.lane.b32.xlu1 %v15660_v18, %s13440_s22  ;;  %v2826_v58 = vpop.f32.mrb[57].mxu1 }
 0x3c3   : > { %12305 = vrot.lane.b32.xlu0 %v12304_v4, %s13440_s22  ;;  %v2827_v3 = vadd.f32 %v15603_v1, %v2826_v58  ;;  %v10431_v55 = vpop.f32.mrb[58].mxu1  ;;  %v3472_v58 = vld [vmem:[#allocation3 + $0x92] sm:$0xff]  ;;  %v3473_v4 = vld [vmem:[#allocation3 + $0x9a] sm:$0xff] }
 0x3c4   : > { %v2838_v5 = vadd.f32 %v15603_v1, %v10431_v55  ;;  %v15670_v54 = vpop.permute.xlu1 %12040  ;;  %v2829_v28 = vpop.f32.mrb[59].mxu1  ;;  %v2883_v37 = vmax.f32 %v2835_v17, 0.0  ;;  %v15684_v50 = vpack.i.bf16 %v3473_v4, %v3472_v58  ;;  %v3482_v17 = vld [vmem:[#allocation3 + $0x10a] sm:$0xff]  ;;  %v3481_v58 = vld [vmem:[#allocation3 + $0xfa] sm:$0xff] }
 0x3c5   : > { %20218 = vst [vmem:[#allocation120_spill] sm:$0xff] %v15670_v54  ;;  %v15672_v42 = vpop.permute.xlu0 %12025  ;;  %v2830_v47 = vadd.f32 %v15603_v1, %v2829_v28  ;;  %v2881_v18 = vmax.f32 %v2827_v3, 0.0  ;;  %v3477_v54 = vld [vmem:[#allocation3 + $0xca] sm:$0xff]  ;;  %v3487_v3 = vld [vmem:[#allocation3 + $0x142] sm:$0xff] }
 0x3c6   : > { %20219 = vst [vmem:[#allocation121_spill] sm:$0xff] %v15672_v42  ;;  %v2884_v44 = vmax.f32 %v2838_v5, 0.0  ;;  %12330 = vrot.lane.b32.xlu1 %v12329_v61, %s13440_s22  ;;  %v12339_v42 = vpack.i.bf16 %v3479_v25, %v3478_v2  ;;  %20222 = vst [vmem:[#allocation124_spill] sm:$0xff] %v15684_v50  ;;  %v3483_v5 = vld [vmem:[#allocation3 + $0x112] sm:$0xff]  ;;  %v3476_v61 = vld [vmem:[#allocation3 + $0xc2] sm:$0xff] }
 0x3c7   : > { %v2882_v55 = vmax.f32 %v2830_v47, 0.0  ;;  %12315 = vrot.lane.b32.xlu0 %v15675_v16, %s13440_s22  ;;  %v12349_v25 = vpack.i.bf16 %v3483_v5, %v3482_v17 }
 0x3c8   : > { %v9011_v27 = vpack.c.bf16 %v2884_v44, %v2883_v37  ;;  %v15680_v53 = vpop.permute.xlu1 %12050  ;;  %v12334_v44 = vpack.i.bf16 %v3477_v54, %v3476_v61 }
 0x3c9   : > { %20220 = vst [vmem:[#allocation122_spill] sm:$0xff] %v15680_v53  ;;  %v9010_v28 = vpack.c.bf16 %v2882_v55, %v2881_v18  ;;  %v15682_v36 = vpop.permute.xlu0 %12035  ;;  %v3486_v18 = vld [vmem:[#allocation3 + $0x13a] sm:$0xff] }
 0x3ca   : > { %20221 = vst [vmem:[#allocation123_spill] sm:$0xff] %v15682_v36  ;;  %12340 = vrot.lane.b32.xlu1 %v12339_v42, %s13440_s22  ;;  %v3480_v42 = vld [vmem:[#allocation3 + $0xf2] sm:$0xff]  ;;  %v12359_v17 = vpack.i.bf16 %v3487_v3, %v3486_v18 }
 0x3cb   : > { %12325 = vrot.lane.b32.xlu0 %v15684_v50, %s13440_s22  ;;  %10542 = vmatprep.mubr.msk.bf16.mxu0 %vm20095_vm4, %v9010_v28  ;;  %v12344_v50 = vpack.i.bf16 %v3481_v58, %v3480_v42  ;;  %v3494_v58 = vld [vmem:[#allocation3 + $0x19a] sm:$0xff] }
 0x3cc   : > { %v15690_v37 = vpop.permute.xlu1 %12060  ;;  %10543 = vmatmul.mubr.msk.bf16.gmra.mrb[24].mxu0 %vm20095_vm4, %v9011_v27 }
 0x3cd   : > { %20223 = vst [vmem:[#allocation125_spill] sm:$0xff] %v15690_v37  ;;  %v15693_v2 = vpop.permute.xlu0 %12045  ;;  %v10434_v47 = vpop.f32.mrb[60].mxu1 }
 0x3ce   : > { %20224 = vst [vmem:[#allocation126_spill] sm:$0xff] %v15693_v2  ;;  %12350 = vrot.lane.b32.xlu1 %v12349_v25, %s13440_s22  ;;  %v2851_v4 = vadd.f32 %v15603_v1, %v10434_v47  ;;  %v2842_v55 = vpop.f32.mrb[61].mxu1  ;;  %v3490_v25 = vld [vmem:[#allocation3 + $0x16a] sm:$0xff]  ;;  %v3491_v2 = vld [vmem:[#allocation3 + $0x172] sm:$0xff]  ;;  %v3484_v47 = vld [vmem:[#allocation3 + $0x122] sm:$0xff] }
 0x3cf   : > { %12335 = vrot.lane.b32.xlu0 %v12334_v44, %s13440_s22  ;;  %v2843_v28 = vadd.f32 %v15603_v1, %v2842_v55  ;;  %v10435_v36 = vpop.f32.mrb[62].mxu1  ;;  %v3485_v44 = vld [vmem:[#allocation3 + $0x12a] sm:$0xff] }
 0x3d0   : > { %v15699_v27 = vpop.permute.xlu1 %12070  ;;  %v2854_v54 = vadd.f32 %v15603_v1, %v10435_v36  ;;  %v2845_v5 = vpop.f32.mrb[63].mxu1  ;;  %v2887_v53 = vmax.f32 %v2851_v4, 0.0  ;;  %v12369_v36 = vpack.i.bf16 %v3491_v2, %v3490_v25  ;;  %v12354_v42 = vpack.i.bf16 %v3485_v44, %v3484_v47  ;;  %v3498_v4 = vld [vmem:[#allocation3 + $0x4b] sm:$0xff] }
 0x3d1   : > { %20225 = vst [vmem:[#allocation127_spill] sm:$0xff] %v15699_v27  ;;  %v15702_v61 = vpop.permute.xlu0 %12055  ;;  %v2846_v37 = vadd.f32 %v15603_v1, %v2845_v5  ;;  %v2885_v27 = vmax.f32 %v2843_v28, 0.0  ;;  %v3489_v5 = vld [vmem:[#allocation3 + $0x15a] sm:$0xff]  ;;  %v3493_v25 = vld [vmem:[#allocation3 + $0x18a] sm:$0xff] }
 0x3d2   : > { %20226 = vst [vmem:[#allocation128_spill] sm:$0xff] %v15702_v61  ;;  %12360 = vrot.lane.b32.xlu1 %v12359_v17, %s13440_s22  ;;  %v2888_v55 = vmax.f32 %v2854_v54, 0.0  ;;  %v3488_v17 = vld [vmem:[#allocation3 + $0x152] sm:$0xff]  ;;  %v3492_v54 = vld [vmem:[#allocation3 + $0x182] sm:$0xff] }
 0x3d3   : > { %12345 = vrot.lane.b32.xlu0 %v12344_v50, %s13440_s22  ;;  %v2886_v18 = vmax.f32 %v2846_v37, 0.0  ;;  %v12379_v37 = vpack.i.bf16 %v3495_v40, %v3494_v58  ;;  %v12364_v2 = vpack.i.bf16 %v3489_v5, %v3488_v17  ;;  %v3499_v28 = vld [vmem:[#allocation3 + $0x53] sm:$0xff]  ;;  %v12374_v44 = vpack.i.bf16 %v3493_v25, %v3492_v54  ;;  %v3506_v5 = vld [vmem:[#allocation3 + $0xab] sm:$0xff]  ;;  %v3510_v25 = vld [vmem:[#allocation3 + $0xdb] sm:$0xff] }
 0x3d4   : > { %v15707_v3 = vpop.permute.xlu1 %12080  ;;  %v9013_v30 = vpack.c.bf16 %v2888_v55, %v2887_v53  ;;  %v15727_v40 = vpack.i.bf16 %v3499_v28, %v3498_v4  ;;  %v3502_v55 = vld [vmem:[#allocation3 + $0x7b] sm:$0xff]  ;;  %v20236_v58 = vpack.c.bf16 %v13964_v19, %v13960_v15  ;;  %v3500_v4 = vld [vmem:[#allocation3 + $0x63] sm:$0xff]  ;;  %v3501_v28 = vld [vmem:[#allocation3 + $0x6b] sm:$0xff] }
 0x3d5   : > { %20227 = vst [vmem:[#allocation129_spill] sm:$0xff] %v15707_v3  ;;  %v15709_v61 = vpop.permute.xlu0 %12065  ;;  %v9012_v1 = vpack.c.bf16 %v2886_v18, %v2885_v27  ;;  %v20231_v27 = vpack.c.bf16 %v13972_v21, %v13970_v20  ;;  %v3503_v18 = vld [vmem:[#allocation3 + $0x83] sm:$0xff]  ;;  %v3496_v20 = vld [vmem:[#allocation3 + $0x33] sm:$0xff]  ;;  %v3497_v21 = vld [vmem:[#allocation3 + $0x3b] sm:$0xff]  ;;  %v15757_v54 = vpack.i.bf16 %v3501_v28, %v3500_v4 }
 0x3d6   : > { %20228 = vst [vmem:[#allocation130_spill] sm:$0xff] %v15709_v61  ;;  %12370 = vrot.lane.b32.xlu1 %v12369_v36, %s13440_s22  ;;  %v12384_v17 = vpack.i.bf16 %v3497_v21, %v3496_v20  ;;  %v20242_v20 = vpack.c.bf16 %v13994_v34, %v13984_v29  ;;  %v3509_v4 = vld [vmem:[#allocation3 + $0xcb] sm:$0xff]  ;;  %v11502_v61 = vunpack.i.l.bf16 %v15242_v12  ;;  %v3105_v3 = vld [vmem:[#allocation3 + $0x138] sm:$0xff] }
 0x3d7   : > { %12355 = vrot.lane.b32.xlu0 %v12354_v42, %s13440_s22  ;;  %10546 = vmatprep.mubr.msk.bf16.mxu0 %vm20095_vm4, %v9012_v1  ;;  %v15736_v42 = vpack.i.bf16 %v3503_v18, %v3502_v55 }
 0x3d8   : > { %v15714_v50 = vpop.permute.xlu1 %12090  ;;  %10547 = vmatmul.mubr.msk.bf16.gmra.mrb[28].mxu0 %vm20095_vm4, %v9013_v30 }
 0x3d9   : > { %20229 = vst [vmem:[#allocation131_spill] sm:$0xff] %v15714_v50  ;;  %v15717_v53 = vpop.permute.xlu0 %12075  ;;  %10552 = vmatprep.mubr.msk.bf16.mxu0 %vm20095_vm4, %v20231_v27  ;;  %20235 = vst [vmem:[#allocation136_spill] sm:$0xff] %v15736_v42 }
 0x3da   : > { %20230 = vst [vmem:[#allocation132_spill] sm:$0xff] %v15717_v53  ;;  %12380 = vrot.lane.b32.xlu1 %v12379_v37, %s13440_s22  ;;  %v3507_v37 = vld [vmem:[#allocation3 + $0xb3] sm:$0xff] }
 0x3db   : > { %12365 = vrot.lane.b32.xlu0 %v12364_v2, %s13440_s22  ;;  %v20238_v2 = vpack.c.bf16 %v13996_v35, %v13987_v32  ;;  %v15753_v19 = vpack.i.bf16 %v3507_v37, %v3506_v5  ;;  %v3504_v32 = vld [vmem:[#allocation3 + $0x93] sm:$0xff]  ;;  %v3505_v35 = vld [vmem:[#allocation3 + $0x9b] sm:$0xff]  ;;  %v20245_v37 = vpack.c.bf16 %v14020_v49, %v14011_v46 }
 0x3dc   : > { %v15725_v47 = vpop.permute.xlu1 %12100  ;;  %v3515_v5 = vld [vmem:[#allocation3 + $0x113] sm:$0xff]  ;;  %v3513_v49 = vld [vmem:[#allocation3 + $0xfb] sm:$0xff] }
 0x3dd   : > { %20232 = vst [vmem:[#allocation133_spill] sm:$0xff] %v15725_v47  ;;  %v15729_v30 = vpop.permute.xlu0 %12085  ;;  %20240 = vst [vmem:[#allocation139_spill] sm:$0xff] %v15753_v19  ;;  %v3512_v46 = vld [vmem:[#allocation3 + $0xf3] sm:$0xff] }
 0x3de   : > { %20233 = vst [vmem:[#allocation134_spill] sm:$0xff] %v15729_v30  ;;  %12390 = vrot.lane.b32.xlu1 %v15727_v40, %s13441_s23  ;;  %v15879_v30 = vld [vmem:[#allocation3 + $0x90] sm:$0xff] }
 0x3df   : > { %12375 = vrot.lane.b32.xlu0 %v12374_v44, %s13440_s22  ;;  %v3511_v44 = vld [vmem:[#allocation3 + $0xe3] sm:$0xff]  ;;  %v20278_v47 = vld [vmem:[#allocation33_spill] sm:$0xff] }
 0x3e0   : > { %v15734_v36 = vpop.permute.xlu1 %12110  ;;  %10553 = vmatmul.mubr.msk.bf16.vlgmr.msra.gmra.mrb[0].mxu0 %vm20095_vm4, %v20236_v58  ;;  %v12419_v18 = vpack.i.bf16 %v3511_v44, %v3510_v25  ;;  %v15771_v58 = vpack.i.bf16 %v3505_v35, %v3504_v32  ;;  %v3518_v44 = vld [vmem:[#allocation3 + $0x13b] sm:$0xff]  ;;  %v3519_v32 = vld [vmem:[#allocation3 + $0x143] sm:$0xff]  ;;  %v11298_v53 = vunpack.i.h.bf16 %v20278_v47  ;;  %v11297_v50 = vunpack.i.l.bf16 %v20278_v47 }
 0x3e1   : > { %20234 = vst [vmem:[#allocation135_spill] sm:$0xff] %v15734_v36  ;;  %v15742_v1 = vpop.permute.xlu0 %12095  ;;  %10556 = vmatprep.mubr.msk.bf16.mxu0 %vm20095_vm4, %v20238_v2  ;;  %v3508_v2 = vld [vmem:[#allocation3 + $0xc3] sm:$0xff] }
 0x3e2   : > { %20237 = vst [vmem:[#allocation137_spill] sm:$0xff] %v15742_v1  ;;  %12400 = vrot.lane.b32.xlu1 %v15736_v42, %s13441_s23  ;;  %20244 = vst [vmem:[#allocation142_spill] sm:$0xff] %v15771_v58  ;;  %v15784_v25 = vpack.i.bf16 %v3509_v4, %v3508_v2  ;;  %v3523_v2 = vld [vmem:[#allocation3 + $0x173] sm:$0xff]  ;;  %v20251_v4 = vpack.c.bf16 %v14044_v63, %v14035_v60  ;;  %v3521_v60 = vld [vmem:[#allocation3 + $0x15b] sm:$0xff] }
 0x3e3   : > { %12385 = vrot.lane.b32.xlu0 %v12384_v17, %s13441_s23  ;;  %v3514_v17 = vld [vmem:[#allocation3 + $0x10b] sm:$0xff]  ;;  %v15877_v36 = vld [vmem:[#allocation3 + $0x82] sm:$0xff] }
 0x3e4   : > { %v15751_v15 = vpop.permute.xlu1 %12120  ;;  %v12429_v34 = vpack.i.bf16 %v3515_v5, %v3514_v17  ;;  %20247 = vst [vmem:[#allocation144_spill] sm:$0xff] %v15784_v25  ;;  %v12424_v5 = vpack.i.bf16 %v3513_v49, %v3512_v46  ;;  %v3526_v46 = vld [vmem:[#allocation3 + $0x19b] sm:$0xff]  ;;  %v3527_v49 = vld [vmem:[#allocation3 + $0x1a3] sm:$0xff] }
 0x3e5   : > { %20239 = vst [vmem:[#allocation138_spill] sm:$0xff] %v15751_v15  ;;  %v15755_v27 = vpop.permute.xlu0 %12105 }
 0x3e6   : > { %20241 = vst [vmem:[#allocation140_spill] sm:$0xff] %v15755_v27  ;;  %12410 = vrot.lane.b32.xlu1 %v15753_v19, %s13441_s23  ;;  %v11482_v19 = vunpack.i.l.bf16 %v15280_v14 }
 0x3e7   : > { %12395 = vrot.lane.b32.xlu0 %v15757_v54, %s13441_s23 }
 0x3e8   : > { %v15763_v55 = vpop.permute.xlu1 %12130  ;;  %10557 = vmatmul.mubr.msk.bf16.gmra.mrb[4].mxu0 %vm20095_vm4, %v20242_v20  ;;  %v20249_v20 = vpack.c.bf16 %v14018_v48, %v14008_v43 }
 0x3e9   : > { %v15769_v21 = vpop.permute.xlu0 %12115  ;;  %10560 = vmatprep.mubr.msk.bf16.mxu0 %vm20095_vm4, %v20245_v37  ;;  %v3522_v37 = vld [vmem:[#allocation3 + $0x16b] sm:$0xff] }
 0x3ea   : > { %20243 = vst [vmem:[#allocation141_spill] sm:$0xff] %v15769_v21  ;;  %12420 = vrot.lane.b32.xlu1 %v12419_v18, %s13441_s23  ;;  %v12439_v18 = vpack.i.bf16 %v3519_v32, %v3518_v44  ;;  %v12449_v43 = vpack.i.bf16 %v3523_v2, %v3522_v37  ;;  %v20268_v21 = vld [vmem:[#allocation10_spill] sm:$0xff] }
 0x3eb   : > { %12405 = vrot.lane.b32.xlu0 %v15771_v58, %s13441_s23  ;;  %v11573_v58 = vunpack.i.h.bf16 %v15339_v22 }
 0x3ec   : > { %v15780_v29 = vpop.permute.xlu1 %12140 }
 0x3ed   : > { %v15782_v28 = vpop.permute.xlu0 %12125 }
 0x3ee   : > { %20246 = vst [vmem:[#allocation143_spill] sm:$0xff] %v15782_v28  ;;  %12430 = vrot.lane.b32.xlu1 %v12429_v34, %s13441_s23  ;;  %v3516_v34 = vld [vmem:[#allocation3 + $0x123] sm:$0xff]  ;;  %v20281_v28 = vld [vmem:[#allocation9_spill] sm:$0xff] }
 0x3ef   : > { %12415 = vrot.lane.b32.xlu0 %v15784_v25, %s13441_s23  ;;  %v3106_v25 = vld [vmem:[#allocation3 + $0x140] sm:$0xff] }
 0x3f0   : > { %v15789_v35 = vpop.permute.xlu1 %12150  ;;  %10561 = vmatmul.mubr.msk.bf16.gmra.mrb[8].mxu0 %vm20095_vm4, %v20249_v20  ;;  %v3520_v20 = vld [vmem:[#allocation3 + $0x153] sm:$0xff] }
 0x3f1   : > { %20248 = vst [vmem:[#allocation145_spill] sm:$0xff] %v15789_v35  ;;  %v15795_v17 = vpop.permute.xlu0 %12135  ;;  %10564 = vmatprep.mubr.msk.bf16.mxu0 %vm20095_vm4, %v20251_v4  ;;  %v3517_v35 = vld [vmem:[#allocation3 + $0x12b] sm:$0xff]  ;;  %v12444_v2 = vpack.i.bf16 %v3521_v60, %v3520_v20  ;;  %v3531_v4 = vld [vmem:[#allocation3 + $0x54] sm:$0xff]  ;;  %v3534_v20 = vld [vmem:[#allocation3 + $0x7c] sm:$0xff] }
 0x3f2   : > { %20250 = vst [vmem:[#allocation146_spill] sm:$0xff] %v15795_v17  ;;  %12440 = vrot.lane.b32.xlu1 %v12439_v18, %s13441_s23  ;;  %v12434_v32 = vpack.i.bf16 %v3517_v35, %v3516_v34  ;;  %v12459_v18 = vpack.i.bf16 %v3527_v49, %v3526_v46  ;;  %v3530_v35 = vld [vmem:[#allocation3 + $0x4c] sm:$0xff]  ;;  %v3535_v60 = vld [vmem:[#allocation3 + $0x84] sm:$0xff]  ;;  %v11572_v17 = vunpack.i.l.bf16 %v15339_v22 }
 0x3f3   : > { %12425 = vrot.lane.b32.xlu0 %v12424_v5, %s13441_s23  ;;  %v20255_v5 = vpack.c.bf16 %v14042_v62, %v14032_v57  ;;  %v20257_v34 = vld [vmem:[#allocation8_spill] sm:$0xff]  ;;  %v15825_v57 = vpack.i.bf16 %v3531_v4, %v3530_v35  ;;  %v20263_v35 = vld [vmem:[#allocation7_spill] sm:$0xff]  ;;  %v20264_v4 = vld [vmem:[#allocation5_spill] sm:$0xff] }
 0x3f4   : > { %v15803_v44 = vpop.permute.xlu1 %12160  ;;  %v13393_v22 = vld [vmem:[#allocation3 + $0x128] sm:$0xff] }
 0x3f5   : > { %20252 = vst [vmem:[#allocation147_spill] sm:$0xff] %v15803_v44  ;;  %v15805_v48 = vpop.permute.xlu0 %12145  ;;  %v20267_v44 = vld [vmem:[#allocation12_spill] sm:$0xff] }
 0x3f6   : > { %20253 = vst [vmem:[#allocation148_spill] sm:$0xff] %v15805_v48  ;;  %12450 = vrot.lane.b32.xlu1 %v12449_v43, %s13441_s23  ;;  %v20258_v48 = vld [vmem:[#allocation6_spill] sm:$0xff]  ;;  %v20269_v27 = vpack.c.bf16 %v20267_v44, %v20268_v21  ;;  %v15865_v44 = vld [vmem:[#allocation3 + $0x81] sm:$0xff] }
 0x3f7   : > { %12435 = vrot.lane.b32.xlu0 %v12434_v32, %s13441_s23  ;;  %v20259_v43 = vpack.c.bf16 %v20257_v34, %v20258_v48  ;;  %v3524_v32 = vld [vmem:[#allocation3 + $0x183] sm:$0xff]  ;;  %v3528_v48 = vld [vmem:[#allocation3 + $0x34] sm:$0xff] }
 0x3f8   : > { %v15809_v63 = vpop.permute.xlu1 %12170  ;;  %10565 = vmatmul.mubr.msk.bf16.gmra.mrb[12].mxu0 %vm20095_vm4, %v20255_v5  ;;  %v3529_v5 = vld [vmem:[#allocation3 + $0x3c] sm:$0xff]  ;;  %v3532_v34 = vld [vmem:[#allocation3 + $0x64] sm:$0xff] }
 0x3f9   : > { %20254 = vst [vmem:[#allocation149_spill] sm:$0xff] %v15809_v63  ;;  %v15815_v37 = vpop.permute.xlu0 %12155  ;;  %10568 = vmatprep.mubr.msk.bf16.mxu0 %vm20095_vm4, %v20259_v43  ;;  %v3525_v63 = vld [vmem:[#allocation3 + $0x18b] sm:$0xff]  ;;  %v20265_v43 = vpack.c.bf16 %v20263_v35, %v20264_v4  ;;  %v15859_v35 = vld [vmem:[#allocation3 + $0x80] sm:$0xff] }
 0x3fa   : > { %20256 = vst [vmem:[#allocation150_spill] sm:$0xff] %v15815_v37  ;;  %12460 = vrot.lane.b32.xlu1 %v12459_v18, %s13441_s23  ;;  %v12454_v49 = vpack.i.bf16 %v3525_v63, %v3524_v32  ;;  %v12464_v32 = vpack.i.bf16 %v3529_v5, %v3528_v48  ;;  %v3537_v37 = vld [vmem:[#allocation3 + $0x9c] sm:$0xff]  ;;  %v15855_v48 = vld [vmem:[#allocation3 + $0x69] sm:$0xff] }
 0x3fb   : > { %12445 = vrot.lane.b32.xlu0 %v12444_v2, %s13441_s23  ;;  %v15834_v2 = vpack.i.bf16 %v3535_v60, %v3534_v20  ;;  %v15850_v20 = vld [vmem:[#allocation3 + $0x68] sm:$0xff]  ;;  %v15857_v5 = vld [vmem:[#allocation3 + $0x78] sm:$0xff] }
 0x3fc   : > { %v15823_v46 = vpop.permute.xlu1 %12180  ;;  %v15852_v60 = vld [vmem:[#allocation3 + $0x61] sm:$0xff] }
 0x3fd   : > { %20260 = vst [vmem:[#allocation8_spill] sm:$0xff] %v15823_v46  ;;  %v15827_v62 = vpop.permute.xlu0 %12165  ;;  %v3536_v46 = vld [vmem:[#allocation3 + $0x94] sm:$0xff] }
 0x3fe   : > { %20261 = vst [vmem:[#allocation6_spill] sm:$0xff] %v15827_v62  ;;  %12470 = vrot.lane.b32.xlu1 %v15825_v57, %s13442_s24  ;;  %v3533_v62 = vld [vmem:[#allocation3 + $0x6c] sm:$0xff]  ;;  %v15867_v4 = vld [vmem:[#allocation3 + $0x7a] sm:$0xff]  ;;  %v15875_v1 = vpack.i.bf16 %v3537_v37, %v3536_v46  ;;  %v5828_v37 = vsel %vm20096_vm2, %v3105_v3, %v11297_v50 }
 0x3ff   : > { %12455 = vrot.lane.b32.xlu0 %v12454_v49, %s13441_s23  ;;  %v15848_v49 = vld [vmem:[#allocation3 + $0x60] sm:$0xff]  ;;  %20271 = vst [vmem:[#allocation12_spill] sm:$0xff] %v15867_v4  ;;  %v20279_v46 = vld [vmem:[#allocation34_spill] sm:$0xff]  ;;  %v13395_v50 = vld [vmem:[#allocation3 + $0x170] sm:$0xff] }
 0x400   : > { %v15832_v18 = vpop.permute.xlu1 %12190  ;;  %10569 = vmatmul.mubr.msk.bf16.gmra.mrb[16].mxu0 %vm20095_vm4, %v20265_v43  ;;  %v20272_v43 = vld [vmem:[#allocation21_spill] sm:$0xff]  ;;  %v20285_v4 = vld [vmem:[#allocation14_spill] sm:$0xff] }
 0x401   : > { %20262 = vst [vmem:[#allocation151_spill] sm:$0xff] %v15832_v18  ;;  %v15840_v63 = vpop.permute.xlu0 %12175  ;;  %10572 = vmatprep.mubr.msk.bf16.mxu0 %vm20095_vm4, %v20269_v27  ;;  %v15863_v27 = vld [vmem:[#allocation3 + $0x79] sm:$0xff]  ;;  %20275 = vst [vmem:[#allocation21_spill] sm:$0xff] %v15877_v36 }
 0x402   : > { %20266 = vst [vmem:[#allocation7_spill] sm:$0xff] %v15840_v63  ;;  %12480 = vrot.lane.b32.xlu1 %v15834_v2, %s13442_s24  ;;  %v20273_v63 = vld [vmem:[#allocation22_spill] sm:$0xff] }
 0x403   : > { %12465 = vrot.lane.b32.xlu0 %v12464_v32, %s13442_s24  ;;  %v15873_v32 = vpack.i.bf16 %v3533_v62, %v3532_v34  ;;  %20276 = vst [vmem:[#allocation22_spill] sm:$0xff] %v15879_v30  ;;  %v11343_v62 = vunpack.i.h.bf16 %v20279_v46  ;;  %v11342_v34 = vunpack.i.l.bf16 %v20279_v46  ;;  %v5829_v46 = vsel %vm20096_vm2, %v3106_v25, %v11298_v53  ;;  %v13396_v25 = vld [vmem:[#allocation3 + $0x168] sm:$0xff] }
 0x404   : > { %v15861_v21 = vpop.permute.xlu1 %12200  ;;  %v11583_v30 = vunpack.i.h.bf16 %v15345_v13 }
 0x405   : > { %20270 = vst [vmem:[#allocation5_spill] sm:$0xff] %v15861_v21  ;;  %v15871_v15 = vpop.permute.xlu0 %12185  ;;  %v15881_v21 = vld [vmem:[#allocation3 + $0x98] sm:$0xff] }
 0x406   : > { %20274 = vst [vmem:[#allocation10_spill] sm:$0xff] %v15871_v15  ;;  %20277 = vst [vmem:[#allocation152_spill] sm:$0xff] %v15881_v21  ;;  %12490 = vrot.lane.b32.xlu1 %v15651_v45, %s13428_s18  ;;  %v11503_v15 = vunpack.i.h.bf16 %v15242_v12  ;;  %v11483_v12 = vunpack.i.h.bf16 %v15280_v14  ;;  %v20280_v45 = vld [vmem:[#allocation11_spill] sm:$0xff]  ;;  %v11582_v21 = vunpack.i.l.bf16 %v15345_v13  ;;  %v20284_v14 = vld [vmem:[#allocation16_spill] sm:$0xff]  ;;  %v5832_v13 = vsel %vm20096_vm2, %v13396_v25, %v11502_v61 }
 0x407   : > { %12475 = vrot.lane.b32.xlu0 %v15873_v32, %s13442_s24  ;;  %v20282_v42 = vpack.c.bf16 %v20280_v45, %v20281_v28  ;;  %v20286_v36 = vpack.c.bf16 %v20284_v14, %v20285_v4  ;;  %v13394_v28 = vld [vmem:[#allocation3 + $0x120] sm:$0xff]  ;;  %v11567_v4 = vunpack.i.l.bf16 %v15347_v33  ;;  %v5861_v61 = vsel %vm20095_vm4, %v5829_v46, %v11573_v58 }
 0x408   : > { %v15897_v47 = vpop.permute.xlu1 %12210  ;;  %v5826_v3 = vsel %vm20096_vm2, %v13394_v28, %v11342_v34  ;;  %v5833_v53 = vsel %vm20096_vm2, %v13395_v50, %v11503_v15  ;;  %v13397_v34 = vld [vmem:[#allocation3 + $0x158] sm:$0xff]  ;;  %v13398_v15 = vld [vmem:[#allocation3 + $0x150] sm:$0xff]  ;;  %v5860_v28 = vsel %vm20095_vm4, %v5828_v37, %v11572_v17  ;;  %v11648_v58 = vunpack.i.h.bf16 %v15401_v10 }
 0x409   : > { %10573 = vmatmul.mubr.msk.bf16.gmra.mrb[20].mxu0 %vm20095_vm4, %v20282_v42  ;;  %v15915_v18 = vpop.permute.xlu0 %12195  ;;  %v5827_v42 = vsel %vm20096_vm2, %v13393_v22, %v11343_v62  ;;  %v11577_v62 = vunpack.i.l.bf16 %v15353_v39  ;;  %v5831_v14 = vsel %vm20096_vm2, %v13397_v34, %v11483_v12  ;;  %v5830_v22 = vsel %vm20096_vm2, %v13398_v15, %v11482_v19  ;;  %v20289_v34 = vld [vmem:[#allocation13_spill] sm:$0xff] }
 0x40a   : > { %20283 = vst [vmem:[#allocation33_spill] sm:$0xff] %v15915_v18  ;;  %10576 = vmatprep.mubr.msk.bf16.mxu0 %vm20095_vm4, %v20286_v36  ;;  %12500 = vrot.lane.b32.xlu1 %v15727_v40, %s13430_s20  ;;  %v11568_v36 = vunpack.i.h.bf16 %v15347_v33  ;;  %v11578_v40 = vunpack.i.h.bf16 %v15353_v39  ;;  %v5864_v33 = vsel %vm20095_vm4, %v5832_v13, %v11582_v21  ;;  %v5865_v25 = vsel %vm20095_vm4, %v5833_v53, %v11583_v30  ;;  %v20288_v13 = vld [vmem:[#allocation15_spill] sm:$0xff] }
 0x40b   : > { %12485 = vrot.lane.b32.xlu0 %v15875_v1, %s13442_s24  ;;  %v11653_v39 = vunpack.i.h.bf16 %v15393_v59  ;;  %v11652_v18 = vunpack.i.l.bf16 %v15393_v59  ;;  %v11663_v12 = vunpack.i.h.bf16 %v15399_v9  ;;  %v11662_v19 = vunpack.i.l.bf16 %v15399_v9 }
 0x40c   : > { %v15937_v45 = vpop.permute.xlu1 %12220  ;;  %v11647_v17 = vunpack.i.l.bf16 %v15401_v10  ;;  %v5858_v30 = vsel %vm20095_vm4, %v5826_v3, %v11567_v4  ;;  %v5859_v21 = vsel %vm20095_vm4, %v5827_v42, %v11568_v36  ;;  %v5862_v59 = vsel %vm20095_vm4, %v5830_v22, %v11577_v62 }
 0x40d   : > { %v15943_v50 = vpop.permute.xlu0 %12205  ;;  %v5863_v37 = vsel %vm20095_vm4, %v5831_v14, %v11578_v40  ;;  %v11658_v46 = vunpack.i.h.bf16 %v15407_v11  ;;  %v11657_v9 = vunpack.i.l.bf16 %v15407_v11  ;;  %v11733_v53 = vunpack.i.h.bf16 %v15447_v26 }
 0x40e   : > { %12510 = vrot.lane.b32.xlu1 %v15825_v57, %s13434_s28  ;;  %v11732_v10 = vunpack.i.l.bf16 %v15447_v26  ;;  %v20290_v15 = vpack.c.bf16 %v20288_v13, %v20289_v34  ;;  %v5892_v3 = vsel %vm2403_vm5, %v5860_v28, %v11652_v18  ;;  %v5893_v36 = vsel %vm2403_vm5, %v5861_v61, %v11653_v39  ;;  %v20298_v13 = vld [vmem:[#allocation17_spill] sm:$0xff] }
 0x40f   : > { %12495 = vrot.lane.b32.xlu0 %v15675_v16, %s13428_s18  ;;  %v11743_v4 = vunpack.i.h.bf16 %v15453_v8  ;;  %v11742_v40 = vunpack.i.l.bf16 %v15453_v8  ;;  %v20291_v11 = vpack.c.bf16 %v20273_v63, %v20272_v43  ;;  %v20292_v26 = vpack.i.bf16 %v15850_v20, %v15848_v49 }
 0x410   : > { %v15961_v57 = vpop.permute.xlu1 %12230  ;;  %v5896_v62 = vsel %vm2403_vm5, %v5864_v33, %v11662_v19  ;;  %v5897_v18 = vsel %vm2403_vm5, %v5865_v25, %v11663_v12  ;;  %v5890_v14 = vsel %vm2403_vm5, %v5858_v30, %v11647_v17  ;;  %v5891_v22 = vsel %vm2403_vm5, %v5859_v21, %v11648_v58 }
 0x411   : > { %20287 = vst [vmem:[#allocation34_spill] sm:$0xff] %v15961_v57  ;;  %10577 = vmatmul.mubr.msk.bf16.gmra.mrb[24].mxu0 %vm20095_vm4, %v20290_v15  ;;  %v15971_v42 = vpop.permute.xlu0 %12215  ;;  %v11728_v8 = vunpack.i.h.bf16 %v15455_v7  ;;  %v11727_v63 = vunpack.i.l.bf16 %v15455_v7  ;;  %v11738_v43 = vunpack.i.h.bf16 %v15461_v24  ;;  %v11737_v49 = vunpack.i.l.bf16 %v15461_v24  ;;  %v16371_v57 = vld [vmem:[#allocation3 + $0x120] sm:$0xff] }
 0x412   : > { %10580 = vmatprep.mubr.msk.bf16.mxu0 %vm20095_vm4, %v20291_v11  ;;  %12520 = vrot.lane.b32.xlu1 %v20292_v26, %s13435_s29  ;;  %v5894_v61 = vsel %vm2403_vm5, %v5862_v59, %v11657_v9  ;;  %v5895_v28 = vsel %vm2403_vm5, %v5863_v37, %v11658_v46  ;;  %v5924_v33 = vsel %vm2436_vm6, %v5892_v3, %v11732_v10  ;;  %v11813_v19 = vunpack.i.h.bf16 %v15505_v6  ;;  %v20297_v10 = vld [vmem:[#allocation18_spill] sm:$0xff] }
 0x413   : > { %12505 = vrot.lane.b32.xlu0 %v15757_v54, %s13430_s20  ;;  %v5925_v25 = vsel %vm2436_vm6, %v5893_v36, %v11733_v53  ;;  %v5928_v12 = vsel %vm2436_vm6, %v5896_v62, %v11742_v40  ;;  %v5929_v7 = vsel %vm2436_vm6, %v5897_v18, %v11743_v4  ;;  %v11812_v24 = vunpack.i.l.bf16 %v15505_v6  ;;  %20368 = vst [vmem:[#allocation160_spill] sm:$0xff] %v16371_v57 }
 0x414   : > { %v15995_v20 = vpop.permute.xlu1 %12240  ;;  %v20295_v58 = vpack.i.bf16 %v15855_v48, %v15852_v60  ;;  %v11823_v17 = vunpack.i.h.bf16 %v15512_v41  ;;  %v11822_v30 = vunpack.i.l.bf16 %v15512_v41  ;;  %v11808_v21 = vunpack.i.h.bf16 %v15514_v52 }
 0x415   : > { %20293 = vst [vmem:[#allocation11_spill] sm:$0xff] %v15995_v20  ;;  %v16001_v39 = vpop.permute.xlu0 %12225  ;;  %v11807_v59 = vunpack.i.l.bf16 %v15514_v52  ;;  %v5922_v37 = vsel %vm2436_vm6, %v5890_v14, %v11727_v63  ;;  %v5923_v6 = vsel %vm2436_vm6, %v5891_v22, %v11728_v8  ;;  %v5926_v46 = vsel %vm2436_vm6, %v5894_v61, %v11737_v49  ;;  %v3644_v20 = vld [vmem:[#allocation3 + $0x12a] sm:$0xff] }
 0x416   : > { %20294 = vst [vmem:[#allocation9_spill] sm:$0xff] %v16001_v39  ;;  %12530 = vrot.lane.b32.xlu1 %v20295_v58, %s13436_s30  ;;  %v5927_v60 = vsel %vm2436_vm6, %v5895_v28, %v11738_v43  ;;  %v11818_v9 = vunpack.i.h.bf16 %v15520_v38  ;;  %v11817_v41 = vunpack.i.l.bf16 %v15520_v38  ;;  %v11893_v53 = vunpack.i.h.bf16 %v15558_v56  ;;  %v20304_v28 = vld [vmem:[#allocation107_spill] sm:$0xff] }
 0x417   : > { %12515 = vrot.lane.b32.xlu0 %v15873_v32, %s13434_s28  ;;  %v11892_v52 = vunpack.i.l.bf16 %v15558_v56  ;;  %v20299_v34 = vpack.c.bf16 %v20297_v10, %v20298_v13  ;;  %v5956_v3 = vsel %vm2469_vm7, %v5924_v33, %v11812_v24  ;;  %v5957_v36 = vsel %vm2469_vm7, %v5925_v25, %v11813_v19  ;;  %v3643_v39 = vld [vmem:[#allocation3 + $0x122] sm:$0xff] }
 0x418   : > { %v16021_v48 = vpop.permute.xlu1 %12250  ;;  %v11903_v4 = vunpack.i.h.bf16 %v15565_v0  ;;  %v11902_v40 = vunpack.i.l.bf16 %v15565_v0  ;;  %v5961_v38 = vsel %vm2469_vm7, %v5929_v7, %v11823_v17  ;;  %v5960_v56 = vsel %vm2469_vm7, %v5928_v12, %v11822_v30  ;;  %v20305_v12 = vld [vmem:[#allocation108_spill] sm:$0xff] }
 0x419   : > { %20296 = vst [vmem:[#allocation16_spill] sm:$0xff] %v16021_v48  ;;  %10581 = vmatmul.mubr.msk.bf16.gmra.mrb[28].mxu0 %vm20095_vm4, %v20299_v34  ;;  %v16031_v15 = vpop.permute.xlu0 %12235  ;;  %v5954_v11 = vsel %vm2469_vm7, %v5922_v37, %v11807_v59  ;;  %v5955_v26 = vsel %vm2469_vm7, %v5923_v6, %v11808_v21  ;;  %v20301_v62 = vpack.i.bf16 %v15859_v35, %v15857_v5  ;;  %v11888_v18 = vunpack.i.h.bf16 %v15568_v31  ;;  %v20308_v21 = vld [vmem:[#allocation122_spill] sm:$0xff]  ;;  %v20309_v6 = vld [vmem:[#allocation125_spill] sm:$0xff] }
 0x41a   : > { %20300 = vst [vmem:[#allocation14_spill] sm:$0xff] %v16031_v15  ;;  %12540 = vrot.lane.b32.xlu1 %v15675_v16, %s13427_s17  ;;  %v11887_v0 = vunpack.i.l.bf16 %v15568_v31  ;;  %v11898_v14 = vunpack.i.h.bf16 %v15574_v51  ;;  %v11897_v16 = vunpack.i.l.bf16 %v15574_v51  ;;  %v5958_v8 = vsel %vm2469_vm7, %v5926_v46, %v11817_v41  ;;  %v20311_v41 = vld [vmem:[#allocation126_spill] sm:$0xff] }
 0x41b   : > { %12525 = vrot.lane.b32.xlu0 %v20301_v62, %s13435_s29  ;;  %v5959_v63 = vsel %vm2469_vm7, %v5927_v60, %v11818_v9  ;;  %v5989_v43 = vsel %vm2502_vm8, %v5957_v36, %v11893_v53  ;;  %v5988_v49 = vsel %vm2502_vm8, %v5956_v3, %v11892_v52  ;;  %v5992_v35 = vsel %vm2502_vm8, %v5960_v56, %v11902_v40  ;;  %v20312_v36 = vld [vmem:[#allocation118_spill] sm:$0xff] }
 0x41c   : > { %v16051_v22 = vpop.permute.xlu1 %12260  ;;  %v5993_v31 = vsel %vm2502_vm8, %v5961_v38, %v11903_v4  ;;  %v11973_v61 = vunpack.i.h.bf16 %v15617_v23  ;;  %v11972_v51 = vunpack.i.l.bf16 %v15617_v23  ;;  %v11983_v33 = vunpack.i.h.bf16 %v20304_v28  ;;  %v20313_v4 = vld [vmem:[#allocation110_spill] sm:$0xff] }
 0x41d   : > { %20302 = vst [vmem:[#allocation15_spill] sm:$0xff] %v16051_v22  ;;  %v16057_v5 = vpop.permute.xlu0 %12245  ;;  %v11982_v25 = vunpack.i.l.bf16 %v20304_v28  ;;  %v11968_v7 = vunpack.i.h.bf16 %v20305_v12  ;;  %v11967_v19 = vunpack.i.l.bf16 %v20305_v12  ;;  %v20306_v24 = vpack.i.bf16 %v15865_v44, %v15863_v27  ;;  %v16353_v22 = vld [vmem:[#allocation3 + $0x109] sm:$0xff]  ;;  %v16355_v15 = vld [vmem:[#allocation3 + $0x111] sm:$0xff] }
 0x41e   : > { %20303 = vst [vmem:[#allocation13_spill] sm:$0xff] %v16057_v5  ;;  %12550 = vrot.lane.b32.xlu1 %v15757_v54, %s13429_s19  ;;  %v5986_v58 = vsel %vm2502_vm8, %v5954_v11, %v11887_v0  ;;  %v5987_v23 = vsel %vm2502_vm8, %v5955_v26, %v11888_v18  ;;  %v16076_v17 = vsel %vm2502_vm8, %v5958_v8, %v11897_v16  ;;  %v12053_v59 = vunpack.i.h.bf16 %v20308_v21  ;;  %v16351_v5 = vld [vmem:[#allocation3 + $0x110] sm:$0xff] }
 0x41f   : > { %12535 = vrot.lane.b32.xlu0 %v20306_v24, %s13436_s30  ;;  %v16079_v54 = vsel %vm2502_vm8, %v5959_v63, %v11898_v14  ;;  %v12052_v37 = vunpack.i.l.bf16 %v20308_v21  ;;  %v12063_v46 = vunpack.i.h.bf16 %v20309_v6  ;;  %v12062_v27 = vunpack.i.l.bf16 %v20309_v6  ;;  %v3833_v48 = vld [vmem:[#allocation3 + $0x113] sm:$0xff] }
 0x420   : > { %v16081_v30 = vpop.permute.xlu1 %12270  ;;  %v6020_v60 = vsel %vm2535_vm9, %v5988_v49, %v11972_v51  ;;  %v6021_v9 = vsel %vm2535_vm9, %v5989_v43, %v11973_v61  ;;  %v12048_v53 = vunpack.i.h.bf16 %v20311_v41  ;;  %v12047_v52 = vunpack.i.l.bf16 %v20311_v41  ;;  %v20316_v43 = vld [vmem:[#allocation128_spill] sm:$0xff] }
 0x421   : > { %20307 = vst [vmem:[#allocation18_spill] sm:$0xff] %v16081_v30  ;;  %v16087_v44 = vpop.permute.xlu0 %12255  ;;  %v6024_v10 = vsel %vm2535_vm9, %v5992_v35, %v11982_v25  ;;  %v6025_v13 = vsel %vm2535_vm9, %v5993_v31, %v11983_v33  ;;  %v6018_v34 = vsel %vm2535_vm9, %v5986_v58, %v11967_v19  ;;  %v6019_v3 = vsel %vm2535_vm9, %v5987_v23, %v11968_v7  ;;  %v20317_v51 = vld [vmem:[#allocation136_spill] sm:$0xff]  ;;  %v20318_v25 = vld [vmem:[#allocation143_spill] sm:$0xff] }
 0x422   : > { %20310 = vst [vmem:[#allocation17_spill] sm:$0xff] %v16087_v44  ;;  %12560 = vrot.lane.b32.xlu1 %v15873_v32, %s13431_s21  ;;  %v11978_v40 = vunpack.i.h.bf16 %v20313_v4  ;;  %v11977_v38 = vunpack.i.l.bf16 %v20313_v4  ;;  %v12133_v56 = vunpack.i.h.bf16 %v15763_v55  ;;  %v12132_v11 = vunpack.i.l.bf16 %v15763_v55  ;;  %v20321_v41 = vld [vmem:[#allocation12_spill] sm:$0xff]  ;;  %v3094_v44 = vld [vmem:[#allocation3 + $0xb0] sm:$0xff] }
 0x423   : > { %12545 = vrot.lane.b32.xlu0 %v20312_v36, %s13427_s17  ;;  %v6052_v26 = vsel %vm2568_vm10, %v6020_v60, %v12052_v37  ;;  %v6053_v62 = vsel %vm2568_vm10, %v6021_v9, %v12053_v59  ;;  %v6056_v18 = vsel %vm2568_vm10, %v6024_v10, %v12062_v27  ;;  %v6057_v0 = vsel %vm2568_vm10, %v6025_v13, %v12063_v46  ;;  %v20320_v9 = vld [vmem:[#allocation21_spill] sm:$0xff]  ;;  %v20323_v10 = vld [vmem:[#allocation146_spill] sm:$0xff] }
 0x424   : > { %v16105_v32 = vpop.permute.xlu1 %12280  ;;  %v6050_v16 = vsel %vm2568_vm10, %v6018_v34, %v12047_v52  ;;  %v6051_v8 = vsel %vm2568_vm10, %v6019_v3, %v12048_v53  ;;  %v12213_v63 = vunpack.i.h.bf16 %v15897_v47  ;;  %v12212_v55 = vunpack.i.l.bf16 %v15897_v47 }
 0x425   : > { %20314 = vst [vmem:[#allocation107_spill] sm:$0xff] %v16105_v32  ;;  %v16111_v14 = vpop.permute.xlu0 %12265  ;;  %v12058_v49 = vunpack.i.h.bf16 %v20316_v43  ;;  %v12057_v35 = vunpack.i.l.bf16 %v20316_v43  ;;  %v12143_v31 = vunpack.i.h.bf16 %v15780_v29  ;;  %v12142_v61 = vunpack.i.l.bf16 %v15780_v29  ;;  %v20356_v32 = vld [vmem:[#allocation27_spill] sm:$0xff] }
 0x426   : > { %20315 = vst [vmem:[#allocation108_spill] sm:$0xff] %v16111_v14  ;;  %12570 = vrot.lane.b32.xlu1 %v15834_v2, %s13431_s21  ;;  %v6084_v28 = vsel %vm2644_vm11, %v6052_v26, %v12132_v11  ;;  %v6085_v33 = vsel %vm2644_vm11, %v6053_v62, %v12133_v56  ;;  %v12128_v47 = vunpack.i.h.bf16 %v20318_v25  ;;  %v12127_v12 = vunpack.i.l.bf16 %v20318_v25  ;;  %v3639_v14 = vld [vmem:[#allocation3 + $0xf2] sm:$0xff] }
 0x427   : > { %12555 = vrot.lane.b32.xlu0 %v20317_v51, %s13429_s19  ;;  %v12223_v19 = vunpack.i.h.bf16 %v15937_v45  ;;  %v12222_v24 = vunpack.i.l.bf16 %v15937_v45  ;;  %v6117_v29 = vsel %vm6090_vm13, %v6084_v28, %v12212_v55  ;;  %v6118_v59 = vsel %vm6090_vm13, %v6085_v33, %v12213_v63 }
 0x428   : > { %v12291_v7 = vpop.permute.xlu1 %12290  ;;  %v12208_v37 = vunpack.i.h.bf16 %v15943_v50  ;;  %v12207_v6 = vunpack.i.l.bf16 %v15943_v50  ;;  %v6088_v46 = vsel %vm2644_vm11, %v6056_v18, %v12142_v61  ;;  %v6089_v27 = vsel %vm2644_vm11, %v6057_v0, %v12143_v31  ;;  %v20324_v31 = vld [vmem:[#allocation124_spill] sm:$0xff] }
 0x429   : > { %v12293_v58 = vunpack.i.h.bf16 %v12291_v7  ;;  %v12292_v23 = vunpack.i.l.bf16 %v12291_v7  ;;  %v16131_v21 = vpop.permute.xlu0 %12275  ;;  %v20322_v53 = vpack.i.bf16 %v20320_v9, %v20321_v41  ;;  %v6082_v50 = vsel %vm2644_vm11, %v6050_v16, %v12127_v12  ;;  %v3758_v12 = vld [vmem:[#allocation3 + $0x91] sm:$0xff]  ;;  %v3759_v7 = vld [vmem:[#allocation3 + $0x99] sm:$0xff]  ;;  %v3728_v41 = vld [vmem:[#allocation3 + $0xa8] sm:$0xff] }
 0x42a   : > { %20319 = vst [vmem:[#allocation122_spill] sm:$0xff] %v16131_v21  ;;  %12580 = vrot.lane.b32.xlu1 %v20317_v51, %s13430_s20  ;;  %v6083_v52 = vsel %vm2644_vm11, %v6051_v8, %v12128_v47  ;;  %v12138_v13 = vunpack.i.h.bf16 %v20323_v10  ;;  %v12137_v34 = vunpack.i.l.bf16 %v20323_v10  ;;  %v6121_v36 = vsel %vm6090_vm13, %v6088_v46, %v12222_v24  ;;  %v20327_v24 = vld [vmem:[#allocation22_spill] sm:$0xff] }
 0x42b   : > { %v16142_v45 = vsel %vm6123_vm14, %v6117_v29, %v12292_v23  ;;  %v16145_v60 = vsel %vm6123_vm14, %v6118_v59, %v12293_v58  ;;  %12565 = vrot.lane.b32.xlu0 %v20322_v53, %s13428_s18  ;;  %v6122_v4 = vsel %vm6090_vm13, %v6089_v27, %v12223_v19  ;;  %v6115_v62 = vsel %vm6090_vm13, %v6082_v50, %v12207_v6  ;;  %v20326_v19 = vld [vmem:[#allocation152_spill] sm:$0xff]  ;;  %v3790_v27 = vld [vmem:[#allocation3 + $0x92] sm:$0xff]  ;;  %v3791_v9 = vld [vmem:[#allocation3 + $0x9a] sm:$0xff] }
 0x42c   : > { %v12301_v3 = vpop.permute.xlu1 %12300  ;;  %v6116_v18 = vsel %vm6090_vm13, %v6083_v52, %v12208_v37  ;;  %v12218_v8 = vunpack.i.h.bf16 %v15971_v42  ;;  %v12217_v63 = vunpack.i.l.bf16 %v15971_v42  ;;  %v6022_v61 = vsel %vm2535_vm9, %v16076_v17, %v11977_v38  ;;  %v3729_v53 = vld [vmem:[#allocation3 + $0xb0] sm:$0xff]  ;;  %v3089_v21 = vld [vmem:[#allocation3 + $0x78] sm:$0xff] }
 0x42d   : > { %v12303_v56 = vunpack.i.h.bf16 %v12301_v3  ;;  %v12302_v11 = vunpack.i.l.bf16 %v12301_v3  ;;  %v12286_v26 = vpop.permute.xlu0 %12285  ;;  %v6023_v51 = vsel %vm2535_vm9, %v16079_v54, %v11978_v40  ;;  %v6054_v33 = vsel %vm2568_vm10, %v6022_v61, %v12057_v35  ;;  %v3761_v3 = vld [vmem:[#allocation3 + $0xb1] sm:$0xff] }
 0x42e   : > { %v12288_v0 = vunpack.i.h.bf16 %v12286_v26  ;;  %v12287_v16 = vunpack.i.l.bf16 %v12286_v26  ;;  %12590 = vrot.lane.b32.xlu1 %v15834_v2, %s13434_s28  ;;  %v6055_v25 = vsel %vm2568_vm10, %v6023_v51, %v12058_v49  ;;  %v6086_v17 = vsel %vm2644_vm11, %v6054_v33, %v12137_v34  ;;  %v20329_v49 = vld [vmem:[#allocation142_spill] sm:$0xff]  ;;  %v3760_v34 = vld [vmem:[#allocation3 + $0xa9] sm:$0xff]  ;;  %v20340_v51 = vld [vmem:[#allocation139_spill] sm:$0xff] }
 0x42f   : > { %v16164_v55 = vsel %vm6123_vm14, %v6121_v36, %v12302_v11  ;;  %v16167_v43 = vsel %vm6123_vm14, %v6122_v4, %v12303_v56  ;;  %12575 = vrot.lane.b32.xlu0 %v20324_v31, %s13428_s18  ;;  %v6087_v38 = vsel %vm2644_vm11, %v6055_v25, %v12138_v13  ;;  %v20328_v58 = vpack.i.bf16 %v20326_v19, %v20327_v24  ;;  %v3792_v11 = vld [vmem:[#allocation3 + $0xaa] sm:$0xff]  ;;  %v3793_v26 = vld [vmem:[#allocation3 + $0xb2] sm:$0xff] }
 0x430   : > { %v16176_v2 = vsel %vm6123_vm14, %v6115_v62, %v12287_v16  ;;  %v16179_v42 = vsel %vm6123_vm14, %v6116_v18, %v12288_v0  ;;  %v16181_v28 = vpop.permute.xlu1 %12310  ;;  %v6119_v23 = vsel %vm6090_vm13, %v6086_v17, %v12217_v63  ;;  %v6120_v35 = vsel %vm6090_vm13, %v6087_v38, %v12218_v8  ;;  %v3856_v16 = vld [vmem:[#allocation3 + $0xac] sm:$0xff]  ;;  %v3857_v8 = vld [vmem:[#allocation3 + $0xb4] sm:$0xff] }
 0x431   : > { %20325 = vst [vmem:[#allocation125_spill] sm:$0xff] %v16181_v28  ;;  %v12296_v47 = vpop.permute.xlu0 %12295  ;;  %v12609_v6 = vpack.i.bf16 %v3759_v7, %v3758_v12  ;;  %v12619_v52 = vpack.i.bf16 %v3791_v9, %v3790_v27  ;;  %v12604_v13 = vpack.i.bf16 %v3729_v53, %v3728_v41  ;;  %v12614_v56 = vpack.i.bf16 %v3761_v3, %v3760_v34  ;;  %v3636_v7 = vld [vmem:[#allocation3 + $0xca] sm:$0xff] }
 0x432   : > { %v12298_v54 = vunpack.i.h.bf16 %v12296_v47  ;;  %v12297_v40 = vunpack.i.l.bf16 %v12296_v47  ;;  %12600 = vrot.lane.b32.xlu1 %v20328_v58, %s13435_s29  ;;  %v12624_v0 = vpack.i.bf16 %v3793_v26, %v3792_v11  ;;  %v12649_v31 = vpack.i.bf16 %v3857_v8, %v3856_v16  ;;  %v20343_v11 = vld [vmem:[#allocation144_spill] sm:$0xff] }
 0x433   : > { %12585 = vrot.lane.b32.xlu0 %v20329_v49, %s13430_s20  ;;  %v16349_v28 = vld [vmem:[#allocation3 + $0x108] sm:$0xff] }
 0x434   : > { %v16196_v29 = vsel %vm6123_vm14, %v6119_v23, %v12297_v40  ;;  %v16199_v59 = vsel %vm6123_vm14, %v6120_v35, %v12298_v54  ;;  %v16201_v37 = vpop.permute.xlu1 %12320  ;;  %v3730_v23 = vld [vmem:[#allocation3 + $0xc0] sm:$0xff]  ;;  %v3731_v35 = vld [vmem:[#allocation3 + $0xc8] sm:$0xff] }
 0x435   : > { %20330 = vst [vmem:[#allocation126_spill] sm:$0xff] %v16201_v37  ;;  %v16203_v46 = vpop.permute.xlu0 %12305  ;;  %v12679_v53 = vpack.i.bf16 %v3731_v35, %v3730_v23  ;;  %v3672_v37 = vld [vmem:[#allocation3 + $0xfb] sm:$0xff] }
 0x436   : > { %20331 = vst [vmem:[#allocation118_spill] sm:$0xff] %v16203_v46  ;;  %12610 = vrot.lane.b32.xlu1 %v12609_v6, %s13436_s30 }
 0x437   : > { %12595 = vrot.lane.b32.xlu0 %v15875_v1, %s13434_s28 }
 0x438   : > { %v16208_v50 = vpop.permute.xlu1 %12330 }
 0x439   : > { %20332 = vst [vmem:[#allocation110_spill] sm:$0xff] %v16208_v50  ;;  %v16210_v10 = vpop.permute.xlu0 %12315 }
 0x43a   : > { %20333 = vst [vmem:[#allocation128_spill] sm:$0xff] %v16210_v10  ;;  %12620 = vrot.lane.b32.xlu1 %v12619_v52, %s13427_s17  ;;  %v3671_v10 = vld [vmem:[#allocation3 + $0xf3] sm:$0xff] }
 0x43b   : > { %12605 = vrot.lane.b32.xlu0 %v12604_v13, %s13435_s29  ;;  %v3763_v13 = vld [vmem:[#allocation3 + $0xc9] sm:$0xff] }
 0x43c   : > { %v16214_v36 = vpop.permute.xlu1 %12340 }
 0x43d   : > { %20334 = vst [vmem:[#allocation136_spill] sm:$0xff] %v16214_v36  ;;  %v16216_v4 = vpop.permute.xlu0 %12325  ;;  %v3088_v36 = vld [vmem:[#allocation3 + $0x68] sm:$0xff] }
 0x43e   : > { %20335 = vst [vmem:[#allocation143_spill] sm:$0xff] %v16216_v4  ;;  %12630 = vrot.lane.b32.xlu1 %v20329_v49, %s13429_s19  ;;  %v3087_v4 = vld [vmem:[#allocation3 + $0x60] sm:$0xff] }
 0x43f   : > { %12615 = vrot.lane.b32.xlu0 %v12614_v56, %s13436_s30  ;;  %v3700_v56 = vld [vmem:[#allocation3 + $0xcc] sm:$0xff] }
 0x440   : > { %v16221_v62 = vpop.permute.xlu1 %12350 }
 0x441   : > { %20336 = vst [vmem:[#allocation21_spill] sm:$0xff] %v16221_v62  ;;  %v16223_v18 = vpop.permute.xlu0 %12335  ;;  %v16315_v62 = vld [vmem:[#allocation3 + $0xe4] sm:$0xff] }
 0x442   : > { %20337 = vst [vmem:[#allocation12_spill] sm:$0xff] %v16223_v18  ;;  %12640 = vrot.lane.b32.xlu1 %v15875_v1, %s13431_s21  ;;  %v3635_v1 = vld [vmem:[#allocation3 + $0xc2] sm:$0xff]  ;;  %v11027_v18 = vunpack.i.l.bf16 %v20356_v32 }
 0x443   : > { %12625 = vrot.lane.b32.xlu0 %v12624_v0, %s13427_s17  ;;  %v12654_v58 = vpack.i.bf16 %v3636_v7, %v3635_v1  ;;  %v3764_v1 = vld [vmem:[#allocation3 + $0xd9] sm:$0xff]  ;;  %v3765_v7 = vld [vmem:[#allocation3 + $0xe1] sm:$0xff] }
 0x444   : > { %v16228_v63 = vpop.permute.xlu1 %12360 }
 0x445   : > { %20338 = vst [vmem:[#allocation146_spill] sm:$0xff] %v16228_v63  ;;  %v16230_v61 = vpop.permute.xlu0 %12345 }
 0x446   : > { %20339 = vst [vmem:[#allocation124_spill] sm:$0xff] %v16230_v61  ;;  %12650 = vrot.lane.b32.xlu1 %v12649_v31, %s13431_s21  ;;  %v3084_v61 = vld [vmem:[#allocation3 + $0x38] sm:$0xff] }
 0x447   : > { %12635 = vrot.lane.b32.xlu0 %v20340_v51, %s13429_s19 }
 0x448   : > { %v12371_v33 = vpop.permute.xlu1 %12370 }
 0x449   : > { %v12373_v25 = vunpack.i.h.bf16 %v12371_v33  ;;  %v12372_v47 = vunpack.i.l.bf16 %v12371_v33  ;;  %v16235_v12 = vpop.permute.xlu0 %12355 }
 0x44a   : > { %20341 = vst [vmem:[#allocation152_spill] sm:$0xff] %v16235_v12  ;;  %12660 = vrot.lane.b32.xlu1 %v20340_v51, %s13430_s20  ;;  %v3733_v51 = vld [vmem:[#allocation3 + $0xe0] sm:$0xff]  ;;  %v3085_v12 = vld [vmem:[#allocation3 + $0x48] sm:$0xff] }
 0x44b   : > { %v16241_v17 = vsel %vm6156_vm15, %v16142_v45, %v12372_v47  ;;  %v16245_v38 = vsel %vm6156_vm15, %v16145_v60, %v12373_v25  ;;  %12645 = vrot.lane.b32.xlu0 %v12624_v0, %s13428_s18  ;;  %v3826_v25 = vld [vmem:[#allocation3 + $0xc3] sm:$0xff]  ;;  %v3827_v47 = vld [vmem:[#allocation3 + $0xcb] sm:$0xff] }
 0x44c   : > { %v12381_v54 = vpop.permute.xlu1 %12380  ;;  %v12709_v35 = vpack.i.bf16 %v3827_v47, %v3826_v25  ;;  %v3796_v47 = vld [vmem:[#allocation3 + $0xda] sm:$0xff] }
 0x44d   : > { %v12383_v40 = vunpack.i.h.bf16 %v12381_v54  ;;  %v12382_v19 = vunpack.i.l.bf16 %v12381_v54  ;;  %v12366_v24 = vpop.permute.xlu0 %12365  ;;  %v3081_v54 = vld [vmem:[#allocation3 + $0x18] sm:$0xff] }
 0x44e   : > { %v12368_v49 = vunpack.i.h.bf16 %v12366_v24  ;;  %v12367_v6 = vunpack.i.l.bf16 %v12366_v24  ;;  %12670 = vrot.lane.b32.xlu1 %v12649_v31, %s13434_s28  ;;  %v3732_v31 = vld [vmem:[#allocation3 + $0xd8] sm:$0xff] }
 0x44f   : > { %v16251_v45 = vsel %vm6156_vm15, %v16164_v55, %v12382_v19  ;;  %v16255_v60 = vsel %vm6156_vm15, %v16167_v43, %v12383_v40  ;;  %12655 = vrot.lane.b32.xlu0 %v12654_v58, %s13428_s18  ;;  %v3762_v55 = vld [vmem:[#allocation3 + $0xc1] sm:$0xff] }
 0x450   : > { %v16260_v27 = vsel %vm6156_vm15, %v16176_v2, %v12367_v6  ;;  %v16264_v9 = vsel %vm6156_vm15, %v16179_v42, %v12368_v49  ;;  %v16266_v41 = vpop.permute.xlu1 %12390  ;;  %v3699_v43 = vld [vmem:[#allocation3 + $0xc4] sm:$0xff]  ;;  %v12689_v0 = vpack.i.bf16 %v3763_v13, %v3762_v55 }
 0x451   : > { %20342 = vst [vmem:[#allocation22_spill] sm:$0xff] %v16266_v41  ;;  %v12376_v52 = vpop.permute.xlu0 %12375  ;;  %v16283_v8 = vpack.i.bf16 %v3700_v56, %v3699_v43  ;;  %v20348_v40 = vld [vmem:[#allocation19_spill] sm:$0xff]  ;;  %v12694_v43 = vpack.i.bf16 %v3765_v7, %v3764_v1  ;;  %v3086_v56 = vld [vmem:[#allocation3 + $0x50] sm:$0xff]  ;;  %v20355_v1 = vld [vmem:[#allocation26_spill] sm:$0xff] }
 0x452   : > { %v12378_v34 = vunpack.i.h.bf16 %v12376_v52  ;;  %v12377_v3 = vunpack.i.l.bf16 %v12376_v52  ;;  %12680 = vrot.lane.b32.xlu1 %v12679_v53, %s13435_s29  ;;  %v10818_v19 = vunpack.i.h.bf16 %v20348_v40  ;;  %v10817_v24 = vunpack.i.l.bf16 %v20348_v40  ;;  %v3082_v49 = vld [vmem:[#allocation3 + $0x20] sm:$0xff]  ;;  %v3080_v53 = vld [vmem:[#allocation3 + $0x8] sm:$0xff]  ;;  %v16330_v41 = vld [vmem:[#allocation3 + $0xf8] sm:$0xff] }
 0x453   : > { %12665 = vrot.lane.b32.xlu0 %v20343_v11, %s13430_s20  ;;  %v3079_v6 = vld [vmem:[#allocation3] sm:$0xff]  ;;  %v20350_v52 = vld [vmem:[#allocation20_spill] sm:$0xff]  ;;  %v10983_v7 = vunpack.i.h.bf16 %v20355_v1 }
 0x454   : > { %v16273_v2 = vsel %vm6156_vm15, %v16196_v29, %v12377_v3  ;;  %v16277_v42 = vsel %vm6156_vm15, %v16199_v59, %v12378_v34  ;;  %v16279_v26 = vpop.permute.xlu1 %12400  ;;  %v12684_v59 = vpack.i.bf16 %v3733_v51, %v3732_v31  ;;  %v10813_v55 = vunpack.i.h.bf16 %v20350_v52  ;;  %v3797_v40 = vld [vmem:[#allocation3 + $0xe2] sm:$0xff] }
 0x455   : > { %20344 = vst [vmem:[#allocation142_spill] sm:$0xff] %v16279_v26  ;;  %v16281_v16 = vpop.permute.xlu0 %12385  ;;  %v10812_v13 = vunpack.i.l.bf16 %v20350_v52  ;;  %v3083_v52 = vld [vmem:[#allocation3 + $0x30] sm:$0xff]  ;;  %v3093_v26 = vld [vmem:[#allocation3 + $0xa8] sm:$0xff]  ;;  %v16347_v46 = vpack.i.bf16 %v3797_v40, %v3796_v47 }
 0x456   : > { %20345 = vst [vmem:[#allocation139_spill] sm:$0xff] %v16281_v16  ;;  %12690 = vrot.lane.b32.xlu1 %v12689_v0, %s13436_s30  ;;  %v20353_v0 = vld [vmem:[#allocation24_spill] sm:$0xff]  ;;  %v16332_v16 = vld [vmem:[#allocation3 + $0xf1] sm:$0xff] }
 0x457   : > { %12675 = vrot.lane.b32.xlu0 %v16283_v8, %s13434_s28  ;;  %v10893_v31 = vunpack.i.h.bf16 %v20353_v0  ;;  %v10892_v51 = vunpack.i.l.bf16 %v20353_v0  ;;  %v16313_v0 = vld [vmem:[#allocation3 + $0xdc] sm:$0xff] }
 0x458   : > { %v16288_v29 = vpop.permute.xlu1 %12410 }
 0x459   : > { %20346 = vst [vmem:[#allocation144_spill] sm:$0xff] %v16288_v29  ;;  %v16290_v33 = vpop.permute.xlu0 %12395  ;;  %v16323_v29 = vsel %vm20096_vm2, %v3081_v54, %v10817_v24  ;;  %v3703_v54 = vld [vmem:[#allocation3 + $0xf4] sm:$0xff]  ;;  %v3704_v24 = vld [vmem:[#allocation3 + $0xfc] sm:$0xff]  ;;  %v16364_v47 = vsel %vm20096_vm2, %v3083_v52, %v10892_v51  ;;  %v16379_v51 = vsel %vm20096_vm2, %v3088_v36, %v10983_v7  ;;  %v16391_v52 = vld [vmem:[#allocation3 + $0x129] sm:$0xff]  ;;  %v16408_v7 = vpack.i.bf16 %v16315_v62, %v16313_v0 }
 0x45a   : > { %20347 = vst [vmem:[#allocation153_spill] sm:$0xff] %v16290_v33  ;;  %12700 = vrot.lane.b32.xlu1 %v12654_v58, %s13427_s17  ;;  %v20351_v58 = vld [vmem:[#allocation23_spill] sm:$0xff]  ;;  %20358 = vst [vmem:[#allocation24_spill] sm:$0xff] %v16323_v29  ;;  %v16328_v33 = vld [vmem:[#allocation3 + $0xf0] sm:$0xff]  ;;  %v16421_v62 = vpack.i.bf16 %v3704_v24, %v3703_v54 }
 0x45b   : > { %12685 = vrot.lane.b32.xlu0 %v12684_v59, %s13435_s29  ;;  %v10863_v34 = vunpack.i.h.bf16 %v20351_v58  ;;  %v10862_v11 = vunpack.i.l.bf16 %v20351_v58  ;;  %v20354_v59 = vld [vmem:[#allocation25_spill] sm:$0xff]  ;;  %v10982_v58 = vunpack.i.l.bf16 %v20355_v1  ;;  %v3090_v1 = vld [vmem:[#allocation3 + $0x80] sm:$0xff]  ;;  %20366 = vst [vmem:[#allocation158_spill] sm:$0xff] %v16364_v47  ;;  %20371 = vst [vmem:[#allocation163_spill] sm:$0xff] %v16379_v51 }
 0x45c   : > { %v16296_v23 = vpop.permute.xlu1 %12420  ;;  %v10937_v25 = vunpack.i.l.bf16 %v20354_v59  ;;  %v10938_v63 = vunpack.i.h.bf16 %v20354_v59  ;;  %v16320_v59 = vsel %vm20096_vm2, %v3082_v49, %v10818_v19  ;;  %v16334_v19 = vld [vmem:[#allocation3 + $0xf9] sm:$0xff]  ;;  %v16337_v49 = vsel %vm20096_vm2, %v3080_v53, %v10813_v55  ;;  %v3800_v53 = vld [vmem:[#allocation3 + $0x10a] sm:$0xff] }
 0x45d   : > { %20349 = vst [vmem:[#allocation19_spill] sm:$0xff] %v16296_v23  ;;  %v16301_v3 = vpop.permute.xlu0 %12405  ;;  %v3829_v23 = vld [vmem:[#allocation3 + $0xe3] sm:$0xff]  ;;  %20357 = vst [vmem:[#allocation23_spill] sm:$0xff] %v16320_v59  ;;  %v3801_v55 = vld [vmem:[#allocation3 + $0x112] sm:$0xff] }
 0x45e   : > { %20352 = vst [vmem:[#allocation20_spill] sm:$0xff] %v16301_v3  ;;  %12710 = vrot.lane.b32.xlu1 %v12709_v35, %s13429_s19  ;;  %v16317_v35 = vld [vmem:[#allocation3 + $0xdb] sm:$0xff]  ;;  %20360 = vst [vmem:[#allocation26_spill] sm:$0xff] %v16337_v49  ;;  %v16367_v40 = vsel %vm20096_vm2, %v3089_v21, %v10937_v25  ;;  %v16382_v21 = vsel %vm20096_vm2, %v3087_v4, %v10982_v58  ;;  %v3708_v47 = vld [vmem:[#allocation3 + $0x12c] sm:$0xff] }
 0x45f   : > { %12695 = vrot.lane.b32.xlu0 %v12694_v43, %s13436_s30  ;;  %v3640_v3 = vld [vmem:[#allocation3 + $0xfa] sm:$0xff]  ;;  %v11028_v43 = vunpack.i.h.bf16 %v20356_v32  ;;  %v16340_v32 = vsel %vm20096_vm2, %v3079_v6, %v10812_v13  ;;  %v3864_v6 = vld [vmem:[#allocation3 + $0x10c] sm:$0xff]  ;;  %20367 = vst [vmem:[#allocation159_spill] sm:$0xff] %v16367_v40  ;;  %20372 = vst [vmem:[#allocation164_spill] sm:$0xff] %v16382_v21  ;;  %v12714_v58 = vpack.i.bf16 %v3829_v23, %v16317_v35 }
 0x460   : > { %v16326_v50 = vpop.permute.xlu1 %12430  ;;  %20361 = vst [vmem:[#allocation27_spill] sm:$0xff] %v16340_v32  ;;  %v3865_v13 = vld [vmem:[#allocation3 + $0x114] sm:$0xff]  ;;  %v16389_v25 = vld [vmem:[#allocation3 + $0x121] sm:$0xff]  ;;  %v16411_v51 = vpack.i.bf16 %v3640_v3, %v3639_v14  ;;  %v3808_v29 = vld [vmem:[#allocation3 + $0x16a] sm:$0xff] }
 0x461   : > { %20359 = vst [vmem:[#allocation25_spill] sm:$0xff] %v16326_v50  ;;  %v16343_v50 = vsel %vm20096_vm2, %v3086_v56, %v10863_v34  ;;  %v16345_v30 = vpop.permute.xlu0 %12415  ;;  %v16358_v34 = vsel %vm20096_vm2, %v3085_v12, %v10862_v11  ;;  %v16361_v56 = vsel %vm20096_vm2, %v3084_v61, %v10893_v31  ;;  %v16373_v12 = vld [vmem:[#allocation3 + $0x128] sm:$0xff]  ;;  %v16376_v31 = vsel %vm20096_vm2, %v3090_v1, %v10938_v63  ;;  %v16393_v63 = vld [vmem:[#allocation3 + $0x138] sm:$0xff]  ;;  %v16395_v1 = vld [vmem:[#allocation3 + $0x140] sm:$0xff] }
 0x462   : > { %20362 = vst [vmem:[#allocation154_spill] sm:$0xff] %v16343_v50  ;;  %20363 = vst [vmem:[#allocation155_spill] sm:$0xff] %v16345_v30  ;;  %12720 = vrot.lane.b32.xlu1 %v16283_v8, %s13431_s21  ;;  %v3832_v30 = vld [vmem:[#allocation3 + $0x10b] sm:$0xff]  ;;  %v3675_v11 = vld [vmem:[#allocation3 + $0x123] sm:$0xff]  ;;  %v16385_v8 = vsel %vm20096_vm2, %v3093_v26, %v11027_v18  ;;  %v16402_v18 = vsel %vm20096_vm2, %v3094_v44, %v11028_v43  ;;  %v16417_v43 = vpack.i.bf16 %v3672_v37, %v3671_v10 }
 0x463   : > { %20364 = vst [vmem:[#allocation156_spill] sm:$0xff] %v16358_v34  ;;  %20365 = vst [vmem:[#allocation157_spill] sm:$0xff] %v16361_v56  ;;  %v3676_v61 = vld [vmem:[#allocation3 + $0x12b] sm:$0xff]  ;;  %12705 = vrot.lane.b32.xlu0 %v16347_v46, %s13427_s17  ;;  %v16397_v36 = vld [vmem:[#allocation3 + $0x139] sm:$0xff]  ;;  %v16435_v54 = vpack.i.bf16 %v3865_v13, %v3864_v6  ;;  %v16442_v34 = vpack.i.bf16 %v3833_v48, %v3832_v30  ;;  %v16444_v50 = vpack.i.bf16 %v3644_v20, %v3643_v39 }
 0x464   : > { %20369 = vst [vmem:[#allocation161_spill] sm:$0xff] %v16373_v12  ;;  %20370 = vst [vmem:[#allocation162_spill] sm:$0xff] %v16376_v31  ;;  %v3707_v56 = vld [vmem:[#allocation3 + $0x124] sm:$0xff]  ;;  %v16404_v26 = vpop.permute.xlu1 %12440  ;;  %v3804_v21 = vld [vmem:[#allocation3 + $0x13a] sm:$0xff]  ;;  %v16448_v10 = vpack.i.bf16 %v3676_v61, %v3675_v11 }
 0x465   : > { %20373 = vst [vmem:[#allocation165_spill] sm:$0xff] %v16385_v8  ;;  %20374 = vst [vmem:[#allocation166_spill] sm:$0xff] %v16397_v36  ;;  %v16399_v4 = vld [vmem:[#allocation3 + $0x141] sm:$0xff]  ;;  %v16413_v32 = vpop.permute.xlu0 %12425  ;;  %v3647_v14 = vld [vmem:[#allocation3 + $0x152] sm:$0xff]  ;;  %v16460_v39 = vpack.i.bf16 %v3708_v47, %v3707_v56 }
 0x466   : > { %20375 = vst [vmem:[#allocation167_spill] sm:$0xff] %v16399_v4  ;;  %20376 = vst [vmem:[#allocation168_spill] sm:$0xff] %v16402_v18  ;;  %v3805_v8 = vld [vmem:[#allocation3 + $0x142] sm:$0xff]  ;;  %v3648_v3 = vld [vmem:[#allocation3 + $0x15a] sm:$0xff]  ;;  %12730 = vrot.lane.b32.xlu1 %v16408_v7, %s13431_s21 }
 0x467   : > { %20377 = vst [vmem:[#allocation169_spill] sm:$0xff] %v16404_v26  ;;  %v3868_v40 = vld [vmem:[#allocation3 + $0x13c] sm:$0xff]  ;;  %v3869_v31 = vld [vmem:[#allocation3 + $0x144] sm:$0xff]  ;;  %20378 = vst [vmem:[#allocation170_spill] sm:$0xff] %v16413_v32  ;;  %v16433_v26 = vpack.i.bf16 %v3801_v55, %v3800_v53  ;;  %12715 = vrot.lane.b32.xlu0 %v12714_v58, %s13429_s19  ;;  %v16475_v11 = vpack.i.bf16 %v3648_v3, %v3647_v14 }
 0x468   : > { %v3836_v0 = vld [vmem:[#allocation3 + $0x13b] sm:$0xff]  ;;  %v3837_v23 = vld [vmem:[#allocation3 + $0x143] sm:$0xff]  ;;  %v16423_v35 = vld [vmem:[#allocation3 + $0x150] sm:$0xff]  ;;  %20382 = vst [vmem:[#allocation174_spill] sm:$0xff] %v16435_v54  ;;  %v12451_v48 = vpop.permute.xlu1 %12450  ;;  %v16470_v59 = vpack.i.bf16 %v3869_v31, %v3868_v40 }
 0x469   : > { %20379 = vst [vmem:[#allocation171_spill] sm:$0xff] %v16423_v35  ;;  %v16425_v18 = vld [vmem:[#allocation3 + $0x158] sm:$0xff]  ;;  %20381 = vst [vmem:[#allocation173_spill] sm:$0xff] %v16433_v26  ;;  %v16450_v6 = vld [vmem:[#allocation3 + $0x168] sm:$0xff]  ;;  %v12453_v57 = vunpack.i.h.bf16 %v12451_v48  ;;  %v12452_v12 = vunpack.i.l.bf16 %v12451_v48  ;;  %v16473_v30 = vpack.i.bf16 %v3837_v23, %v3836_v0 }
 0x46a   : > { %20380 = vst [vmem:[#allocation172_spill] sm:$0xff] %v16425_v18  ;;  %v3679_v24 = vld [vmem:[#allocation3 + $0x153] sm:$0xff]  ;;  %v3680_v44 = vld [vmem:[#allocation3 + $0x15b] sm:$0xff]  ;;  %20385 = vst [vmem:[#allocation177_spill] sm:$0xff] %v16442_v34  ;;  %v16468_v34 = vpack.i.bf16 %v3805_v8, %v3804_v21  ;;  %12740 = vrot.lane.b32.xlu1 %v12714_v58, %s13430_s20 }
 0x46b   : > { %v16437_v32 = vld [vmem:[#allocation3 + $0x151] sm:$0xff]  ;;  %v16439_v49 = vld [vmem:[#allocation3 + $0x159] sm:$0xff]  ;;  %20386 = vst [vmem:[#allocation178_spill] sm:$0xff] %v16444_v50  ;;  %20387 = vst [vmem:[#allocation179_spill] sm:$0xff] %v16448_v10  ;;  %v16466_v50 = vpop.permute.xlu0 %12435  ;;  %v16485_v40 = vsel %vm6189_vm1, %v16241_v17, %v12452_v12  ;;  %v16489_v31 = vsel %vm6189_vm1, %v16245_v38, %v12453_v57  ;;  %12725 = vrot.lane.b32.xlu0 %v16347_v46, %s13428_s18  ;;  %v16493_v8 = vpack.i.bf16 %v3680_v44, %v3679_v24 }
 0x46c   : > { %20383 = vst [vmem:[#allocation175_spill] sm:$0xff] %v16437_v32  ;;  %20384 = vst [vmem:[#allocation176_spill] sm:$0xff] %v16439_v49  ;;  %v3711_v53 = vld [vmem:[#allocation3 + $0x154] sm:$0xff]  ;;  %v3712_v55 = vld [vmem:[#allocation3 + $0x15c] sm:$0xff]  ;;  %v12461_v17 = vpop.permute.xlu1 %12460 }
 0x46d   : > { %20388 = vst [vmem:[#allocation180_spill] sm:$0xff] %v16450_v6  ;;  %v16452_v13 = vld [vmem:[#allocation3 + $0x170] sm:$0xff]  ;;  %20392 = vst [vmem:[#allocation184_spill] sm:$0xff] %v16466_v50  ;;  %v3651_v47 = vld [vmem:[#allocation3 + $0x182] sm:$0xff]  ;;  %v16501_v12 = vpack.i.bf16 %v3712_v55, %v3711_v53  ;;  %v12463_v36 = vunpack.i.h.bf16 %v12461_v17 }
 0x46e   : > { %20389 = vst [vmem:[#allocation181_spill] sm:$0xff] %v16452_v13  ;;  %v16454_v54 = vld [vmem:[#allocation3 + $0x169] sm:$0xff]  ;;  %v16456_v26 = vld [vmem:[#allocation3 + $0x171] sm:$0xff]  ;;  %20393 = vst [vmem:[#allocation185_spill] sm:$0xff] %v16468_v34  ;;  %12750 = vrot.lane.b32.xlu1 %v16408_v7, %s13434_s28  ;;  %v20438_v13 = vpack.i.bf16 %v16330_v41, %v16328_v33 }
 0x46f   : > { %20390 = vst [vmem:[#allocation182_spill] sm:$0xff] %v16454_v54  ;;  %20391 = vst [vmem:[#allocation183_spill] sm:$0xff] %v16456_v26  ;;  %v3809_v61 = vld [vmem:[#allocation3 + $0x172] sm:$0xff]  ;;  %v3652_v48 = vld [vmem:[#allocation3 + $0x18a] sm:$0xff]  ;;  %12735 = vrot.lane.b32.xlu0 %v16411_v51, %s13428_s18 }
 0x470   : > { %v3872_v37 = vld [vmem:[#allocation3 + $0x16c] sm:$0xff]  ;;  %v3873_v10 = vld [vmem:[#allocation3 + $0x174] sm:$0xff]  ;;  %20394 = vst [vmem:[#allocation186_spill] sm:$0xff] %v16470_v59  ;;  %20395 = vst [vmem:[#allocation187_spill] sm:$0xff] %v16473_v30  ;;  %v16507_v38 = vpack.i.bf16 %v3809_v61, %v3808_v29  ;;  %v16524_v54 = vpack.i.bf16 %v3652_v48, %v3651_v47 }
 0x471   : > { %v3840_v20 = vld [vmem:[#allocation3 + $0x16b] sm:$0xff]  ;;  %v3841_v56 = vld [vmem:[#allocation3 + $0x173] sm:$0xff]  ;;  %20396 = vst [vmem:[#allocation188_spill] sm:$0xff] %v16475_v11  ;;  %v16479_v4 = vld [vmem:[#allocation3 + $0x180] sm:$0xff]  ;;  %v16511_v50 = vpack.i.bf16 %v3873_v10, %v3872_v37 }
 0x472   : > { %20397 = vst [vmem:[#allocation189_spill] sm:$0xff] %v16479_v4  ;;  %v16481_v21 = vld [vmem:[#allocation3 + $0x188] sm:$0xff]  ;;  %20399 = vst [vmem:[#allocation191_spill] sm:$0xff] %v16485_v40  ;;  %v16509_v58 = vld [vmem:[#allocation3 + $0x198] sm:$0xff]  ;;  %v12462_v40 = vunpack.i.l.bf16 %v12461_v17  ;;  %v16513_v32 = vpack.i.bf16 %v3841_v56, %v3840_v20  ;;  %12760 = vrot.lane.b32.xlu1 %v20438_v13, %s13435_s29 }
 0x473   : > { %20398 = vst [vmem:[#allocation190_spill] sm:$0xff] %v16481_v21  ;;  %20400 = vst [vmem:[#allocation192_spill] sm:$0xff] %v16489_v31  ;;  %v3683_v0 = vld [vmem:[#allocation3 + $0x183] sm:$0xff]  ;;  %v3684_v23 = vld [vmem:[#allocation3 + $0x18b] sm:$0xff]  ;;  %v12446_v31 = vpop.permute.xlu0 %12445  ;;  %12745 = vrot.lane.b32.xlu0 %v16417_v43, %s13430_s20 }
 0x474   : > { %20401 = vst [vmem:[#allocation193_spill] sm:$0xff] %v16493_v8  ;;  %v16497_v14 = vld [vmem:[#allocation3 + $0x181] sm:$0xff]  ;;  %v16499_v3 = vld [vmem:[#allocation3 + $0x189] sm:$0xff]  ;;  %20404 = vst [vmem:[#allocation196_spill] sm:$0xff] %v16501_v12  ;;  %v12448_v61 = vunpack.i.h.bf16 %v12446_v31  ;;  %v16529_v6 = vsel %vm6189_vm1, %v16251_v45, %v12462_v40  ;;  %v16555_v40 = vpack.i.bf16 %v3684_v23, %v3683_v0 }
 0x475   : > { %20402 = vst [vmem:[#allocation194_spill] sm:$0xff] %v16497_v14  ;;  %20403 = vst [vmem:[#allocation195_spill] sm:$0xff] %v16499_v3  ;;  %v3715_v44 = vld [vmem:[#allocation3 + $0x184] sm:$0xff]  ;;  %v3716_v24 = vld [vmem:[#allocation3 + $0x18c] sm:$0xff] }
 0x476   : > { %20405 = vst [vmem:[#allocation197_spill] sm:$0xff] %v16507_v38  ;;  %20406 = vst [vmem:[#allocation198_spill] sm:$0xff] %v16509_v58  ;;  %v16515_v53 = vld [vmem:[#allocation3 + $0x1a0] sm:$0xff]  ;;  %v20412_v46 = vld [vmem:[#allocation28_spill] sm:$0xff]  ;;  %v12447_v38 = vunpack.i.l.bf16 %v12446_v31  ;;  %v16533_v31 = vsel %vm6189_vm1, %v16255_v60, %v12463_v36  ;;  %v16551_v60 = vsel %vm6189_vm1, %v16264_v9, %v12448_v61  ;;  %v16553_v36 = vpop.permute.xlu1 %12470 }
 0x477   : > { %20407 = vst [vmem:[#allocation199_spill] sm:$0xff] %v16511_v50  ;;  %20408 = vst [vmem:[#allocation200_spill] sm:$0xff] %v16513_v32  ;;  %v16517_v55 = vld [vmem:[#allocation3 + $0x199] sm:$0xff]  ;;  %v16519_v57 = vld [vmem:[#allocation3 + $0x1a1] sm:$0xff]  ;;  %v11073_v29 = vunpack.i.h.bf16 %v20412_v46  ;;  %v11072_v26 = vunpack.i.l.bf16 %v20412_v46  ;;  %v12456_v61 = vpop.permute.xlu0 %12455  ;;  %12755 = vrot.lane.b32.xlu0 %v16421_v62, %s13434_s28 }
 0x478   : > { %20409 = vst [vmem:[#allocation201_spill] sm:$0xff] %v16515_v53  ;;  %20410 = vst [vmem:[#allocation202_spill] sm:$0xff] %v16517_v55  ;;  %v3812_v17 = vld [vmem:[#allocation3 + $0x19a] sm:$0xff]  ;;  %v3813_v37 = vld [vmem:[#allocation3 + $0x1a2] sm:$0xff]  ;;  %v16547_v45 = vsel %vm6189_vm1, %v16260_v27, %v12447_v38  ;;  %v12458_v53 = vunpack.i.h.bf16 %v12456_v61 }
 0x479   : > { %20411 = vst [vmem:[#allocation203_spill] sm:$0xff] %v16519_v57  ;;  %20413 = vst [vmem:[#allocation28_spill] sm:$0xff] %v16524_v54  ;;  %v3876_v10 = vld [vmem:[#allocation3 + $0x19c] sm:$0xff]  ;;  %v3877_v20 = vld [vmem:[#allocation3 + $0x1a4] sm:$0xff]  ;;  %v16621_v33 = vpack.i.bf16 %v3813_v37, %v3812_v17 }
 0x47a   : > { %v3844_v56 = vld [vmem:[#allocation3 + $0x19b] sm:$0xff]  ;;  %v3845_v32 = vld [vmem:[#allocation3 + $0x1a3] sm:$0xff]  ;;  %20414 = vst [vmem:[#allocation204_spill] sm:$0xff] %v16529_v6  ;;  %20415 = vst [vmem:[#allocation205_spill] sm:$0xff] %v16533_v31  ;;  %v16623_v13 = vpack.i.bf16 %v3877_v20, %v3876_v10  ;;  %v16649_v37 = vsel %vm6189_vm1, %v16277_v42, %v12458_v53  ;;  %v16651_v10 = vpop.permute.xlu1 %12480 }
 0x47b   : > { %v3092_v50 = vld [vmem:[#allocation3 + $0x98] sm:$0xff]  ;;  %v16539_v47 = vld [vmem:[#allocation3 + $0x50] sm:$0xff]  ;;  %v16543_v54 = vld [vmem:[#allocation3 + $0x80] sm:$0xff]  ;;  %20419 = vst [vmem:[#allocation209_spill] sm:$0xff] %v16547_v45  ;;  %v16625_v12 = vpack.i.bf16 %v3845_v32, %v3844_v56  ;;  %v16669_v53 = vpop.permute.xlu0 %12465 }
 0x47c   : > { %20416 = vst [vmem:[#allocation206_spill] sm:$0xff] %v16539_v47  ;;  %v16541_v48 = vld [vmem:[#allocation3 + $0x78] sm:$0xff]  ;;  %20418 = vst [vmem:[#allocation208_spill] sm:$0xff] %v16543_v54  ;;  %v3091_v46 = vld [vmem:[#allocation3 + $0x90] sm:$0xff] }
 0x47d   : > { %20417 = vst [vmem:[#allocation207_spill] sm:$0xff] %v16541_v48  ;;  %20420 = vst [vmem:[#allocation210_spill] sm:$0xff] %v16551_v60  ;;  %v16559_v6 = vld [vmem:[#allocation3 + $0x60] sm:$0xff]  ;;  %v16561_v31 = vld [vmem:[#allocation3 + $0x68] sm:$0xff]  ;;  %v16569_v60 = vpack.i.bf16 %v3716_v24, %v3715_v44  ;;  %v16592_v24 = vsel %vm20096_vm2, %v3092_v50, %v11073_v29  ;;  %v16617_v41 = vsel %vm20096_vm2, %v3091_v46, %v11072_v26 }
 0x47e   : > { %20421 = vst [vmem:[#allocation211_spill] sm:$0xff] %v16553_v36  ;;  %20422 = vst [vmem:[#allocation212_spill] sm:$0xff] %v16555_v40  ;;  %v16563_v4 = vld [vmem:[#allocation3 + $0xac] sm:$0xff]  ;;  %v16565_v21 = vld [vmem:[#allocation3 + $0xb4] sm:$0xff] }
 0x47f   : > { %20423 = vst [vmem:[#allocation213_spill] sm:$0xff] %v16559_v6  ;;  %20424 = vst [vmem:[#allocation214_spill] sm:$0xff] %v16561_v31  ;;  %v20427_v27 = vld [vmem:[#allocation29_spill] sm:$0xff]  ;;  %v16573_v23 = vld [vmem:[#allocation3 + $0x48] sm:$0xff] }
 0x480   : > { %20425 = vst [vmem:[#allocation215_spill] sm:$0xff] %v16563_v4  ;;  %20426 = vst [vmem:[#allocation216_spill] sm:$0xff] %v16565_v21  ;;  %v11118_v38 = vunpack.i.h.bf16 %v20427_v27  ;;  %v11117_v9 = vunpack.i.l.bf16 %v20427_v27  ;;  %v16575_v7 = vld [vmem:[#allocation3 + $0x90] sm:$0xff]  ;;  %v16577_v45 = vld [vmem:[#allocation3 + $0x98] sm:$0xff] }
 0x481   : > { %20428 = vst [vmem:[#allocation29_spill] sm:$0xff] %v16569_v60  ;;  %20429 = vst [vmem:[#allocation217_spill] sm:$0xff] %v16573_v23  ;;  %v16579_v36 = vld [vmem:[#allocation3 + $0xc0] sm:$0xff]  ;;  %v16581_v14 = vld [vmem:[#allocation3 + $0xc8] sm:$0xff]  ;;  %v12457_v60 = vunpack.i.l.bf16 %v12456_v61 }
 0x482   : > { %20430 = vst [vmem:[#allocation218_spill] sm:$0xff] %v16575_v7  ;;  %20431 = vst [vmem:[#allocation219_spill] sm:$0xff] %v16577_v45  ;;  %v16583_v3 = vld [vmem:[#allocation3 + $0xa8] sm:$0xff]  ;;  %v16585_v40 = vld [vmem:[#allocation3 + $0xb0] sm:$0xff] }
 0x483   : > { %20432 = vst [vmem:[#allocation220_spill] sm:$0xff] %v16579_v36  ;;  %20433 = vst [vmem:[#allocation221_spill] sm:$0xff] %v16581_v14  ;;  %v16587_v27 = vld [vmem:[#allocation3 + $0xdc] sm:$0xff]  ;;  %v16589_v44 = vld [vmem:[#allocation3 + $0xe4] sm:$0xff]  ;;  %v16645_v32 = vsel %vm6189_vm1, %v16273_v2, %v12457_v60 }
 0x484   : > { %20434 = vst [vmem:[#allocation222_spill] sm:$0xff] %v16583_v3  ;;  %20435 = vst [vmem:[#allocation223_spill] sm:$0xff] %v16585_v40  ;;  %v3097_v0 = vld [vmem:[#allocation3 + $0xd8] sm:$0xff]  ;;  %v3098_v58 = vld [vmem:[#allocation3 + $0xe0] sm:$0xff] }
 0x485   : > { %20436 = vst [vmem:[#allocation224_spill] sm:$0xff] %v16587_v27  ;;  %20437 = vst [vmem:[#allocation225_spill] sm:$0xff] %v16589_v44  ;;  %v16600_v49 = vld [vmem:[#allocation3 + $0xf0] sm:$0xff]  ;;  %v16602_v8 = vld [vmem:[#allocation3 + $0xf8] sm:$0xff]  ;;  %v16664_v2 = vsel %vm20096_vm2, %v3097_v0, %v11117_v9  ;;  %v16667_v42 = vsel %vm20096_vm2, %v3098_v58, %v11118_v38  ;;  %v20468_v9 = vpack.i.bf16 %v16334_v19, %v16332_v16  ;;  %v16715_v27 = vpop.permute.xlu1 %12490 }
 0x486   : > { %20439 = vst [vmem:[#allocation226_spill] sm:$0xff] %v16600_v49  ;;  %20440 = vst [vmem:[#allocation227_spill] sm:$0xff] %v16602_v8  ;;  %v16604_v35 = vld [vmem:[#allocation3 + $0xc4] sm:$0xff]  ;;  %v16606_v50 = vld [vmem:[#allocation3 + $0xcc] sm:$0xff] }
 0x487   : > { %20441 = vst [vmem:[#allocation228_spill] sm:$0xff] %v16604_v35  ;;  %20442 = vst [vmem:[#allocation229_spill] sm:$0xff] %v16606_v50  ;;  %v16608_v29 = vld [vmem:[#allocation3 + $0xd8] sm:$0xff]  ;;  %v16610_v18 = vld [vmem:[#allocation3 + $0xe0] sm:$0xff]  ;;  %12770 = vrot.lane.b32.xlu1 %v20468_v9, %s13436_s30 }
 0x488   : > { %20443 = vst [vmem:[#allocation230_spill] sm:$0xff] %v16608_v29  ;;  %20444 = vst [vmem:[#allocation231_spill] sm:$0xff] %v16610_v18  ;;  %v16612_v61 = vld [vmem:[#allocation3 + $0x10c] sm:$0xff]  ;;  %v16614_v11 = vld [vmem:[#allocation3 + $0x114] sm:$0xff]  ;;  %v20484_v29 = vpack.i.bf16 %v16351_v5, %v16349_v28 }
 0x489   : > { %20445 = vst [vmem:[#allocation232_spill] sm:$0xff] %v16612_v61  ;;  %20446 = vst [vmem:[#allocation233_spill] sm:$0xff] %v16614_v11  ;;  %v16627_v55 = vld [vmem:[#allocation3 + $0x120] sm:$0xff]  ;;  %v16629_v57 = vld [vmem:[#allocation3 + $0x128] sm:$0xff]  ;;  %v16725_v61 = vpop.permute.xlu0 %12475 }
 0x48a   : > { %20447 = vst [vmem:[#allocation234_spill] sm:$0xff] %v16621_v33  ;;  %20448 = vst [vmem:[#allocation235_spill] sm:$0xff] %v16623_v13  ;;  %v16631_v30 = vld [vmem:[#allocation3 + $0xf4] sm:$0xff]  ;;  %v16633_v59 = vld [vmem:[#allocation3 + $0xfc] sm:$0xff]  ;;  %12765 = vrot.lane.b32.xlu0 %v20484_v29, %s13435_s29 }
 0x48b   : > { %20449 = vst [vmem:[#allocation236_spill] sm:$0xff] %v16625_v12  ;;  %20450 = vst [vmem:[#allocation237_spill] sm:$0xff] %v16627_v55  ;;  %v16635_v34 = vld [vmem:[#allocation3 + $0x108] sm:$0xff]  ;;  %v16637_v26 = vld [vmem:[#allocation3 + $0x110] sm:$0xff]  ;;  %12780 = vrot.lane.b32.xlu1 %v16411_v51, %s13427_s17 }
 0x48c   : > { %20451 = vst [vmem:[#allocation238_spill] sm:$0xff] %v16629_v57  ;;  %20452 = vst [vmem:[#allocation239_spill] sm:$0xff] %v16631_v30  ;;  %v16639_v46 = vld [vmem:[#allocation3 + $0x13c] sm:$0xff]  ;;  %v16641_v17 = vld [vmem:[#allocation3 + $0x144] sm:$0xff] }
 0x48d   : > { %20453 = vst [vmem:[#allocation240_spill] sm:$0xff] %v16633_v59  ;;  %20454 = vst [vmem:[#allocation241_spill] sm:$0xff] %v16635_v34  ;;  %v16657_v12 = vld [vmem:[#allocation3 + $0x150] sm:$0xff]  ;;  %v16659_v13 = vld [vmem:[#allocation3 + $0x158] sm:$0xff]  ;;  %v16777_v59 = vpop.permute.xlu0 %12485 }
 0x48e   : > { %20455 = vst [vmem:[#allocation242_spill] sm:$0xff] %v16637_v26  ;;  %20456 = vst [vmem:[#allocation243_spill] sm:$0xff] %v16639_v46  ;;  %v16661_v33 = vld [vmem:[#allocation3 + $0x124] sm:$0xff]  ;;  %v16675_v20 = vld [vmem:[#allocation3 + $0x12c] sm:$0xff] }
 0x48f   : > { %20457 = vst [vmem:[#allocation244_spill] sm:$0xff] %v16641_v17  ;;  %20458 = vst [vmem:[#allocation245_spill] sm:$0xff] %v16645_v32  ;;  %v16679_v32 = vld [vmem:[#allocation3 + $0x140] sm:$0xff]  ;;  %v16693_v60 = vld [vmem:[#allocation3 + $0x16c] sm:$0xff]  ;;  %12790 = vrot.lane.b32.xlu1 %v16417_v43, %s13429_s19  ;;  %v20492_v43 = vpack.i.bf16 %v16355_v15, %v16353_v22 }
 0x490   : > { %20459 = vst [vmem:[#allocation246_spill] sm:$0xff] %v16649_v37  ;;  %20460 = vst [vmem:[#allocation247_spill] sm:$0xff] %v16651_v10  ;;  %v16677_v37 = vld [vmem:[#allocation3 + $0x138] sm:$0xff]  ;;  %v16709_v0 = vld [vmem:[#allocation3 + $0x188] sm:$0xff] }
 0x491   : > { %20461 = vst [vmem:[#allocation248_spill] sm:$0xff] %v16657_v12  ;;  %20462 = vst [vmem:[#allocation249_spill] sm:$0xff] %v16659_v13  ;;  %v16695_v10 = vld [vmem:[#allocation3 + $0x174] sm:$0xff]  ;;  %v16713_v58 = vld [vmem:[#allocation3 + $0x15c] sm:$0xff]  ;;  %v16770_v13 = vpop.permute.xlu1 %12500  ;;  %12775 = vrot.lane.b32.xlu0 %v20492_v43, %s13436_s30 }
 0x492   : > { %20463 = vst [vmem:[#allocation250_spill] sm:$0xff] %v16661_v33  ;;  %20464 = vst [vmem:[#allocation251_spill] sm:$0xff] %v16669_v53  ;;  %v16697_v53 = vld [vmem:[#allocation3 + $0x180] sm:$0xff]  ;;  %v16711_v38 = vld [vmem:[#allocation3 + $0x154] sm:$0xff] }
 0x493   : > { %20465 = vst [vmem:[#allocation252_spill] sm:$0xff] %v16675_v20  ;;  %20466 = vst [vmem:[#allocation253_spill] sm:$0xff] %v16677_v37  ;;  %v16735_v30 = vld [vmem:[#allocation3 + $0x168] sm:$0xff]  ;;  %v16737_v9 = vld [vmem:[#allocation3 + $0x170] sm:$0xff]  ;;  %12800 = vrot.lane.b32.xlu1 %v16421_v62, %s13431_s21 }
 0x494   : > { %20467 = vst [vmem:[#allocation254_spill] sm:$0xff] %v16679_v32  ;;  %20469 = vst [vmem:[#allocation255_spill] sm:$0xff] %v16693_v60  ;;  %v20478_v34 = vld [vmem:[#allocation30_spill] sm:$0xff]  ;;  %v16747_v11 = vld [vmem:[#allocation3 + $0x184] sm:$0xff] }
 0x495   : > { %20470 = vst [vmem:[#allocation256_spill] sm:$0xff] %v16695_v10  ;;  %20471 = vst [vmem:[#allocation257_spill] sm:$0xff] %v16697_v53  ;;  %v11163_v56 = vunpack.i.h.bf16 %v20478_v34  ;;  %v16749_v19 = vld [vmem:[#allocation3 + $0x18c] sm:$0xff]  ;;  %v16751_v60 = vld [vmem:[#allocation3 + $0x198] sm:$0xff] }
 0x496   : > { %20472 = vst [vmem:[#allocation258_spill] sm:$0xff] %v16709_v0  ;;  %20473 = vst [vmem:[#allocation259_spill] sm:$0xff] %v16711_v38  ;;  %v20482_v10 = vld [vmem:[#allocation31_spill] sm:$0xff]  ;;  %v3096_v5 = vld [vmem:[#allocation3 + $0xc8] sm:$0xff] }
 0x497   : > { %20474 = vst [vmem:[#allocation260_spill] sm:$0xff] %v16713_v58  ;;  %20475 = vst [vmem:[#allocation261_spill] sm:$0xff] %v16725_v61  ;;  %v11162_v61 = vunpack.i.l.bf16 %v20478_v34  ;;  %v11208_v37 = vunpack.i.h.bf16 %v20482_v10  ;;  %v11207_v32 = vunpack.i.l.bf16 %v20482_v10  ;;  %v20483_v34 = vld [vmem:[#allocation32_spill] sm:$0xff]  ;;  %v16761_v16 = vld [vmem:[#allocation3 + $0x1a0] sm:$0xff]  ;;  %v5819_v55 = vsel %vm20096_vm2, %v3096_v5, %v11163_v56 }
 0x498   : > { %20476 = vst [vmem:[#allocation262_spill] sm:$0xff] %v16735_v30  ;;  %20477 = vst [vmem:[#allocation263_spill] sm:$0xff] %v16737_v9  ;;  %v11253_v33 = vunpack.i.h.bf16 %v20483_v34  ;;  %v11252_v51 = vunpack.i.l.bf16 %v20483_v34  ;;  %v16763_v38 = vld [vmem:[#allocation3 + $0x19c] sm:$0xff]  ;;  %v16765_v58 = vld [vmem:[#allocation3 + $0x1a4] sm:$0xff] }
 0x499   : > { %20479 = vst [vmem:[#allocation30_spill] sm:$0xff] %v16747_v11  ;;  %20480 = vst [vmem:[#allocation264_spill] sm:$0xff] %v16749_v19  ;;  %v20488_v53 = vld [vmem:[#allocation35_spill] sm:$0xff]  ;;  %v20489_v10 = vld [vmem:[#allocation36_spill] sm:$0xff] }
 0x49a   : > { %20481 = vst [vmem:[#allocation265_spill] sm:$0xff] %v16751_v60  ;;  %20485 = vst [vmem:[#allocation31_spill] sm:$0xff] %v16761_v16  ;;  %v11513_v0 = vunpack.i.h.bf16 %v20488_v53  ;;  %v11512_v20 = vunpack.i.l.bf16 %v20488_v53  ;;  %v11523_v12 = vunpack.i.h.bf16 %v20489_v10  ;;  %v3095_v46 = vld [vmem:[#allocation3 + $0xc0] sm:$0xff]  ;;  %v11522_v28 = vunpack.i.l.bf16 %v20489_v10  ;;  %v20490_v29 = vld [vmem:[#allocation37_spill] sm:$0xff] }
 0x49b   : > { %20486 = vst [vmem:[#allocation32_spill] sm:$0xff] %v16763_v38  ;;  %20487 = vst [vmem:[#allocation266_spill] sm:$0xff] %v16765_v58  ;;  %v11508_v17 = vunpack.i.h.bf16 %v20490_v29  ;;  %v11507_v26 = vunpack.i.l.bf16 %v20490_v29  ;;  %v5818_v57 = vsel %vm20096_vm2, %v3095_v46, %v11162_v61  ;;  %v3101_v18 = vld [vmem:[#allocation3 + $0x108] sm:$0xff]  ;;  %v3102_v35 = vld [vmem:[#allocation3 + $0x110] sm:$0xff] }
 0x49c   : > { %20491 = vst [vmem:[#allocation35_spill] sm:$0xff] %v16777_v59  ;;  %v5824_v34 = vsel %vm20096_vm2, %v3101_v18, %v11207_v32  ;;  %v5825_v59 = vsel %vm20096_vm2, %v3102_v35, %v11208_v37  ;;  %v13399_v53 = vld [vmem:[#allocation3 + $0xf8] sm:$0xff]  ;;  %v13400_v61 = vld [vmem:[#allocation3 + $0xf0] sm:$0xff]  ;;  %v20493_v5 = vld [vmem:[#allocation23_spill] sm:$0xff] }
 0x49d   : > { %v16792_v56 = vsel %vm20096_vm2, %v13399_v53, %v11253_v33  ;;  %v16795_v46 = vsel %vm20096_vm2, %v13400_v61, %v11252_v51  ;;  %v16803_v29 = vsel %vm20095_vm4, %v20493_v5, %v11513_v0  ;;  %v20494_v18 = vld [vmem:[#allocation24_spill] sm:$0xff]  ;;  %v20495_v32 = vld [vmem:[#allocation154_spill] sm:$0xff]  ;;  %v16814_v53 = vpop.permute.xlu1 %12510  ;;  %v20499_v43 = vld [vmem:[#allocation27_spill] sm:$0xff] }
 0x49e   : > { %v16807_v35 = vsel %vm20095_vm4, %v20494_v18, %v11512_v20  ;;  %v16811_v33 = vsel %vm20095_vm4, %v20495_v32, %v11523_v12  ;;  %v20496_v37 = vld [vmem:[#allocation38_spill] sm:$0xff]  ;;  %v20497_v61 = vld [vmem:[#allocation156_spill] sm:$0xff]  ;;  %v16826_v20 = vsel %vm20095_vm4, %v20499_v43, %v11507_v26  ;;  %v16829_v12 = vpop.permute.xlu0 %12495  ;;  %v20500_v18 = vld [vmem:[#allocation39_spill] sm:$0xff] }
 0x49f   : > { %v11533_v51 = vunpack.i.h.bf16 %v20496_v37  ;;  %v16818_v15 = vsel %vm20095_vm4, %v20497_v61, %v11522_v28  ;;  %v20498_v22 = vld [vmem:[#allocation26_spill] sm:$0xff]  ;;  %v11532_v5 = vunpack.i.l.bf16 %v20496_v37  ;;  %v11518_v32 = vunpack.i.h.bf16 %v20500_v18  ;;  %v20501_v38 = vld [vmem:[#allocation40_spill] sm:$0xff]  ;;  %v20504_v60 = vld [vmem:[#allocation173_spill] sm:$0xff] }
 0x4a0   : > { %v16822_v0 = vsel %vm20095_vm4, %v20498_v22, %v11508_v17  ;;  %v11517_v10 = vunpack.i.l.bf16 %v20500_v18  ;;  %v11543_v58 = vunpack.i.h.bf16 %v20501_v38  ;;  %v11542_v28 = vunpack.i.l.bf16 %v20501_v38  ;;  %v20502_v17 = vld [vmem:[#allocation41_spill] sm:$0xff]  ;;  %v20503_v22 = vld [vmem:[#allocation42_spill] sm:$0xff]  ;;  %12785 = vrot.lane.b32.xlu0 %v20504_v60, %s13427_s17  ;;  %v20506_v11 = vld [vmem:[#allocation43_spill] sm:$0xff] }
 0x4a1   : > { %v11528_v61 = vunpack.i.h.bf16 %v20502_v17  ;;  %v11527_v26 = vunpack.i.l.bf16 %v20502_v17  ;;  %v11553_v43 = vunpack.i.h.bf16 %v20503_v22  ;;  %v11552_v37 = vunpack.i.l.bf16 %v20503_v22  ;;  %v20505_v16 = vld [vmem:[#allocation162_spill] sm:$0xff]  ;;  %v20507_v30 = vld [vmem:[#allocation44_spill] sm:$0xff]  ;;  %v16848_v9 = vpop.permute.xlu1 %12520  ;;  %v20508_v50 = vld [vmem:[#allocation159_spill] sm:$0xff] }
 0x4a2   : > { %v5845_v18 = vsel %vm20095_vm4, %v20505_v16, %v11533_v51  ;;  %v11538_v19 = vunpack.i.h.bf16 %v20506_v11  ;;  %v11537_v38 = vunpack.i.l.bf16 %v20506_v11  ;;  %v11563_v62 = vunpack.i.h.bf16 %v20507_v30  ;;  %v20509_v22 = vld [vmem:[#allocation45_spill] sm:$0xff]  ;;  %v16855_v3 = vpop.permute.xlu0 %12505  ;;  %v20510_v16 = vld [vmem:[#allocation158_spill] sm:$0xff]  ;;  %v20512_v36 = vld [vmem:[#allocation168_spill] sm:$0xff] }
 0x4a3   : > { %v5844_v17 = vsel %vm20095_vm4, %v20508_v50, %v11532_v5  ;;  %v11562_v49 = vunpack.i.l.bf16 %v20507_v30  ;;  %v11548_v8 = vunpack.i.h.bf16 %v20509_v22  ;;  %v11547_v44 = vunpack.i.l.bf16 %v20509_v22  ;;  %v20511_v40 = vld [vmem:[#allocation157_spill] sm:$0xff]  ;;  %v20514_v30 = vld [vmem:[#allocation174_spill] sm:$0xff]  ;;  %v20515_v5 = vld [vmem:[#allocation164_spill] sm:$0xff] }
 0x4a4   : > { %v5838_v51 = vsel %vm20095_vm4, %v20510_v16, %v11517_v10  ;;  %v5839_v11 = vsel %vm20095_vm4, %v20511_v40, %v11518_v32  ;;  %v5849_v14 = vsel %vm20095_vm4, %v20512_v36, %v11543_v58  ;;  %v20513_v7 = vld [vmem:[#allocation165_spill] sm:$0xff]  ;;  %12810 = vrot.lane.b32.xlu1 %v20514_v30, %s13431_s21  ;;  %v5842_v22 = vsel %vm20095_vm4, %v20515_v5, %v11527_v26  ;;  %v20516_v45 = vld [vmem:[#allocation163_spill] sm:$0xff] }
 0x4a5   : > { %v5848_v50 = vsel %vm20095_vm4, %v20513_v7, %v11542_v28  ;;  %v5843_v4 = vsel %vm20095_vm4, %v20516_v45, %v11528_v61  ;;  %v16873_v10 = vsel %vm20095_vm4, %v16667_v42, %v11553_v43  ;;  %v16877_v40 = vsel %vm20095_vm4, %v16664_v2, %v11552_v37  ;;  %v20517_v36 = vld [vmem:[#allocation177_spill] sm:$0xff]  ;;  %v20518_v42 = vld [vmem:[#allocation46_spill] sm:$0xff]  ;;  %v16893_v28 = vpop.permute.xlu1 %12530  ;;  %v20520_v37 = vld [vmem:[#allocation48_spill] sm:$0xff] }
 0x4a6   : > { %12795 = vrot.lane.b32.xlu0 %v20517_v36, %s13429_s19  ;;  %v16883_v7 = vsel %vm20095_vm4, %v16617_v41, %v11537_v38  ;;  %v16887_v58 = vsel %vm20095_vm4, %v16592_v24, %v11538_v19  ;;  %v16890_v45 = vsel %vm20095_vm4, %v5825_v59, %v11563_v62  ;;  %v11557_v32 = vunpack.i.l.bf16 %v20518_v42  ;;  %v16905_v24 = vpop.permute.xlu0 %12515  ;;  %v20519_v19 = vld [vmem:[#allocation47_spill] sm:$0xff] }
 0x4a7   : > { %v16896_v2 = vsel %vm20095_vm4, %v5824_v34, %v11562_v49  ;;  %v16899_v61 = vsel %vm20095_vm4, %v5818_v57, %v11547_v44  ;;  %v16902_v41 = vsel %vm20095_vm4, %v5819_v55, %v11548_v8  ;;  %v11558_v26 = vunpack.i.h.bf16 %v20518_v42  ;;  %v20521_v49 = vld [vmem:[#allocation49_spill] sm:$0xff]  ;;  %v20522_v55 = vld [vmem:[#allocation50_spill] sm:$0xff]  ;;  %v20523_v5 = vld [vmem:[#allocation51_spill] sm:$0xff] }
 0x4a8   : > { %v11593_v59 = vunpack.i.h.bf16 %v20519_v19  ;;  %v11592_v43 = vunpack.i.l.bf16 %v20519_v19  ;;  %v11603_v38 = vunpack.i.h.bf16 %v20520_v37  ;;  %v11602_v62 = vunpack.i.l.bf16 %v20520_v37  ;;  %12820 = vrot.lane.b32.xlu1 %v20517_v36, %s13430_s20  ;;  %v20524_v37 = vld [vmem:[#allocation52_spill] sm:$0xff] }
 0x4a9   : > { %v11588_v57 = vunpack.i.h.bf16 %v20521_v49  ;;  %v11587_v8 = vunpack.i.l.bf16 %v20521_v49  ;;  %v11613_v44 = vunpack.i.h.bf16 %v20522_v55  ;;  %v11612_v34 = vunpack.i.l.bf16 %v20522_v55  ;;  %v16924_v21 = vpop.permute.xlu1 %12540  ;;  %v20525_v55 = vld [vmem:[#allocation53_spill] sm:$0xff] }
 0x4aa   : > { %12805 = vrot.lane.b32.xlu0 %v20504_v60, %s13428_s18  ;;  %v5854_v16 = vsel %vm20095_vm4, %v16795_v46, %v11557_v32  ;;  %v11598_v42 = vunpack.i.h.bf16 %v20523_v5  ;;  %v11597_v19 = vunpack.i.l.bf16 %v20523_v5  ;;  %v11622_v36 = vunpack.i.l.bf16 %v20524_v37  ;;  %v16931_v48 = vpop.permute.xlu0 %12525 }
 0x4ab   : > { %v5855_v49 = vsel %vm20095_vm4, %v16792_v56, %v11558_v26  ;;  %v11623_v6 = vunpack.i.h.bf16 %v20524_v37  ;;  %v11608_v31 = vunpack.i.h.bf16 %v20525_v55  ;;  %v11607_v60 = vunpack.i.l.bf16 %v20525_v55 }
 0x4ac   : > { %v5868_v46 = vsel %vm2403_vm5, %v16807_v35, %v11592_v43  ;;  %v5869_v32 = vsel %vm2403_vm5, %v16803_v29, %v11593_v59  ;;  %v5872_v5 = vsel %vm2403_vm5, %v16818_v15, %v11602_v62  ;;  %v5873_v56 = vsel %vm2403_vm5, %v16811_v33, %v11603_v38  ;;  %12830 = vrot.lane.b32.xlu1 %v20514_v30, %s13434_s28  ;;  %v20526_v15 = vld [vmem:[#allocation178_spill] sm:$0xff]  ;;  %v20530_v62 = vld [vmem:[#allocation55_spill] sm:$0xff] }
 0x4ad   : > { %v5866_v26 = vsel %vm2403_vm5, %v16826_v20, %v11587_v8  ;;  %v5867_v37 = vsel %vm2403_vm5, %v16822_v0, %v11588_v57  ;;  %v16948_v35 = vsel %vm2403_vm5, %v5844_v17, %v11612_v34  ;;  %v16951_v29 = vsel %vm2403_vm5, %v5845_v18, %v11613_v44  ;;  %v20527_v59 = vld [vmem:[#allocation54_spill] sm:$0xff]  ;;  %v16965_v43 = vpop.permute.xlu1 %12550  ;;  %v20531_v8 = vld [vmem:[#allocation56_spill] sm:$0xff] }
 0x4ae   : > { %12815 = vrot.lane.b32.xlu0 %v20526_v15, %s13428_s18  ;;  %v16956_v33 = vsel %vm2403_vm5, %v5838_v51, %v11597_v19  ;;  %v16959_v30 = vsel %vm2403_vm5, %v5839_v11, %v11598_v42  ;;  %v16962_v20 = vsel %vm2403_vm5, %v5848_v50, %v11622_v36  ;;  %v11632_v0 = vunpack.i.l.bf16 %v20527_v59  ;;  %20528 = vst [vmem:[#allocation36_spill] sm:$0xff] %v16965_v43  ;;  %v16977_v11 = vpop.permute.xlu0 %12535  ;;  %v20535_v42 = vld [vmem:[#allocation57_spill] sm:$0xff]  ;;  %v20536_v19 = vld [vmem:[#allocation58_spill] sm:$0xff] }
 0x4af   : > { %v16968_v17 = vsel %vm2403_vm5, %v5849_v14, %v11623_v6  ;;  %v16971_v18 = vsel %vm2403_vm5, %v5842_v22, %v11607_v60  ;;  %v16974_v38 = vsel %vm2403_vm5, %v5843_v4, %v11608_v31  ;;  %v11633_v51 = vunpack.i.h.bf16 %v20527_v59  ;;  %20529 = vst [vmem:[#allocation37_spill] sm:$0xff] %v16977_v11  ;;  %v20532_v6 = vld [vmem:[#allocation161_spill] sm:$0xff]  ;;  %v20533_v14 = vld [vmem:[#allocation160_spill] sm:$0xff]  ;;  %v20537_v60 = vld [vmem:[#allocation179_spill] sm:$0xff] }
 0x4b0   : > { %v11618_v50 = vunpack.i.h.bf16 %v20530_v62  ;;  %v11617_v57 = vunpack.i.l.bf16 %v20530_v62  ;;  %v11643_v44 = vunpack.i.h.bf16 %v20531_v8  ;;  %v11642_v34 = vunpack.i.l.bf16 %v20531_v8  ;;  %v20538_v62 = vld [vmem:[#allocation59_spill] sm:$0xff] }
 0x4b1   : > { %v20534_v22 = vpack.i.bf16 %v20532_v6, %v20533_v14  ;;  %v11628_v4 = vunpack.i.h.bf16 %v20535_v42  ;;  %v11627_v31 = vunpack.i.l.bf16 %v20535_v42  ;;  %v11638_v36 = vunpack.i.h.bf16 %v20536_v19  ;;  %v20539_v6 = vld [vmem:[#allocation60_spill] sm:$0xff] }
 0x4b2   : > { %v11637_v55 = vunpack.i.l.bf16 %v20536_v19  ;;  %12825 = vrot.lane.b32.xlu0 %v20537_v60, %s13430_s20  ;;  %v5884_v59 = vsel %vm2403_vm5, %v16877_v40, %v11632_v0  ;;  %v11673_v8 = vunpack.i.h.bf16 %v20538_v62  ;;  %v11672_v54 = vunpack.i.l.bf16 %v20538_v62  ;;  %v20540_v19 = vld [vmem:[#allocation61_spill] sm:$0xff]  ;;  %v17005_v43 = vpop.permute.xlu0 %12545 }
 0x4b3   : > { %12840 = vrot.lane.b32.xlu1 %v20534_v22, %s13435_s29  ;;  %v11682_v14 = vunpack.i.l.bf16 %v20539_v6  ;;  %v16998_v22 = vpop.permute.xlu1 %12560  ;;  %v5885_v42 = vsel %vm2403_vm5, %v16873_v10, %v11633_v51  ;;  %v11683_v23 = vunpack.i.h.bf16 %v20539_v6  ;;  %v11668_v47 = vunpack.i.h.bf16 %v20540_v19 }
 0x4b4   : > { %v11667_v11 = vunpack.i.l.bf16 %v20540_v19  ;;  %v5878_v40 = vsel %vm2403_vm5, %v16883_v7, %v11617_v57  ;;  %v5879_v0 = vsel %vm2403_vm5, %v16887_v58, %v11618_v50  ;;  %v5888_v62 = vsel %vm2403_vm5, %v16896_v2, %v11642_v34  ;;  %v20542_v2 = vld [vmem:[#allocation62_spill] sm:$0xff]  ;;  %v20545_v34 = vld [vmem:[#allocation64_spill] sm:$0xff] }
 0x4b5   : > { %v5889_v10 = vsel %vm2403_vm5, %v16890_v45, %v11643_v44  ;;  %v20541_v51 = vpack.i.bf16 %v16391_v52, %v16389_v25  ;;  %v5882_v6 = vsel %vm2403_vm5, %v16899_v61, %v11627_v31  ;;  %v5883_v7 = vsel %vm2403_vm5, %v16902_v41, %v11628_v4  ;;  %v20550_v19 = vld [vmem:[#allocation68_spill] sm:$0xff] }
 0x4b6   : > { %v17024_v57 = vsel %vm2403_vm5, %v5854_v16, %v11637_v55  ;;  %v17027_v58 = vsel %vm2403_vm5, %v5855_v49, %v11638_v36  ;;  %12835 = vrot.lane.b32.xlu0 %v16460_v39, %s13434_s28  ;;  %v17032_v45 = vsel %vm2436_vm6, %v5868_v46, %v11672_v54  ;;  %v17035_v25 = vsel %vm2436_vm6, %v5869_v32, %v11673_v8  ;;  %v17053_v46 = vpop.permute.xlu0 %12555  ;;  %v20544_v32 = vld [vmem:[#allocation63_spill] sm:$0xff] }
 0x4b7   : > { %12850 = vrot.lane.b32.xlu1 %v20541_v51, %s13436_s30  ;;  %v17038_v52 = vsel %vm2436_vm6, %v5872_v5, %v11682_v14  ;;  %v11692_v61 = vunpack.i.l.bf16 %v20542_v2  ;;  %v17041_v41 = vpop.permute.xlu1 %12570  ;;  %v17044_v16 = vsel %vm2436_vm6, %v5873_v56, %v11683_v23  ;;  %v17047_v49 = vsel %vm2436_vm6, %v5866_v26, %v11667_v11  ;;  %v20546_v23 = vld [vmem:[#allocation65_spill] sm:$0xff]  ;;  %v20547_v26 = vld [vmem:[#allocation66_spill] sm:$0xff]  ;;  %v20549_v8 = vld [vmem:[#allocation67_spill] sm:$0xff] }
 0x4b8   : > { %20543 = vst [vmem:[#allocation23_spill] sm:$0xff] %v17041_v41  ;;  %v17050_v50 = vsel %vm2436_vm6, %v5867_v37, %v11668_v47  ;;  %v11693_v54 = vunpack.i.h.bf16 %v20542_v2  ;;  %v11678_v5 = vunpack.i.h.bf16 %v20544_v32  ;;  %v11677_v44 = vunpack.i.l.bf16 %v20544_v32 }
 0x4b9   : > { %v11703_v4 = vunpack.i.h.bf16 %v20545_v34  ;;  %v11702_v31 = vunpack.i.l.bf16 %v20545_v34  ;;  %v11688_v56 = vunpack.i.h.bf16 %v20546_v23  ;;  %v11687_v47 = vunpack.i.l.bf16 %v20546_v23  ;;  %v20552_v23 = vld [vmem:[#allocation69_spill] sm:$0xff] }
 0x4ba   : > { %v11713_v37 = vunpack.i.h.bf16 %v20547_v26  ;;  %v11712_v11 = vunpack.i.l.bf16 %v20547_v26  ;;  %v20548_v36 = vpack.i.bf16 %v16395_v1, %v16393_v63  ;;  %v5908_v55 = vsel %vm2436_vm6, %v16948_v35, %v11692_v61  ;;  %v17081_v1 = vpop.permute.xlu0 %12565 }
 0x4bb   : > { %12860 = vrot.lane.b32.xlu1 %v20526_v15, %s13427_s17  ;;  %v11698_v14 = vunpack.i.h.bf16 %v20549_v8  ;;  %v11697_v15 = vunpack.i.l.bf16 %v20549_v8  ;;  %v11722_v51 = vunpack.i.l.bf16 %v20550_v19  ;;  %v17074_v2 = vpop.permute.xlu1 %12580  ;;  %v5909_v32 = vsel %vm2436_vm6, %v16951_v29, %v11693_v54 }
 0x4bc   : > { %12845 = vrot.lane.b32.xlu0 %v20548_v36, %s13435_s29  ;;  %20551 = vst [vmem:[#allocation24_spill] sm:$0xff] %v17074_v2  ;;  %v11723_v34 = vunpack.i.h.bf16 %v20550_v19  ;;  %v11708_v26 = vunpack.i.h.bf16 %v20552_v23  ;;  %v11707_v63 = vunpack.i.l.bf16 %v20552_v23  ;;  %v5902_v35 = vsel %vm2436_vm6, %v16956_v33, %v11677_v44  ;;  %v20562_v19 = vld [vmem:[#allocation74_spill] sm:$0xff]  ;;  %v20563_v23 = vld [vmem:[#allocation185_spill] sm:$0xff] }
 0x4bd   : > { %v5903_v61 = vsel %vm2436_vm6, %v16959_v30, %v11678_v5  ;;  %v5912_v36 = vsel %vm2436_vm6, %v16962_v20, %v11702_v31  ;;  %v5913_v29 = vsel %vm2436_vm6, %v16968_v17, %v11703_v4  ;;  %v5906_v54 = vsel %vm2436_vm6, %v16971_v18, %v11687_v47  ;;  %v20553_v20 = vld [vmem:[#allocation167_spill] sm:$0xff]  ;;  %v20554_v5 = vld [vmem:[#allocation166_spill] sm:$0xff] }
 0x4be   : > { %v5907_v8 = vsel %vm2436_vm6, %v16974_v38, %v11688_v56  ;;  %v17098_v33 = vsel %vm2436_vm6, %v5884_v59, %v11712_v11  ;;  %v17101_v30 = vsel %vm2436_vm6, %v5885_v42, %v11713_v37  ;;  %v20555_v44 = vpack.i.bf16 %v20553_v20, %v20554_v5  ;;  %v20556_v38 = vld [vmem:[#allocation70_spill] sm:$0xff]  ;;  %v20559_v47 = vld [vmem:[#allocation71_spill] sm:$0xff]  ;;  %v20560_v11 = vld [vmem:[#allocation72_spill] sm:$0xff] }
 0x4bf   : > { %12870 = vrot.lane.b32.xlu1 %v20537_v60, %s13429_s19  ;;  %v17108_v17 = vsel %vm2436_vm6, %v5878_v40, %v11697_v15  ;;  %v17111_v60 = vsel %vm2436_vm6, %v5879_v0, %v11698_v14  ;;  %v17114_v18 = vsel %vm2436_vm6, %v5888_v62, %v11722_v51  ;;  %v11717_v59 = vunpack.i.l.bf16 %v20556_v38  ;;  %v17117_v4 = vpop.permute.xlu1 %12590  ;;  %v17129_v0 = vpop.permute.xlu0 %12575 }
 0x4c0   : > { %12855 = vrot.lane.b32.xlu0 %v20555_v44, %s13436_s30  ;;  %20557 = vst [vmem:[#allocation154_spill] sm:$0xff] %v17117_v4  ;;  %v17120_v42 = vsel %vm2436_vm6, %v5889_v10, %v11723_v34  ;;  %v17123_v31 = vsel %vm2436_vm6, %v5882_v6, %v11707_v63  ;;  %v17126_v56 = vsel %vm2436_vm6, %v5883_v7, %v11708_v26  ;;  %v11718_v40 = vunpack.i.h.bf16 %v20556_v38  ;;  %v20561_v10 = vld [vmem:[#allocation73_spill] sm:$0xff]  ;;  %v20564_v63 = vld [vmem:[#allocation75_spill] sm:$0xff]  ;;  %v20565_v44 = vld [vmem:[#allocation76_spill] sm:$0xff] }
 0x4c1   : > { %20558 = vst [vmem:[#allocation38_spill] sm:$0xff] %v17129_v0  ;;  %v11753_v62 = vunpack.i.h.bf16 %v20559_v47  ;;  %v11752_v37 = vunpack.i.l.bf16 %v20559_v47  ;;  %v11763_v14 = vunpack.i.h.bf16 %v20560_v11  ;;  %v11762_v15 = vunpack.i.l.bf16 %v20560_v11 }
 0x4c2   : > { %v11748_v6 = vunpack.i.h.bf16 %v20561_v10  ;;  %v11747_v7 = vunpack.i.l.bf16 %v20561_v10  ;;  %v11773_v51 = vunpack.i.h.bf16 %v20562_v19  ;;  %v11772_v34 = vunpack.i.l.bf16 %v20562_v19  ;;  %v20567_v10 = vld [vmem:[#allocation77_spill] sm:$0xff] }
 0x4c3   : > { %12880 = vrot.lane.b32.xlu1 %v16460_v39, %s13431_s21  ;;  %v5918_v26 = vsel %vm2436_vm6, %v17024_v57, %v11717_v59  ;;  %v11758_v20 = vunpack.i.h.bf16 %v20564_v63  ;;  %v11757_v5 = vunpack.i.l.bf16 %v20564_v63  ;;  %v11782_v39 = vunpack.i.l.bf16 %v20565_v44  ;;  %v17148_v38 = vpop.permute.xlu1 %12600  ;;  %v17155_v4 = vpop.permute.xlu0 %12585 }
 0x4c4   : > { %12865 = vrot.lane.b32.xlu0 %v20563_v23, %s13427_s17  ;;  %20566 = vst [vmem:[#allocation156_spill] sm:$0xff] %v17148_v38  ;;  %v5919_v47 = vsel %vm2436_vm6, %v17027_v58, %v11718_v40  ;;  %v11783_v11 = vunpack.i.h.bf16 %v20565_v44  ;;  %v11768_v19 = vunpack.i.h.bf16 %v20567_v10  ;;  %v11767_v0 = vunpack.i.l.bf16 %v20567_v10  ;;  %20568 = vst [vmem:[#allocation26_spill] sm:$0xff] %v17155_v4  ;;  %v20569_v40 = vld [vmem:[#allocation186_spill] sm:$0xff] }
 0x4c5   : > { %v5932_v57 = vsel %vm2469_vm7, %v17032_v45, %v11752_v37  ;;  %v5933_v59 = vsel %vm2469_vm7, %v17035_v25, %v11753_v62  ;;  %v5936_v63 = vsel %vm2469_vm7, %v17038_v52, %v11762_v15  ;;  %v5937_v58 = vsel %vm2469_vm7, %v17044_v16, %v11763_v14  ;;  %v20570_v52 = vld [vmem:[#allocation187_spill] sm:$0xff]  ;;  %v20571_v37 = vld [vmem:[#allocation78_spill] sm:$0xff] }
 0x4c6   : > { %v5930_v44 = vsel %vm2469_vm7, %v17047_v49, %v11747_v7  ;;  %v5931_v10 = vsel %vm2469_vm7, %v17050_v50, %v11748_v6  ;;  %v17172_v45 = vsel %vm2469_vm7, %v5908_v55, %v11772_v34  ;;  %v17175_v25 = vsel %vm2469_vm7, %v5909_v32, %v11773_v51  ;;  %v20574_v6 = vld [vmem:[#allocation79_spill] sm:$0xff]  ;;  %v20575_v51 = vld [vmem:[#allocation80_spill] sm:$0xff] }
 0x4c7   : > { %12890 = vrot.lane.b32.xlu1 %v20569_v40, %s13431_s21  ;;  %v17180_v16 = vsel %vm2469_vm7, %v5902_v35, %v11757_v5  ;;  %v17183_v62 = vsel %vm2469_vm7, %v5903_v61, %v11758_v20  ;;  %v17186_v49 = vsel %vm2469_vm7, %v5912_v36, %v11782_v39  ;;  %v11792_v50 = vunpack.i.l.bf16 %v20571_v37  ;;  %v17189_v14 = vpop.permute.xlu1 %12610  ;;  %v17201_v61 = vpop.permute.xlu0 %12595 }
 0x4c8   : > { %12875 = vrot.lane.b32.xlu0 %v20570_v52, %s13429_s19  ;;  %20572 = vst [vmem:[#allocation27_spill] sm:$0xff] %v17189_v14  ;;  %v17192_v55 = vsel %vm2469_vm7, %v5913_v29, %v11783_v11  ;;  %v17195_v32 = vsel %vm2469_vm7, %v5906_v54, %v11767_v0  ;;  %v17198_v15 = vsel %vm2469_vm7, %v5907_v8, %v11768_v19  ;;  %v11793_v35 = vunpack.i.h.bf16 %v20571_v37  ;;  %v20576_v29 = vld [vmem:[#allocation81_spill] sm:$0xff]  ;;  %v20577_v0 = vld [vmem:[#allocation82_spill] sm:$0xff]  ;;  %v20578_v19 = vld [vmem:[#allocation83_spill] sm:$0xff] }
 0x4c9   : > { %20573 = vst [vmem:[#allocation39_spill] sm:$0xff] %v17201_v61  ;;  %v11778_v36 = vunpack.i.h.bf16 %v20574_v6  ;;  %v11777_v7 = vunpack.i.l.bf16 %v20574_v6  ;;  %v11803_v34 = vunpack.i.h.bf16 %v20575_v51  ;;  %v11802_v20 = vunpack.i.l.bf16 %v20575_v51  ;;  %v20579_v51 = vld [vmem:[#allocation84_spill] sm:$0xff] }
 0x4ca   : > { %v11788_v54 = vunpack.i.h.bf16 %v20576_v29  ;;  %v11787_v8 = vunpack.i.l.bf16 %v20576_v29  ;;  %v11798_v5 = vunpack.i.h.bf16 %v20577_v0  ;;  %v11797_v39 = vunpack.i.l.bf16 %v20577_v0  ;;  %v20581_v0 = vld [vmem:[#allocation85_spill] sm:$0xff] }
 0x4cb   : > { %12900 = vrot.lane.b32.xlu1 %v20570_v52, %s13430_s20  ;;  %v5948_v11 = vsel %vm2469_vm7, %v17098_v33, %v11792_v50  ;;  %v11833_v37 = vunpack.i.h.bf16 %v20578_v19  ;;  %v11832_v6 = vunpack.i.l.bf16 %v20578_v19  ;;  %v11843_v52 = vunpack.i.h.bf16 %v20579_v51  ;;  %v17220_v61 = vpop.permute.xlu1 %12620  ;;  %v17227_v38 = vpop.permute.xlu0 %12605 }
 0x4cc   : > { %12885 = vrot.lane.b32.xlu0 %v20563_v23, %s13428_s18  ;;  %20580 = vst [vmem:[#allocation40_spill] sm:$0xff] %v17220_v61  ;;  %v5949_v29 = vsel %vm2469_vm7, %v17101_v30, %v11793_v35  ;;  %v11842_v14 = vunpack.i.l.bf16 %v20579_v51  ;;  %v11828_v4 = vunpack.i.h.bf16 %v20581_v0  ;;  %v11827_v23 = vunpack.i.l.bf16 %v20581_v0  ;;  %20582 = vst [vmem:[#allocation41_spill] sm:$0xff] %v17227_v38 }
 0x4cd   : > { %v5942_v33 = vsel %vm2469_vm7, %v17108_v17, %v11777_v7  ;;  %v5943_v50 = vsel %vm2469_vm7, %v17111_v60, %v11778_v36  ;;  %v5952_v19 = vsel %vm2469_vm7, %v17114_v18, %v11802_v20  ;;  %v5953_v30 = vsel %vm2469_vm7, %v17120_v42, %v11803_v34  ;;  %v20583_v18 = vld [vmem:[#allocation188_spill] sm:$0xff]  ;;  %v20584_v36 = vld [vmem:[#allocation86_spill] sm:$0xff]  ;;  %v20587_v20 = vld [vmem:[#allocation87_spill] sm:$0xff] }
 0x4ce   : > { %v5946_v35 = vsel %vm2469_vm7, %v17123_v31, %v11787_v8  ;;  %v5947_v51 = vsel %vm2469_vm7, %v17126_v56, %v11788_v54  ;;  %v17244_v17 = vsel %vm2469_vm7, %v5918_v26, %v11797_v39  ;;  %v17247_v60 = vsel %vm2469_vm7, %v5919_v47, %v11798_v5  ;;  %v20588_v8 = vld [vmem:[#allocation88_spill] sm:$0xff] }
 0x4cf   : > { %12910 = vrot.lane.b32.xlu1 %v20569_v40, %s13434_s28  ;;  %v17252_v42 = vsel %vm2502_vm8, %v5933_v59, %v11833_v37  ;;  %v17255_v40 = vsel %vm2502_vm8, %v5932_v57, %v11832_v6  ;;  %v17258_v31 = vsel %vm2502_vm8, %v5937_v58, %v11843_v52  ;;  %v11853_v56 = vunpack.i.h.bf16 %v20584_v36  ;;  %v17261_v7 = vpop.permute.xlu1 %12630  ;;  %v17273_v57 = vpop.permute.xlu0 %12615  ;;  %v20592_v37 = vld [vmem:[#allocation89_spill] sm:$0xff]  ;;  %v20593_v6 = vld [vmem:[#allocation90_spill] sm:$0xff] }
 0x4d0   : > { %12895 = vrot.lane.b32.xlu0 %v20583_v18, %s13428_s18  ;;  %20585 = vst [vmem:[#allocation42_spill] sm:$0xff] %v17261_v7  ;;  %v17264_v26 = vsel %vm2502_vm8, %v5936_v63, %v11842_v14  ;;  %v17267_v47 = vsel %vm2502_vm8, %v5930_v44, %v11827_v23  ;;  %v17270_v34 = vsel %vm2502_vm8, %v5931_v10, %v11828_v4  ;;  %v11852_v59 = vunpack.i.l.bf16 %v20584_v36  ;;  %v20589_v63 = vld [vmem:[#allocation172_spill] sm:$0xff]  ;;  %v20590_v14 = vld [vmem:[#allocation171_spill] sm:$0xff]  ;;  %v20594_v23 = vld [vmem:[#allocation193_spill] sm:$0xff] }
 0x4d1   : > { %20586 = vst [vmem:[#allocation173_spill] sm:$0xff] %v17273_v57  ;;  %v11838_v58 = vunpack.i.h.bf16 %v20587_v20  ;;  %v11837_v54 = vunpack.i.l.bf16 %v20587_v20  ;;  %v11863_v5 = vunpack.i.h.bf16 %v20588_v8  ;;  %v11862_v39 = vunpack.i.l.bf16 %v20588_v8  ;;  %v20595_v20 = vld [vmem:[#allocation91_spill] sm:$0xff] }
 0x4d2   : > { %v20591_v44 = vpack.i.bf16 %v20589_v63, %v20590_v14  ;;  %v11848_v4 = vunpack.i.h.bf16 %v20592_v37  ;;  %v11847_v10 = vunpack.i.l.bf16 %v20592_v37  ;;  %v11873_v52 = vunpack.i.h.bf16 %v20593_v6  ;;  %v20596_v63 = vld [vmem:[#allocation92_spill] sm:$0xff] }
 0x4d3   : > { %v11872_v0 = vunpack.i.l.bf16 %v20593_v6  ;;  %v5973_v36 = vsel %vm2502_vm8, %v17175_v25, %v11853_v56  ;;  %v11858_v8 = vunpack.i.h.bf16 %v20595_v20  ;;  %v11857_v7 = vunpack.i.l.bf16 %v20595_v20  ;;  %v20598_v6 = vld [vmem:[#allocation93_spill] sm:$0xff]  ;;  %v17301_v2 = vpop.permute.xlu0 %12625 }
 0x4d4   : > { %12920 = vrot.lane.b32.xlu1 %v20591_v44, %s13435_s29  ;;  %12905 = vrot.lane.b32.xlu0 %v20594_v23, %s13430_s20  ;;  %v11883_v14 = vunpack.i.h.bf16 %v20596_v63  ;;  %v17294_v44 = vpop.permute.xlu1 %12640  ;;  %v5972_v37 = vsel %vm2502_vm8, %v17172_v45, %v11852_v59  ;;  %v11882_v57 = vunpack.i.l.bf16 %v20596_v63  ;;  %v11868_v38 = vunpack.i.h.bf16 %v20598_v6  ;;  %20599 = vst [vmem:[#allocation43_spill] sm:$0xff] %v17301_v2  ;;  %v20600_v59 = vld [vmem:[#allocation176_spill] sm:$0xff]  ;;  %v20601_v63 = vld [vmem:[#allocation175_spill] sm:$0xff]  ;;  %v20616_v2 = vld [vmem:[#allocation101_spill] sm:$0xff] }
 0x4d5   : > { %20597 = vst [vmem:[#allocation162_spill] sm:$0xff] %v17294_v44  ;;  %v11867_v61 = vunpack.i.l.bf16 %v20598_v6  ;;  %v5966_v25 = vsel %vm2502_vm8, %v17180_v16, %v11837_v54  ;;  %v5967_v56 = vsel %vm2502_vm8, %v17183_v62, %v11838_v58  ;;  %v5977_v20 = vsel %vm2502_vm8, %v17192_v55, %v11863_v5  ;;  %v20603_v55 = vld [vmem:[#allocation196_spill] sm:$0xff]  ;;  %v20604_v5 = vld [vmem:[#allocation94_spill] sm:$0xff] }
 0x4d6   : > { %v5976_v45 = vsel %vm2502_vm8, %v17186_v49, %v11862_v39  ;;  %v20602_v44 = vpack.i.bf16 %v20600_v59, %v20601_v63  ;;  %v5970_v6 = vsel %vm2502_vm8, %v17195_v32, %v11847_v10  ;;  %v5971_v16 = vsel %vm2502_vm8, %v17198_v15, %v11848_v4 }
 0x4d7   : > { %v17320_v54 = vsel %vm2502_vm8, %v5949_v29, %v11873_v52  ;;  %v17323_v62 = vsel %vm2502_vm8, %v5948_v11, %v11872_v0  ;;  %v17328_v49 = vsel %vm2502_vm8, %v5942_v33, %v11857_v7  ;;  %v17331_v58 = vsel %vm2502_vm8, %v5943_v50, %v11858_v8  ;;  %v17349_v50 = vpop.permute.xlu0 %12635  ;;  %v20607_v7 = vld [vmem:[#allocation95_spill] sm:$0xff]  ;;  %v20608_v52 = vld [vmem:[#allocation96_spill] sm:$0xff] }
 0x4d8   : > { %12930 = vrot.lane.b32.xlu1 %v20602_v44, %s13436_s30  ;;  %12915 = vrot.lane.b32.xlu0 %v20603_v55, %s13434_s28  ;;  %v17334_v32 = vsel %vm2502_vm8, %v5953_v30, %v11883_v14  ;;  %v11877_v15 = vunpack.i.l.bf16 %v20604_v5  ;;  %v17337_v39 = vpop.permute.xlu1 %12650  ;;  %v17340_v29 = vsel %vm2502_vm8, %v5952_v19, %v11882_v57  ;;  %v17343_v11 = vsel %vm2502_vm8, %v5946_v35, %v11867_v61  ;;  %v20609_v61 = vld [vmem:[#allocation97_spill] sm:$0xff]  ;;  %v20610_v35 = vld [vmem:[#allocation98_spill] sm:$0xff]  ;;  %v20612_v44 = vld [vmem:[#allocation180_spill] sm:$0xff] }
 0x4d9   : > { %20605 = vst [vmem:[#allocation44_spill] sm:$0xff] %v17337_v39  ;;  %v17346_v4 = vsel %vm2502_vm8, %v5947_v51, %v11868_v38  ;;  %v11878_v33 = vunpack.i.h.bf16 %v20604_v5  ;;  %20606 = vst [vmem:[#allocation159_spill] sm:$0xff] %v17349_v50  ;;  %v11913_v30 = vunpack.i.h.bf16 %v20607_v7  ;;  %v11912_v10 = vunpack.i.l.bf16 %v20607_v7  ;;  %v20611_v14 = vld [vmem:[#allocation181_spill] sm:$0xff]  ;;  %v20614_v5 = vld [vmem:[#allocation99_spill] sm:$0xff] }
 0x4da   : > { %v11923_v0 = vunpack.i.h.bf16 %v20608_v52  ;;  %v11922_v8 = vunpack.i.l.bf16 %v20608_v52  ;;  %v11908_v19 = vunpack.i.h.bf16 %v20609_v61  ;;  %v11907_v38 = vunpack.i.l.bf16 %v20609_v61  ;;  %v20615_v52 = vld [vmem:[#allocation100_spill] sm:$0xff] }
 0x4db   : > { %v11933_v51 = vunpack.i.h.bf16 %v20610_v35  ;;  %v11932_v57 = vunpack.i.l.bf16 %v20610_v35  ;;  %v20613_v59 = vpack.i.bf16 %v20611_v14, %v20612_v44  ;;  %v5982_v63 = vsel %vm2502_vm8, %v17244_v17, %v11877_v15  ;;  %v17377_v44 = vpop.permute.xlu0 %12645 }
 0x4dc   : > { %12940 = vrot.lane.b32.xlu1 %v20583_v18, %s13427_s17  ;;  %v11918_v7 = vunpack.i.h.bf16 %v20614_v5  ;;  %v11917_v18 = vunpack.i.l.bf16 %v20614_v5  ;;  %v11942_v39 = vunpack.i.l.bf16 %v20615_v52  ;;  %v17370_v50 = vpop.permute.xlu1 %12660  ;;  %v5983_v61 = vsel %vm2502_vm8, %v17247_v60, %v11878_v33 }
 0x4dd   : > { %12925 = vrot.lane.b32.xlu0 %v20613_v59, %s13435_s29  ;;  %v11943_v35 = vunpack.i.h.bf16 %v20615_v52  ;;  %v11928_v41 = vunpack.i.h.bf16 %v20616_v2  ;;  %v11927_v14 = vunpack.i.l.bf16 %v20616_v2  ;;  %v5996_v17 = vsel %vm2535_vm9, %v17255_v40, %v11912_v10  ;;  %v20627_v52 = vld [vmem:[#allocation197_spill] sm:$0xff] }
 0x4de   : > { %v5997_v15 = vsel %vm2535_vm9, %v17252_v42, %v11913_v30  ;;  %v6000_v59 = vsel %vm2535_vm9, %v17264_v26, %v11922_v8  ;;  %v6001_v60 = vsel %vm2535_vm9, %v17258_v31, %v11923_v0  ;;  %v5994_v2 = vsel %vm2535_vm9, %v17267_v47, %v11907_v38  ;;  %v20617_v26 = vld [vmem:[#allocation183_spill] sm:$0xff]  ;;  %v20618_v30 = vld [vmem:[#allocation182_spill] sm:$0xff] }
 0x4df   : > { %v5995_v33 = vsel %vm2535_vm9, %v17270_v34, %v11908_v19  ;;  %v17394_v40 = vsel %vm2535_vm9, %v5972_v37, %v11932_v57  ;;  %v17397_v42 = vsel %vm2535_vm9, %v5973_v36, %v11933_v51  ;;  %v20619_v10 = vpack.i.bf16 %v20617_v26, %v20618_v30  ;;  %v20620_v34 = vld [vmem:[#allocation102_spill] sm:$0xff]  ;;  %v20623_v38 = vld [vmem:[#allocation103_spill] sm:$0xff]  ;;  %v20624_v51 = vld [vmem:[#allocation104_spill] sm:$0xff] }
 0x4e0   : > { %12950 = vrot.lane.b32.xlu1 %v20594_v23, %s13429_s19  ;;  %v17404_v31 = vsel %vm2535_vm9, %v5966_v25, %v11917_v18  ;;  %v17407_v23 = vsel %vm2535_vm9, %v5967_v56, %v11918_v7  ;;  %v17410_v47 = vsel %vm2535_vm9, %v5976_v45, %v11942_v39  ;;  %v11952_v37 = vunpack.i.l.bf16 %v20620_v34  ;;  %v17413_v0 = vpop.permute.xlu1 %12670  ;;  %v17425_v56 = vpop.permute.xlu0 %12655 }
 0x4e1   : > { %12935 = vrot.lane.b32.xlu0 %v20619_v10, %s13436_s30  ;;  %20621 = vst [vmem:[#allocation45_spill] sm:$0xff] %v17413_v0  ;;  %v17416_v36 = vsel %vm2535_vm9, %v5977_v20, %v11943_v35  ;;  %v17419_v8 = vsel %vm2535_vm9, %v5970_v6, %v11927_v14  ;;  %v17422_v19 = vsel %vm2535_vm9, %v5971_v16, %v11928_v41  ;;  %v11953_v25 = vunpack.i.h.bf16 %v20620_v34  ;;  %v20625_v20 = vld [vmem:[#allocation105_spill] sm:$0xff]  ;;  %v20626_v16 = vld [vmem:[#allocation106_spill] sm:$0xff]  ;;  %v20629_v10 = vld [vmem:[#allocation111_spill] sm:$0xff] }
 0x4e2   : > { %20622 = vst [vmem:[#allocation158_spill] sm:$0xff] %v17425_v56  ;;  %v11938_v45 = vunpack.i.h.bf16 %v20623_v38  ;;  %v11937_v39 = vunpack.i.l.bf16 %v20623_v38  ;;  %v11963_v57 = vunpack.i.h.bf16 %v20624_v51  ;;  %v11962_v5 = vunpack.i.l.bf16 %v20624_v51  ;;  %v20628_v14 = vld [vmem:[#allocation109_spill] sm:$0xff] }
 0x4e3   : > { %v11948_v6 = vunpack.i.h.bf16 %v20625_v20  ;;  %v11947_v41 = vunpack.i.l.bf16 %v20625_v20  ;;  %v11958_v7 = vunpack.i.h.bf16 %v20626_v16  ;;  %v11957_v18 = vunpack.i.l.bf16 %v20626_v16  ;;  %v20631_v20 = vld [vmem:[#allocation112_spill] sm:$0xff] }
 0x4e4   : > { %12960 = vrot.lane.b32.xlu1 %v20603_v55, %s13431_s21  ;;  %v6012_v35 = vsel %vm2535_vm9, %v17323_v62, %v11952_v37  ;;  %v11993_v26 = vunpack.i.h.bf16 %v20628_v14  ;;  %v11992_v30 = vunpack.i.l.bf16 %v20628_v14  ;;  %v12002_v55 = vunpack.i.l.bf16 %v20629_v10  ;;  %v17444_v34 = vpop.permute.xlu1 %12680  ;;  %v17451_v0 = vpop.permute.xlu0 %12665 }
 0x4e5   : > { %12945 = vrot.lane.b32.xlu0 %v20627_v52, %s13427_s17  ;;  %20630 = vst [vmem:[#allocation157_spill] sm:$0xff] %v17444_v34  ;;  %v6013_v38 = vsel %vm2535_vm9, %v17320_v54, %v11953_v25  ;;  %v12003_v51 = vunpack.i.h.bf16 %v20629_v10  ;;  %v11988_v16 = vunpack.i.h.bf16 %v20631_v20  ;;  %v11987_v56 = vunpack.i.l.bf16 %v20631_v20  ;;  %20632 = vst [vmem:[#allocation168_spill] sm:$0xff] %v17451_v0  ;;  %v20633_v25 = vld [vmem:[#allocation199_spill] sm:$0xff] }
 0x4e6   : > { %v6006_v62 = vsel %vm2535_vm9, %v17328_v49, %v11937_v39  ;;  %v6007_v37 = vsel %vm2535_vm9, %v17331_v58, %v11938_v45  ;;  %v6016_v14 = vsel %vm2535_vm9, %v17340_v29, %v11962_v5  ;;  %v6017_v54 = vsel %vm2535_vm9, %v17334_v32, %v11963_v57  ;;  %v20634_v29 = vld [vmem:[#allocation200_spill] sm:$0xff]  ;;  %v20635_v39 = vld [vmem:[#allocation113_spill] sm:$0xff] }
 0x4e7   : > { %v6010_v10 = vsel %vm2535_vm9, %v17343_v11, %v11947_v41  ;;  %v6011_v20 = vsel %vm2535_vm9, %v17346_v4, %v11948_v6  ;;  %v17468_v49 = vsel %vm2535_vm9, %v5982_v63, %v11957_v18  ;;  %v17471_v58 = vsel %vm2535_vm9, %v5983_v61, %v11958_v7  ;;  %v20638_v6 = vld [vmem:[#allocation114_spill] sm:$0xff]  ;;  %v20639_v7 = vld [vmem:[#allocation115_spill] sm:$0xff] }
 0x4e8   : > { %12970 = vrot.lane.b32.xlu1 %v20633_v25, %s13431_s21  ;;  %v17476_v32 = vsel %vm2568_vm10, %v5996_v17, %v11992_v30  ;;  %v17479_v45 = vsel %vm2568_vm10, %v5997_v15, %v11993_v26  ;;  %v17482_v11 = vsel %vm2568_vm10, %v6000_v59, %v12002_v55  ;;  %v12012_v4 = vunpack.i.l.bf16 %v20635_v39  ;;  %v17485_v57 = vpop.permute.xlu1 %12690  ;;  %v17497_v15 = vpop.permute.xlu0 %12675 }
 0x4e9   : > { %12955 = vrot.lane.b32.xlu0 %v20634_v29, %s13429_s19  ;;  %20636 = vst [vmem:[#allocation165_spill] sm:$0xff] %v17485_v57  ;;  %v17488_v63 = vsel %vm2568_vm10, %v6001_v60, %v12003_v51  ;;  %v17491_v61 = vsel %vm2568_vm10, %v5994_v2, %v11987_v56  ;;  %v17494_v5 = vsel %vm2568_vm10, %v5995_v33, %v11988_v16  ;;  %v12013_v17 = vunpack.i.h.bf16 %v20635_v39  ;;  %v20640_v60 = vld [vmem:[#allocation116_spill] sm:$0xff]  ;;  %v20641_v56 = vld [vmem:[#allocation117_spill] sm:$0xff]  ;;  %v20642_v16 = vld [vmem:[#allocation119_spill] sm:$0xff] }
 0x4ea   : > { %20637 = vst [vmem:[#allocation174_spill] sm:$0xff] %v17497_v15  ;;  %v11998_v59 = vunpack.i.h.bf16 %v20638_v6  ;;  %v11997_v41 = vunpack.i.l.bf16 %v20638_v6  ;;  %v12023_v18 = vunpack.i.h.bf16 %v20639_v7  ;;  %v12022_v26 = vunpack.i.l.bf16 %v20639_v7  ;;  %v20643_v7 = vld [vmem:[#allocation120_spill] sm:$0xff] }
 0x4eb   : > { %v12008_v2 = vunpack.i.h.bf16 %v20640_v60  ;;  %v12007_v33 = vunpack.i.l.bf16 %v20640_v60  ;;  %v12033_v30 = vunpack.i.h.bf16 %v20641_v56  ;;  %v12032_v55 = vunpack.i.l.bf16 %v20641_v56  ;;  %v20644_v56 = vld [vmem:[#allocation121_spill] sm:$0xff] }
 0x4ec   : > { %12980 = vrot.lane.b32.xlu1 %v20634_v29, %s13430_s20  ;;  %v6036_v51 = vsel %vm2568_vm10, %v17394_v40, %v12012_v4  ;;  %v12018_v39 = vunpack.i.h.bf16 %v20642_v16  ;;  %v12017_v6 = vunpack.i.l.bf16 %v20642_v16  ;;  %v12042_v29 = vunpack.i.l.bf16 %v20643_v7  ;;  %v17516_v15 = vpop.permute.xlu1 %12700  ;;  %v17523_v34 = vpop.permute.xlu0 %12685 }
 0x4ed   : > { %12965 = vrot.lane.b32.xlu0 %v20627_v52, %s13428_s18  ;;  %v6037_v60 = vsel %vm2568_vm10, %v17397_v42, %v12013_v17  ;;  %v12043_v57 = vunpack.i.h.bf16 %v20643_v7  ;;  %v12028_v0 = vunpack.i.h.bf16 %v20644_v56  ;;  %v12027_v52 = vunpack.i.l.bf16 %v20644_v56 }
 0x4ee   : > { %v6030_v40 = vsel %vm2568_vm10, %v17404_v31, %v11997_v41  ;;  %v6031_v4 = vsel %vm2568_vm10, %v17407_v23, %v11998_v59  ;;  %v6040_v16 = vsel %vm2568_vm10, %v17410_v47, %v12022_v26  ;;  %v6041_v42 = vsel %vm2568_vm10, %v17416_v36, %v12023_v18  ;;  %v20647_v47 = vld [vmem:[#allocation28_spill] sm:$0xff]  ;;  %v20651_v59 = vld [vmem:[#allocation123_spill] sm:$0xff] }
 0x4ef   : > { %v6034_v17 = vsel %vm2568_vm10, %v17419_v8, %v12007_v33  ;;  %v6035_v7 = vsel %vm2568_vm10, %v17422_v19, %v12008_v2  ;;  %v17540_v31 = vsel %vm2568_vm10, %v6012_v35, %v12032_v55  ;;  %v17543_v23 = vsel %vm2568_vm10, %v6013_v38, %v12033_v30  ;;  %v20655_v26 = vld [vmem:[#allocation127_spill] sm:$0xff]  ;;  %v20656_v33 = vld [vmem:[#allocation129_spill] sm:$0xff] }
 0x4f0   : > { %12990 = vrot.lane.b32.xlu1 %v20633_v25, %s13434_s28  ;;  %20645 = vst [vmem:[#allocation164_spill] sm:$0xff] %v17540_v31  ;;  %20646 = vst [vmem:[#allocation163_spill] sm:$0xff] %v17543_v23  ;;  %v17548_v36 = vsel %vm2568_vm10, %v6006_v62, %v12017_v6  ;;  %v17551_v25 = vsel %vm2568_vm10, %v6007_v37, %v12018_v39  ;;  %v17554_v8 = vsel %vm2568_vm10, %v6016_v14, %v12042_v29  ;;  %v17557_v41 = vpop.permute.xlu1 %12710  ;;  %v17569_v37 = vpop.permute.xlu0 %12695  ;;  %v20660_v39 = vld [vmem:[#allocation130_spill] sm:$0xff]  ;;  %v20661_v6 = vld [vmem:[#allocation131_spill] sm:$0xff] }
 0x4f1   : > { %12975 = vrot.lane.b32.xlu0 %v20647_v47, %s13428_s18  ;;  %20648 = vst [vmem:[#allocation177_spill] sm:$0xff] %v17548_v36  ;;  %20649 = vst [vmem:[#allocation46_spill] sm:$0xff] %v17551_v25  ;;  %v12037_v19 = vunpack.i.l.bf16 %v20651_v59  ;;  %v17560_v35 = vsel %vm2568_vm10, %v6017_v54, %v12043_v57  ;;  %v17563_v38 = vsel %vm2568_vm10, %v6010_v10, %v12027_v52  ;;  %v12038_v62 = vunpack.i.h.bf16 %v20651_v59  ;;  %v20657_v54 = vld [vmem:[#allocation190_spill] sm:$0xff]  ;;  %v20658_v57 = vld [vmem:[#allocation189_spill] sm:$0xff] }
 0x4f2   : > { %20650 = vst [vmem:[#allocation47_spill] sm:$0xff] %v17554_v8  ;;  %20652 = vst [vmem:[#allocation48_spill] sm:$0xff] %v17560_v35  ;;  %v17566_v18 = vsel %vm2568_vm10, %v6011_v20, %v12028_v0  ;;  %v12073_v14 = vunpack.i.h.bf16 %v20655_v26  ;;  %v12072_v2 = vunpack.i.l.bf16 %v20655_v26  ;;  %v12083_v30 = vunpack.i.h.bf16 %v20656_v33  ;;  %v20662_v52 = vld [vmem:[#allocation212_spill] sm:$0xff]  ;;  %v20710_v31 = vld [vmem:[#allocation39_spill] sm:$0xff] }
 0x4f3   : > { %20653 = vst [vmem:[#allocation49_spill] sm:$0xff] %v17563_v38  ;;  %20654 = vst [vmem:[#allocation50_spill] sm:$0xff] %v17566_v18  ;;  %v12082_v55 = vunpack.i.l.bf16 %v20656_v33  ;;  %v20659_v10 = vpack.i.bf16 %v20657_v54, %v20658_v57  ;;  %v12068_v0 = vunpack.i.h.bf16 %v20660_v39  ;;  %v12067_v20 = vunpack.i.l.bf16 %v20660_v39  ;;  %v20664_v26 = vld [vmem:[#allocation132_spill] sm:$0xff]  ;;  %v20665_v57 = vld [vmem:[#allocation133_spill] sm:$0xff] }
 0x4f4   : > { %v12093_v29 = vunpack.i.h.bf16 %v20661_v6  ;;  %v12092_v56 = vunpack.i.l.bf16 %v20661_v6  ;;  %v17587_v59 = vsel %vm2568_vm10, %v17468_v49, %v12037_v19  ;;  %v12078_v33 = vunpack.i.h.bf16 %v20664_v26  ;;  %v17592_v18 = vpop.permute.xlu1 %12720  ;;  %v20667_v38 = vld [vmem:[#allocation134_spill] sm:$0xff]  ;;  %v17601_v49 = vpop.permute.xlu0 %12705 }
 0x4f5   : > { %13000 = vrot.lane.b32.xlu1 %v20659_v10, %s13435_s29  ;;  %12985 = vrot.lane.b32.xlu0 %v20662_v52, %s13430_s20  ;;  %20663 = vst [vmem:[#allocation51_spill] sm:$0xff] %v17587_v59  ;;  %v12077_v54 = vunpack.i.l.bf16 %v20664_v26  ;;  %v12102_v10 = vunpack.i.l.bf16 %v20665_v57  ;;  %v17596_v39 = vsel %vm2568_vm10, %v17471_v58, %v12038_v62  ;;  %v12103_v6 = vunpack.i.h.bf16 %v20665_v57  ;;  %v20673_v57 = vld [vmem:[#allocation194_spill] sm:$0xff] }
 0x4f6   : > { %20666 = vst [vmem:[#allocation52_spill] sm:$0xff] %v17596_v39  ;;  %v12088_v35 = vunpack.i.h.bf16 %v20667_v38  ;;  %v12087_v8 = vunpack.i.l.bf16 %v20667_v38  ;;  %v17605_v19 = vsel %vm2644_vm11, %v17476_v32, %v12072_v2  ;;  %v17609_v26 = vsel %vm2644_vm11, %v17479_v45, %v12073_v14  ;;  %v20672_v38 = vld [vmem:[#allocation195_spill] sm:$0xff]  ;;  %v3655_v59 = vld [vmem:[#allocation3 + $0x1b2] sm:$0xff] }
 0x4f7   : > { %20668 = vst [vmem:[#allocation53_spill] sm:$0xff] %v17605_v19  ;;  %20669 = vst [vmem:[#allocation178_spill] sm:$0xff] %v17609_v26  ;;  %v17613_v58 = vsel %vm2644_vm11, %v17482_v11, %v12082_v55  ;;  %v17617_v62 = vsel %vm2644_vm11, %v17488_v63, %v12083_v30  ;;  %v20674_v39 = vpack.i.bf16 %v20672_v38, %v20673_v57  ;;  %v3656_v32 = vld [vmem:[#allocation3 + $0x1ba] sm:$0xff]  ;;  %v20679_v14 = vld [vmem:[#allocation29_spill] sm:$0xff]  ;;  %v12568_v25 = vunpack.i.h.bf16 %v17081_v1 }
 0x4f8   : > { %20670 = vst [vmem:[#allocation54_spill] sm:$0xff] %v17613_v58  ;;  %20671 = vst [vmem:[#allocation55_spill] sm:$0xff] %v17617_v62  ;;  %v17625_v2 = vsel %vm2644_vm11, %v17491_v61, %v12067_v20  ;;  %v17629_v45 = vsel %vm2644_vm11, %v17494_v5, %v12068_v0  ;;  %v17632_v11 = vsel %vm2644_vm11, %v6036_v51, %v12092_v56  ;;  %v3750_v30 = vld [vmem:[#allocation3 + $0x1b0] sm:$0xff]  ;;  %v3751_v55 = vld [vmem:[#allocation3 + $0x1b8] sm:$0xff]  ;;  %v12493_v51 = vunpack.i.h.bf16 %v16715_v27  ;;  %v17649_v0 = vpop.permute.xlu1 %12730 }
 0x4f9   : > { %13010 = vrot.lane.b32.xlu1 %v20674_v39, %s13436_s30  ;;  %20675 = vst [vmem:[#allocation56_spill] sm:$0xff] %v17625_v2  ;;  %20676 = vst [vmem:[#allocation161_spill] sm:$0xff] %v17629_v45  ;;  %v17635_v63 = vsel %vm2644_vm11, %v6037_v60, %v12093_v29  ;;  %12995 = vrot.lane.b32.xlu0 %v20679_v14, %s13434_s28  ;;  %v3687_v39 = vld [vmem:[#allocation3 + $0x1b3] sm:$0xff]  ;;  %v17640_v38 = vsel %vm2644_vm11, %v6030_v40, %v12077_v54  ;;  %v3688_v60 = vld [vmem:[#allocation3 + $0x1bb] sm:$0xff]  ;;  %v12533_v2 = vunpack.i.h.bf16 %v16893_v28 }
 0x4fa   : > { %20677 = vst [vmem:[#allocation160_spill] sm:$0xff] %v17632_v11  ;;  %20678 = vst [vmem:[#allocation57_spill] sm:$0xff] %v17635_v63  ;;  %v17643_v61 = vsel %vm2644_vm11, %v6031_v4, %v12078_v33  ;;  %v17646_v5 = vsel %vm2644_vm11, %v6040_v16, %v12102_v10  ;;  %v17651_v20 = vld [vmem:[#allocation3 + $0x1b1] sm:$0xff]  ;;  %v17653_v29 = vld [vmem:[#allocation3 + $0x1b9] sm:$0xff]  ;;  %v17656_v56 = vsel %vm2644_vm11, %v6041_v42, %v12103_v6  ;;  %v12492_v16 = vunpack.i.l.bf16 %v16715_v27  ;;  %v17665_v33 = vpop.permute.xlu0 %12715 }
 0x4fb   : > { %20680 = vst [vmem:[#allocation58_spill] sm:$0xff] %v17640_v38  ;;  %20681 = vst [vmem:[#allocation179_spill] sm:$0xff] %v17643_v61  ;;  %v17659_v40 = vsel %vm2644_vm11, %v6034_v17, %v12087_v8  ;;  %v17662_v4 = vsel %vm2644_vm11, %v6035_v7, %v12088_v35  ;;  %v3719_v54 = vld [vmem:[#allocation3 + $0x1b4] sm:$0xff]  ;;  %v3720_v10 = vld [vmem:[#allocation3 + $0x1bc] sm:$0xff]  ;;  %v12502_v61 = vunpack.i.l.bf16 %v16770_v13  ;;  %v17671_v42 = vpack.i.bf16 %v3656_v32, %v3655_v59 }
 0x4fc   : > { %20682 = vst [vmem:[#allocation59_spill] sm:$0xff] %v17646_v5  ;;  %20683 = vst [vmem:[#allocation60_spill] sm:$0xff] %v17656_v56  ;;  %v20686_v57 = vld [vmem:[#allocation135_spill] sm:$0xff]  ;;  %v17673_v17 = vpack.i.bf16 %v3751_v55, %v3750_v30  ;;  %v17675_v8 = vld [vmem:[#allocation3 + $0x1c8] sm:$0xff]  ;;  %v12503_v35 = vunpack.i.h.bf16 %v16770_v13  ;;  %v12512_v6 = vunpack.i.l.bf16 %v16814_v53  ;;  %v17685_v56 = vpack.i.bf16 %v3688_v60, %v3687_v39  ;;  %v17692_v13 = vpop.permute.xlu1 %12740 }
 0x4fd   : > { %20684 = vst [vmem:[#allocation61_spill] sm:$0xff] %v17659_v40  ;;  %20685 = vst [vmem:[#allocation62_spill] sm:$0xff] %v17662_v4  ;;  %13020 = vrot.lane.b32.xlu1 %v20647_v47, %s13427_s17  ;;  %v17677_v7 = vld [vmem:[#allocation3 + $0x1d0] sm:$0xff]  ;;  %v20689_v4 = vld [vmem:[#allocation198_spill] sm:$0xff]  ;;  %v12513_v30 = vunpack.i.h.bf16 %v16814_v53  ;;  %v12498_v55 = vunpack.i.h.bf16 %v16829_v12  ;;  %v17694_v38 = vpack.i.bf16 %v3720_v10, %v3719_v54  ;;  %v12497_v60 = vunpack.i.l.bf16 %v16829_v12 }
 0x4fe   : > { %20687 = vst [vmem:[#allocation63_spill] sm:$0xff] %v17673_v17  ;;  %v3594_v27 = vld [vmem:[#allocation3 + $0x51] sm:$0xff]  ;;  %v3593_v59 = vld [vmem:[#allocation3 + $0x49] sm:$0xff]  ;;  %v12523_v54 = vunpack.i.h.bf16 %v16848_v9  ;;  %v12508_v10 = vunpack.i.h.bf16 %v16855_v3  ;;  %v12532_v53 = vunpack.i.l.bf16 %v16893_v28  ;;  %v12542_v62 = vunpack.i.l.bf16 %v16924_v21 }
 0x4ff   : > { %v20688_v5 = vld [vmem:[#allocation201_spill] sm:$0xff]  ;;  %v7313_v32 = vsel %vm20096_vm2, %v3594_v27, %v12493_v51  ;;  %v7312_v39 = vsel %vm20096_vm2, %v3593_v59, %v12492_v16  ;;  %v12507_v27 = vunpack.i.l.bf16 %v16855_v3  ;;  %v12567_v36 = vunpack.i.l.bf16 %v17081_v1 }
 0x500   : > { %v20690_v40 = vpack.i.bf16 %v20688_v5, %v20689_v4  ;;  %v17696_v63 = vld [vmem:[#allocation3 + $0x1c9] sm:$0xff]  ;;  %v17698_v5 = vld [vmem:[#allocation3 + $0x1d1] sm:$0xff]  ;;  %v17703_v4 = vpop.permute.xlu0 %12725  ;;  %v7344_v51 = vsel %vm20095_vm4, %v7312_v39, %v12502_v61  ;;  %v7345_v59 = vsel %vm20095_vm4, %v7313_v32, %v12503_v35  ;;  %v20691_v61 = vld [vmem:[#allocation203_spill] sm:$0xff]  ;;  %v12517_v35 = vunpack.i.l.bf16 %v16905_v24 }
 0x501   : > { %13030 = vrot.lane.b32.xlu1 %v20662_v52, %s13429_s19  ;;  %v17713_v16 = vld [vmem:[#allocation3 + $0x1ca] sm:$0xff]  ;;  %v17715_v12 = vld [vmem:[#allocation3 + $0x1d2] sm:$0xff]  ;;  %v7376_v47 = vsel %vm2403_vm5, %v7344_v51, %v12512_v6  ;;  %v7377_v52 = vsel %vm2403_vm5, %v7345_v59, %v12513_v30  ;;  %v17730_v6 = vpop.permute.xlu1 %12750  ;;  %v12518_v30 = vunpack.i.h.bf16 %v16905_v24  ;;  %v12543_v24 = vunpack.i.h.bf16 %v16924_v21 }
 0x502   : > { %13005 = vrot.lane.b32.xlu0 %v20690_v40, %s13435_s29  ;;  %v12522_v40 = vunpack.i.l.bf16 %v16848_v9  ;;  %v20692_v9 = vld [vmem:[#allocation202_spill] sm:$0xff]  ;;  %v13401_v11 = vld [vmem:[#allocation3 + $0x69] sm:$0xff]  ;;  %v12558_v1 = vunpack.i.h.bf16 %v17053_v46 }
 0x503   : > { %v20693_v39 = vpack.i.bf16 %v20691_v61, %v20692_v9  ;;  %v7315_v45 = vsel %vm20096_vm2, %v13401_v11, %v12498_v55  ;;  %v17732_v32 = vld [vmem:[#allocation3 + $0x1cb] sm:$0xff]  ;;  %v17734_v51 = vld [vmem:[#allocation3 + $0x1d3] sm:$0xff]  ;;  %v13402_v61 = vld [vmem:[#allocation3 + $0x61] sm:$0xff]  ;;  %v7409_v11 = vsel %vm2436_vm6, %v7377_v52, %v12523_v54 }
 0x504   : > { %v7314_v9 = vsel %vm20096_vm2, %v13402_v61, %v12497_v60  ;;  %v17739_v59 = vpop.permute.xlu0 %12735  ;;  %v7347_v3 = vsel %vm20095_vm4, %v7315_v45, %v12508_v10  ;;  %v12527_v60 = vunpack.i.l.bf16 %v16931_v48  ;;  %v17758_v45 = vld [vmem:[#allocation3 + $0x1d4] sm:$0xff]  ;;  %v7441_v10 = vsel %vm2469_vm7, %v7409_v11, %v12533_v2  ;;  %v20695_v52 = vld [vmem:[#allocation36_spill] sm:$0xff]  ;;  %v20697_v11 = vld [vmem:[#allocation235_spill] sm:$0xff] }
 0x505   : > { %v7346_v55 = vsel %vm20095_vm4, %v7314_v9, %v12507_v27  ;;  %13040 = vrot.lane.b32.xlu1 %v20679_v14, %s13431_s21  ;;  %v17756_v27 = vld [vmem:[#allocation3 + $0x1cc] sm:$0xff]  ;;  %v12552_v21 = vunpack.i.l.bf16 %v20695_v52  ;;  %v17764_v61 = vpop.permute.xlu1 %12760  ;;  %v7379_v9 = vsel %vm2403_vm5, %v7347_v3, %v12518_v30  ;;  %v7473_v30 = vsel %vm2502_vm8, %v7441_v10, %v12543_v24 }
 0x506   : > { %13015 = vrot.lane.b32.xlu0 %v20693_v39, %s13436_s30  ;;  %v7408_v39 = vsel %vm2436_vm6, %v7376_v47, %v12522_v40  ;;  %v20694_v40 = vld [vmem:[#allocation234_spill] sm:$0xff]  ;;  %v7378_v14 = vsel %vm2403_vm5, %v7346_v55, %v12517_v35  ;;  %v20696_v28 = vld [vmem:[#allocation37_spill] sm:$0xff]  ;;  %v12562_v35 = vunpack.i.l.bf16 %v16998_v22  ;;  %v12548_v10 = vunpack.i.h.bf16 %v17005_v43 }
 0x507   : > { %v7440_v47 = vsel %vm2469_vm7, %v7408_v39, %v12532_v53  ;;  %v12528_v53 = vunpack.i.h.bf16 %v16931_v48  ;;  %v12553_v39 = vunpack.i.h.bf16 %v20695_v52  ;;  %v12538_v54 = vunpack.i.h.bf16 %v20696_v28 }
 0x508   : > { %v12537_v58 = vunpack.i.l.bf16 %v20696_v28  ;;  %v17770_v26 = vpop.permute.xlu0 %12745  ;;  %v7472_v2 = vsel %vm2502_vm8, %v7440_v47, %v12542_v62  ;;  %v12547_v48 = vunpack.i.l.bf16 %v17005_v43  ;;  %v7410_v55 = vsel %vm2436_vm6, %v7378_v14, %v12527_v60  ;;  %v20698_v62 = vld [vmem:[#allocation236_spill] sm:$0xff] }
 0x509   : > { %13050 = vrot.lane.b32.xlu1 %v20697_v11, %s13431_s21  ;;  %v12563_v28 = vunpack.i.h.bf16 %v16998_v22  ;;  %v12557_v52 = vunpack.i.l.bf16 %v17053_v46  ;;  %v7411_v47 = vsel %vm2436_vm6, %v7379_v9, %v12528_v53  ;;  %v7504_v19 = vsel %vm2535_vm9, %v7472_v2, %v12552_v21  ;;  %v17789_v3 = vpop.permute.xlu1 %12770  ;;  %v20700_v9 = vld [vmem:[#allocation23_spill] sm:$0xff]  ;;  %v20701_v43 = vld [vmem:[#allocation24_spill] sm:$0xff] }
 0x50a   : > { %13025 = vrot.lane.b32.xlu0 %v20694_v40, %s13427_s17  ;;  %v7505_v24 = vsel %vm2535_vm9, %v7473_v30, %v12553_v39  ;;  %v7442_v60 = vsel %vm2469_vm7, %v7410_v55, %v12537_v58  ;;  %v7443_v22 = vsel %vm2469_vm7, %v7411_v47, %v12538_v54  ;;  %v17798_v53 = vsel %vm2568_vm10, %v7504_v19, %v12562_v35  ;;  %v3597_v19 = vld [vmem:[#allocation3 + $0x79] sm:$0xff]  ;;  %v3598_v35 = vld [vmem:[#allocation3 + $0x81] sm:$0xff] }
 0x50b   : > { %v7474_v21 = vsel %vm2502_vm8, %v7442_v60, %v12547_v48  ;;  %v12572_v2 = vunpack.i.l.bf16 %v20700_v9  ;;  %v17806_v58 = vsel %vm2568_vm10, %v7505_v24, %v12563_v28  ;;  %v12583_v39 = vunpack.i.h.bf16 %v20701_v43  ;;  %v20702_v55 = vld [vmem:[#allocation154_spill] sm:$0xff] }
 0x50c   : > { %v17795_v14 = vpop.permute.xlu0 %12755  ;;  %v7506_v54 = vsel %vm2535_vm9, %v7474_v21, %v12557_v52  ;;  %v12582_v30 = vunpack.i.l.bf16 %v20701_v43  ;;  %v7317_v48 = vsel %vm20096_vm2, %v3598_v35, %v12568_v25  ;;  %v7316_v46 = vsel %vm20096_vm2, %v3597_v19, %v12567_v36  ;;  %v20704_v60 = vld [vmem:[#allocation38_spill] sm:$0xff]  ;;  %v20706_v36 = vld [vmem:[#allocation156_spill] sm:$0xff] }
 0x50d   : > { %20699 = vst [vmem:[#allocation64_spill] sm:$0xff] %v17795_v14  ;;  %13060 = vrot.lane.b32.xlu1 %v20698_v62, %s13430_s20  ;;  %v12592_v28 = vunpack.i.l.bf16 %v20702_v55  ;;  %v17817_v47 = vpop.permute.xlu1 %12780  ;;  %v7475_v52 = vsel %vm2502_vm8, %v7443_v22, %v12548_v10  ;;  %v12578_v21 = vunpack.i.h.bf16 %v20704_v60  ;;  %v12577_v43 = vunpack.i.l.bf16 %v20704_v60 }
 0x50e   : > { %13035 = vrot.lane.b32.xlu0 %v20698_v62, %s13429_s19  ;;  %v12593_v62 = vunpack.i.h.bf16 %v20702_v55  ;;  %20703 = vst [vmem:[#allocation65_spill] sm:$0xff] %v17817_v47  ;;  %v17826_v25 = vsel %vm2535_vm9, %v7475_v52, %v12558_v1  ;;  %v12602_v19 = vunpack.i.l.bf16 %v20706_v36  ;;  %v17833_v22 = vsel %vm2568_vm10, %v7506_v54, %v12572_v2  ;;  %v20707_v55 = vld [vmem:[#allocation26_spill] sm:$0xff]  ;;  %v20713_v47 = vld [vmem:[#allocation41_spill] sm:$0xff] }
 0x50f   : > { %v7348_v10 = vsel %vm20095_vm4, %v7316_v46, %v12582_v30  ;;  %v7349_v35 = vsel %vm20095_vm4, %v7317_v48, %v12583_v39  ;;  %v12588_v60 = vunpack.i.h.bf16 %v20707_v55  ;;  %v12587_v24 = vunpack.i.l.bf16 %v20707_v55  ;;  %v13363_v39 = vld [vmem:[%s19761_s5] sm:$0xff]   ;;  %v13403_v30 = vld [vmem:[#allocation3 + $0x99] sm:$0xff] }
 0x510   : > { %v17823_v23 = vpop.permute.xlu0 %12765  ;;  %v7380_v1 = vsel %vm2403_vm5, %v7348_v10, %v12592_v28  ;;  %v7381_v52 = vsel %vm2403_vm5, %v7349_v35, %v12593_v62  ;;  %v7319_v48 = vsel %vm20096_vm2, %v13403_v30, %v12578_v21  ;;  %v13404_v46 = vld [vmem:[#allocation3 + $0x91] sm:$0xff]  ;;  %v12598_v28 = vunpack.i.h.bf16 %v20710_v31  ;;  %10436 = vmatprep.subr.bf16.mxu1 %v13363_v39 }
 0x511   : > { %20705 = vst [vmem:[#allocation66_spill] sm:$0xff] %v17823_v23  ;;  %13070 = vrot.lane.b32.xlu1 %v20697_v11, %s13434_s28  ;;  %v17845_v54 = vpop.permute.xlu1 %12790  ;;  %v7318_v55 = vsel %vm20096_vm2, %v13404_v46, %v12577_v43  ;;  %v12597_v62 = vunpack.i.l.bf16 %v20710_v31  ;;  %v7412_v35 = vsel %vm2436_vm6, %v7380_v1, %v12602_v19  ;;  %v12607_v14 = vunpack.i.l.bf16 %v20713_v47  ;;  %v20714_v30 = vld [vmem:[#allocation173_spill] sm:$0xff]  ;;  %10437 = vmatpush3.bf16.msra.mxu1 %v13363_v39 }
 0x512   : > { %13045 = vrot.lane.b32.xlu0 %v20694_v40, %s13428_s18  ;;  %v12603_v40 = vunpack.i.h.bf16 %v20706_v36  ;;  %v20708_v36 = vld [vmem:[#allocation27_spill] sm:$0xff]  ;;  %20709 = vst [vmem:[#allocation67_spill] sm:$0xff] %v17845_v54  ;;  %v20712_v54 = vld [vmem:[#allocation40_spill] sm:$0xff]  ;;  %v7350_v21 = vsel %vm20095_vm4, %v7318_v55, %v12587_v24  ;;  %v7351_v43 = vsel %vm20095_vm4, %v7319_v48, %v12588_v60  ;;  %v12608_v31 = vunpack.i.h.bf16 %v20713_v47  ;;  %v13364_v47 = vld [vmem:[%s19761_s5 + $0x8] sm:$0xff]  }
 0x513   : > { %v12613_v11 = vunpack.i.h.bf16 %v20708_v36  ;;  %v12612_v2 = vunpack.i.l.bf16 %v20708_v36  ;;  %v12622_v23 = vunpack.i.l.bf16 %v20712_v54  ;;  %v12617_v46 = vunpack.i.l.bf16 %v20714_v30  ;;  %10438 = vmatprep.subr.bf16.mxu1 %v13364_v47 }
 0x514   : > { %v17854_v10 = vpop.permute.xlu0 %12775  ;;  %v7413_v36 = vsel %vm2436_vm6, %v7381_v52, %v12603_v40  ;;  %v12618_v1 = vunpack.i.h.bf16 %v20714_v30  ;;  %v20715_v52 = vld [vmem:[#allocation43_spill] sm:$0xff]  ;;  %v7382_v24 = vsel %vm2403_vm5, %v7350_v21, %v12597_v62  ;;  %v7383_v60 = vsel %vm2403_vm5, %v7351_v43, %v12598_v28  ;;  %v20718_v28 = vld [vmem:[#allocation42_spill] sm:$0xff] }
 0x515   : > { %20711 = vst [vmem:[#allocation68_spill] sm:$0xff] %v17854_v10  ;;  %13080 = vrot.lane.b32.xlu1 %v17673_v17, %s13435_s29  ;;  %v7444_v40 = vsel %vm2469_vm7, %v7412_v35, %v12612_v2  ;;  %v7445_v19 = vsel %vm2469_vm7, %v7413_v36, %v12613_v11  ;;  %v12627_v17 = vunpack.i.l.bf16 %v20715_v52  ;;  %v17872_v10 = vpop.permute.xlu1 %12800  ;;  %v12623_v39 = vunpack.i.h.bf16 %v20712_v54  ;;  %v20716_v35 = vld [vmem:[#allocation159_spill] sm:$0xff]  ;;  %10439 = vmatpush3.bf16.msra.mxu1 %v13364_v47 }
 0x516   : > { %13055 = vrot.lane.b32.xlu0 %v17671_v42, %s13428_s18  ;;  %v12628_v2 = vunpack.i.h.bf16 %v20715_v52  ;;  %v7476_v11 = vsel %vm2502_vm8, %v7444_v40, %v12622_v23  ;;  %v7414_v55 = vsel %vm2436_vm6, %v7382_v24, %v12607_v14  ;;  %v12638_v36 = vunpack.i.h.bf16 %v20716_v35  ;;  %v20719_v40 = vld [vmem:[#allocation162_spill] sm:$0xff]  ;;  %s13444_s18 = smov 64  }
 0x517   : > { %v12637_v30 = vunpack.i.l.bf16 %v20716_v35  ;;  %v20717_v62 = vpack.i.bf16 %v17653_v29, %v17651_v20  ;;  %v7415_v54 = vsel %vm2436_vm6, %v7383_v60, %v12608_v31  ;;  %v12633_v21 = vunpack.i.h.bf16 %v20718_v28  ;;  %v13365_v31 = vld [vmem:[%s19761_s5 + $0x10] sm:$0xff]   ;;  %v20720_v60 = vld [vmem:[#allocation44_spill] sm:$0xff] }
 0x518   : > { %v17881_v48 = vpop.permute.xlu0 %12785  ;;  %v12632_v43 = vunpack.i.l.bf16 %v20718_v28  ;;  %v7446_v23 = vsel %vm2469_vm7, %v7414_v55, %v12617_v46  ;;  %v7447_v14 = vsel %vm2469_vm7, %v7415_v54, %v12618_v1  ;;  %v12643_v52 = vunpack.i.h.bf16 %v20719_v40  ;;  %10440 = vmatprep.subr.bf16.mxu1 %v13365_v31 }
 0x519   : > { %13090 = vrot.lane.b32.xlu1 %v20717_v62, %s13436_s30  ;;  %v12642_v20 = vunpack.i.l.bf16 %v20719_v40  ;;  %v7478_v29 = vsel %vm2502_vm8, %v7446_v23, %v12627_v17  ;;  %v17901_v24 = vpop.permute.xlu1 %12810  ;;  %v7479_v46 = vsel %vm2502_vm8, %v7447_v14, %v12628_v2  ;;  %v12653_v55 = vunpack.i.h.bf16 %v20720_v60  ;;  %10441 = vmatpush3.bf16.msra.mxu1 %v13365_v31  ;;  %v13406_v2 = vld [vmem:[#allocation3 + $0xc1] sm:$0xff] }
 0x51a   : > { %13065 = vrot.lane.b32.xlu0 %v17685_v56, %s13430_s20  ;;  %v12652_v47 = vunpack.i.l.bf16 %v20720_v60  ;;  %v12647_v1 = vunpack.i.l.bf16 %v17377_v44  ;;  %v7477_v62 = vsel %vm2502_vm8, %v7445_v19, %v12623_v39  ;;  %v7510_v17 = vsel %vm2535_vm9, %v7478_v29, %v12637_v30 }
 0x51b   : > { %v7511_v54 = vsel %vm2535_vm9, %v7479_v46, %v12638_v36  ;;  %v12648_v28 = vunpack.i.h.bf16 %v17377_v44  ;;  %v7508_v23 = vsel %vm2535_vm9, %v7476_v11, %v12632_v43  ;;  %v7509_v14 = vsel %vm2535_vm9, %v7477_v62, %v12633_v21  ;;  %v3601_v21 = vld [vmem:[#allocation3 + $0xa9] sm:$0xff]  ;;  %v20724_v46 = vld [vmem:[#allocation158_spill] sm:$0xff] }
 0x51c   : > { %v17910_v35 = vpop.permute.xlu0 %12795  ;;  %v20721_v19 = vpack.i.bf16 %v17677_v7, %v17675_v8  ;;  %v20722_v39 = vunpack.i.h.bf16 %v20700_v9  ;;  %v17935_v36 = vsel %vm2568_vm10, %v7509_v14, %v12643_v52  ;;  %v12663_v11 = vunpack.i.h.bf16 %v17370_v50  ;;  %v13366_v7 = vld [vmem:[%s19761_s5 + $0x18] sm:$0xff]   ;;  %v3602_v9 = vld [vmem:[#allocation3 + $0xb1] sm:$0xff] }
 0x51d   : > { %13100 = vrot.lane.b32.xlu1 %v17671_v42, %s13427_s17  ;;  %v17932_v42 = vsel %vm2568_vm10, %v7508_v23, %v12642_v20  ;;  %v12662_v30 = vunpack.i.l.bf16 %v17370_v50  ;;  %v17939_v8 = vpop.permute.xlu1 %12820  ;;  %v20723_v43 = vld [vmem:[#allocation45_spill] sm:$0xff]  ;;  %v17949_v52 = vsel %vm2568_vm10, %v7510_v17, %v12652_v47  ;;  %v17952_v29 = vsel %vm2568_vm10, %v7511_v54, %v12653_v55  ;;  %10442 = vmatprep.subr.bf16.mxu1 %v13366_v7  ;;  %v20727_v14 = vld [vmem:[#allocation168_spill] sm:$0xff] }
 0x51e   : > { %13075 = vrot.lane.b32.xlu0 %v17694_v38, %s13434_s28  ;;  %v17929_v44 = vsel %vm2568_vm10, %v17826_v25, %v20722_v39  ;;  %v7320_v25 = vsel %vm20096_vm2, %v3601_v21, %v12647_v1  ;;  %v12672_v40 = vunpack.i.l.bf16 %v20723_v43  ;;  %v7321_v50 = vsel %vm20096_vm2, %v3602_v9, %v12648_v28  ;;  %v20725_v1 = vld [vmem:[#allocation157_spill] sm:$0xff]  ;;  %10443 = vmatpush3.bf16.msra.mxu1 %v13366_v7 }
 0x51f   : > { %v12673_v31 = vunpack.i.h.bf16 %v20723_v43  ;;  %v12658_v60 = vunpack.i.h.bf16 %v20724_v46  ;;  %v12657_v62 = vunpack.i.l.bf16 %v20724_v46  ;;  %v12682_v23 = vunpack.i.l.bf16 %v20725_v1  ;;  %v20728_v43 = vld [vmem:[#allocation165_spill] sm:$0xff] }
 0x520   : > { %v17946_v20 = vpop.permute.xlu0 %12805  ;;  %v20726_v47 = vpack.i.bf16 %v17698_v5, %v17696_v63  ;;  %v13139_v55 = vpack.i.bf16 %v17806_v58, %v17798_v53  ;;  %v13159_v17 = vpack.i.bf16 %v17935_v36, %v17932_v42  ;;  %v12683_v28 = vunpack.i.h.bf16 %v20725_v1  ;;  %v13405_v1 = vld [vmem:[#allocation3 + $0xc9] sm:$0xff] }
 0x521   : > { %13110 = vrot.lane.b32.xlu1 %v17685_v56, %s13429_s19  ;;  %v7352_v56 = vsel %vm20095_vm4, %v7320_v25, %v12662_v30  ;;  %v17974_v39 = vpop.permute.xlu1 %12830  ;;  %v7353_v5 = vsel %vm20095_vm4, %v7321_v50, %v12663_v11  ;;  %v12668_v9 = vunpack.i.h.bf16 %v20727_v14  ;;  %v12692_v46 = vunpack.i.l.bf16 %v20728_v43  ;;  %v13367_v30 = vld [vmem:[%s19761_s5 + $0x20] sm:$0xff]  }
 0x522   : > { %13085 = vrot.lane.b32.xlu0 %v20721_v19, %s13435_s29  ;;  %v12667_v19 = vunpack.i.l.bf16 %v20727_v14  ;;  %v7384_v21 = vsel %vm2403_vm5, %v7352_v56, %v12672_v40  ;;  %v7385_v25 = vsel %vm2403_vm5, %v7353_v5, %v12673_v31  ;;  %v7322_v11 = vsel %vm20096_vm2, %v13406_v2, %v12657_v62  ;;  %v20729_v56 = vld [vmem:[#allocation174_spill] sm:$0xff]  ;;  %10444 = vmatprep.subr.bf16.mxu1 %v13367_v30 }
 0x523   : > { %v12693_v40 = vunpack.i.h.bf16 %v20728_v43  ;;  %v7416_v50 = vsel %vm2436_vm6, %v7384_v21, %v12682_v23  ;;  %v12678_v14 = vunpack.i.h.bf16 %v20729_v56  ;;  %v12677_v63 = vunpack.i.l.bf16 %v20729_v56  ;;  %10445 = vmatpush3.bf16.msra.mxu1 %v13367_v30  ;;  %v13368_v5 = vld [vmem:[%s19761_s5 + $0x28] sm:$0xff]  }
 0x524   : > { %v17982_v7 = vpop.permute.xlu0 %12815  ;;  %v12702_v54 = vunpack.i.l.bf16 %v17516_v15  ;;  %v20730_v31 = vpack.i.bf16 %v17715_v12, %v17713_v16  ;;  %v7417_v2 = vsel %vm2436_vm6, %v7385_v25, %v12683_v28  ;;  %v12687_v62 = vunpack.i.l.bf16 %v17523_v34  ;;  %10446 = vmatprep.subr.bf16.mxu1 %v13368_v5 }
 0x525   : > { %13120 = vrot.lane.b32.xlu1 %v17694_v38, %s13431_s21  ;;  %v12703_v38 = vunpack.i.h.bf16 %v17516_v15  ;;  %v18005_v23 = vpop.permute.xlu1 %12840  ;;  %v7448_v16 = vsel %vm2469_vm7, %v7416_v50, %v12692_v46  ;;  %v12688_v12 = vunpack.i.h.bf16 %v17523_v34  ;;  %v12697_v28 = vunpack.i.l.bf16 %v17569_v37 }
 0x526   : > { %13095 = vrot.lane.b32.xlu0 %v20726_v47, %s13436_s30  ;;  %v7323_v47 = vsel %vm20096_vm2, %v13405_v1, %v12658_v60  ;;  %v7354_v60 = vsel %vm20095_vm4, %v7322_v11, %v12667_v19  ;;  %v7449_v15 = vsel %vm2469_vm7, %v7417_v2, %v12693_v40  ;;  %v12712_v43 = vunpack.i.l.bf16 %v17557_v41  ;;  %v20731_v1 = vld [vmem:[#allocation206_spill] sm:$0xff] }
 0x527   : > { %v7355_v21 = vsel %vm20095_vm4, %v7323_v47, %v12668_v9  ;;  %v12698_v30 = vunpack.i.h.bf16 %v17569_v37  ;;  %v12707_v25 = vunpack.i.l.bf16 %v17601_v49  ;;  %v20732_v9 = vld [vmem:[#allocation217_spill] sm:$0xff]  ;;  %v7386_v34 = vsel %vm2403_vm5, %v7354_v60, %v12677_v63  ;;  %10447 = vmatpush3.bf16.msra.mxu1 %v13368_v5  ;;  %v13369_v60 = vld [vmem:[%s19761_s5 + $0x30] ss:$0 sps:$4 sm:$0x33]  }
 0x528   : > { %v18014_v19 = vpop.permute.xlu0 %12825  ;;  %v20733_v47 = vpack.i.bf16 %v20731_v1, %v20732_v9  ;;  %v7387_v46 = vsel %vm2403_vm5, %v7355_v21, %v12678_v14  ;;  %v7480_v11 = vsel %vm2502_vm8, %v7448_v16, %v12702_v54  ;;  %v12708_v40 = vunpack.i.h.bf16 %v17601_v49  ;;  %10750 = vmatprep.subr.msk.bf16.mxu1 %vm612_vm0, %v13369_v60 }
 0x529   : > { %v20734_v37 = vpack.i.bf16 %v17734_v51, %v17732_v32  ;;  %v18033_v50 = vsel %vm2502_vm8, %v7449_v15, %v12703_v38  ;;  %v7418_v56 = vsel %vm2436_vm6, %v7386_v34, %v12687_v62  ;;  %v12717_v63 = vunpack.i.l.bf16 %v17665_v33  ;;  %v18038_v2 = vpop.permute.xlu1 %12850 }
 0x52a   : > { %13105 = vrot.lane.b32.xlu0 %v20730_v31, %s13427_s17  ;;  %s13443_s17 = smov 60   ;;  %v12718_v31 = vunpack.i.h.bf16 %v17665_v33  ;;  %v7419_v54 = vsel %vm2436_vm6, %v7387_v46, %v12688_v12  ;;  %v7450_v49 = vsel %vm2469_vm7, %v7418_v56, %v12697_v28  ;;  %v12728_v14 = vunpack.i.h.bf16 %v17703_v4 }
 0x52b   : > { %13130 = vrot.lane.b32.xlu1 %v20733_v47, %s13443_s17  ;;  %v12727_v32 = vunpack.i.l.bf16 %v17703_v4  ;;  %v12713_v38 = vunpack.i.h.bf16 %v17557_v41  ;;  %v18051_v33 = vsel %vm2535_vm9, %v7480_v11, %v12712_v43  ;;  %v7451_v62 = vsel %vm2469_vm7, %v7419_v54, %v12698_v30  ;;  %v3605_v43 = vld [vmem:[#allocation3 + $0xd9] sm:$0xff]  ;;  %v3606_v30 = vld [vmem:[#allocation3 + $0xe1] sm:$0xff] }
 0x52c   : > { %v18044_v51 = vpop.permute.xlu0 %12835  ;;  %v7482_v5 = vsel %vm2502_vm8, %v7450_v49, %v12707_v25  ;;  %v7483_v4 = vsel %vm2502_vm8, %v7451_v62, %v12708_v40  ;;  %v12733_v21 = vunpack.i.h.bf16 %v17649_v0  ;;  %v12732_v16 = vunpack.i.l.bf16 %v17649_v0  ;;  %v20736_v11 = vld [vmem:[#allocation208_spill] sm:$0xff]  ;;  %v20737_v40 = vld [vmem:[#allocation207_spill] sm:$0xff] }
 0x52d   : > { %v20735_v12 = vpack.i.bf16 %v17758_v45, %v17756_v27  ;;  %v7854_v28 = vsel %vm612_vm0, %v13369_v60, 0  ;;  %v7514_v15 = vsel %vm2535_vm9, %v7482_v5, %v12717_v63  ;;  %v7515_v53 = vsel %vm2535_vm9, %v7483_v4, %v12718_v31  ;;  %v18072_v0 = vpop.permute.xlu1 %12860  ;;  %v20740_v63 = vld [vmem:[#allocation213_spill] sm:$0xff] }
 0x52e   : > { %13115 = vrot.lane.b32.xlu0 %v20734_v37, %s13429_s19  ;;  %v12743_v58 = vunpack.i.h.bf16 %v17692_v13  ;;  %10449 = vmatpush3.bf16.msra.mxu1 %v7854_v28  ;;  %v7325_v27 = vsel %vm20096_vm2, %v3606_v30, %v12728_v14  ;;  %v7324_v45 = vsel %vm20096_vm2, %v3605_v43, %v12727_v32  ;;  %v12753_v25 = vunpack.i.h.bf16 %v17730_v6  ;;  %v13407_v28 = vld [vmem:[#allocation3 + $0xf9] sm:$0xff] }
 0x52f   : > { %13140 = vrot.lane.b32.xlu1 %v13139_v55, %s13444_s18  ;;  %v12742_v55 = vunpack.i.l.bf16 %v17692_v13  ;;  %v12752_v1 = vunpack.i.l.bf16 %v17730_v6  ;;  %v12723_v47 = vunpack.i.h.bf16 %v17592_v18  ;;  %v12722_v34 = vunpack.i.l.bf16 %v17592_v18  ;;  %v20739_v6 = vld [vmem:[#allocation214_spill] sm:$0xff] }
 0x530   : > { %v18078_v9 = vpop.permute.xlu0 %12845  ;;  %v12738_v13 = vunpack.i.h.bf16 %v17739_v59  ;;  %v12737_v46 = vunpack.i.l.bf16 %v17739_v59  ;;  %v20738_v37 = vpack.i.bf16 %v20736_v11, %v20737_v40  ;;  %v12763_v56 = vunpack.i.h.bf16 %v17764_v61  ;;  %v20745_v11 = vld [vmem:[#allocation66_spill] sm:$0xff] }
 0x531   : > { %v12762_v31 = vunpack.i.l.bf16 %v17764_v61  ;;  %v20741_v54 = vpack.i.bf16 %v20739_v6, %v20740_v63  ;;  %v18095_v49 = vsel %vm2568_vm10, %v7514_v15, %v12732_v16  ;;  %v18098_v14 = vsel %vm2568_vm10, %v7515_v53, %v12733_v21  ;;  %v18104_v61 = vpop.permute.xlu1 %12870  ;;  %v13408_v53 = vld [vmem:[#allocation3 + $0xf1] sm:$0xff] }
 0x532   : > { %13125 = vrot.lane.b32.xlu0 %v20735_v12, %s13431_s21  ;;  %v7356_v59 = vsel %vm20095_vm4, %v7324_v45, %v12742_v55  ;;  %v7357_v32 = vsel %vm20095_vm4, %v7325_v27, %v12743_v58  ;;  %v12748_v60 = vunpack.i.h.bf16 %v17770_v26  ;;  %v12747_v62 = vunpack.i.l.bf16 %v17770_v26  ;;  %v20742_v55 = vld [vmem:[#allocation64_spill] sm:$0xff]  ;;  %v20743_v27 = vld [vmem:[#allocation65_spill] sm:$0xff] }
 0x533   : > { %13150 = vrot.lane.b32.xlu1 %v20738_v37, %s13443_s17  ;;  %v7388_v5 = vsel %vm2403_vm5, %v7356_v59, %v12752_v1  ;;  %v7389_v4 = vsel %vm2403_vm5, %v7357_v32, %v12753_v25  ;;  %v12773_v16 = vunpack.i.h.bf16 %v17789_v3  ;;  %v12772_v12 = vunpack.i.l.bf16 %v17789_v3  ;;  %v20747_v32 = vld [vmem:[#allocation216_spill] sm:$0xff] }
 0x534   : > { %v18110_v21 = vpop.permute.xlu0 %12855  ;;  %v7327_v15 = vsel %vm20096_vm2, %v13407_v28, %v12738_v13  ;;  %v7326_v58 = vsel %vm20096_vm2, %v13408_v53, %v12737_v46  ;;  %v12758_v26 = vunpack.i.h.bf16 %v20742_v55  ;;  %v12757_v43 = vunpack.i.l.bf16 %v20742_v55  ;;  %v20750_v28 = vld [vmem:[#allocation219_spill] sm:$0xff] }
 0x535   : > { %v7420_v30 = vsel %vm2436_vm6, %v7388_v5, %v12762_v31  ;;  %v7421_v3 = vsel %vm2436_vm6, %v7389_v4, %v12763_v56  ;;  %v12783_v45 = vunpack.i.h.bf16 %v20743_v27  ;;  %v12782_v25 = vunpack.i.l.bf16 %v20743_v27  ;;  %v20746_v56 = vld [vmem:[#allocation68_spill] sm:$0xff]  ;;  %v20753_v55 = vld [vmem:[#allocation67_spill] sm:$0xff] }
 0x536   : > { %13135 = vrot.lane.b32.xlu0 %v20741_v54, %s13443_s17  ;;  %v20744_v1 = vpack.i.bf16 %v17929_v44, %v17833_v22  ;;  %v7358_v13 = vsel %vm20095_vm4, %v7326_v58, %v12747_v62  ;;  %v7359_v46 = vsel %vm20095_vm4, %v7327_v15, %v12748_v60  ;;  %v12768_v42 = vunpack.i.h.bf16 %v20745_v11  ;;  %v20748_v60 = vld [vmem:[#allocation215_spill] sm:$0xff]  ;;  %v20751_v15 = vld [vmem:[#allocation218_spill] sm:$0xff] }
 0x537   : > { %13160 = vrot.lane.b32.xlu1 %v13159_v17, %s13444_s18  ;;  %v12767_v36 = vunpack.i.l.bf16 %v20745_v11  ;;  %v18132_v17 = vpop.permute.xlu1 %12880  ;;  %v7452_v40 = vsel %vm2469_vm7, %v7420_v30, %v12772_v12  ;;  %v7453_v37 = vsel %vm2469_vm7, %v7421_v3, %v12773_v16  ;;  %v12778_v31 = vunpack.i.h.bf16 %v20746_v56 }
 0x538   : > { %v12777_v6 = vunpack.i.l.bf16 %v20746_v56  ;;  %v18138_v22 = vpop.permute.xlu0 %12865  ;;  %v7390_v44 = vsel %vm2403_vm5, %v7358_v13, %v12757_v43  ;;  %v7391_v63 = vsel %vm2403_vm5, %v7359_v46, %v12758_v26  ;;  %v12788_v54 = vunpack.i.h.bf16 %v17881_v48 }
 0x539   : > { %v12787_v59 = vunpack.i.l.bf16 %v17881_v48  ;;  %v20749_v62 = vpack.i.bf16 %v20747_v32, %v20748_v60  ;;  %v7484_v5 = vsel %vm2502_vm8, %v7452_v40, %v12782_v25  ;;  %v7485_v4 = vsel %vm2502_vm8, %v7453_v37, %v12783_v45  ;;  %v3610_v32 = vld [vmem:[#allocation3 + $0x111] sm:$0xff] }
 0x53a   : > { %13145 = vrot.lane.b32.xlu0 %v20744_v1, %s13444_s18  ;;  %v12798_v16 = vunpack.i.h.bf16 %v17910_v35  ;;  %v12797_v12 = vunpack.i.l.bf16 %v17910_v35  ;;  %v20752_v53 = vpack.i.bf16 %v20750_v28, %v20751_v15  ;;  %v7422_v48 = vsel %vm2436_vm6, %v7390_v44, %v12767_v36  ;;  %v20755_v36 = vld [vmem:[#allocation220_spill] sm:$0xff] }
 0x53b   : > { %13170 = vrot.lane.b32.xlu1 %v20749_v62, %s13442_s24  ;;  %v7423_v58 = vsel %vm2436_vm6, %v7391_v63, %v12768_v42  ;;  %v12793_v26 = vunpack.i.h.bf16 %v20753_v55  ;;  %v12792_v43 = vunpack.i.l.bf16 %v20753_v55  ;;  %v18160_v30 = vpop.permute.xlu1 %12890  ;;  %v7454_v3 = vsel %vm2469_vm7, %v7422_v48, %v12777_v6  ;;  %v20754_v42 = vld [vmem:[#allocation221_spill] sm:$0xff] }
 0x53c   : > { %v7455_v27 = vsel %vm2469_vm7, %v7423_v58, %v12778_v31  ;;  %v12803_v35 = vunpack.i.h.bf16 %v17872_v10  ;;  %v12802_v45 = vunpack.i.l.bf16 %v17872_v10  ;;  %v18166_v25 = vpop.permute.xlu0 %12875  ;;  %v7486_v1 = vsel %vm2502_vm8, %v7454_v3, %v12787_v59 }
 0x53d   : > { %v7487_v13 = vsel %vm2502_vm8, %v7455_v27, %v12788_v54  ;;  %v12813_v46 = vunpack.i.h.bf16 %v17901_v24  ;;  %v12812_v11 = vunpack.i.l.bf16 %v17901_v24  ;;  %v20756_v40 = vpack.i.bf16 %v20754_v42, %v20755_v36  ;;  %v13409_v36 = vld [vmem:[#allocation3 + $0x129] sm:$0xff] }
 0x53e   : > { %13155 = vrot.lane.b32.xlu0 %v20752_v53, %s13443_s17  ;;  %v7518_v37 = vsel %vm2535_vm9, %v7486_v1, %v12797_v12  ;;  %v7519_v56 = vsel %vm2535_vm9, %v7487_v13, %v12798_v16  ;;  %v12808_v10 = vunpack.i.h.bf16 %v17946_v20  ;;  %v12807_v31 = vunpack.i.l.bf16 %v17946_v20  ;;  %v20761_v16 = vld [vmem:[#allocation137_spill] sm:$0xff]  ;;  %v20763_v1 = vld [vmem:[#allocation224_spill] sm:$0xff] }
 0x53f   : > { %13180 = vrot.lane.b32.xlu1 %v20756_v40, %s13443_s17  ;;  %v20757_v6 = vpack.i.bf16 %v17952_v29, %v17949_v52  ;;  %v7513_v24 = vsel %vm2535_vm9, %v18033_v50, %v12713_v38  ;;  %v7516_v44 = vsel %vm2535_vm9, %v7484_v5, %v12792_v43  ;;  %v7517_v63 = vsel %vm2535_vm9, %v7485_v4, %v12793_v26  ;;  %v18190_v54 = vpop.permute.xlu1 %12900  ;;  %v20758_v5 = vld [vmem:[#allocation223_spill] sm:$0xff] }
 0x540   : > { %v13189_v59 = vpack.i.bf16 %v18098_v14, %v18095_v49  ;;  %v7544_v20 = vsel %vm2568_vm10, %v18051_v33, %v12722_v34  ;;  %v7545_v41 = vsel %vm2568_vm10, %v7513_v24, %v12723_v47  ;;  %v18202_v52 = vsel %vm2568_vm10, %v7516_v44, %v12802_v45  ;;  %v18207_v50 = vpop.permute.xlu0 %12885  ;;  %v3609_v14 = vld [vmem:[#allocation3 + $0x109] sm:$0xff] }
 0x541   : > { %v18205_v29 = vsel %vm2568_vm10, %v7517_v63, %v12803_v35  ;;  %v12823_v38 = vunpack.i.h.bf16 %v17939_v8  ;;  %v12822_v49 = vunpack.i.l.bf16 %v17939_v8  ;;  %v18213_v18 = vsel %vm2568_vm10, %v7518_v37, %v12812_v11  ;;  %v20759_v8 = vld [vmem:[#allocation222_spill] sm:$0xff]  ;;  %v20762_v45 = vld [vmem:[#allocation225_spill] sm:$0xff]  ;;  %v13410_v37 = vld [vmem:[#allocation3 + $0x121] sm:$0xff] }
 0x542   : > { %13165 = vrot.lane.b32.xlu0 %v20757_v6, %s13444_s18  ;;  %v7551_v33 = vsel %vm2568_vm10, %v7519_v56, %v12813_v46  ;;  %v7329_v47 = vsel %vm20096_vm2, %v3610_v32, %v12808_v10  ;;  %v7328_v34 = vsel %vm20096_vm2, %v3609_v14, %v12807_v31  ;;  %v12833_v60 = vunpack.i.h.bf16 %v17974_v39 }
 0x543   : > { %13190 = vrot.lane.b32.xlu1 %v13189_v59, %s13444_s18  ;;  %v12832_v62 = vunpack.i.l.bf16 %v17974_v39  ;;  %v20760_v4 = vpack.i.bf16 %v20758_v5, %v20759_v8  ;;  %v12098_v12 = vunpack.i.h.bf16 %v20761_v16  ;;  %v12818_v28 = vunpack.i.h.bf16 %v17982_v7  ;;  %v18227_v53 = vpop.permute.xlu1 %12910 }
 0x544   : > { %v12817_v15 = vunpack.i.l.bf16 %v17982_v7  ;;  %v13184_v48 = vpack.i.bf16 %v7545_v41, %v7544_v20  ;;  %v12843_v58 = vunpack.i.h.bf16 %v18005_v23  ;;  %v12842_v55 = vunpack.i.l.bf16 %v18005_v23  ;;  %v18231_v26 = vpop.permute.xlu0 %12895 }
 0x545   : > { %v13219_v39 = vpack.i.bf16 %v7551_v33, %v18213_v18  ;;  %v13214_v43 = vpack.i.bf16 %v18205_v29, %v18202_v52  ;;  %v7360_v3 = vsel %vm20095_vm4, %v7328_v34, %v12822_v49  ;;  %v7361_v27 = vsel %vm20095_vm4, %v7329_v47, %v12823_v38  ;;  %v20765_v38 = vld [vmem:[#allocation227_spill] sm:$0xff]  ;;  %v20766_v49 = vld [vmem:[#allocation226_spill] sm:$0xff]  ;;  %v20768_v47 = vld [vmem:[#allocation229_spill] sm:$0xff] }
 0x546   : > { %13175 = vrot.lane.b32.xlu0 %v20760_v4, %s13443_s17  ;;  %v12828_v7 = vunpack.i.h.bf16 %v18014_v19  ;;  %v12827_v35 = vunpack.i.l.bf16 %v18014_v19  ;;  %v20764_v13 = vpack.i.bf16 %v20762_v45, %v20763_v1  ;;  %v7392_v23 = vsel %vm2403_vm5, %v7360_v3, %v12832_v62  ;;  %v20769_v34 = vld [vmem:[#allocation228_spill] sm:$0xff]  ;;  %v20771_v1 = vld [vmem:[#allocation231_spill] sm:$0xff] }
 0x547   : > { %v7393_v46 = vsel %vm2403_vm5, %v7361_v27, %v12833_v60  ;;  %v12853_v11 = vunpack.i.h.bf16 %v18038_v2  ;;  %v12852_v42 = vunpack.i.l.bf16 %v18038_v2  ;;  %v7331_v40 = vsel %vm20096_vm2, %v13409_v36, %v12818_v28  ;;  %v18253_v31 = vpop.permute.xlu1 %12920 }
 0x548   : > { %13200 = vrot.lane.b32.xlu1 %v20764_v13, %s13442_s24  ;;  %v7330_v19 = vsel %vm20096_vm2, %v13410_v37, %v12817_v15  ;;  %v12838_v56 = vunpack.i.h.bf16 %v18044_v51  ;;  %v12837_v10 = vunpack.i.l.bf16 %v18044_v51  ;;  %v7424_v6 = vsel %vm2436_vm6, %v7392_v23, %v12842_v55  ;;  %v18259_v63 = vpop.permute.xlu0 %12905  ;;  %v20772_v13 = vld [vmem:[#allocation230_spill] sm:$0xff] }
 0x549   : > { %v7425_v24 = vsel %vm2436_vm6, %v7393_v46, %v12843_v58  ;;  %v12863_v2 = vunpack.i.h.bf16 %v18072_v0  ;;  %v12862_v44 = vunpack.i.l.bf16 %v18072_v0  ;;  %v7362_v59 = vsel %vm20095_vm4, %v7330_v19, %v12827_v35 }
 0x54a   : > { %13185 = vrot.lane.b32.xlu0 %v13184_v48, %s13444_s18  ;;  %v7363_v20 = vsel %vm20095_vm4, %v7331_v40, %v12828_v7  ;;  %v12848_v41 = vunpack.i.h.bf16 %v18078_v9  ;;  %v12847_v51 = vunpack.i.l.bf16 %v18078_v9  ;;  %v20767_v14 = vpack.i.bf16 %v20765_v38, %v20766_v49  ;;  %v20781_v38 = vld [vmem:[#allocation138_spill] sm:$0xff] }
 0x54b   : > { %v7456_v32 = vsel %vm2469_vm7, %v7424_v6, %v12852_v42  ;;  %v7457_v18 = vsel %vm2469_vm7, %v7425_v24, %v12853_v11  ;;  %v12858_v0 = vunpack.i.h.bf16 %v18110_v21  ;;  %v12857_v33 = vunpack.i.l.bf16 %v18110_v21  ;;  %v18281_v4 = vpop.permute.xlu1 %12930 }
 0x54c   : > { %13210 = vrot.lane.b32.xlu1 %v20767_v14, %s13443_s17  ;;  %v20770_v60 = vpack.i.bf16 %v20768_v47, %v20769_v34  ;;  %v7394_v9 = vsel %vm2403_vm5, %v7362_v59, %v12837_v10  ;;  %v7395_v62 = vsel %vm2403_vm5, %v7363_v20, %v12838_v56  ;;  %v12868_v5 = vunpack.i.h.bf16 %v18138_v22  ;;  %v18287_v58 = vpop.permute.xlu0 %12915  ;;  %v20775_v10 = vld [vmem:[#allocation164_spill] sm:$0xff] }
 0x54d   : > { %v12867_v8 = vunpack.i.l.bf16 %v18138_v22  ;;  %v7488_v28 = vsel %vm2502_vm8, %v7456_v32, %v12862_v44  ;;  %v7489_v15 = vsel %vm2502_vm8, %v7457_v18, %v12863_v2  ;;  %v12878_v21 = vunpack.i.h.bf16 %v18166_v25  ;;  %v20776_v44 = vld [vmem:[#allocation233_spill] sm:$0xff]  ;;  %v20777_v59 = vld [vmem:[#allocation232_spill] sm:$0xff] }
 0x54e   : > { %13195 = vrot.lane.b32.xlu0 %v20770_v60, %s13442_s24  ;;  %v12877_v48 = vunpack.i.l.bf16 %v18166_v25  ;;  %v7426_v55 = vsel %vm2436_vm6, %v7394_v9, %v12847_v51  ;;  %v7427_v3 = vsel %vm2436_vm6, %v7395_v62, %v12848_v41  ;;  %v12873_v27 = vunpack.i.h.bf16 %v18104_v61  ;;  %v20780_v41 = vld [vmem:[#allocation163_spill] sm:$0xff] }
 0x54f   : > { %v12872_v22 = vunpack.i.l.bf16 %v18104_v61  ;;  %v7458_v7 = vsel %vm2469_vm7, %v7426_v55, %v12857_v33  ;;  %v7459_v35 = vsel %vm2469_vm7, %v7427_v3, %v12858_v0  ;;  %v12883_v45 = vunpack.i.h.bf16 %v18132_v17  ;;  %v18306_v42 = vpop.permute.xlu1 %12940  ;;  %v3613_v0 = vld [vmem:[#allocation3 + $0x139] sm:$0xff]  ;;  %v3614_v33 = vld [vmem:[#allocation3 + $0x141] sm:$0xff] }
 0x550   : > { %13220 = vrot.lane.b32.xlu1 %v13219_v39, %s13444_s18  ;;  %v12882_v25 = vunpack.i.l.bf16 %v18132_v17  ;;  %v20773_v23 = vpack.i.bf16 %v20771_v1, %v20772_v13  ;;  %v7490_v46 = vsel %vm2502_vm8, %v7458_v7, %v12867_v8  ;;  %v7491_v11 = vsel %vm2502_vm8, %v7459_v35, %v12868_v5  ;;  %v18312_v19 = vpop.permute.xlu0 %12925  ;;  %v20787_v7 = vld [vmem:[#allocation239_spill] sm:$0xff] }
 0x551   : > { %v12893_v61 = vunpack.i.h.bf16 %v18160_v30  ;;  %v12892_v39 = vunpack.i.l.bf16 %v18160_v30  ;;  %v7522_v36 = vsel %vm2535_vm9, %v7490_v46, %v12877_v48  ;;  %v7523_v40 = vsel %vm2535_vm9, %v7491_v11, %v12878_v21  ;;  %v20783_v21 = vld [vmem:[#allocation238_spill] sm:$0xff]  ;;  %v20784_v48 = vld [vmem:[#allocation237_spill] sm:$0xff] }
 0x552   : > { %13205 = vrot.lane.b32.xlu0 %v20773_v23, %s13443_s17  ;;  %v12888_v17 = vunpack.i.h.bf16 %v18207_v50  ;;  %v12887_v37 = vunpack.i.l.bf16 %v18207_v50  ;;  %v20774_v56 = vunpack.i.l.bf16 %v20686_v57  ;;  %v12097_v30 = vunpack.i.l.bf16 %v20761_v16 }
 0x553   : > { %v7520_v24 = vsel %vm2535_vm9, %v7488_v28, %v12872_v22  ;;  %v7521_v2 = vsel %vm2535_vm9, %v7489_v15, %v12873_v27  ;;  %v20778_v20 = vpack.i.bf16 %v20776_v44, %v20777_v59  ;;  %v20779_v50 = vunpack.i.h.bf16 %v20686_v57  ;;  %v18346_v47 = vpop.permute.xlu1 %12950  ;;  %v20786_v22 = vld [vmem:[#allocation240_spill] sm:$0xff]  ;;  %v20789_v59 = vld [vmem:[#allocation242_spill] sm:$0xff] }
 0x554   : > { %v18318_v6 = vsel %vm2644_vm11, %v20775_v10, %v20774_v56  ;;  %v12123_v49 = vunpack.i.h.bf16 %v20781_v38  ;;  %v18335_v14 = vsel %vm2568_vm10, %v7520_v24, %v12882_v25  ;;  %v18338_v32 = vsel %vm2568_vm10, %v7521_v2, %v12883_v45  ;;  %v12936_v29 = vpop.permute.xlu0 %12935 }
 0x555   : > { %13230 = vrot.lane.b32.xlu1 %v20778_v20, %s13442_s24  ;;  %v18331_v51 = vsel %vm2644_vm11, %v20780_v41, %v20779_v50  ;;  %v12903_v18 = vunpack.i.h.bf16 %v18190_v54  ;;  %v12902_v57 = vunpack.i.l.bf16 %v18190_v54  ;;  %v7554_v34 = vsel %vm2568_vm10, %v7522_v36, %v12892_v39  ;;  %v20782_v54 = vld [vmem:[#allocation140_spill] sm:$0xff]  ;;  %v13411_v36 = vld [vmem:[#allocation3 + $0x159] sm:$0xff] }
 0x556   : > { %13215 = vrot.lane.b32.xlu0 %v13214_v43, %s13444_s18  ;;  %v7555_v60 = vsel %vm2568_vm10, %v7523_v40, %v12893_v61  ;;  %v7333_v9 = vsel %vm20096_vm2, %v3614_v33, %v12888_v17  ;;  %v7332_v62 = vsel %vm20096_vm2, %v3613_v0, %v12887_v37  ;;  %v12913_v5 = vunpack.i.h.bf16 %v18227_v53  ;;  %v13412_v17 = vld [vmem:[#allocation3 + $0x151] sm:$0xff] }
 0x557   : > { %v12912_v52 = vunpack.i.l.bf16 %v18227_v53  ;;  %v12122_v43 = vunpack.i.l.bf16 %v20781_v38  ;;  %v12108_v8 = vunpack.i.h.bf16 %v20782_v54  ;;  %v12898_v28 = vunpack.i.h.bf16 %v18231_v26  ;;  %v18374_v23 = vpop.permute.xlu1 %12960  ;;  %v20808_v38 = vld [vmem:[#allocation145_spill] sm:$0xff] }
 0x558   : > { %v12897_v15 = vunpack.i.l.bf16 %v18231_v26  ;;  %v20785_v55 = vpack.i.bf16 %v20783_v21, %v20784_v48  ;;  %v13244_v3 = vpack.i.bf16 %v18338_v32, %v18335_v14  ;;  %v12908_v27 = vunpack.i.h.bf16 %v18259_v63  ;;  %v12946_v39 = vpop.permute.xlu0 %12945 }
 0x559   : > { %v12907_v53 = vunpack.i.l.bf16 %v18259_v63  ;;  %v20788_v35 = vpack.i.bf16 %v20786_v22, %v20787_v7  ;;  %v13249_v45 = vpack.i.bf16 %v7555_v60, %v7554_v34  ;;  %v7364_v26 = vsel %vm20095_vm4, %v7332_v62, %v12902_v57 }
 0x55a   : > { %13240 = vrot.lane.b32.xlu1 %v20785_v55, %s13443_s17  ;;  %v7365_v25 = vsel %vm20095_vm4, %v7333_v9, %v12903_v18  ;;  %v12918_v1 = vunpack.i.h.bf16 %v18287_v58  ;;  %v12917_v13 = vunpack.i.l.bf16 %v18287_v58  ;;  %v7396_v46 = vsel %vm2403_vm5, %v7364_v26, %v12912_v52 }
 0x55b   : > { %13225 = vrot.lane.b32.xlu0 %v20788_v35, %s13442_s24  ;;  %v7397_v63 = vsel %vm2403_vm5, %v7365_v25, %v12913_v5  ;;  %v12928_v11 = vunpack.i.h.bf16 %v18312_v19  ;;  %v12927_v61 = vunpack.i.l.bf16 %v18312_v19  ;;  %v7335_v40 = vsel %vm20096_vm2, %v13411_v36, %v12898_v28  ;;  %v20790_v19 = vld [vmem:[#allocation241_spill] sm:$0xff]  ;;  %v12971_v18 = vpop.permute.xlu1 %12970 }
 0x55c   : > { %v7334_v37 = vsel %vm20096_vm2, %v13412_v17, %v12897_v15  ;;  %v12938_v56 = vunpack.i.h.bf16 %v12936_v29  ;;  %v12937_v10 = vunpack.i.l.bf16 %v12936_v29  ;;  %v7367_v24 = vsel %vm20095_vm4, %v7335_v40, %v12908_v27  ;;  %v12956_v60 = vpop.permute.xlu0 %12955  ;;  %v20793_v29 = vld [vmem:[#allocation243_spill] sm:$0xff]  ;;  %v20798_v40 = vld [vmem:[#allocation141_spill] sm:$0xff] }
 0x55d   : > { %v7366_v58 = vsel %vm20095_vm4, %v7334_v37, %v12907_v53  ;;  %v12948_v2 = vunpack.i.h.bf16 %v12946_v39  ;;  %v12947_v44 = vunpack.i.l.bf16 %v12946_v39  ;;  %v20791_v20 = vpack.i.bf16 %v20789_v59, %v20790_v19  ;;  %v20796_v39 = vld [vmem:[#allocation248_spill] sm:$0xff]  ;;  %v20802_v59 = vld [vmem:[#allocation177_spill] sm:$0xff] }
 0x55e   : > { %13250 = vrot.lane.b32.xlu1 %v13249_v45, %s13444_s18  ;;  %v12923_v50 = vunpack.i.h.bf16 %v18253_v31  ;;  %v12922_v41 = vunpack.i.l.bf16 %v18253_v31  ;;  %v7398_v14 = vsel %vm2403_vm5, %v7366_v58, %v12917_v13  ;;  %v7399_v32 = vsel %vm2403_vm5, %v7367_v24, %v12918_v1  ;;  %v20792_v31 = vld [vmem:[#allocation244_spill] sm:$0xff] }
 0x55f   : > { %13235 = vrot.lane.b32.xlu0 %v20791_v20, %s13443_s17  ;;  %v7430_v57 = vsel %vm2436_vm6, %v7398_v14, %v12927_v61  ;;  %v7431_v0 = vsel %vm2436_vm6, %v7399_v32, %v12928_v11  ;;  %v12973_v33 = vunpack.i.h.bf16 %v12971_v18  ;;  %v12972_v34 = vunpack.i.l.bf16 %v12971_v18  ;;  %v18410_v35 = vpop.permute.xlu1 %12980  ;;  %v20795_v61 = vld [vmem:[#allocation249_spill] sm:$0xff]  ;;  %v20803_v20 = vld [vmem:[#allocation46_spill] sm:$0xff]  ;;  %v20804_v18 = vld [vmem:[#allocation47_spill] sm:$0xff] }
 0x560   : > { %v7462_v9 = vsel %vm2469_vm7, %v7430_v57, %v12937_v10  ;;  %v7463_v62 = vsel %vm2469_vm7, %v7431_v0, %v12938_v56  ;;  %v12958_v5 = vunpack.i.h.bf16 %v12956_v60  ;;  %v12957_v52 = vunpack.i.l.bf16 %v12956_v60  ;;  %v18414_v26 = vpop.permute.xlu0 %12965 }
 0x561   : > { %v20794_v28 = vpack.i.bf16 %v20792_v31, %v20793_v29  ;;  %v12933_v15 = vunpack.i.h.bf16 %v18281_v4  ;;  %v12932_v21 = vunpack.i.l.bf16 %v18281_v4  ;;  %v7494_v48 = vsel %vm2502_vm8, %v7462_v9, %v12947_v44  ;;  %v20812_v31 = vld [vmem:[#allocation51_spill] sm:$0xff] }
 0x562   : > { %v7495_v55 = vsel %vm2502_vm8, %v7463_v62, %v12948_v2  ;;  %v12943_v27 = vunpack.i.h.bf16 %v18306_v42  ;;  %v12942_v53 = vunpack.i.l.bf16 %v18306_v42  ;;  %v7526_v22 = vsel %vm2535_vm9, %v7494_v48, %v12957_v52  ;;  %v20809_v62 = vld [vmem:[#allocation254_spill] sm:$0xff] }
 0x563   : > { %13260 = vrot.lane.b32.xlu1 %v20794_v28, %s13442_s24  ;;  %13245 = vrot.lane.b32.xlu0 %v13244_v3, %s13444_s18  ;;  %v7527_v7 = vsel %vm2535_vm9, %v7495_v55, %v12958_v5  ;;  %v12953_v45 = vunpack.i.h.bf16 %v18346_v47  ;;  %v12952_v4 = vunpack.i.l.bf16 %v18346_v47  ;;  %v7558_v25 = vsel %vm2568_vm10, %v7526_v22, %v12972_v34  ;;  %v18437_v2 = vpop.permute.xlu1 %12990  ;;  %v20810_v5 = vld [vmem:[#allocation253_spill] sm:$0xff]  ;;  %v20813_v28 = vld [vmem:[#allocation52_spill] sm:$0xff] }
 0x564   : > { %v7559_v3 = vsel %vm2568_vm10, %v7527_v7, %v12973_v33  ;;  %v7428_v1 = vsel %vm2436_vm6, %v7396_v46, %v12922_v41  ;;  %v7429_v42 = vsel %vm2436_vm6, %v7397_v63, %v12923_v50  ;;  %v12963_v13 = vunpack.i.h.bf16 %v18374_v23  ;;  %v20799_v46 = vld [vmem:[#allocation252_spill] sm:$0xff]  ;;  %v20800_v63 = vld [vmem:[#allocation250_spill] sm:$0xff]  ;;  %v18453_v32 = vpop.permute.xlu0 %12975  ;;  %v20806_v33 = vld [vmem:[#allocation49_spill] sm:$0xff] }
 0x565   : > { %v12962_v11 = vunpack.i.l.bf16 %v18374_v23  ;;  %v20797_v36 = vpack.i.bf16 %v20795_v61, %v20796_v39  ;;  %v12107_v47 = vunpack.i.l.bf16 %v20782_v54  ;;  %v12118_v17 = vunpack.i.h.bf16 %v20798_v40  ;;  %v18501_v55 = vld [vmem:[%s19763_s7] sm:$0x3]  ;;  %v20819_v39 = vld [vmem:[#allocation256_spill] sm:$0xff] }
 0x566   : > { %v7460_v37 = vsel %vm2469_vm7, %v7428_v1, %v12932_v21  ;;  %v7461_v56 = vsel %vm2469_vm7, %v7429_v42, %v12933_v15  ;;  %v20801_v10 = vpack.i.bf16 %v20799_v46, %v20800_v63  ;;  %v12117_v23 = vunpack.i.l.bf16 %v20798_v40  ;;  %v20814_v15 = vld [vmem:[#allocation147_spill] sm:$0xff]  ;;  %v20816_v7 = vld [vmem:[#allocation149_spill] sm:$0xff]  ;;  %10751 = vmatprep.subr.msk.bf16.mxu1 %vm612_vm0, %v18501_v55  ;;  %v20817_v1 = vld [vmem:[#allocation150_spill] sm:$0xff] }
 0x567   : > { %13270 = vrot.lane.b32.xlu1 %v20797_v36, %s13443_s17  ;;  %v7492_v58 = vsel %vm2502_vm8, %v7460_v37, %v12942_v53  ;;  %v7493_v24 = vsel %vm2502_vm8, %v7461_v56, %v12943_v27  ;;  %v13279_v44 = vpack.i.bf16 %v7559_v3, %v7558_v25  ;;  %v18443_v19 = vsel %vm2644_vm11, %v20802_v59, %v12097_v30  ;;  %v20805_v30 = vld [vmem:[#allocation48_spill] sm:$0xff]  ;;  %v18496_v48 = vpop.permute.xlu1 %13000  ;;  %v20820_v36 = vld [vmem:[#allocation255_spill] sm:$0xff]  ;;  %v20822_v40 = vld [vmem:[#allocation53_spill] sm:$0xff] }
 0x568   : > { %13255 = vrot.lane.b32.xlu0 %v20801_v10, %s13442_s24  ;;  %v18449_v50 = vsel %vm2644_vm11, %v20803_v20, %v12098_v12  ;;  %v7524_v41 = vsel %vm2535_vm9, %v7492_v58, %v12952_v4  ;;  %v7525_v14 = vsel %vm2535_vm9, %v7493_v24, %v12953_v45  ;;  %v18459_v57 = vsel %vm2644_vm11, %v20804_v18, %v12122_v43  ;;  %v20807_v43 = vld [vmem:[#allocation50_spill] sm:$0xff]  ;;  %v20815_v27 = vld [vmem:[#allocation148_spill] sm:$0xff]  ;;  %v18506_v25 = vpop.permute.xlu0 %12985  ;;  %v20826_v24 = vld [vmem:[#allocation55_spill] sm:$0xff] }
 0x569   : > { %v18465_v16 = vsel %vm2644_vm11, %v20805_v30, %v12123_v49  ;;  %v7556_v12 = vsel %vm2568_vm10, %v7524_v41, %v12962_v11  ;;  %v7557_v0 = vsel %vm2568_vm10, %v7525_v14, %v12963_v13  ;;  %v18472_v34 = vsel %vm2644_vm11, %v20806_v33, %v12107_v47  ;;  %v20818_v11 = vld [vmem:[#allocation8_spill] sm:$0xff]  ;;  %v20823_v37 = vld [vmem:[#allocation178_spill] sm:$0xff]  ;;  %v20828_v30 = vld [vmem:[#allocation161_spill] sm:$0xff] }
 0x56a   : > { %v18478_v60 = vsel %vm2644_vm11, %v20807_v43, %v12108_v8  ;;  %v12153_v9 = vunpack.i.h.bf16 %v20808_v38  ;;  %v12152_v49 = vunpack.i.l.bf16 %v20808_v38  ;;  %v20811_v52 = vpack.i.bf16 %v20809_v62, %v20810_v5  ;;  %v20824_v63 = vld [vmem:[#allocation6_spill] sm:$0xff]  ;;  %v20827_v14 = vld [vmem:[#allocation56_spill] sm:$0xff]  ;;  %v20832_v5 = vld [vmem:[#allocation179_spill] sm:$0xff] }
 0x56b   : > { %13280 = vrot.lane.b32.xlu1 %v13279_v44, %s13444_s18  ;;  %v18488_v29 = vsel %vm2644_vm11, %v20812_v31, %v12117_v23  ;;  %v18492_v54 = vsel %vm2644_vm11, %v20813_v28, %v12118_v17  ;;  %v12163_v8 = vunpack.i.h.bf16 %v20814_v15  ;;  %v12162_v21 = vunpack.i.l.bf16 %v20814_v15  ;;  %v20825_v23 = vld [vmem:[#allocation54_spill] sm:$0xff]  ;;  %v13011_v41 = vpop.permute.xlu1 %13010  ;;  %v20833_v31 = vld [vmem:[#allocation59_spill] sm:$0xff] }
 0x56c   : > { %13265 = vrot.lane.b32.xlu0 %v20811_v52, %s13443_s17  ;;  %v12148_v53 = vunpack.i.h.bf16 %v20815_v27  ;;  %v12147_v22 = vunpack.i.l.bf16 %v20815_v27  ;;  %v12172_v45 = vunpack.i.l.bf16 %v20816_v7  ;;  %v13274_v4 = vpack.i.bf16 %v7557_v0, %v7556_v12  ;;  %v20829_v0 = vld [vmem:[#allocation160_spill] sm:$0xff]  ;;  %v18552_v38 = vpop.permute.xlu0 %12995  ;;  %v20834_v15 = vld [vmem:[#allocation258_spill] sm:$0xff] }
 0x56d   : > { %v12173_v3 = vunpack.i.h.bf16 %v20816_v7  ;;  %v12158_v42 = vunpack.i.h.bf16 %v20817_v1  ;;  %v12157_v13 = vunpack.i.l.bf16 %v20817_v1  ;;  %v12182_v61 = vunpack.i.l.bf16 %v20818_v11  ;;  %v20837_v27 = vld [vmem:[#allocation60_spill] sm:$0xff]  ;;  %v3618_v1 = vld [vmem:[#allocation3 + $0x171] sm:$0xff] }
 0x56e   : > { %v20821_v47 = vpack.i.bf16 %v20819_v39, %v20820_v36  ;;  %v18520_v17 = vsel %vm6090_vm13, %v20822_v40, %v12152_v49  ;;  %v18524_v56 = vsel %vm6090_vm13, %v20823_v37, %v12153_v9  ;;  %v12183_v46 = vunpack.i.h.bf16 %v20818_v11  ;;  %v20830_v9 = vld [vmem:[#allocation57_spill] sm:$0xff]  ;;  %v20831_v49 = vld [vmem:[#allocation58_spill] sm:$0xff] }
 0x56f   : > { %v12167_v10 = vunpack.i.l.bf16 %v20824_v63  ;;  %v18531_v58 = vsel %vm6090_vm13, %v20825_v23, %v12162_v21  ;;  %v18535_v44 = vsel %vm6090_vm13, %v20826_v24, %v12163_v8  ;;  %v12968_v59 = vunpack.i.h.bf16 %v18414_v26  ;;  %v20835_v8 = vld [vmem:[#allocation257_spill] sm:$0xff]  ;;  %v13021_v40 = vpop.permute.xlu1 %13020  ;;  %v20842_v37 = vld [vmem:[#allocation62_spill] sm:$0xff] }
 0x570   : > { %13290 = vrot.lane.b32.xlu1 %v20821_v47, %s13442_s24  ;;  %13275 = vrot.lane.b32.xlu0 %v13274_v4, %s13444_s18  ;;  %v12967_v20 = vunpack.i.l.bf16 %v18414_v26  ;;  %v18541_v18 = vsel %vm6090_vm13, %v20827_v14, %v12147_v22  ;;  %v18545_v12 = vsel %vm6090_vm13, %v20828_v30, %v12148_v53  ;;  %v18549_v33 = vsel %vm6090_vm13, %v20829_v0, %v12172_v45  ;;  %v20838_v22 = vld [vmem:[#allocation61_spill] sm:$0xff]  ;;  %v20844_v14 = vld [vmem:[#allocation7_spill] sm:$0xff] }
 0x571   : > { %v12168_v43 = vunpack.i.h.bf16 %v20824_v63  ;;  %v18556_v26 = vsel %vm6090_vm13, %v20830_v9, %v12173_v3  ;;  %v18560_v62 = vsel %vm6090_vm13, %v20831_v49, %v12157_v13  ;;  %v18564_v52 = vsel %vm6090_vm13, %v20832_v5, %v12158_v42  ;;  %v3617_v3 = vld [vmem:[#allocation3 + $0x169] sm:$0xff]  ;;  %v20840_v13 = vld [vmem:[#allocation259_spill] sm:$0xff] }
 0x572   : > { %v18568_v28 = vsel %vm6090_vm13, %v20833_v31, %v12182_v61  ;;  %v20836_v21 = vpack.i.bf16 %v20834_v15, %v20835_v8  ;;  %v18576_v53 = vsel %vm6090_vm13, %v20837_v27, %v12183_v46  ;;  %v18580_v7 = vsel %vm6090_vm13, %v20838_v22, %v12167_v10  ;;  %v20839_v42 = vld [vmem:[#allocation260_spill] sm:$0xff]  ;;  %v20845_v5 = vld [vmem:[#allocation263_spill] sm:$0xff] }
 0x573   : > { %v12983_v45 = vunpack.i.h.bf16 %v18410_v35  ;;  %v12982_v4 = vunpack.i.l.bf16 %v18410_v35  ;;  %v20841_v11 = vpack.i.bf16 %v20839_v42, %v20840_v13  ;;  %v7337_v61 = vsel %vm20096_vm2, %v3618_v1, %v12968_v59  ;;  %v20843_v35 = vld [vmem:[#allocation151_spill] sm:$0xff]  ;;  %v13413_v22 = vld [vmem:[#allocation3 + $0x189] sm:$0xff] }
 0x574   : > { %13300 = vrot.lane.b32.xlu1 %v20836_v21, %s13443_s17  ;;  %v7336_v39 = vsel %vm20096_vm2, %v3617_v3, %v12967_v20  ;;  %v12993_v36 = vunpack.i.h.bf16 %v18437_v2  ;;  %v12992_v47 = vunpack.i.l.bf16 %v18437_v2  ;;  %v18594_v46 = vsel %vm6090_vm13, %v20842_v37, %v12168_v43  ;;  %v13006_v24 = vpop.permute.xlu0 %13005 }
 0x575   : > { %13285 = vrot.lane.b32.xlu0 %v20841_v11, %s13442_s24  ;;  %v12193_v63 = vunpack.i.h.bf16 %v20843_v35  ;;  %v12978_v10 = vunpack.i.h.bf16 %v18453_v32  ;;  %v12977_v23 = vunpack.i.l.bf16 %v18453_v32  ;;  %v12192_v59 = vunpack.i.l.bf16 %v20843_v35  ;;  %v20846_v32 = vld [vmem:[#allocation262_spill] sm:$0xff] }
 0x576   : > { %v12178_v20 = vunpack.i.h.bf16 %v20844_v14  ;;  %v13003_v30 = vunpack.i.h.bf16 %v18496_v48  ;;  %v13002_v2 = vunpack.i.l.bf16 %v18496_v48  ;;  %v7368_v0 = vsel %vm20095_vm4, %v7336_v39, %v12982_v4  ;;  %v13031_v48 = vpop.permute.xlu1 %13030 }
 0x577   : > { %v7369_v43 = vsel %vm20095_vm4, %v7337_v61, %v12983_v45  ;;  %v12988_v9 = vunpack.i.h.bf16 %v18506_v25  ;;  %v12987_v49 = vunpack.i.l.bf16 %v18506_v25  ;;  %v20847_v31 = vpack.i.bf16 %v20845_v5, %v20846_v32  ;;  %v13414_v45 = vld [vmem:[#allocation3 + $0x181] sm:$0xff] }
 0x578   : > { %v7400_v15 = vsel %vm2403_vm5, %v7368_v0, %v12992_v47  ;;  %v7401_v8 = vsel %vm2403_vm5, %v7369_v43, %v12993_v36  ;;  %v13013_v21 = vunpack.i.h.bf16 %v13011_v41  ;;  %v13012_v27 = vunpack.i.l.bf16 %v13011_v41  ;;  %v13016_v42 = vpop.permute.xlu0 %13015 }
 0x579   : > { %13295 = vrot.lane.b32.xlu0 %v20847_v31, %s13443_s17  ;;  %v7339_v4 = vsel %vm20096_vm2, %v13413_v22, %v12978_v10  ;;  %v7338_v3 = vsel %vm20096_vm2, %v13414_v45, %v12977_v23  ;;  %v13023_v1 = vunpack.i.h.bf16 %v13021_v40  ;;  %v13022_v25 = vunpack.i.l.bf16 %v13021_v40 }
 0x57a   : > { %v7432_v13 = vsel %vm2436_vm6, %v7400_v15, %v13002_v2  ;;  %v7433_v11 = vsel %vm2436_vm6, %v7401_v8, %v13003_v30  ;;  %v13033_v61 = vunpack.i.h.bf16 %v13031_v48  ;;  %v13032_v39 = vunpack.i.l.bf16 %v13031_v48  ;;  %v13041_v43 = vpop.permute.xlu1 %13040 }
 0x57b   : > { %v7370_v36 = vsel %vm20095_vm4, %v7338_v3, %v12987_v49  ;;  %v7371_v41 = vsel %vm20095_vm4, %v7339_v4, %v12988_v9  ;;  %v12998_v47 = vunpack.i.h.bf16 %v18552_v38  ;;  %v12997_v37 = vunpack.i.l.bf16 %v18552_v38 }
 0x57c   : > { %v7464_v10 = vsel %vm2469_vm7, %v7432_v13, %v13012_v27  ;;  %v7465_v23 = vsel %vm2469_vm7, %v7433_v11, %v13013_v21  ;;  %v13008_v40 = vunpack.i.h.bf16 %v13006_v24  ;;  %v13007_v0 = vunpack.i.l.bf16 %v13006_v24  ;;  %v13026_v49 = vpop.permute.xlu0 %13025 }
 0x57d   : > { %v7496_v2 = vsel %vm2502_vm8, %v7464_v10, %v13022_v25  ;;  %v7497_v30 = vsel %vm2502_vm8, %v7465_v23, %v13023_v1  ;;  %v13043_v5 = vunpack.i.h.bf16 %v13041_v43  ;;  %v13042_v32 = vunpack.i.l.bf16 %v13041_v43 }
 0x57e   : > { %v7528_v9 = vsel %vm2535_vm9, %v7496_v2, %v13032_v39  ;;  %v7529_v31 = vsel %vm2535_vm9, %v7497_v30, %v13033_v61  ;;  %v13018_v15 = vunpack.i.h.bf16 %v13016_v42  ;;  %v13017_v38 = vunpack.i.l.bf16 %v13016_v42  ;;  %v13051_v3 = vpop.permute.xlu1 %13050 }
 0x57f   : > { %v7560_v8 = vsel %vm2568_vm10, %v7528_v9, %v13042_v32  ;;  %v7561_v21 = vsel %vm2568_vm10, %v7529_v31, %v13043_v5  ;;  %v13028_v27 = vunpack.i.h.bf16 %v13026_v49  ;;  %v13027_v24 = vunpack.i.l.bf16 %v13026_v49  ;;  %v20850_v9 = vld [vmem:[#allocation34_spill] sm:$0xff] }
 0x580   : > { %v12177_v48 = vunpack.i.l.bf16 %v20844_v14  ;;  %v7402_v22 = vsel %vm2403_vm5, %v7370_v36, %v12997_v37  ;;  %v7403_v4 = vsel %vm2403_vm5, %v7371_v41, %v12998_v47  ;;  %v13304_v45 = vpack.i.bf16 %v7561_v21, %v7560_v8  ;;  %v13036_v11 = vpop.permute.xlu0 %13035  ;;  %v20848_v36 = vld [vmem:[#allocation10_spill] sm:$0xff] }
 0x581   : > { %v7434_v1 = vsel %vm2436_vm6, %v7402_v22, %v13007_v0  ;;  %v7435_v25 = vsel %vm2436_vm6, %v7403_v4, %v13008_v40  ;;  %v13053_v13 = vunpack.i.h.bf16 %v13051_v3  ;;  %v13052_v42 = vunpack.i.l.bf16 %v13051_v3  ;;  %v20855_v22 = vld [vmem:[#allocation9_spill] sm:$0xff]  ;;  %v20856_v3 = vld [vmem:[#allocation16_spill] sm:$0xff] }
 0x582   : > { %v7466_v61 = vsel %vm2469_vm7, %v7434_v1, %v13017_v38  ;;  %v7467_v39 = vsel %vm2469_vm7, %v7435_v25, %v13018_v15  ;;  %v13038_v10 = vunpack.i.h.bf16 %v13036_v11  ;;  %v13037_v23 = vunpack.i.l.bf16 %v13036_v11  ;;  %13305 = vrot.lane.b32.xlu0 %v13304_v45, %s13444_s18  ;;  %v18655_v5 = vpop.permute.xlu1 %13060  ;;  %v20852_v38 = vld [vmem:[#allocation30_spill] sm:$0xff] }
 0x583   : > { %v12188_v37 = vunpack.i.h.bf16 %v20848_v36  ;;  %v12187_v41 = vunpack.i.l.bf16 %v20848_v36  ;;  %v7498_v47 = vsel %vm2502_vm8, %v7466_v61, %v13027_v24  ;;  %v7499_v0 = vsel %vm2502_vm8, %v7467_v39, %v13028_v27  ;;  %v20854_v27 = vld [vmem:[#allocation11_spill] sm:$0xff]  ;;  %v20858_v11 = vld [vmem:[#allocation14_spill] sm:$0xff] }
 0x584   : > { %v18645_v40 = vsel %vm6090_vm13, %v18318_v6, %v12192_v59  ;;  %v18651_v43 = vsel %vm6090_vm13, %v18331_v51, %v12193_v63  ;;  %v7530_v2 = vsel %vm2535_vm9, %v7498_v47, %v13037_v23  ;;  %v7531_v30 = vsel %vm2535_vm9, %v7499_v0, %v13038_v10  ;;  %v18667_v35 = vpop.permute.xlu0 %13045  ;;  %v20849_v59 = vld [vmem:[#allocation5_spill] sm:$0xff]  ;;  %v20860_v47 = vld [vmem:[#allocation31_spill] sm:$0xff] }
 0x585   : > { %v18659_v32 = vsel %vm6090_vm13, %v18443_v19, %v12177_v48  ;;  %v18665_v6 = vsel %vm6090_vm13, %v18449_v50, %v12178_v20  ;;  %v7562_v51 = vsel %vm2568_vm10, %v7530_v2, %v13052_v42  ;;  %v7563_v63 = vsel %vm2568_vm10, %v7531_v30, %v13053_v13  ;;  %v20851_v19 = vld [vmem:[#allocation264_spill] sm:$0xff]  ;;  %v20861_v0 = vld [vmem:[#allocation265_spill] sm:$0xff]  ;;  %v3621_v50 = vld [vmem:[#allocation3 + $0x199] sm:$0xff] }
 0x586   : > { %v12233_v31 = vunpack.i.h.bf16 %v20850_v9  ;;  %v12232_v15 = vunpack.i.l.bf16 %v20850_v9  ;;  %v20853_v14 = vpack.i.bf16 %v20851_v19, %v20852_v38  ;;  %v13309_v8 = vpack.i.bf16 %v7563_v63, %v7562_v51  ;;  %v18693_v25 = vpop.permute.xlu1 %13070  ;;  %v20863_v63 = vld [vmem:[#allocation13_spill] sm:$0xff]  ;;  %v20864_v19 = vld [vmem:[#allocation266_spill] sm:$0xff]  ;;  %v20865_v38 = vld [vmem:[#allocation32_spill] sm:$0xff] }
 0x587   : > { %v18681_v20 = vsel %vm6090_vm13, %v18472_v34, %v12187_v41  ;;  %v18685_v21 = vsel %vm6090_vm13, %v18478_v60, %v12188_v37  ;;  %v12242_v24 = vunpack.i.l.bf16 %v20854_v27  ;;  %v12243_v48 = vunpack.i.h.bf16 %v20854_v27  ;;  %v20857_v34 = vld [vmem:[#allocation33_spill] sm:$0xff]  ;;  %v20859_v37 = vld [vmem:[#allocation15_spill] sm:$0xff] }
 0x588   : > { %13315 = vrot.lane.b32.xlu0 %v20853_v14, %s13442_s24  ;;  %v12228_v4 = vunpack.i.h.bf16 %v20855_v22  ;;  %v12227_v45 = vunpack.i.l.bf16 %v20855_v22  ;;  %v12252_v1 = vunpack.i.l.bf16 %v20856_v3  ;;  %13310 = vrot.lane.b32.xlu1 %v13309_v8, %s13444_s18  ;;  %v12253_v60 = vunpack.i.h.bf16 %v20856_v3  ;;  %v18699_v39 = vpop.permute.xlu0 %13055 }
 0x589   : > { %v12237_v61 = vunpack.i.l.bf16 %v20858_v11  ;;  %v6126_v10 = vsel %vm6123_vm14, %v18520_v17, %v12232_v15  ;;  %v6127_v23 = vsel %vm6123_vm14, %v18524_v56, %v12233_v31  ;;  %v12238_v36 = vunpack.i.h.bf16 %v20858_v11  ;;  %v20870_v11 = vld [vmem:[#allocation17_spill] sm:$0xff] }
 0x58a   : > { %v12262_v41 = vunpack.i.l.bf16 %v20859_v37  ;;  %v20862_v2 = vpack.i.bf16 %v20860_v47, %v20861_v0  ;;  %v18713_v30 = vsel %vm6123_vm14, %v18531_v58, %v12242_v24  ;;  %v12263_v51 = vunpack.i.h.bf16 %v20859_v37  ;;  %v18734_v8 = vpop.permute.xlu1 %13080  ;;  %v20873_v0 = vld [vmem:[#allocation126_spill] sm:$0xff] }
 0x58b   : > { %v12248_v17 = vunpack.i.h.bf16 %v20863_v63  ;;  %v12247_v9 = vunpack.i.l.bf16 %v20863_v63  ;;  %v18720_v56 = vsel %vm6123_vm14, %v18535_v44, %v12243_v48  ;;  %v6124_v31 = vsel %vm6123_vm14, %v18541_v18, %v12227_v45 }
 0x58c   : > { %13325 = vrot.lane.b32.xlu0 %v20862_v2, %s13443_s17  ;;  %v6125_v15 = vsel %vm6123_vm14, %v18545_v12, %v12228_v4  ;;  %v18728_v58 = vsel %vm6123_vm14, %v18549_v33, %v12252_v1  ;;  %v20866_v14 = vpack.i.bf16 %v20864_v19, %v20865_v38  ;;  %v18738_v44 = vsel %vm6123_vm14, %v18556_v26, %v12253_v60  ;;  %v20867_v12 = vld [vmem:[#allocation125_spill] sm:$0xff]  ;;  %v18746_v24 = vpop.permute.xlu0 %13065  ;;  %v20868_v26 = vld [vmem:[#allocation118_spill] sm:$0xff] }
 0x58d   : > { %v18742_v18 = vsel %vm6123_vm14, %v18560_v62, %v12237_v61  ;;  %v12313_v27 = vunpack.i.h.bf16 %v20867_v12  ;;  %v12312_v33 = vunpack.i.l.bf16 %v20867_v12  ;;  %v18750_v48 = vsel %vm6123_vm14, %v18564_v52, %v12238_v36  ;;  %v20869_v1 = vld [vmem:[#allocation18_spill] sm:$0xff]  ;;  %v20871_v36 = vld [vmem:[#allocation139_spill] sm:$0xff] }
 0x58e   : > { %13320 = vrot.lane.b32.xlu1 %v20866_v14, %s13442_s24  ;;  %v18754_v22 = vsel %vm6123_vm14, %v18568_v28, %v12262_v41  ;;  %v12308_v4 = vunpack.i.h.bf16 %v20868_v26  ;;  %v12307_v45 = vunpack.i.l.bf16 %v20868_v26  ;;  %v18760_v62 = vsel %vm6123_vm14, %v18576_v53, %v12263_v51  ;;  %v20872_v41 = vld [vmem:[#allocation63_spill] sm:$0xff]  ;;  %v20874_v14 = vld [vmem:[#allocation128_spill] sm:$0xff] }
 0x58f   : > { %v18764_v3 = vsel %vm6123_vm14, %v18580_v7, %v12247_v9  ;;  %v18768_v52 = vsel %vm6123_vm14, %v18594_v46, %v12248_v17  ;;  %v12388_v37 = vunpack.i.h.bf16 %v20871_v36  ;;  %v12387_v53 = vunpack.i.l.bf16 %v20871_v36  ;;  %v13091_v7 = vpop.permute.xlu1 %13090  ;;  %v3622_v61 = vld [vmem:[#allocation3 + $0x1a1] sm:$0xff] }
 0x590   : > { %v18778_v47 = vsel %vm6156_vm15, %v6126_v10, %v12312_v33  ;;  %v18781_v46 = vsel %vm6156_vm15, %v6127_v23, %v12313_v27  ;;  %v18785_v63 = vpop.permute.xlu0 %13075  ;;  %v6157_v17 = vsel %vm6156_vm15, %v6124_v31, %v12307_v45  ;;  %v6158_v9 = vsel %vm6156_vm15, %v6125_v15, %v12308_v4  ;;  %v20875_v23 = vld [vmem:[#allocation22_spill] sm:$0xff]  ;;  %v20877_v45 = vld [vmem:[#allocation153_spill] sm:$0xff] }
 0x591   : > { %v13048_v19 = vunpack.i.h.bf16 %v18667_v35  ;;  %v13047_v38 = vunpack.i.l.bf16 %v18667_v35  ;;  %v6190_v26 = vsel %vm6189_vm1, %v6157_v17, %v12387_v53  ;;  %v6191_v36 = vsel %vm6189_vm1, %v6158_v9, %v12388_v37 }
 0x592   : > { %13330 = vrot.lane.b32.xlu1 %v20872_v41, %s13443_s17  ;;  %v20876_v41 = vld [vmem:[#allocation251_spill] sm:$0xff]  ;;  %v13063_v42 = vunpack.i.h.bf16 %v18655_v5  ;;  %v13062_v49 = vunpack.i.l.bf16 %v18655_v5  ;;  %v13073_v17 = vunpack.i.h.bf16 %v18693_v25  ;;  %v13072_v9 = vunpack.i.l.bf16 %v18693_v25  ;;  %s10058_s17 = sshll.u32 %s21004_s27, 3 }
 0x593   : > { %v12468_v31 = vunpack.i.h.bf16 %v20876_v41  ;;  %v12467_v15 = vunpack.i.l.bf16 %v20876_v41  ;;  %v13101_v4 = vpop.permute.xlu1 %13100  ;;  %v7341_v53 = vsel %vm20096_vm2, %v3622_v61, %v13048_v19  ;;  %v7340_v37 = vsel %vm20096_vm2, %v3621_v50, %v13047_v38  ;;  %v20878_v41 = vld [vmem:[#allocation211_spill] sm:$0xff] }
 0x594   : > { %v18803_v60 = vpop.permute.xlu0 %13085  ;;  %v13058_v2 = vunpack.i.h.bf16 %v18699_v39  ;;  %v13083_v51 = vunpack.i.h.bf16 %v18734_v8  ;;  %v13082_v5 = vunpack.i.l.bf16 %v18734_v8  ;;  %v13093_v61 = vunpack.i.h.bf16 %v13091_v7 }
 0x595   : > { %v18814_v13 = vsel %vm6222_vm3, %v6190_v26, %v12467_v15  ;;  %v18817_v35 = vsel %vm6222_vm3, %v6191_v36, %v12468_v31  ;;  %v13092_v50 = vunpack.i.l.bf16 %v13091_v7  ;;  %v7372_v38 = vsel %vm20095_vm4, %v7340_v37, %v13062_v49  ;;  %v13415_v15 = vld [vmem:[#allocation3 + $0x1b9] sm:$0xff] }
 0x596   : > { %v7373_v25 = vsel %vm20095_vm4, %v7341_v53, %v13063_v42  ;;  %v13103_v28 = vunpack.i.h.bf16 %v13101_v4  ;;  %v13102_v27 = vunpack.i.l.bf16 %v13101_v4  ;;  %v7404_v10 = vsel %vm2403_vm5, %v7372_v38, %v13072_v9 }
 0x597   : > { %v13111_v19 = vpop.permute.xlu1 %13110  ;;  %v7405_v8 = vsel %vm2403_vm5, %v7373_v25, %v13073_v17  ;;  %v7343_v36 = vsel %vm20096_vm2, %v13415_v15, %v13058_v2  ;;  %v13057_v31 = vunpack.i.l.bf16 %v18699_v39  ;;  %v7436_v7 = vsel %vm2436_vm6, %v7404_v10, %v13082_v5 }
 0x598   : > { %v13096_v33 = vpop.permute.xlu0 %13095  ;;  %v13113_v12 = vunpack.i.h.bf16 %v13111_v19  ;;  %v13112_v26 = vunpack.i.l.bf16 %v13111_v19  ;;  %v7437_v49 = vsel %vm2436_vm6, %v7405_v8, %v13083_v51  ;;  %vm6255_vm11 = vcmask 490496  }
 0x599   : > { %v13068_v42 = vunpack.i.h.bf16 %v18746_v24  ;;  %v13067_v4 = vunpack.i.l.bf16 %v18746_v24  ;;  %v7468_v53 = vsel %vm2469_vm7, %v7436_v7, %v13092_v50  ;;  %v7469_v37 = vsel %vm2469_vm7, %v7437_v49, %v13093_v61 }
 0x59a   : > { %v7500_v9 = vsel %vm2502_vm8, %v7468_v53, %v13102_v27  ;;  %v7501_v2 = vsel %vm2502_vm8, %v7469_v37, %v13103_v28  ;;  %v13078_v10 = vunpack.i.h.bf16 %v18785_v63  ;;  %v13077_v51 = vunpack.i.l.bf16 %v18785_v63  ;;  %v13416_v28 = vld [vmem:[#allocation3 + $0x1b1] sm:$0xff] }
 0x59b   : > { %v13121_v17 = vpop.permute.xlu1 %13120  ;;  %v7532_v5 = vsel %vm2535_vm9, %v7500_v9, %v13112_v26  ;;  %v7533_v24 = vsel %vm2535_vm9, %v7501_v2, %v13113_v12  ;;  %v13088_v50 = vunpack.i.h.bf16 %v18803_v60  ;;  %v13087_v61 = vunpack.i.l.bf16 %v18803_v60 }
 0x59c   : > { %v13123_v19 = vunpack.i.h.bf16 %v13121_v17  ;;  %v13122_v39 = vunpack.i.l.bf16 %v13121_v17  ;;  %v13106_v38 = vpop.permute.xlu0 %13105  ;;  %v7342_v8 = vsel %vm20096_vm2, %v13416_v28, %v13057_v31  ;;  %v13098_v15 = vunpack.i.h.bf16 %v13096_v33 }
 0x59d   : > { %v13097_v7 = vunpack.i.l.bf16 %v13096_v33  ;;  %v7374_v63 = vsel %vm20095_vm4, %v7342_v8, %v13067_v4  ;;  %v7375_v26 = vsel %vm20095_vm4, %v7343_v36, %v13068_v42  ;;  %v13108_v12 = vunpack.i.h.bf16 %v13106_v38 }
 0x59e   : > { %v7564_v25 = vsel %vm2568_vm10, %v7532_v5, %v13122_v39  ;;  %v7565_v27 = vsel %vm2568_vm10, %v7533_v24, %v13123_v19  ;;  %v13107_v37 = vunpack.i.l.bf16 %v13106_v38  ;;  %v7406_v60 = vsel %vm2403_vm5, %v7374_v63, %v13077_v51 }
 0x59f   : > { %v13334_v49 = vpack.i.bf16 %v7565_v27, %v7564_v25  ;;  %v13131_v53 = vpop.permute.xlu1 %13130  ;;  %v7407_v9 = vsel %vm2403_vm5, %v7375_v26, %v13078_v10  ;;  %v7438_v31 = vsel %vm2436_vm6, %v7406_v60, %v13087_v61  ;;  %vm7696_vm4 = vcmask 523264  }
 0x5a0   : > { %v13116_v17 = vpop.permute.xlu0 %13115  ;;  %v13133_v2 = vunpack.i.h.bf16 %v13131_v53  ;;  %v13132_v19 = vunpack.i.l.bf16 %v13131_v53  ;;  %v7439_v33 = vsel %vm2436_vm6, %v7407_v9, %v13088_v50  ;;  %v7470_v4 = vsel %vm2469_vm7, %v7438_v31, %v13097_v7 }
 0x5a1   : > { %13335 = vrot.lane.b32.xlu0 %v13334_v49, %s13444_s18  ;;  %v13118_v39 = vunpack.i.h.bf16 %v13116_v17  ;;  %v13117_v5 = vunpack.i.l.bf16 %v13116_v17  ;;  %v7471_v36 = vsel %vm2469_vm7, %v7439_v33, %v13098_v15  ;;  %vm7804_vm2 = vcmask 818176   ;;  %v20880_v17 = vld [vmem:[#allocation261_spill] sm:$0xff] }
 0x5a2   : > { %v7502_v38 = vsel %vm2502_vm8, %v7470_v4, %v13107_v37  ;;  %v7503_v10 = vsel %vm2502_vm8, %v7471_v36, %v13108_v12  ;;  %v6256_v61 = vsel %vm6255_vm11, %v18814_v13, %v13132_v19  ;;  %v6257_v50 = vsel %vm6255_vm11, %v18817_v35, %v13133_v2  ;;  %v20879_v37 = vld [vmem:[#allocation110_spill] sm:$0xff] }
 0x5a3   : > { %v13141_v42 = vpop.permute.xlu1 %13140  ;;  %v7534_v8 = vsel %vm2535_vm9, %v7502_v38, %v13117_v5  ;;  %v7535_v15 = vsel %vm2535_vm9, %v7503_v10, %v13118_v39  ;;  %v12472_v53 = vunpack.i.l.bf16 %v20878_v41  ;;  %v12332_v35 = vunpack.i.l.bf16 %v20879_v37 }
 0x5a4   : > { %v13143_v51 = vunpack.i.h.bf16 %v13141_v42  ;;  %v13142_v24 = vunpack.i.l.bf16 %v13141_v42  ;;  %v13126_v25 = vpop.permute.xlu0 %13125  ;;  %v12478_v60 = vunpack.i.h.bf16 %v20880_v17  ;;  %v12477_v9 = vunpack.i.l.bf16 %v20880_v17 }
 0x5a5   : > { %v13128_v27 = vunpack.i.h.bf16 %v13126_v25  ;;  %v13127_v28 = vunpack.i.l.bf16 %v13126_v25  ;;  %v20881_v31 = vunpack.i.l.bf16 %v20874_v14  ;;  %v20882_v39 = vunpack.i.h.bf16 %v20874_v14 }
 0x5a6   : > { %v7697_v7 = vsel %vm7696_vm4, %v6256_v61, %v13142_v24  ;;  %v7698_v49 = vsel %vm7696_vm4, %v6257_v50, %v13143_v51  ;;  %v20883_v42 = vunpack.i.l.bf16 %v20875_v23  ;;  %v20884_v10 = vunpack.i.h.bf16 %v20875_v23 }
 0x5a7   : > { %v7729_v63 = vpack.c.bf16 %v7698_v49, %v7697_v7  ;;  %v7566_v26 = vsel %vm2568_vm10, %v7534_v8, %v13127_v28  ;;  %v7567_v13 = vsel %vm2568_vm10, %v7535_v15, %v13128_v27  ;;  %v13151_v12 = vpop.permute.xlu1 %13150  ;;  %v6161_v33 = vsel %vm6156_vm15, %v18742_v18, %v20881_v31  ;;  %v20888_v31 = vld [vmem:[#allocation142_spill] sm:$0xff] }
 0x5a8   : > { %v13339_v2 = vpack.i.bf16 %v7567_v13, %v7566_v26  ;;  %v13136_v19 = vpop.permute.xlu0 %13135  ;;  %v6162_v5 = vsel %vm6156_vm15, %v18750_v48, %v20882_v39  ;;  %v13153_v4 = vunpack.i.h.bf16 %v13151_v12  ;;  %v13152_v36 = vunpack.i.l.bf16 %v13151_v12 }
 0x5a9   : > { %10450 = vmatprep.mubr.msk.bf16.mxu1 %vm7804_vm2, %v7729_v63  ;;  %v6192_v38 = vsel %vm6189_vm1, %v18778_v47, %v20883_v42  ;;  %v6193_v51 = vsel %vm6189_vm1, %v18781_v46, %v20884_v10  ;;  %v13138_v18 = vunpack.i.h.bf16 %v13136_v19  ;;  %v13137_v24 = vunpack.i.l.bf16 %v13136_v19  ;;  %v20890_v10 = vld [vmem:[#allocation247_spill] sm:$0xff] }
 0x5aa   : > { %13340 = vrot.lane.b32.xlu1 %v13339_v2, %s13444_s18  ;;  %v20885_v48 = vunpack.i.l.bf16 %v20877_v45  ;;  %v20886_v25 = vunpack.i.h.bf16 %v20877_v45  ;;  %v6225_v50 = vsel %vm6222_vm3, %v6192_v38, %v12472_v53  ;;  %v20887_v47 = vunpack.i.h.bf16 %v20878_v41  ;;  %s19687_s18 = scalar_lea.vmem %s19769_s13, %s10058_s17 }
 0x5ab   : > { %v13161_v27 = vpop.permute.xlu1 %13160  ;;  %v6258_v41 = vsel %vm6255_vm11, %v6225_v50, %v13137_v24  ;;  %v12333_v17 = vunpack.i.h.bf16 %v20879_v37  ;;  %v12402_v39 = vunpack.i.l.bf16 %v20888_v31  ;;  %v12257_v42 = vunpack.i.l.bf16 %v20870_v11 }
 0x5ac   : > { %v6194_v14 = vsel %vm6189_vm1, %v6161_v33, %v20885_v48  ;;  %v6195_v61 = vsel %vm6189_vm1, %v6162_v5, %v20886_v25  ;;  %v6226_v23 = vsel %vm6222_vm3, %v6193_v51, %v20887_v47  ;;  %v13163_v8 = vunpack.i.h.bf16 %v13161_v27  ;;  %v13146_v7 = vpop.permute.xlu0 %13145 }
 0x5ad   : > { %v6227_v46 = vsel %vm6222_vm3, %v6194_v14, %v12477_v9  ;;  %v6228_v28 = vsel %vm6222_vm3, %v6195_v61, %v12478_v60  ;;  %v13162_v15 = vunpack.i.l.bf16 %v13161_v27  ;;  %v13148_v63 = vunpack.i.h.bf16 %v13146_v7 }
 0x5ae   : > { %v6260_v49 = vsel %vm6255_vm11, %v6227_v46, %v13152_v36  ;;  %v6261_v45 = vsel %vm6255_vm11, %v6228_v28, %v13153_v4  ;;  %v13147_v26 = vunpack.i.l.bf16 %v13146_v7  ;;  %v6259_v53 = vsel %vm6255_vm11, %v6226_v23, %v13138_v18  ;;  %v20893_v23 = vld [vmem:[#allocation143_spill] sm:$0xff]  ;;  %v20894_v46 = vld [vmem:[#allocation144_spill] sm:$0xff] }
 0x5af   : > { %v7701_v13 = vsel %vm7696_vm4, %v6260_v49, %v13162_v15  ;;  %v7702_v12 = vsel %vm7696_vm4, %v6261_v45, %v13163_v8  ;;  %v7700_v9 = vsel %vm7696_vm4, %v6259_v53, %v13148_v63  ;;  %v18906_v19 = vpop.permute.xlu1 %13170  ;;  %v12403_v33 = vunpack.i.h.bf16 %v20888_v31  ;;  %v20895_v63 = vld [vmem:[#allocation20_spill] sm:$0xff] }
 0x5b0   : > { %v7731_v60 = vpack.c.bf16 %v7702_v12, %v7701_v13  ;;  %v7699_v2 = vsel %vm7696_vm4, %v6258_v41, %v13147_v26  ;;  %v13156_v4 = vpop.permute.xlu0 %13155  ;;  %v8786_v36 = vsel %vm612_vm0, %v18501_v55, 0  ;;  %v20889_v37 = vunpack.i.l.bf16 %v20873_v0  ;;  %v20896_v12 = vld [vmem:[#allocation35_spill] sm:$0xff] }
 0x5b1   : > { %v7730_v5 = vpack.c.bf16 %v7700_v9, %v7699_v2  ;;  %v12483_v51 = vunpack.i.h.bf16 %v20890_v10  ;;  %v12482_v18 = vunpack.i.l.bf16 %v20890_v10  ;;  %v20891_v24 = vunpack.i.h.bf16 %v20873_v0 }
 0x5b2   : > { %v6163_v38 = vsel %vm6156_vm15, %v18713_v30, %v20889_v37  ;;  %v6167_v14 = vsel %vm6156_vm15, %v18728_v58, %v12332_v35  ;;  %v13158_v55 = vunpack.i.h.bf16 %v13156_v4  ;;  %v13157_v25 = vunpack.i.l.bf16 %v13156_v4  ;;  %v20892_v30 = vld [vmem:[#allocation136_spill] sm:$0xff] }
 0x5b3   : > { %v6164_v48 = vsel %vm6156_vm15, %v18720_v56, %v20891_v24  ;;  %10451 = vmatmul.mubr.msk.bf16.vlgmr.msra.gmra.mrb[64].mxu1 %vm7804_vm2, %v7730_v5  ;;  %v6168_v61 = vsel %vm6156_vm15, %v18738_v44, %v12333_v17  ;;  %v12343_v50 = vunpack.i.h.bf16 %v20892_v30  ;;  %v12342_v47 = vunpack.i.l.bf16 %v20892_v30  ;;  %v13181_v0 = vpop.permute.xlu1 %13180 }
 0x5b4   : > { %v12328_v27 = vunpack.i.h.bf16 %v20893_v23  ;;  %10454 = vmatprep.mubr.msk.bf16.mxu1 %vm7804_vm2, %v7731_v60  ;;  %10483 = vmatpush3.bf16.msra.mxu1 %v8786_v36  ;;  %v12327_v56 = vunpack.i.l.bf16 %v20893_v23  ;;  %v6196_v58 = vsel %vm6189_vm1, %v6163_v38, %v12402_v39  ;;  %v6197_v35 = vsel %vm6189_vm1, %v6164_v48, %v12403_v33  ;;  %v13166_v8 = vpop.permute.xlu0 %13165 }
 0x5b5   : > { %v12413_v28 = vunpack.i.h.bf16 %v20894_v46  ;;  %v6229_v44 = vsel %vm6222_vm3, %v6196_v58, %v12482_v18  ;;  %v6230_v15 = vsel %vm6222_vm3, %v6197_v35, %v12483_v51  ;;  %v13168_v7 = vunpack.i.h.bf16 %v13166_v8 }
 0x5b6   : > { %v13167_v49 = vunpack.i.l.bf16 %v13166_v8  ;;  %v12412_v45 = vunpack.i.l.bf16 %v20894_v46  ;;  %v12408_v26 = vunpack.i.h.bf16 %v20895_v63  ;;  %v6263_v53 = vsel %vm6255_vm11, %v6230_v15, %v13158_v55 }
 0x5b7   : > { %v6262_v41 = vsel %vm6255_vm11, %v6229_v44, %v13157_v25  ;;  %v12407_v13 = vunpack.i.l.bf16 %v20895_v63  ;;  %v12488_v17 = vunpack.i.h.bf16 %v20896_v12  ;;  %v7704_v9 = vsel %vm7696_vm4, %v6263_v53, %v13168_v7  ;;  %v13191_v2 = vpop.permute.xlu1 %13190 }
 0x5b8   : > { %v7703_v60 = vsel %vm7696_vm4, %v6262_v41, %v13167_v49  ;;  %v12487_v31 = vunpack.i.l.bf16 %v20896_v12  ;;  %v13173_v33 = vunpack.i.h.bf16 %v18906_v19  ;;  %v13172_v39 = vunpack.i.l.bf16 %v18906_v19  ;;  %v13176_v4 = vpop.permute.xlu0 %13175 }
 0x5b9   : > { %v7732_v5 = vpack.c.bf16 %v7704_v9, %v7703_v60  ;;  %v6165_v36 = vsel %vm6156_vm15, %v18764_v3, %v12327_v56  ;;  %v6166_v37 = vsel %vm6156_vm15, %v18768_v52, %v12328_v27  ;;  %v13183_v38 = vunpack.i.h.bf16 %v13181_v0 }
 0x5ba   : > { %v13182_v10 = vunpack.i.l.bf16 %v13181_v0  ;;  %v13193_v51 = vunpack.i.h.bf16 %v13191_v2  ;;  %v13192_v18 = vunpack.i.l.bf16 %v13191_v2  ;;  %v13178_v24 = vunpack.i.h.bf16 %v13176_v4  ;;  %v20901_v2 = vld [vmem:[#allocation19_spill] sm:$0xff] }
 0x5bb   : > { %v13177_v48 = vunpack.i.l.bf16 %v13176_v4  ;;  %10455 = vmatmul.mubr.msk.bf16.gmra.mrb[68].mxu1 %vm7804_vm2, %v7732_v5  ;;  %v6200_v55 = vsel %vm6189_vm1, %v6167_v14, %v12412_v45  ;;  %v6201_v19 = vsel %vm6189_vm1, %v6168_v61, %v12413_v28  ;;  %v6198_v25 = vsel %vm6189_vm1, %v6165_v36, %v12407_v13  ;;  %v13201_v3 = vpop.permute.xlu1 %13200  ;;  %v20903_v4 = vld [vmem:[#allocation12_spill] sm:$0xff] }
 0x5bc   : > { %v6199_v23 = vsel %vm6189_vm1, %v6166_v37, %v12408_v26  ;;  %v6231_v56 = vsel %vm6222_vm3, %v6198_v25, %v12487_v31  ;;  %v6234_v27 = vsel %vm6222_vm3, %v6201_v19, %v13173_v33  ;;  %v6233_v0 = vsel %vm6222_vm3, %v6200_v55, %v13172_v39  ;;  %v13186_v58 = vpop.permute.xlu0 %13185 }
 0x5bd   : > { %v6232_v52 = vsel %vm6222_vm3, %v6199_v23, %v12488_v17  ;;  %v6266_v35 = vsel %vm6255_vm11, %v6233_v0, %v13182_v10  ;;  %v6267_v14 = vsel %vm6255_vm11, %v6234_v27, %v13183_v38  ;;  %v13188_v46 = vunpack.i.h.bf16 %v13186_v58 }
 0x5be   : > { %v13187_v61 = vunpack.i.l.bf16 %v13186_v58  ;;  %v7707_v28 = vsel %vm7696_vm4, %v6266_v35, %v13192_v18  ;;  %v7708_v8 = vsel %vm7696_vm4, %v6267_v14, %v13193_v51  ;;  %v6264_v44 = vsel %vm6255_vm11, %v6231_v56, %v13177_v48 }
 0x5bf   : > { %v6265_v15 = vsel %vm6255_vm11, %v6232_v52, %v13178_v24  ;;  %v20897_v7 = vunpack.i.l.bf16 %v20869_v1  ;;  %v20898_v45 = vunpack.i.h.bf16 %v20869_v1  ;;  %v13211_v41 = vpop.permute.xlu1 %13210  ;;  %v6136_v13 = vsel %vm6123_vm14, %v18659_v32, %v12257_v42  ;;  %v20900_v1 = vld [vmem:[#allocation108_spill] sm:$0xff] }
 0x5c0   : > { %v7705_v26 = vsel %vm7696_vm4, %v6264_v44, %v13187_v61  ;;  %v7706_v53 = vsel %vm7696_vm4, %v6265_v15, %v13188_v46  ;;  %v20899_v12 = vunpack.i.h.bf16 %v20870_v11  ;;  %v12268_v17 = vunpack.i.h.bf16 %v20900_v1  ;;  %v20902_v11 = vld [vmem:[#allocation21_spill] sm:$0xff] }
 0x5c1   : > { %v18972_v49 = vsel %vm6123_vm14, %v18645_v40, %v20897_v7  ;;  %v18978_v63 = vsel %vm6123_vm14, %v18651_v43, %v20898_v45  ;;  %v7733_v60 = vpack.c.bf16 %v7706_v53, %v7705_v26  ;;  %v13196_v43 = vpop.permute.xlu0 %13195  ;;  %v12267_v9 = vunpack.i.l.bf16 %v20900_v1 }
 0x5c2   : > { %v6137_v40 = vsel %vm6123_vm14, %v18665_v6, %v20899_v12  ;;  %v12423_v31 = vunpack.i.h.bf16 %v20901_v2  ;;  %v12422_v33 = vunpack.i.l.bf16 %v20901_v2  ;;  %v7734_v39 = vpack.c.bf16 %v7708_v8, %v7707_v28  ;;  %v20905_v12 = vld [vmem:[#allocation107_spill] sm:$0xff] }
 0x5c3   : > { %v6171_v32 = vsel %vm6156_vm15, %v18754_v22, %v12342_v47  ;;  %v6172_v6 = vsel %vm6156_vm15, %v18760_v62, %v12343_v50  ;;  %v12353_v42 = vunpack.i.h.bf16 %v20902_v11  ;;  %v12352_v5 = vunpack.i.l.bf16 %v20902_v11  ;;  %10458 = vmatprep.mubr.msk.bf16.mxu1 %vm7804_vm2, %v7733_v60  ;;  %v13221_v22 = vpop.permute.xlu1 %13220  ;;  %v20904_v47 = vld [vmem:[#allocation155_spill] sm:$0xff] }
 0x5c4   : > { %v12338_v36 = vunpack.i.h.bf16 %v20903_v4  ;;  %v12337_v37 = vunpack.i.l.bf16 %v20903_v4  ;;  %v13203_v38 = vunpack.i.h.bf16 %v13201_v3  ;;  %v13202_v10 = vunpack.i.l.bf16 %v13201_v3  ;;  %10459 = vmatmul.mubr.msk.bf16.gmra.mrb[72].mxu1 %vm7804_vm2, %v7734_v39  ;;  %v20906_v39 = vld [vmem:[#allocation122_spill] sm:$0xff] }
 0x5c5   : > { %v12418_v30 = vunpack.i.h.bf16 %v20904_v47  ;;  %v12417_v51 = vunpack.i.l.bf16 %v20904_v47  ;;  %v13213_v62 = vunpack.i.h.bf16 %v13211_v41  ;;  %v13212_v50 = vunpack.i.l.bf16 %v13211_v41  ;;  %v13206_v18 = vpop.permute.xlu0 %13205 }
 0x5c6   : > { %v6204_v24 = vsel %vm6189_vm1, %v6171_v32, %v12422_v33  ;;  %v6205_v48 = vsel %vm6189_vm1, %v6172_v6, %v12423_v31  ;;  %v13198_v55 = vunpack.i.h.bf16 %v13196_v43  ;;  %v13197_v19 = vunpack.i.l.bf16 %v13196_v43 }
 0x5c7   : > { %v13223_v25 = vunpack.i.h.bf16 %v13221_v22  ;;  %v13222_v23 = vunpack.i.l.bf16 %v13221_v22  ;;  %v13208_v56 = vunpack.i.h.bf16 %v13206_v18  ;;  %v13207_v3 = vunpack.i.l.bf16 %v13206_v18  ;;  %v13231_v35 = vpop.permute.xlu1 %13230 }
 0x5c8   : > { %v6169_v52 = vsel %vm6156_vm15, %v6136_v13, %v12337_v37  ;;  %v6170_v27 = vsel %vm6156_vm15, %v6137_v40, %v12338_v36  ;;  %v6238_v0 = vsel %vm6222_vm3, %v6205_v48, %v13203_v38  ;;  %v6237_v58 = vsel %vm6222_vm3, %v6204_v24, %v13202_v10  ;;  %v20907_v36 = vld [vmem:[#allocation25_spill] sm:$0xff]  ;;  %v20910_v24 = vld [vmem:[#allocation170_spill] sm:$0xff] }
 0x5c9   : > { %v6202_v14 = vsel %vm6189_vm1, %v6169_v52, %v12417_v51  ;;  %v6203_v46 = vsel %vm6189_vm1, %v6170_v27, %v12418_v30  ;;  %v6270_v61 = vsel %vm6255_vm11, %v6237_v58, %v13212_v50  ;;  %v6271_v28 = vsel %vm6255_vm11, %v6238_v0, %v13213_v62  ;;  %v13216_v8 = vpop.permute.xlu0 %13215 }
 0x5ca   : > { %v6235_v44 = vsel %vm6222_vm3, %v6202_v14, %v13197_v19  ;;  %v6236_v15 = vsel %vm6222_vm3, %v6203_v46, %v13198_v55  ;;  %v13218_v7 = vunpack.i.h.bf16 %v13216_v8  ;;  %v13217_v45 = vunpack.i.l.bf16 %v13216_v8 }
 0x5cb   : > { %v7711_v26 = vsel %vm7696_vm4, %v6270_v61, %v13222_v23  ;;  %v7712_v53 = vsel %vm7696_vm4, %v6271_v28, %v13223_v25  ;;  %v6268_v41 = vsel %vm6255_vm11, %v6235_v44, %v13207_v3  ;;  %v6269_v13 = vsel %vm6255_vm11, %v6236_v15, %v13208_v56 }
 0x5cc   : > { %v12283_v40 = vunpack.i.h.bf16 %v20905_v12  ;;  %v12282_v1 = vunpack.i.l.bf16 %v20905_v12  ;;  %v7709_v60 = vsel %vm7696_vm4, %v6268_v41, %v13217_v45  ;;  %v7710_v43 = vsel %vm7696_vm4, %v6269_v13, %v13218_v7  ;;  %v13241_v2 = vpop.permute.xlu1 %13240  ;;  %v20916_v12 = vld [vmem:[#allocation152_spill] sm:$0xff] }
 0x5cd   : > { %v6140_v31 = vsel %vm6123_vm14, %v18681_v20, %v12267_v9  ;;  %v6141_v33 = vsel %vm6123_vm14, %v18685_v21, %v12268_v17  ;;  %v12278_v32 = vunpack.i.h.bf16 %v20906_v39  ;;  %v7735_v6 = vpack.c.bf16 %v7710_v43, %v7709_v60  ;;  %v13226_v11 = vpop.permute.xlu0 %13225  ;;  %v20908_v9 = vld [vmem:[#allocation146_spill] sm:$0xff]  ;;  %v20909_v17 = vld [vmem:[#allocation124_spill] sm:$0xff] }
 0x5ce   : > { %v12277_v4 = vunpack.i.l.bf16 %v20906_v39  ;;  %v12433_v37 = vunpack.i.h.bf16 %v20907_v36  ;;  %v12432_v38 = vunpack.i.l.bf16 %v20907_v36  ;;  %v7736_v10 = vpack.c.bf16 %v7712_v53, %v7711_v26 }
 0x5cf   : > { %v6175_v22 = vsel %vm6156_vm15, %v18972_v49, %v12352_v5  ;;  %v6176_v20 = vsel %vm6156_vm15, %v18978_v63, %v12353_v42  ;;  %v12363_v47 = vunpack.i.h.bf16 %v20908_v9  ;;  %v12362_v21 = vunpack.i.l.bf16 %v20908_v9  ;;  %10462 = vmatprep.mubr.msk.bf16.mxu1 %vm7804_vm2, %v7735_v6 }
 0x5d0   : > { %v12348_v30 = vunpack.i.h.bf16 %v20909_v17  ;;  %v12347_v51 = vunpack.i.l.bf16 %v20909_v17  ;;  %v13233_v62 = vunpack.i.h.bf16 %v13231_v35  ;;  %v13232_v50 = vunpack.i.l.bf16 %v13231_v35  ;;  %10463 = vmatmul.mubr.msk.bf16.gmra.mrb[76].mxu1 %vm7804_vm2, %v7736_v10  ;;  %v13251_v18 = vpop.permute.xlu1 %13250  ;;  %v20915_v17 = vld [vmem:[#allocation169_spill] sm:$0xff] }
 0x5d1   : > { %v12428_v49 = vunpack.i.h.bf16 %v20910_v24  ;;  %v12427_v5 = vunpack.i.l.bf16 %v20910_v24  ;;  %v13243_v63 = vunpack.i.h.bf16 %v13241_v2  ;;  %v13242_v42 = vunpack.i.l.bf16 %v13241_v2  ;;  %v13236_v48 = vpop.permute.xlu0 %13235 }
 0x5d2   : > { %v6208_v55 = vsel %vm6189_vm1, %v6175_v22, %v12432_v38  ;;  %v6209_v19 = vsel %vm6189_vm1, %v6176_v20, %v12433_v37  ;;  %v13228_v25 = vunpack.i.h.bf16 %v13226_v11  ;;  %v13227_v23 = vunpack.i.l.bf16 %v13226_v11 }
 0x5d3   : > { %v13253_v56 = vunpack.i.h.bf16 %v13251_v18  ;;  %v13252_v3 = vunpack.i.l.bf16 %v13251_v18  ;;  %v13238_v52 = vunpack.i.h.bf16 %v13236_v48  ;;  %v13237_v27 = vunpack.i.l.bf16 %v13236_v48 }
 0x5d4   : > { %v6173_v0 = vsel %vm6156_vm15, %v6140_v31, %v12347_v51  ;;  %v6174_v58 = vsel %vm6156_vm15, %v6141_v33, %v12348_v30  ;;  %v6242_v35 = vsel %vm6222_vm3, %v6209_v19, %v13233_v62  ;;  %v6241_v14 = vsel %vm6222_vm3, %v6208_v55, %v13232_v50 }
 0x5d5   : > { %v13261_v46 = vpop.permute.xlu1 %13260  ;;  %v6206_v61 = vsel %vm6189_vm1, %v6173_v0, %v12427_v5  ;;  %v6207_v28 = vsel %vm6189_vm1, %v6174_v58, %v12428_v49  ;;  %v6274_v8 = vsel %vm6255_vm11, %v6241_v14, %v13242_v42  ;;  %v6275_v44 = vsel %vm6255_vm11, %v6242_v35, %v13243_v63  ;;  %v13246_v15 = vpop.permute.xlu0 %13245 }
 0x5d6   : > { %v6239_v7 = vsel %vm6222_vm3, %v6206_v61, %v13227_v23  ;;  %v6240_v45 = vsel %vm6222_vm3, %v6207_v28, %v13228_v25  ;;  %v13248_v26 = vunpack.i.h.bf16 %v13246_v15  ;;  %v13247_v53 = vunpack.i.l.bf16 %v13246_v15 }
 0x5d7   : > { %v7715_v41 = vsel %vm7696_vm4, %v6274_v8, %v13252_v3  ;;  %v7716_v13 = vsel %vm7696_vm4, %v6275_v44, %v13253_v56  ;;  %v6272_v60 = vsel %vm6255_vm11, %v6239_v7, %v13237_v27  ;;  %v6273_v43 = vsel %vm6255_vm11, %v6240_v45, %v13238_v52 }
 0x5d8   : > { %v20911_v2 = vunpack.i.l.bf16 %v20849_v59  ;;  %v20912_v33 = vunpack.i.h.bf16 %v20849_v59  ;;  %v7713_v11 = vsel %vm7696_vm4, %v6272_v60, %v13247_v53  ;;  %v7714_v36 = vsel %vm7696_vm4, %v6273_v43, %v13248_v26 }
 0x5d9   : > { %v13271_v37 = vpop.permute.xlu1 %13270  ;;  %v20913_v38 = vunpack.i.l.bf16 %v20857_v34  ;;  %v20914_v22 = vunpack.i.h.bf16 %v20857_v34  ;;  %v12443_v30 = vunpack.i.h.bf16 %v20915_v17  ;;  %v12442_v51 = vunpack.i.l.bf16 %v20915_v17 }
 0x5da   : > { %v6113_v31 = vsel %vm6090_vm13, %v18459_v57, %v20911_v2  ;;  %v6114_v6 = vsel %vm6090_vm13, %v18465_v16, %v20912_v33  ;;  %v7737_v16 = vpack.c.bf16 %v7714_v36, %v7713_v11  ;;  %v13256_v20 = vpop.permute.xlu0 %13255  ;;  %v12358_v50 = vunpack.i.h.bf16 %v20916_v12  ;;  %v8200_v33 = vld [vmem:[#allocation4 + $0x1] sm:$0xff]  ;;  %v8201_v11 = vld [vmem:[#allocation4 + $0x9] sm:$0xff] }
 0x5db   : > { %v6111_v10 = vsel %vm6090_vm13, %v18488_v29, %v20913_v38  ;;  %v6112_v57 = vsel %vm6090_vm13, %v18492_v54, %v20914_v22  ;;  %v6146_v59 = vsel %vm6123_vm14, %v6113_v31, %v12282_v1  ;;  %v6147_v9 = vsel %vm6123_vm14, %v6114_v6, %v12283_v40  ;;  %v8168_v31 = vld [vmem:[#allocation4] sm:$0xff]  ;;  %v8169_v6 = vld [vmem:[#allocation4 + $0x8] sm:$0xff] }
 0x5dc   : > { %v7738_v29 = vpack.c.bf16 %v7716_v13, %v7715_v41  ;;  %v6144_v34 = vsel %vm6123_vm14, %v6111_v10, %v12277_v4  ;;  %v6145_v54 = vsel %vm6123_vm14, %v6112_v57, %v12278_v32  ;;  %v6179_v62 = vsel %vm6156_vm15, %v6146_v59, %v12362_v21  ;;  %10466 = vmatprep.mubr.msk.bf16.mxu1 %vm7804_vm2, %v7737_v16  ;;  %v20917_v4 = vld [vmem:[#allocation184_spill] sm:$0xff] }
 0x5dd   : > { %v6180_v1 = vsel %vm6156_vm15, %v6147_v9, %v12363_v47  ;;  %v12357_v40 = vunpack.i.l.bf16 %v20916_v12  ;;  %v13263_v18 = vunpack.i.h.bf16 %v13261_v46  ;;  %v13262_v24 = vunpack.i.l.bf16 %v13261_v46  ;;  %v13281_v49 = vpop.permute.xlu1 %13280  ;;  %v8264_v10 = vld [vmem:[#allocation4 + $0x2] sm:$0xff]  ;;  %v8265_v16 = vld [vmem:[#allocation4 + $0xa] sm:$0xff]  ;;  %v8392_v9 = vld [vmem:[#allocation4 + $0x19] sm:$0xff] }
 0x5de   : > { %10467 = vmatmul.mubr.msk.bf16.gmra.mrb[80].mxu1 %vm7804_vm2, %v7738_v29  ;;  %v12438_v5 = vunpack.i.h.bf16 %v20917_v4  ;;  %v12437_v39 = vunpack.i.l.bf16 %v20917_v4  ;;  %v13273_v32 = vunpack.i.h.bf16 %v13271_v37  ;;  %v13272_v63 = vunpack.i.l.bf16 %v13271_v37  ;;  %v13266_v21 = vpop.permute.xlu0 %13265 }
 0x5df   : > { %v6212_v47 = vsel %vm6189_vm1, %v6179_v62, %v12442_v51  ;;  %v6213_v42 = vsel %vm6189_vm1, %v6180_v1, %v12443_v30  ;;  %v13258_v48 = vunpack.i.h.bf16 %v13256_v20  ;;  %v13257_v55 = vunpack.i.l.bf16 %v13256_v20  ;;  %v8328_v20 = vld [vmem:[#allocation4 + $0x18] sm:$0xff]  ;;  %v20918_v1 = vld [vmem:[#allocation209_spill] sm:$0xff] }
 0x5e0   : > { %v13283_v19 = vunpack.i.h.bf16 %v13281_v49  ;;  %v13282_v25 = vunpack.i.l.bf16 %v13281_v49  ;;  %v13268_v23 = vunpack.i.h.bf16 %v13266_v21  ;;  %v13267_v56 = vunpack.i.l.bf16 %v13266_v21 }
 0x5e1   : > { %v6177_v3 = vsel %vm6156_vm15, %v6144_v34, %v12357_v40  ;;  %v6178_v52 = vsel %vm6156_vm15, %v6145_v54, %v12358_v50  ;;  %v6246_v27 = vsel %vm6222_vm3, %v6213_v42, %v13263_v18  ;;  %v6245_v0 = vsel %vm6222_vm3, %v6212_v47, %v13262_v24  ;;  %v20919_v50 = vld [vmem:[#allocation210_spill] sm:$0xff] }
 0x5e2   : > { %v6210_v58 = vsel %vm6189_vm1, %v6177_v3, %v12437_v39  ;;  %v6211_v35 = vsel %vm6189_vm1, %v6178_v52, %v12438_v5  ;;  %v6278_v14 = vsel %vm6255_vm11, %v6245_v0, %v13272_v63  ;;  %v6279_v46 = vsel %vm6255_vm11, %v6246_v27, %v13273_v32  ;;  %v13276_v61 = vpop.permute.xlu0 %13275  ;;  %v13291_v37 = vpop.permute.xlu1 %13290  ;;  %v8329_v5 = vld [vmem:[#allocation4 + $0x20] sm:$0xff]  ;;  %v8521_v52 = vld [vmem:[#allocation4 + $0x30] sm:$0xff]  ;;  %v8522_v27 = vld [vmem:[#allocation4 + $0x38] sm:$0xff] }
 0x5e3   : > { %v6243_v28 = vsel %vm6222_vm3, %v6210_v58, %v13257_v55  ;;  %v6244_v8 = vsel %vm6222_vm3, %v6211_v35, %v13258_v48  ;;  %v13278_v44 = vunpack.i.h.bf16 %v13276_v61  ;;  %v13277_v15 = vunpack.i.l.bf16 %v13276_v61  ;;  %v8393_v32 = vld [vmem:[#allocation4 + $0x21] sm:$0xff]  ;;  %v19132_v55 = vld [vmem:[#allocation4 + $0x31] sm:$0xff] }
 0x5e4   : > { %v7719_v7 = vsel %vm7696_vm4, %v6278_v14, %v13282_v25  ;;  %v7720_v45 = vsel %vm7696_vm4, %v6279_v46, %v13283_v19  ;;  %v6276_v26 = vsel %vm6255_vm11, %v6243_v28, %v13267_v56  ;;  %v6277_v53 = vsel %vm6255_vm11, %v6244_v8, %v13268_v23  ;;  %v8456_v63 = vld [vmem:[#allocation4 + $0x1a] sm:$0xff]  ;;  %v8457_v14 = vld [vmem:[#allocation4 + $0x22] sm:$0xff] }
 0x5e5   : > { %v7717_v41 = vsel %vm7696_vm4, %v6276_v26, %v13277_v15  ;;  %v7718_v13 = vsel %vm7696_vm4, %v6277_v53, %v13278_v44  ;;  %v7740_v43 = vpack.c.bf16 %v7720_v45, %v7719_v7  ;;  %v8232_v36 = vmax.f32 %v8168_v31, %v8200_v33  ;;  %v19134_v19 = vld [vmem:[#allocation4 + $0x39] sm:$0xff]  ;;  %v20920_v28 = vld [vmem:[#allocation192_spill] sm:$0xff] }
 0x5e6   : > { %v7739_v60 = vpack.c.bf16 %v7718_v13, %v7717_v41  ;;  %v8233_v22 = vmax.f32 %v8169_v6, %v8201_v11  ;;  %v8234_v54 = vmax.f32 %v8328_v20, %v8392_v9  ;;  %v13301_v62 = vpop.permute.xlu1 %13300  ;;  %v13293_v21 = vunpack.i.h.bf16 %v13291_v37  ;;  %v20921_v44 = vld [vmem:[#allocation191_spill] sm:$0xff] }
 0x5e7   : > { %v13286_v2 = vpop.permute.xlu0 %13285  ;;  %v8296_v51 = vmax.f32 %v8232_v36, %v8264_v10  ;;  %v13292_v47 = vunpack.i.l.bf16 %v13291_v37  ;;  %v13303_v25 = vunpack.i.h.bf16 %v13301_v62  ;;  %v13302_v23 = vunpack.i.l.bf16 %v13301_v62 }
 0x5e8   : > { %10470 = vmatprep.mubr.msk.bf16.mxu1 %vm7804_vm2, %v7739_v60  ;;  %v13288_v57 = vunpack.i.h.bf16 %v13286_v2  ;;  %v13287_v59 = vunpack.i.l.bf16 %v13286_v2  ;;  %v8297_v34 = vmax.f32 %v8233_v22, %v8265_v16  ;;  %v8235_v0 = vmax.f32 %v8329_v5, %v8393_v32  ;;  %v8649_v60 = vld [vmem:[#allocation4 + $0x32] sm:$0xff] }
 0x5e9   : > { %10471 = vmatmul.mubr.msk.bf16.gmra.mrb[84].mxu1 %vm7804_vm2, %v7740_v43  ;;  %v8360_v39 = vmax.f32 %v8296_v51, %v8328_v20  ;;  %v8298_v58 = vmax.f32 %v8234_v54, %v8456_v63  ;;  %v8236_v46 = vmax.f32 %v8521_v52, %v19132_v55  ;;  %v8237_v61 = vmax.f32 %v8522_v27, %v19134_v19  ;;  %v8650_v43 = vld [vmem:[#allocation4 + $0x3a] sm:$0xff]  ;;  %v8524_v16 = vld [vmem:[#allocation4 + $0x50] sm:$0xff] }
 0x5ea   : > { %v6247_v12 = vsel %vm6222_vm3, %v20918_v1, %v13287_v59  ;;  %v6248_v40 = vsel %vm6222_vm3, %v20919_v50, %v13288_v57  ;;  %v8361_v3 = vmax.f32 %v8297_v34, %v8329_v5  ;;  %v6250_v8 = vsel %vm6222_vm3, %v20920_v28, %v13293_v21  ;;  %v8523_v59 = vld [vmem:[#allocation4 + $0x48] sm:$0xff]  ;;  %v19180_v28 = vld [vmem:[#allocation4 + $0x79] sm:$0xff] }
 0x5eb   : > { %v13296_v38 = vpop.permute.xlu0 %13295  ;;  %v6249_v15 = vsel %vm6222_vm3, %v20921_v44, %v13292_v47  ;;  %v6283_v53 = vsel %vm6255_vm11, %v6250_v8, %v13303_v25  ;;  %v8424_v41 = vmax.f32 %v8360_v39, %v8392_v9  ;;  %v8299_v33 = vmax.f32 %v8235_v0, %v8457_v14  ;;  %v8587_v20 = vld [vmem:[#allocation4 + $0x49] sm:$0xff]  ;;  %v19149_v9 = vld [vmem:[#allocation4 + $0x51] sm:$0xff]  ;;  %v19151_v34 = vld [vmem:[#allocation4 + $0x61] sm:$0xff] }
 0x5ec   : > { %v13298_v17 = vunpack.i.h.bf16 %v13296_v38  ;;  %v13297_v30 = vunpack.i.l.bf16 %v13296_v38  ;;  %v6282_v26 = vsel %vm6255_vm11, %v6249_v15, %v13302_v23  ;;  %v8425_v13 = vmax.f32 %v8361_v3, %v8393_v32  ;;  %v19153_v54 = vld [vmem:[#allocation4 + $0x69] sm:$0xff]  ;;  %v19182_v8 = vld [vmem:[#allocation4 + $0x81] sm:$0xff] }
 0x5ed   : > { %v8362_v6 = vmax.f32 %v8298_v58, %v8521_v52  ;;  %v8300_v36 = vmax.f32 %v8236_v46, %v8649_v60  ;;  %v8301_v37 = vmax.f32 %v8237_v61, %v8650_v43  ;;  %v8488_v38 = vmax.f32 %v8424_v41, %v8456_v63  ;;  %v8526_v50 = vld [vmem:[#allocation4 + $0x68] sm:$0xff]  ;;  %v9456_v44 = vld [vmem:[%s19767_s11] sm:$0xf] }
 0x5ee   : > { %v6280_v49 = vsel %vm6255_vm11, %v6247_v12, %v13297_v30  ;;  %v6281_v4 = vsel %vm6255_vm11, %v6248_v40, %v13298_v17  ;;  %v8489_v10 = vmax.f32 %v8425_v13, %v8457_v14  ;;  %v8363_v22 = vmax.f32 %v8299_v33, %v8522_v27  ;;  %v8525_v12 = vld [vmem:[#allocation4 + $0x60] sm:$0xff]  ;;  %10754 = vmatprep.subr.msk.bf16.mxu0 %vm9063_vm12, %v9456_v44 }
 0x5ef   : > { %v8426_v57 = vmax.f32 %v8362_v6, %v19132_v55  ;;  %v8364_v17 = vmax.f32 %v8300_v36, %v8523_v59  ;;  %v8365_v30 = vmax.f32 %v8301_v37, %v8524_v16  ;;  %v8553_v51 = vmax.f32 %v8488_v38, %v8521_v52  ;;  %v19164_v47 = vld [vmem:[#allocation4 + $0x62] sm:$0xff] }
 0x5f0   : > { %v8427_v62 = vmax.f32 %v8363_v22, %v19134_v19  ;;  %v8238_v40 = vmax.f32 %v8523_v59, %v8587_v20  ;;  %v8240_v39 = vmax.f32 %v8525_v12, %v19151_v34  ;;  %v8241_v32 = vmax.f32 %v8526_v50, %v19153_v54  ;;  %v19178_v14 = vld [vmem:[#allocation4 + $0x80] sm:$0xff] }
 0x5f1   : > { %v8490_v1 = vmax.f32 %v8426_v57, %v8649_v60  ;;  %v8429_v5 = vmax.f32 %v8365_v30, %v19149_v9  ;;  %v8617_v63 = vmax.f32 %v8553_v51, %v19132_v55  ;;  %v9506_v33 = vsel %vm9063_vm12, %v9456_v44, 0  ;;  %v19202_v38 = vld [vmem:[#allocation4 + $0x82] sm:$0xff]  ;;  %v19206_v22 = vld [vmem:[#allocation4 + $0x99] sm:$0xff] }
 0x5f2   : > { %v8491_v25 = vmax.f32 %v8427_v62, %v8650_v43  ;;  %v8304_v0 = vmax.f32 %v8240_v39, %v19164_v47  ;;  %10585 = vmatpush3.bf16.msra.mxu0 %v9506_v33  ;;  %v8529_v62 = vld [vmem:[#allocation4 + $0x90] sm:$0xff]  ;;  %vm20926_vm0 = vcmask 31744  }
 0x5f3   : > { %v8555_v23 = vmax.f32 %v8490_v1, %v8523_v59  ;;  %v19172_v55 = vmax.f32 %v8617_v63, %v8649_v60  ;;  %v8530_v1 = vld [vmem:[#allocation4 + $0x98] sm:$0xff]  ;;  %vm20929_vm5 = vmmov %vm20926_vm0 }
 0x5f4   : > { %v13306_v29 = vpop.permute.xlu0 %13305  ;;  %v8556_v46 = vmax.f32 %v8491_v25, %v8524_v16  ;;  %v19224_v63 = vld [vmem:[#allocation4 + $0x92] sm:$0xff]  ;;  %vm20930_vm6 = vmmov %vm20926_vm0 }
 0x5f5   : > { %v13308_v18 = vunpack.i.h.bf16 %v13306_v29  ;;  %v13307_v24 = vunpack.i.l.bf16 %v13306_v29  ;;  %v8554_v29 = vmax.f32 %v8489_v10, %v8522_v27  ;;  %v8619_v61 = vmax.f32 %v8555_v23, %v8587_v20  ;;  %v19204_v10 = vld [vmem:[#allocation4 + $0x91] sm:$0xff]  ;;  %vm20931_vm7 = vmmov %vm20926_vm0 }
 0x5f6   : > { %v8620_v36 = vmax.f32 %v8556_v46, %v19149_v9  ;;  %vm20932_vm8 = vmmov %vm20926_vm0 }
 0x5f7   : > { %v7721_v42 = vsel %vm7696_vm4, %v6280_v49, %v13307_v24  ;;  %v7722_v48 = vsel %vm7696_vm4, %v6281_v4, %v13308_v18  ;;  %v8239_v18 = vmax.f32 %v8524_v16, %v19149_v9  ;;  %v8651_v24 = vld [vmem:[#allocation4 + $0x4a] sm:$0xff]  ;;  %v19157_v49 = vld [vmem:[#allocation4 + $0x52] sm:$0xff]  ;;  %v8428_v4 = vmax.f32 %v8364_v17, %v8587_v20  ;;  %vm20933_vm9 = vmmov %vm20926_vm0 }
 0x5f8   : > { %v7741_v56 = vpack.c.bf16 %v7722_v48, %v7721_v42  ;;  %v8618_v21 = vmax.f32 %v8554_v29, %v19134_v19  ;;  %v19166_v42 = vld [vmem:[#allocation4 + $0x6a] sm:$0xff]  ;;  %v8493_v27 = vmax.f32 %v8429_v5, %v19157_v49  ;;  %v19200_v37 = vmax.f32 %v8619_v61, %v8651_v24  ;;  %v20923_v5 = vld [vmem:[#allocation246_spill] sm:$0xff]  ;;  %vm20934_vm10 = vmmov %vm20926_vm0 }
 0x5f9   : > { %v8303_v3 = vmax.f32 %v8239_v18, %v19157_v49  ;;  %v8492_v52 = vmax.f32 %v8428_v4, %v8651_v24  ;;  %v8305_v58 = vmax.f32 %v8241_v32, %v19166_v42  ;;  %v8244_v18 = vmax.f32 %v8529_v62, %v19204_v10  ;;  %v20922_v4 = vld [vmem:[#allocation245_spill] sm:$0xff]  ;;  %vm20935_vm13 = vmmov %vm20926_vm0 }
 0x5fa   : > { %v13311_v35 = vpop.permute.xlu1 %13310  ;;  %10474 = vmatprep.mubr.msk.bf16.mxu1 %vm7804_vm2, %v7741_v56  ;;  %v13316_v48 = vpop.permute.xlu0 %13315  ;;  %v8302_v56 = vmax.f32 %v8238_v40, %v8651_v24  ;;  %v19174_v19 = vmax.f32 %v8618_v21, %v8650_v43  ;;  %v19192_v43 = vld [vmem:[#allocation4 + $0x7a] sm:$0xff]  ;;  %v8245_v24 = vmax.f32 %v8530_v1, %v19206_v22  ;;  %vm20936_vm14 = vmmov %vm20926_vm0 }
 0x5fb   : > { %v13313_v7 = vunpack.i.h.bf16 %v13311_v35  ;;  %v13312_v45 = vunpack.i.l.bf16 %v13311_v35  ;;  %v19176_v35 = vld [vmem:[#allocation4 + $0x78] sm:$0xff]  ;;  %v8369_v13 = vmax.f32 %v8305_v58, %v19178_v14  ;;  %v13318_v6 = vunpack.i.h.bf16 %v13316_v48  ;;  %v19238_v58 = vld [vmem:[#allocation4 + $0xa8] sm:$0xff]  ;;  %vm20937_vm15 = vmmov %vm20926_vm0 }
 0x5fc   : > { %v8366_v15 = vmax.f32 %v8302_v56, %v8525_v12  ;;  %v8368_v41 = vmax.f32 %v8304_v0, %v19176_v35  ;;  %v8713_v60 = vpack.c.bf16 %v19174_v19, %v19172_v55  ;;  %v19226_v21 = vld [vmem:[#allocation4 + $0x9a] sm:$0xff]  ;;  %vm20938_vm1 = vmmov %vm20926_vm0 }
 0x5fd   : > { %v7723_v2 = vsel %vm7696_vm4, %v6282_v26, %v13312_v45  ;;  %v7724_v31 = vsel %vm7696_vm4, %v6283_v53, %v13313_v7  ;;  %v8367_v7 = vmax.f32 %v8303_v3, %v8526_v50  ;;  %v8557_v26 = vmax.f32 %v8492_v52, %v8525_v12 }
 0x5fe   : > { %v7742_v11 = vpack.c.bf16 %v7724_v31, %v7723_v2  ;;  %v13326_v45 = vpop.permute.xlu0 %13325  ;;  %v8558_v53 = vmax.f32 %v8493_v27, %v8526_v50  ;;  %v8242_v2 = vmax.f32 %v19176_v35, %v19180_v28  ;;  %v8243_v31 = vmax.f32 %v19178_v14, %v19182_v8 }
 0x5ff   : > { %v13328_v57 = vunpack.i.h.bf16 %v13326_v45  ;;  %v13327_v59 = vunpack.i.l.bf16 %v13326_v45  ;;  %v8430_v20 = vmax.f32 %v8366_v15, %v19151_v34  ;;  %v8431_v17 = vmax.f32 %v8367_v7, %v19153_v54  ;;  %v19241_v15 = vld [vmem:[#allocation4 + $0xb0] sm:$0xff] }
 0x600   : > { %10475 = vmatmul.mubr.msk.bf16.gmra.mrb[88].mxu1 %vm7804_vm2, %v7742_v11  ;;  %v13317_v11 = vunpack.i.l.bf16 %v13316_v48  ;;  %v19208_v16 = vpop.permute.xlu1 %13320  ;;  %v8621_v30 = vmax.f32 %v8557_v26, %v19151_v34  ;;  %v8622_v9 = vmax.f32 %v8558_v53, %v19153_v54  ;;  %v8432_v51 = vmax.f32 %v8368_v41, %v19180_v28  ;;  %v19243_v7 = vld [vmem:[#allocation4 + $0xa9] sm:$0xff]  ;;  %v19245_v45 = vld [vmem:[#allocation4 + $0xb1] sm:$0xff] }
 0x601   : > { %v8433_v29 = vmax.f32 %v8369_v13, %v19182_v8  ;;  %v8306_v50 = vmax.f32 %v8242_v2, %v19192_v43  ;;  %v8307_v40 = vmax.f32 %v8243_v31, %v19202_v38  ;;  %v6252_v54 = vsel %vm6222_vm3, %v20923_v5, %v13318_v6 }
 0x602   : > { %v6251_v34 = vsel %vm6222_vm3, %v20922_v4, %v13317_v11  ;;  %v6285_v25 = vsel %vm6255_vm11, %v6252_v54, %v13328_v57  ;;  %v8494_v23 = vmax.f32 %v8430_v20, %v19164_v47  ;;  %v8495_v56 = vmax.f32 %v8431_v17, %v19166_v42  ;;  %v20925_v4 = vld [vmem:[#allocation204_spill] sm:$0xff] }
 0x603   : > { %v6284_v48 = vsel %vm6255_vm11, %v6251_v34, %v13327_v59  ;;  %v19235_v27 = vmax.f32 %v8620_v36, %v19157_v49  ;;  %v8496_v0 = vmax.f32 %v8432_v51, %v19192_v43  ;;  %v8497_v44 = vmax.f32 %v8433_v29, %v19202_v38  ;;  %v19264_v36 = vld [vmem:[#allocation4 + $0xc1] sm:$0xff]  ;;  %v19268_v59 = vld [vmem:[#allocation4 + $0xaa] sm:$0xff] }
 0x604   : > { %v13331_v46 = vpop.permute.xlu1 %13330  ;;  %v8308_v26 = vmax.f32 %v8244_v18, %v19224_v63  ;;  %v8309_v53 = vmax.f32 %v8245_v24, %v19226_v21  ;;  %v19250_v49 = vmax.f32 %v8621_v30, %v19164_v47  ;;  %v19253_v41 = vmax.f32 %v8622_v9, %v19166_v42  ;;  %v19266_v47 = vld [vmem:[#allocation4 + $0xc9] sm:$0xff]  ;;  %v19282_v51 = vld [vmem:[#allocation4 + $0xc0] sm:$0xff] }
 0x605   : > { %v8370_v13 = vmax.f32 %v8306_v50, %v8529_v62  ;;  %v8371_v2 = vmax.f32 %v8307_v40, %v8530_v1  ;;  %v13323_v31 = vunpack.i.h.bf16 %v19208_v16  ;;  %v13322_v33 = vunpack.i.l.bf16 %v19208_v16  ;;  %v19284_v29 = vld [vmem:[#allocation4 + $0xc8] sm:$0xff]  ;;  %v20924_v18 = vld [vmem:[#allocation205_spill] sm:$0xff] }
 0x606   : > { %v19259_v6 = vmax.f32 %v8494_v23, %v19176_v35  ;;  %v19262_v11 = vmax.f32 %v8495_v56, %v19178_v14  ;;  %v13333_v42 = vunpack.i.h.bf16 %v13331_v46  ;;  %v13332_v57 = vunpack.i.l.bf16 %v13331_v46  ;;  %v19278_v14 = vld [vmem:[#allocation4 + $0xb2] sm:$0xff] }
 0x607   : > { %v8246_v20 = vmax.f32 %v19238_v58, %v19243_v7  ;;  %v8247_v16 = vmax.f32 %v19241_v15, %v19245_v45  ;;  %v19274_v17 = vmax.f32 %v8496_v0, %v8529_v62  ;;  %v19276_v35 = vmax.f32 %v8497_v44, %v8530_v1  ;;  %v19308_v44 = vld [vmem:[#allocation4 + $0xd8] sm:$0xff] }
 0x608   : > { %v8372_v30 = vmax.f32 %v8308_v26, %v19238_v58  ;;  %v8373_v9 = vmax.f32 %v8309_v53, %v19241_v15  ;;  %v8434_v50 = vmax.f32 %v8370_v13, %v19204_v10  ;;  %v8435_v40 = vmax.f32 %v8371_v2, %v19206_v22 }
 0x609   : > { %v8248_v62 = vmax.f32 %v19282_v51, %v19264_v36  ;;  %v8249_v1 = vmax.f32 %v19284_v29, %v19266_v47  ;;  %v6254_v24 = vsel %vm6222_vm3, %v20924_v18, %v13323_v31  ;;  %v6253_v34 = vsel %vm6222_vm3, %v20925_v4, %v13322_v33  ;;  %v19375_v4 = vld [vmem:[#allocation4 + $0xfa] sm:$0xff]  ;;  %vm20939_vm3 = vmmov %vm20926_vm0 }
 0x60a   : > { %v8310_v23 = vmax.f32 %v8246_v20, %v19268_v59  ;;  %v8311_v56 = vmax.f32 %v8247_v16, %v19278_v14  ;;  %v8436_v0 = vmax.f32 %v8372_v30, %v19243_v7  ;;  %v8437_v46 = vmax.f32 %v8373_v9, %v19245_v45  ;;  %v19324_v20 = vld [vmem:[#allocation4 + $0xe1] sm:$0xff] }
 0x60b   : > { %v8714_v13 = vpack.c.bf16 %v19235_v27, %v19200_v37  ;;  %v8715_v2 = vpack.c.bf16 %v19253_v41, %v19250_v49  ;;  %v8623_v31 = vmax.f32 %v19259_v6, %v19180_v28  ;;  %v8624_v33 = vmax.f32 %v19262_v11, %v19182_v8  ;;  %v19331_v28 = vld [vmem:[#allocation4 + $0xf1] sm:$0xff]  ;;  %v19333_v41 = vld [vmem:[#allocation4 + $0xf9] sm:$0xff] }
 0x60c   : > { %v8498_v16 = vmax.f32 %v8434_v50, %v19224_v63  ;;  %v8499_v37 = vmax.f32 %v8435_v40, %v19226_v21  ;;  %v8374_v27 = vmax.f32 %v8310_v23, %v19282_v51  ;;  %v8375_v49 = vmax.f32 %v8311_v56, %v19284_v29  ;;  %v19347_v50 = vld [vmem:[#allocation4 + $0xf0] sm:$0xff]  ;;  %v19349_v40 = vld [vmem:[#allocation4 + $0xf8] sm:$0xff]  ;;  %v19385_v56 = vld [vmem:[#allocation4 + $0x108] sm:$0xff] }
 0x60d   : > { %v8625_v8 = vmax.f32 %v19274_v17, %v19204_v10  ;;  %v8626_v6 = vmax.f32 %v19276_v35, %v19206_v22  ;;  %v8500_v11 = vmax.f32 %v8436_v0, %v19268_v59  ;;  %v8501_v30 = vmax.f32 %v8437_v46, %v19278_v14  ;;  %v19361_v22 = vld [vmem:[#allocation4 + $0xda] sm:$0xff]  ;;  %v19363_v17 = vld [vmem:[#allocation4 + $0xe2] sm:$0xff]  ;;  %v19394_v0 = vld [vmem:[#allocation4 + $0x110] sm:$0xff] }
 0x60e   : > { %v19359_v10 = vmax.f32 %v8624_v33, %v19202_v38  ;;  %v8252_v35 = vmax.f32 %v19347_v50, %v19331_v28  ;;  %v8564_v18 = vmax.f32 %v8499_v37, %v19241_v15  ;;  %v19373_v38 = vld [vmem:[#allocation4 + $0xf2] sm:$0xff]  ;;  %v19396_v46 = vld [vmem:[#allocation4 + $0x109] sm:$0xff]  ;;  %v19409_v37 = vld [vmem:[#allocation4 + $0x121] sm:$0xff] }
 0x613   : > { %v13336_v12 = vpop.permute.xlu0 %13335 }
 0x614   : > { %v13338_v39 = vunpack.i.h.bf16 %v13336_v12  ;;  %v13337_v32 = vunpack.i.l.bf16 %v13336_v12 }
 0x616   : > { %v7725_v3 = vsel %vm7696_vm4, %v6284_v48, %v13337_v32  ;;  %v7726_v52 = vsel %vm7696_vm4, %v6285_v25, %v13338_v39  ;;  %v19296_v39 = vld [vmem:[#allocation4 + $0xc2] sm:$0xff]  ;;  %v19298_v32 = vld [vmem:[#allocation4 + $0xca] sm:$0xff]  ;;  %v6286_v48 = vsel %vm6255_vm11, %v6253_v34, %v13332_v57  ;;  %v6287_v25 = vsel %vm6255_vm11, %v6254_v24, %v13333_v42  ;;  %v19322_v57 = vld [vmem:[#allocation4 + $0xd9] sm:$0xff] }
 0x617   : > { %v7743_v61 = vpack.c.bf16 %v7726_v52, %v7725_v3  ;;  %v8312_v26 = vmax.f32 %v8248_v62, %v19296_v39  ;;  %v8313_v53 = vmax.f32 %v8249_v1, %v19298_v32  ;;  %v19320_v42 = vld [vmem:[#allocation4 + $0xe0] sm:$0xff]  ;;  %v8250_v55 = vmax.f32 %v19308_v44, %v19322_v57  ;;  %vm20940_vm11 = vmmov %vm20926_vm0 }
 0x618   : > { %v8251_v19 = vmax.f32 %v19320_v42, %v19324_v20  ;;  %v8253_v62 = vmax.f32 %v19349_v40, %v19333_v41  ;;  %v8563_v1 = vmax.f32 %v8498_v16, %v19238_v58  ;;  %v8439_v24 = vmax.f32 %v8375_v49, %v19266_v47 }
 0x619   : > { %10478 = vmatprep.mubr.msk.bf16.mxu1 %vm7804_vm2, %v7743_v61  ;;  %v8376_v9 = vmax.f32 %v8312_v26, %v19308_v44  ;;  %v8689_v34 = vmax.f32 %v8625_v8, %v19224_v63 }
 0x61a   : > { %v8315_v23 = vmax.f32 %v8251_v19, %v19363_v17  ;;  %v8317_v63 = vmax.f32 %v8253_v62, %v19375_v4  ;;  %v8542_v19 = vld [vmem:[#allocation4 + $0x128] sm:$0xff] }
 0x61b   : > { %v8440_v58 = vmax.f32 %v8376_v9, %v19322_v57 }
 0x61c   : > { %v13341_v12 = vpop.permute.xlu1 %13340  ;;  %v8379_v16 = vmax.f32 %v8315_v23, %v19349_v40 }
 0x61d   : > { %v13343_v5 = vunpack.i.h.bf16 %v13341_v12  ;;  %v13342_v54 = vunpack.i.l.bf16 %v13341_v12  ;;  %v8377_v12 = vmax.f32 %v8313_v53, %v19320_v42 }
 0x61f   : > { %v7727_v3 = vsel %vm7696_vm4, %v6286_v48, %v13342_v54  ;;  %v7728_v52 = vsel %vm7696_vm4, %v6287_v25, %v13343_v5  ;;  %v8690_v5 = vmax.f32 %v8626_v6, %v19226_v21  ;;  %v8565_v54 = vmax.f32 %v8500_v11, %v19282_v51  ;;  %vm20928_vm4 = vmmov %vm20926_vm0 }
 0x620   : > { %v7744_v61 = vpack.c.bf16 %v7728_v52, %v7727_v3  ;;  %v8566_v48 = vmax.f32 %v8501_v30, %v19284_v29  ;;  %v8441_v15 = vmax.f32 %v8377_v12, %v19324_v20  ;;  %v8314_v25 = vmax.f32 %v8250_v55, %v19361_v22  ;;  %v19429_v12 = vld [vmem:[#allocation4 + $0x112] sm:$0xff]  ;;  %v8541_v55 = vld [vmem:[#allocation4 + $0x120] sm:$0xff] }
 0x621   : > { %v8316_v3 = vmax.f32 %v8252_v35, %v19373_v38  ;;  %v8627_v21 = vmax.f32 %v8563_v1, %v19243_v7  ;;  %v8628_v51 = vmax.f32 %v8564_v18, %v19245_v45  ;;  %v8503_v52 = vmax.f32 %v8439_v24, %v19298_v32  ;;  %v19441_v1 = vld [vmem:[#allocation4 + $0x122] sm:$0xff]  ;;  %v19443_v18 = vld [vmem:[#allocation4 + $0x12a] sm:$0xff] }
 0x622   : > { %10479 = vmatmul.mubr.msk.bf16.gmra.mrb[92].mxu1 %vm7804_vm2, %v7744_v61  ;;  %vm20927_vm2 = vmmov %vm20926_vm0  ;;  %v19398_v61 = vld [vmem:[#allocation4 + $0x111] sm:$0xff]  ;;  %v8717_v53 = vpack.c.bf16 %v8690_v5, %v8689_v34  ;;  %v8629_v7 = vmax.f32 %v8565_v54, %v19264_v36  ;;  %v8630_v45 = vmax.f32 %v8566_v48, %v19266_v47  ;;  %v8378_v33 = vmax.f32 %v8314_v25, %v19347_v50  ;;  %v19458_v48 = vld [vmem:[#allocation4 + $0x140] sm:$0xff] }
 0x623   : > { %10484 = vmatprep.mubr.msk.bf16.mxu1 %vm20926_vm0, %v8713_v60  ;;  %v19356_v60 = vmax.f32 %v8623_v31, %v19192_v43  ;;  %v8438_v43 = vmax.f32 %v8374_v27, %v19264_v36  ;;  %v8505_v31 = vmax.f32 %v8441_v15, %v19363_v17  ;;  %v19411_v27 = vld [vmem:[#allocation4 + $0x129] sm:$0xff]  ;;  %v8380_v49 = vmax.f32 %v8316_v3, %v19385_v56  ;;  %v19452_v34 = vld [vmem:[#allocation4 + $0x138] sm:$0xff]  ;;  %v19462_v15 = vld [vmem:[#allocation4 + $0x141] sm:$0xff] }
 0x624   : > { %v8381_v36 = vmax.f32 %v8317_v63, %v19394_v0  ;;  %v8254_v47 = vmax.f32 %v19385_v56, %v19396_v46  ;;  %v8255_v8 = vmax.f32 %v19394_v0, %v19398_v61  ;;  %v19422_v6 = vmax.f32 %v8627_v21, %v19268_v59  ;;  %v19470_v21 = vld [vmem:[#allocation4 + $0x151] sm:$0xff] }
 0x625   : > { %v8502_v29 = vmax.f32 %v8438_v43, %v19296_v39  ;;  %v8716_v26 = vpack.c.bf16 %v19359_v10, %v19356_v60  ;;  %v19425_v11 = vmax.f32 %v8628_v51, %v19278_v14  ;;  %v8568_v9 = vmax.f32 %v8503_v52, %v19320_v42  ;;  %v19472_v51 = vld [vmem:[#allocation4 + $0x159] sm:$0xff] }
 0x626   : > { %v19432_v60 = vmax.f32 %v8629_v7, %v19296_v39  ;;  %v8694_v10 = vmax.f32 %v8630_v45, %v19298_v32  ;;  %v8256_v35 = vmax.f32 %v8541_v55, %v19409_v37  ;;  %v8257_v59 = vmax.f32 %v8542_v19, %v19411_v27  ;;  %v8545_v45 = vld [vmem:[#allocation4 + $0x150] sm:$0xff] }
 0x627   : > { %v8567_v30 = vmax.f32 %v8502_v29, %v19308_v44  ;;  %v8570_v62 = vmax.f32 %v8505_v31, %v19349_v40  ;;  %v8442_v44 = vmax.f32 %v8378_v33, %v19331_v28  ;;  %v8443_v42 = vmax.f32 %v8379_v16, %v19333_v41  ;;  %v19482_v33 = vld [vmem:[#allocation4 + $0x13a] sm:$0xff]  ;;  %v19484_v16 = vld [vmem:[#allocation4 + $0x142] sm:$0xff] }
 0x628   : > { %v8444_v39 = vmax.f32 %v8380_v49, %v19396_v46  ;;  %v8445_v32 = vmax.f32 %v8381_v36, %v19398_v61  ;;  %v8319_v24 = vmax.f32 %v8255_v8, %v19429_v12  ;;  %v8632_v40 = vmax.f32 %v8568_v9, %v19324_v20  ;;  %v19496_v9 = vld [vmem:[#allocation4 + $0x15a] sm:$0xff] }
 0x629   : > { %v8718_v5 = vpack.c.bf16 %v19425_v11, %v19422_v6  ;;  %v8719_v54 = vpack.c.bf16 %v8694_v10, %v19432_v60  ;;  %v8320_v25 = vmax.f32 %v8256_v35, %v19441_v1  ;;  %v8634_v23 = vmax.f32 %v8570_v62, %v19333_v41  ;;  %v8546_v41 = vld [vmem:[#allocation4 + $0x158] sm:$0xff] }
 0x62a   : > { %10485 = vmatmul.mubr.msk.bf16.vlgmr.msra.gmra.mrb[96].mxu1 %vm20927_vm2, %v8714_v13  ;;  %v8504_v13 = vmax.f32 %v8440_v58, %v19361_v22  ;;  %v19460_v58 = vld [vmem:[#allocation4 + $0x139] sm:$0xff]  ;;  %v8506_v3 = vmax.f32 %v8442_v44, %v19373_v38  ;;  %v8507_v63 = vmax.f32 %v8443_v42, %v19375_v4  ;;  %v8509_v52 = vmax.f32 %v8445_v32, %v19429_v12  ;;  %v19510_v62 = vld [vmem:[#allocation4 + $0x171] sm:$0xff] }
 0x62b   : > { %10488 = vmatprep.mubr.msk.bf16.mxu1 %vm20928_vm4, %v8715_v2  ;;  %v19413_v2 = vld [vmem:[#allocation4 + $0x10a] sm:$0xff]  ;;  %v8259_v31 = vmax.f32 %v19458_v48, %v19462_v15  ;;  %v8384_v49 = vmax.f32 %v8320_v25, %v19452_v34  ;;  %v8698_v8 = vmax.f32 %v8634_v23, %v19375_v4  ;;  %vm20941_vm2 = vcmask 64512  }
 0x62c   : > { %v8569_v14 = vmax.f32 %v8504_v13, %v19347_v50  ;;  %v8318_v43 = vmax.f32 %v8254_v47, %v19413_v2  ;;  %v8631_v50 = vmax.f32 %v8567_v30, %v19322_v57  ;;  %v8321_v57 = vmax.f32 %v8257_v59, %v19443_v18  ;;  %v19494_v30 = vld [vmem:[#allocation4 + $0x152] sm:$0xff]  ;;  %vm20942_vm4 = vmmov %vm20941_vm2 }
 0x62d   : > { %v8508_v29 = vmax.f32 %v8444_v39, %v19413_v2  ;;  %v8258_v13 = vmax.f32 %v19452_v34, %v19460_v58  ;;  %v8571_v6 = vmax.f32 %v8506_v3, %v19385_v56  ;;  %v8572_v11 = vmax.f32 %v8507_v63, %v19394_v0 }
 0x62e   : > { %v8633_v20 = vmax.f32 %v8569_v14, %v19331_v28  ;;  %v8695_v7 = vmax.f32 %v8631_v50, %v19361_v22  ;;  %v8696_v28 = vmax.f32 %v8632_v40, %v19363_v17  ;;  %v8385_v36 = vmax.f32 %v8321_v57, %v19458_v48  ;;  %v19503_v14 = vld [vmem:[#allocation4 + $0x168] sm:$0xff] }
 0x62f   : > { %v8260_v22 = vmax.f32 %v8545_v45, %v19470_v21  ;;  %v8261_v17 = vmax.f32 %v8546_v41, %v19472_v51  ;;  %v8573_v60 = vmax.f32 %v8508_v29, %v8541_v55  ;;  %v8574_v10 = vmax.f32 %v8509_v52, %v8542_v19 }
 0x630   : > { %v8697_v47 = vmax.f32 %v8633_v20, %v19373_v38  ;;  %v8322_v38 = vmax.f32 %v8258_v13, %v19482_v33  ;;  %v8323_v4 = vmax.f32 %v8259_v31, %v19484_v16  ;;  %v8448_v56 = vmax.f32 %v8384_v49, %v19460_v58 }
 0x631   : > { %v8449_v0 = vmax.f32 %v8385_v36, %v19462_v15  ;;  %v8324_v44 = vmax.f32 %v8260_v22, %v19494_v30  ;;  %v8325_v42 = vmax.f32 %v8261_v17, %v19496_v9  ;;  %v8720_v39 = vpack.c.bf16 %v8696_v28, %v8695_v7  ;;  %v8549_v36 = vld [vmem:[#allocation4 + $0x180] sm:$0xff] }
 0x632   : > { %10489 = vmatmul.mubr.msk.bf16.gmra.mrb[100].mxu1 %vm20929_vm5, %v8716_v26  ;;  %v8382_v26 = vmax.f32 %v8318_v43, %v8541_v55  ;;  %v8548_v55 = vld [vmem:[#allocation4 + $0x170] sm:$0xff]  ;;  %v8721_v32 = vpack.c.bf16 %v8698_v8, %v8697_v47  ;;  %v8635_v43 = vmax.f32 %v8571_v6, %v19396_v46  ;;  %v8637_v50 = vmax.f32 %v8573_v60, %v19409_v37  ;;  %vm20944_vm5 = vmmov %vm20941_vm2 }
 0x633   : > { %10492 = vmatprep.mubr.msk.bf16.mxu1 %vm20930_vm6, %v8717_v53  ;;  %v8383_v53 = vmax.f32 %v8319_v24, %v8542_v19  ;;  %v19508_v19 = vld [vmem:[#allocation4 + $0x169] sm:$0xff]  ;;  %v8636_v24 = vmax.f32 %v8572_v11, %v19398_v61  ;;  %v8638_v40 = vmax.f32 %v8574_v10, %v19411_v27  ;;  %v8386_v25 = vmax.f32 %v8322_v38, %v8545_v45  ;;  %vm20945_vm6 = vmmov %vm20941_vm2 }
 0x634   : > { %v8446_v35 = vmax.f32 %v8382_v26, %v19409_v37  ;;  %v8387_v57 = vmax.f32 %v8323_v4, %v8546_v41  ;;  %v8262_v20 = vmax.f32 %v19503_v14, %v19508_v19  ;;  %v8263_v23 = vmax.f32 %v8548_v55, %v19510_v62  ;;  %v19525_v61 = vld [vmem:[#allocation4 + $0x16a] sm:$0xff]  ;;  %v19527_v37 = vld [vmem:[#allocation4 + $0x172] sm:$0xff] }
 0x635   : > { %v8447_v59 = vmax.f32 %v8383_v53, %v19411_v27  ;;  %v8512_v3 = vmax.f32 %v8448_v56, %v19482_v33  ;;  %v8513_v46 = vmax.f32 %v8449_v0, %v19484_v16  ;;  %v8388_v27 = vmax.f32 %v8324_v44, %v19503_v14  ;;  %v19549_v6 = vld [vmem:[%s19768_s12] sm:$0xf] }
 0x636   : > { %v8389_v63 = vmax.f32 %v8325_v42, %v8548_v55  ;;  %v8699_v29 = vmax.f32 %v8635_v43, %v19413_v2  ;;  %v8700_v52 = vmax.f32 %v8636_v24, %v19429_v12  ;;  %v8701_v26 = vmax.f32 %v8637_v50, %v19441_v1  ;;  %10755 = vmatprep.subr.msk.bf16.mxu0 %vm9063_vm12, %v19549_v6  ;;  %v8614_v38 = vld [vmem:[#allocation4 + $0x189] sm:$0xff] }
 0x637   : > { %v8702_v53 = vmax.f32 %v8638_v40, %v19443_v18  ;;  %v8450_v13 = vmax.f32 %v8386_v25, %v19470_v21  ;;  %v8451_v31 = vmax.f32 %v8387_v57, %v19472_v51  ;;  %v8326_v49 = vmax.f32 %v8262_v20, %v19525_v61  ;;  %v8677_v24 = vld [vmem:[#allocation4 + $0x182] sm:$0xff]  ;;  %v8678_v50 = vld [vmem:[#allocation4 + $0x18a] sm:$0xff]  ;;  %v8551_v57 = vld [vmem:[#allocation4 + $0x198] sm:$0xff] }
 0x638   : > { %v8327_v2 = vmax.f32 %v8263_v23, %v19527_v37  ;;  %v8577_v12 = vmax.f32 %v8512_v3, %v8545_v45  ;;  %v8722_v22 = vpack.c.bf16 %v8700_v52, %v8699_v29  ;;  %v8552_v20 = vld [vmem:[#allocation4 + $0x1a0] sm:$0xff] }
 0x639   : > { %v8723_v17 = vpack.c.bf16 %v8702_v53, %v8701_v26  ;;  %v8514_v45 = vmax.f32 %v8450_v13, %v19494_v30  ;;  %v8390_v11 = vmax.f32 %v8326_v49, %v8549_v36  ;;  %v8679_v53 = vld [vmem:[#allocation4 + $0x19a] sm:$0xff]  ;;  %v19578_v13 = vld [vmem:[%s19762_s6] ss:$0 sm:$0xff] }
 0x63a   : > { %10493 = vmatmul.mubr.msk.bf16.gmra.mrb[104].mxu1 %vm20931_vm7, %v8718_v5  ;;  %v8510_v5 = vmax.f32 %v8446_v35, %v19441_v1  ;;  %v8578_v1 = vmax.f32 %v8513_v46, %v8546_v41  ;;  %v8515_v41 = vmax.f32 %v8451_v31, %v19496_v9  ;;  %v8641_v10 = vmax.f32 %v8577_v12, %v19470_v21  ;;  %vm20946_vm7 = vmmov %vm20941_vm2 }
 0x63b   : > { %10496 = vmatprep.mubr.msk.bf16.mxu1 %vm20932_vm8, %v8719_v54  ;;  %v8511_v54 = vmax.f32 %v8447_v59, %v19443_v18  ;;  %v8452_v18 = vmax.f32 %v8388_v27, %v19508_v19  ;;  %v8613_v59 = vld [vmem:[#allocation4 + $0x181] sm:$0xff]  ;;  %v8579_v0 = vmax.f32 %v8514_v45, %v19503_v14  ;;  %vm20947_vm8 = vmmov %vm20941_vm2 }
 0x63c   : > { %v8575_v7 = vmax.f32 %v8510_v5, %v19452_v34  ;;  %v8453_v34 = vmax.f32 %v8389_v63, %v19510_v62  ;;  %v8580_v44 = vmax.f32 %v8515_v41, %v8548_v55  ;;  %v8454_v42 = vmax.f32 %v8390_v11, %v8613_v59  ;;  %v8616_v27 = vld [vmem:[#allocation4 + $0x1a1] sm:$0xff] }
 0x63d   : > { %v8576_v28 = vmax.f32 %v8511_v54, %v19458_v48  ;;  %v8550_v48 = vld [vmem:[#allocation4 + $0x188] sm:$0xff]  ;;  %v8705_v21 = vmax.f32 %v8641_v10, %v19494_v30  ;;  %v9767_v10 = vsel %vm9063_vm12, %v19549_v6, 0  ;;  %vm20943_vm12 = vmmov %vm20941_vm2 }
 0x63e   : > { %v8639_v47 = vmax.f32 %v8575_v7, %v19460_v58  ;;  %v8391_v60 = vmax.f32 %v8327_v2, %v8550_v48  ;;  %v8642_v58 = vmax.f32 %v8578_v1, %v19472_v51  ;;  %v8517_v35 = vmax.f32 %v8453_v34, %v19527_v37  ;;  %v8680_v7 = vld [vmem:[#allocation4 + $0x1a2] sm:$0xff] }
 0x63f   : > { %v8640_v8 = vmax.f32 %v8576_v28, %v19462_v15  ;;  %v8516_v15 = vmax.f32 %v8452_v18, %v19525_v61  ;;  %v8644_v40 = vmax.f32 %v8580_v44, %v19510_v62  ;;  %v8518_v5 = vmax.f32 %v8454_v42, %v8677_v24  ;;  %v8615_v62 = vld [vmem:[#allocation4 + $0x199] sm:$0xff] }
 0x640   : > { %v8703_v4 = vmax.f32 %v8639_v47, %v19482_v33  ;;  %v8706_v51 = vmax.f32 %v8642_v58, %v19496_v9  ;;  %v8582_v43 = vmax.f32 %v8517_v35, %v8550_v48 }
 0x641   : > { %v8704_v56 = vmax.f32 %v8640_v8, %v19484_v16  ;;  %v8643_v16 = vmax.f32 %v8579_v0, %v19508_v19  ;;  %v8708_v9 = vmax.f32 %v8644_v40, %v19527_v37  ;;  %v8583_v23 = vmax.f32 %v8518_v5, %v8551_v57 }
 0x642   : > { %10497 = vmatmul.mubr.msk.bf16.gmra.mrb[108].mxu1 %vm20933_vm9, %v8720_v39  ;;  %v8455_v39 = vmax.f32 %v8391_v60, %v8614_v38  ;;  %v8725_v55 = vpack.c.bf16 %v8706_v51, %v8705_v21  ;;  %v8646_v25 = vmax.f32 %v8582_v43, %v8614_v38  ;;  %vm20948_vm9 = vmmov %vm20941_vm2 }
 0x643   : > { %10500 = vmatprep.mubr.msk.bf16.mxu1 %vm20934_vm10, %v8721_v32  ;;  %v8581_v32 = vmax.f32 %v8516_v15, %v8549_v36  ;;  %v8724_v33 = vpack.c.bf16 %v8704_v56, %v8703_v4  ;;  %v8707_v30 = vmax.f32 %v8643_v16, %v19525_v61  ;;  %v8647_v29 = vmax.f32 %v8583_v23, %v8615_v62  ;;  %vm20949_vm10 = vmmov %vm20941_vm2 }
 0x644   : > { %v8519_v14 = vmax.f32 %v8455_v39, %v8678_v50  ;;  %v8710_v46 = vmax.f32 %v8646_v25, %v8678_v50 }
 0x645   : > { %v8645_v54 = vmax.f32 %v8581_v32, %v8613_v59  ;;  %v8726_v63 = vpack.c.bf16 %v8708_v9, %v8707_v30  ;;  %v8711_v28 = vmax.f32 %v8647_v29, %v8679_v53 }
 0x646   : > { %v8584_v3 = vmax.f32 %v8519_v14, %v8552_v20 }
 0x647   : > { %v8709_v19 = vmax.f32 %v8645_v54, %v8677_v24 }
 0x648   : > { %v8648_v52 = vmax.f32 %v8584_v3, %v8616_v27 }
 0x649   : > { %v8727_v26 = vpack.c.bf16 %v8710_v46, %v8709_v19 }
 0x64a   : > { %10501 = vmatmul.mubr.msk.bf16.gmra.mrb[112].mxu1 %vm20935_vm13, %v8722_v22  ;;  %v8712_v61 = vmax.f32 %v8648_v52, %v8680_v7  ;;  %vm20950_vm13 = vmmov %vm20941_vm2 }
 0x64b   : > { %10504 = vmatprep.mubr.msk.bf16.mxu1 %vm20936_vm14, %v8723_v17  ;;  %vm20951_vm14 = vmmov %vm20941_vm2 }
 0x64c   : > { %v8728_v37 = vpack.c.bf16 %v8712_v61, %v8711_v28 }
 0x652   : > { %10505 = vmatmul.mubr.msk.bf16.gmra.mrb[116].mxu1 %vm20937_vm15, %v8724_v33  ;;  %vm20952_vm15 = vmmov %vm20941_vm2 }
 0x653   : > { %10508 = vmatprep.mubr.msk.bf16.mxu1 %vm20938_vm1, %v8725_v55  ;;  %vm20953_vm1 = vmmov %vm20941_vm2 }
 0x65a   : > { %10509 = vmatmul.mubr.msk.bf16.gmra.mrb[120].mxu1 %vm20939_vm3, %v8726_v63  ;;  %vm20954_vm3 = vmmov %vm20953_vm1 }
 0x65b   : > { %10512 = vmatprep.mubr.msk.bf16.mxu1 %vm20940_vm11, %v8727_v26  ;;  %vm20955_vm11 = vmmov %vm20953_vm1 }
 0x662   : > { %10513 = vmatmul.mubr.msk.bf16.gmra.mrb[124].mxu1 %vm20926_vm0, %v8728_v37  ;;  %vm20956_vm0 = vmmov %vm20953_vm1 }
 0x686   : > { %v10452_v31 = vpop.f32.mrb[64].mxu1 }
 0x687   : > { %v7899_v49 = vadd.f32 %v10452_v31, %v19578_v13  ;;  %v7890_v2 = vpop.f32.mrb[65].mxu1 }
 0x688   : > { %v7891_v12 = vadd.f32 %v19578_v13, %v7890_v2  ;;  %v10453_v1 = vpop.f32.mrb[66].mxu1 }
 0x689   : > { %v7902_v18 = vadd.f32 %v10453_v1, %v19578_v13  ;;  %v7893_v34 = vpop.f32.mrb[67].mxu1  ;;  %v8019_v48 = vmax.f32 %v7899_v49, 0.0 }
 0x68a   : > { %v7894_v36 = vadd.f32 %v19578_v13, %v7893_v34  ;;  %v8017_v17 = vmax.f32 %v7891_v12, 0.0 }
 0x68b   : > { %v8020_v22 = vmax.f32 %v7902_v18, 0.0 }
 0x68c   : > { %v8018_v47 = vmax.f32 %v7894_v36, 0.0 }
 0x68d   : > { %v9441_v8 = vpack.c.bf16 %v8020_v22, %v8019_v48 }
 0x68e   : > { %v9440_v45 = vpack.c.bf16 %v8018_v47, %v8017_v17  ;;  %v10456_v41 = vpop.f32.mrb[68].mxu1 }
 0x68f   : > { %v7915_v11 = vadd.f32 %v10456_v41, %v19578_v13  ;;  %v7906_v60 = vpop.f32.mrb[69].mxu1 }
 0x690   : > { %v7907_v58 = vadd.f32 %v19578_v13, %v7906_v60  ;;  %v10457_v15 = vpop.f32.mrb[70].mxu1  ;;  %10586 = vmatprep.mubr.msk.bf16.mxu0 %vm20941_vm2, %v9440_v45  ;;  %vm20957_vm2 = vmmov %vm20956_vm0 }
 0x691   : > { %v7918_v35 = vadd.f32 %v10457_v15, %v19578_v13  ;;  %v7909_v59 = vpop.f32.mrb[71].mxu1  ;;  %10587 = vmatmul.mubr.msk.bf16.vlgmr.msra.gmra.mrb[0].mxu0 %vm20942_vm4, %v9441_v8  ;;  %v8023_v4 = vmax.f32 %v7915_v11, 0.0  ;;  %vm20958_vm4 = vmmov %vm20956_vm0 }
 0x692   : > { %v7910_v38 = vadd.f32 %v19578_v13, %v7909_v59  ;;  %10619 = vmatpush3.bf16.msra.mxu0 %v9767_v10  ;;  %v8021_v0 = vmax.f32 %v7907_v58, 0.0 }
 0x693   : > { %v8024_v56 = vmax.f32 %v7918_v35, 0.0 }
 0x694   : > { %v8022_v44 = vmax.f32 %v7910_v38, 0.0 }
 0x695   : > { %v9443_v42 = vpack.c.bf16 %v8024_v56, %v8023_v4 }
 0x696   : > { %v9442_v39 = vpack.c.bf16 %v8022_v44, %v8021_v0 }
 0x697   : > { %v10460_v6 = vpop.f32.mrb[72].mxu1 }
 0x698   : > { %v7931_v21 = vadd.f32 %v10460_v6, %v19578_v13  ;;  %v7922_v51 = vpop.f32.mrb[73].mxu1  ;;  %10590 = vmatprep.mubr.msk.bf16.mxu0 %vm20943_vm12, %v9442_v39  ;;  %vm20959_vm12 = vmmov %vm20956_vm0 }
 0x699   : > { %v7923_v32 = vadd.f32 %v19578_v13, %v7922_v51  ;;  %v10461_v43 = vpop.f32.mrb[74].mxu1  ;;  %10591 = vmatmul.mubr.msk.bf16.gmra.mrb[4].mxu0 %vm20944_vm5, %v9443_v42  ;;  %vm20960_vm5 = vmmov %vm20956_vm0 }
 0x69a   : > { %v7934_v24 = vadd.f32 %v10461_v43, %v19578_v13  ;;  %v7925_v50 = vpop.f32.mrb[75].mxu1  ;;  %v8027_v16 = vmax.f32 %v7931_v21, 0.0 }
 0x69b   : > { %v7926_v33 = vadd.f32 %v19578_v13, %v7925_v50  ;;  %v8025_v5 = vmax.f32 %v7923_v32, 0.0 }
 0x69c   : > { %v8028_v40 = vmax.f32 %v7934_v24, 0.0 }
 0x69d   : > { %v8026_v14 = vmax.f32 %v7926_v33, 0.0 }
 0x69e   : > { %v9445_v55 = vpack.c.bf16 %v8028_v40, %v8027_v16 }
 0x69f   : > { %v9444_v54 = vpack.c.bf16 %v8026_v14, %v8025_v5 }
 0x6a1   : > { %10594 = vmatprep.mubr.msk.bf16.mxu0 %vm20945_vm6, %v9444_v54  ;;  %vm20961_vm6 = vmmov %vm20956_vm0 }
 0x6a2   : > { %10595 = vmatmul.mubr.msk.bf16.gmra.mrb[8].mxu0 %vm20946_vm7, %v9445_v55  ;;  %vm20962_vm7 = vmmov %vm20956_vm0 }
 0x6a3   : > { %v10464_v25 = vpop.f32.mrb[76].mxu1 }
 0x6a4   : > { %v7947_v57 = vadd.f32 %v10464_v25, %v19578_v13  ;;  %v7938_v20 = vpop.f32.mrb[77].mxu1 }
 0x6a5   : > { %v7939_v30 = vadd.f32 %v19578_v13, %v7938_v20  ;;  %v10465_v9 = vpop.f32.mrb[78].mxu1 }
 0x6a6   : > { %v7950_v23 = vadd.f32 %v10465_v9, %v19578_v13  ;;  %v7941_v3 = vpop.f32.mrb[79].mxu1  ;;  %v8031_v46 = vmax.f32 %v7947_v57, 0.0 }
 0x6a7   : > { %v7942_v19 = vadd.f32 %v19578_v13, %v7941_v3  ;;  %v8029_v27 = vmax.f32 %v7939_v30, 0.0 }
 0x6a8   : > { %v8032_v62 = vmax.f32 %v7950_v23, 0.0  ;;  %v19631_v23 = vld [vmem:[%s19764_s8] ss:$0 sm:$0xff] }
 0x6a9   : > { %v8030_v63 = vmax.f32 %v7942_v19, 0.0 }
 0x6aa   : > { %v9447_v29 = vpack.c.bf16 %v8032_v62, %v8031_v46 }
 0x6ab   : > { %v9446_v52 = vpack.c.bf16 %v8030_v63, %v8029_v27 }
 0x6ad   : > { %10598 = vmatprep.mubr.msk.bf16.mxu0 %vm20947_vm8, %v9446_v52  ;;  %vm20963_vm8 = vmmov %vm20956_vm0 }
 0x6ae   : > { %10599 = vmatmul.mubr.msk.bf16.gmra.mrb[12].mxu0 %vm20948_vm9, %v9447_v29  ;;  %vm20964_vm9 = vmmov %vm20956_vm0 }
 0x6b1   : > { %v10468_v26 = vpop.f32.mrb[80].mxu1 }
 0x6b2   : > { %v7963_v53 = vadd.f32 %v10468_v26, %v19578_v13  ;;  %v7954_v7 = vpop.f32.mrb[81].mxu1 }
 0x6b3   : > { %v7955_v28 = vadd.f32 %v19578_v13, %v7954_v7  ;;  %v10469_v61 = vpop.f32.mrb[82].mxu1 }
 0x6b4   : > { %v7966_v37 = vadd.f32 %v10469_v61, %v19578_v13  ;;  %v7957_v31 = vpop.f32.mrb[83].mxu1  ;;  %v8035_v2 = vmax.f32 %v7963_v53, 0.0 }
 0x6b5   : > { %v7958_v49 = vadd.f32 %v19578_v13, %v7957_v31  ;;  %v8033_v1 = vmax.f32 %v7955_v28, 0.0 }
 0x6b6   : > { %v8036_v12 = vmax.f32 %v7966_v37, 0.0 }
 0x6b7   : > { %v8034_v18 = vmax.f32 %v7958_v49, 0.0 }
 0x6b8   : > { %v9449_v34 = vpack.c.bf16 %v8036_v12, %v8035_v2 }
 0x6b9   : > { %v9448_v36 = vpack.c.bf16 %v8034_v18, %v8033_v1 }
 0x6bb   : > { %10602 = vmatprep.mubr.msk.bf16.mxu0 %vm20949_vm10, %v9448_v36  ;;  %vm20965_vm10 = vmmov %vm20956_vm0 }
 0x6bc   : > { %10603 = vmatmul.mubr.msk.bf16.gmra.mrb[16].mxu0 %vm20950_vm13, %v9449_v34  ;;  %v10472_v48 = vpop.f32.mrb[84].mxu1  ;;  %vm20966_vm13 = vmmov %vm20956_vm0 }
 0x6bd   : > { %v7979_v22 = vadd.f32 %v10472_v48, %v19578_v13  ;;  %v7970_v17 = vpop.f32.mrb[85].mxu1 }
 0x6be   : > { %v7971_v47 = vadd.f32 %v19578_v13, %v7970_v17  ;;  %v10473_v8 = vpop.f32.mrb[86].mxu1 }
 0x6bf   : > { %v7982_v45 = vadd.f32 %v10473_v8, %v19578_v13  ;;  %v7973_v41 = vpop.f32.mrb[87].mxu1  ;;  %v8039_v60 = vmax.f32 %v7979_v22, 0.0 }
 0x6c0   : > { %v7974_v11 = vadd.f32 %v19578_v13, %v7973_v41  ;;  %v8037_v58 = vmax.f32 %v7971_v47, 0.0 }
 0x6c1   : > { %v8040_v10 = vmax.f32 %v7982_v45, 0.0 }
 0x6c2   : > { %v8038_v15 = vmax.f32 %v7974_v11, 0.0 }
 0x6c3   : > { %v9451_v35 = vpack.c.bf16 %v8040_v10, %v8039_v60 }
 0x6c4   : > { %v9450_v59 = vpack.c.bf16 %v8038_v15, %v8037_v58 }
 0x6c6   : > { %10606 = vmatprep.mubr.msk.bf16.mxu0 %vm20951_vm14, %v9450_v59  ;;  %vm20967_vm14 = vmmov %vm20956_vm0 }
 0x6c7   : > { %10607 = vmatmul.mubr.msk.bf16.gmra.mrb[20].mxu0 %vm20952_vm15, %v9451_v35  ;;  %vm20968_vm15 = vmmov %vm20956_vm0 }
 0x6d3   : > { %v10476_v38 = vpop.f32.mrb[88].mxu1 }
 0x6d4   : > { %v7995_v4 = vadd.f32 %v10476_v38, %v19578_v13  ;;  %v7986_v56 = vpop.f32.mrb[89].mxu1 }
 0x6d5   : > { %v7987_v0 = vadd.f32 %v19578_v13, %v7986_v56  ;;  %v10477_v44 = vpop.f32.mrb[90].mxu1 }
 0x6d6   : > { %v7998_v42 = vadd.f32 %v10477_v44, %v19578_v13  ;;  %v7989_v39 = vpop.f32.mrb[91].mxu1  ;;  %v8043_v21 = vmax.f32 %v7995_v4, 0.0 }
 0x6d7   : > { %v7990_v6 = vadd.f32 %v19578_v13, %v7989_v39  ;;  %v8041_v32 = vmax.f32 %v7987_v0, 0.0 }
 0x6d8   : > { %v8044_v51 = vmax.f32 %v7998_v42, 0.0 }
 0x6d9   : > { %v8042_v43 = vmax.f32 %v7990_v6, 0.0 }
 0x6da   : > { %v9453_v24 = vpack.c.bf16 %v8044_v51, %v8043_v21 }
 0x6db   : > { %v9452_v50 = vpack.c.bf16 %v8042_v43, %v8041_v32 }
 0x6dd   : > { %10610 = vmatprep.mubr.msk.bf16.mxu0 %vm20953_vm1, %v9452_v50  ;;  %vm20969_vm1 = vmmov %vm20956_vm0 }
 0x6de   : > { %10611 = vmatmul.mubr.msk.bf16.gmra.mrb[24].mxu0 %vm20954_vm3, %v9453_v24  ;;  %vm20970_vm3 = vmmov %vm20956_vm0 }
 0x6f5   : > { %v10480_v33 = vpop.f32.mrb[92].mxu1 }
 0x6f6   : > { %v8011_v16 = vadd.f32 %v10480_v33, %v19578_v13  ;;  %v8002_v40 = vpop.f32.mrb[93].mxu1 }
 0x6f7   : > { %v8003_v5 = vadd.f32 %v19578_v13, %v8002_v40  ;;  %v10481_v14 = vpop.f32.mrb[94].mxu1 }
 0x6f8   : > { %v8014_v55 = vadd.f32 %v10481_v14, %v19578_v13  ;;  %v8005_v54 = vpop.f32.mrb[95].mxu1  ;;  %v8047_v57 = vmax.f32 %v8011_v16, 0.0 }
 0x6f9   : > { %v8006_v25 = vadd.f32 %v19578_v13, %v8005_v54  ;;  %v8045_v30 = vmax.f32 %v8003_v5, 0.0 }
 0x6fa   : > { %v8048_v20 = vmax.f32 %v8014_v55, 0.0 }
 0x6fb   : > { %v8046_v9 = vmax.f32 %v8006_v25, 0.0 }
 0x6fc   : > { %v9455_v3 = vpack.c.bf16 %v8048_v20, %v8047_v57 }
 0x6fd   : > { %v9454_v19 = vpack.c.bf16 %v8046_v9, %v8045_v30  ;;  %v10486_v46 = vpop.f32.mrb[96].mxu1 }
 0x6fe   : > { %v8831_v62 = vadd.f32 %v10486_v46, %v19631_v23  ;;  %v8822_v27 = vpop.f32.mrb[97].mxu1 }
 0x6ff   : > { %v8823_v63 = vadd.f32 %v19631_v23, %v8822_v27  ;;  %v10487_v29 = vpop.f32.mrb[98].mxu1  ;;  %10614 = vmatprep.mubr.msk.bf16.mxu0 %vm20955_vm11, %v9454_v19  ;;  %vm20971_vm11 = vmmov %vm20956_vm0 }
 0x700   : > { %v8834_v13 = vadd.f32 %v10487_v29, %v19631_v23  ;;  %v8825_v52 = vpop.f32.mrb[99].mxu1  ;;  %10615 = vmatmul.mubr.msk.bf16.gmra.mrb[28].mxu0 %vm20956_vm0, %v9455_v3  ;;  %v8951_v53 = vmax.f32 %v8831_v62, 0.0 }
 0x701   : > { %v8826_v26 = vadd.f32 %v19631_v23, %v8825_v52  ;;  %v8949_v28 = vmax.f32 %v8823_v63, 0.0 }
 0x702   : > { %v8952_v7 = vmax.f32 %v8834_v13, 0.0 }
 0x703   : > { %v8950_v61 = vmax.f32 %v8826_v26, 0.0 }
 0x704   : > { %v9702_v37 = vpack.c.bf16 %v8952_v7, %v8951_v53 }
 0x705   : > { %v9701_v31 = vpack.c.bf16 %v8950_v61, %v8949_v28  ;;  %v10490_v49 = vpop.f32.mrb[100].mxu1 }
 0x706   : > { %v8847_v2 = vadd.f32 %v10490_v49, %v19631_v23  ;;  %v8838_v12 = vpop.f32.mrb[101].mxu1 }
 0x707   : > { %v8839_v1 = vadd.f32 %v19631_v23, %v8838_v12  ;;  %v10491_v18 = vpop.f32.mrb[102].mxu1  ;;  %10620 = vmatprep.mubr.msk.bf16.mxu0 %vm20957_vm2, %v9701_v31  ;;  %vm20972_vm2 = vcmask 31744  }
 0x708   : > { %v8850_v34 = vadd.f32 %v10491_v18, %v19631_v23  ;;  %v8841_v36 = vpop.f32.mrb[103].mxu1  ;;  %10621 = vmatmul.mubr.msk.bf16.vlgmr.msra.gmra.mrb[0].mxu0 %vm20958_vm4, %v9702_v37  ;;  %v8955_v22 = vmax.f32 %v8847_v2, 0.0  ;;  %vm20973_vm4 = vmmov %vm20972_vm2 }
 0x709   : > { %v8842_v48 = vadd.f32 %v19631_v23, %v8841_v36  ;;  %v8953_v47 = vmax.f32 %v8839_v1, 0.0 }
 0x70a   : > { %v8956_v17 = vmax.f32 %v8850_v34, 0.0 }
 0x70b   : > { %v8954_v8 = vmax.f32 %v8842_v48, 0.0 }
 0x70c   : > { %v9704_v45 = vpack.c.bf16 %v8956_v17, %v8955_v22 }
 0x70d   : > { %v9703_v41 = vpack.c.bf16 %v8954_v8, %v8953_v47  ;;  %v10494_v11 = vpop.f32.mrb[104].mxu1 }
 0x70e   : > { %v8863_v60 = vadd.f32 %v10494_v11, %v19631_v23  ;;  %v8854_v10 = vpop.f32.mrb[105].mxu1 }
 0x70f   : > { %v8855_v58 = vadd.f32 %v19631_v23, %v8854_v10  ;;  %v10495_v15 = vpop.f32.mrb[106].mxu1  ;;  %10624 = vmatprep.mubr.msk.bf16.mxu0 %vm20959_vm12, %v9703_v41  ;;  %vm20974_vm12 = vmmov %vm20972_vm2 }
 0x710   : > { %v8866_v35 = vadd.f32 %v10495_v15, %v19631_v23  ;;  %v8857_v59 = vpop.f32.mrb[107].mxu1  ;;  %10625 = vmatmul.mubr.msk.bf16.gmra.mrb[4].mxu0 %vm20960_vm5, %v9704_v45  ;;  %v8959_v4 = vmax.f32 %v8863_v60, 0.0  ;;  %vm20975_vm5 = vmmov %vm20972_vm2 }
 0x711   : > { %v8858_v38 = vadd.f32 %v19631_v23, %v8857_v59  ;;  %v8957_v0 = vmax.f32 %v8855_v58, 0.0 }
 0x712   : > { %v8960_v56 = vmax.f32 %v8866_v35, 0.0 }
 0x713   : > { %v8958_v44 = vmax.f32 %v8858_v38, 0.0 }
 0x714   : > { %v9706_v42 = vpack.c.bf16 %v8960_v56, %v8959_v4 }
 0x715   : > { %v9705_v39 = vpack.c.bf16 %v8958_v44, %v8957_v0  ;;  %v10498_v6 = vpop.f32.mrb[108].mxu1 }
 0x716   : > { %v8879_v21 = vadd.f32 %v10498_v6, %v19631_v23  ;;  %v8870_v51 = vpop.f32.mrb[109].mxu1 }
 0x717   : > { %v8871_v32 = vadd.f32 %v19631_v23, %v8870_v51  ;;  %v10499_v43 = vpop.f32.mrb[110].mxu1  ;;  %10628 = vmatprep.mubr.msk.bf16.mxu0 %vm20961_vm6, %v9705_v39  ;;  %vm20976_vm6 = vmmov %vm20972_vm2 }
 0x718   : > { %v8882_v24 = vadd.f32 %v10499_v43, %v19631_v23  ;;  %v8873_v50 = vpop.f32.mrb[111].mxu1  ;;  %10629 = vmatmul.mubr.msk.bf16.gmra.mrb[8].mxu0 %vm20962_vm7, %v9706_v42  ;;  %v8963_v16 = vmax.f32 %v8879_v21, 0.0  ;;  %vm20977_vm7 = vmmov %vm20972_vm2 }
 0x719   : > { %v8874_v33 = vadd.f32 %v19631_v23, %v8873_v50  ;;  %v8961_v5 = vmax.f32 %v8871_v32, 0.0 }
 0x71a   : > { %v8964_v40 = vmax.f32 %v8882_v24, 0.0 }
 0x71b   : > { %v8962_v14 = vmax.f32 %v8874_v33, 0.0 }
 0x71c   : > { %v9708_v55 = vpack.c.bf16 %v8964_v40, %v8963_v16 }
 0x71d   : > { %v9707_v54 = vpack.c.bf16 %v8962_v14, %v8961_v5  ;;  %v10502_v25 = vpop.f32.mrb[112].mxu1 }
 0x71e   : > { %v8895_v57 = vadd.f32 %v10502_v25, %v19631_v23  ;;  %v8886_v20 = vpop.f32.mrb[113].mxu1 }
 0x71f   : > { %v8887_v30 = vadd.f32 %v19631_v23, %v8886_v20  ;;  %v10503_v9 = vpop.f32.mrb[114].mxu1  ;;  %10632 = vmatprep.mubr.msk.bf16.mxu0 %vm20963_vm8, %v9707_v54  ;;  %vm20978_vm8 = vmmov %vm20972_vm2 }
 0x720   : > { %v8898_v3 = vadd.f32 %v10503_v9, %v19631_v23  ;;  %v8889_v19 = vpop.f32.mrb[115].mxu1  ;;  %10633 = vmatmul.mubr.msk.bf16.gmra.mrb[12].mxu0 %vm20964_vm9, %v9708_v55  ;;  %v8967_v62 = vmax.f32 %v8895_v57, 0.0  ;;  %vm20979_vm9 = vmmov %vm20972_vm2 }
 0x721   : > { %v8890_v46 = vadd.f32 %v19631_v23, %v8889_v19  ;;  %v8965_v63 = vmax.f32 %v8887_v30, 0.0 }
 0x722   : > { %v8968_v27 = vmax.f32 %v8898_v3, 0.0 }
 0x723   : > { %v8966_v29 = vmax.f32 %v8890_v46, 0.0 }
 0x724   : > { %v9710_v13 = vpack.c.bf16 %v8968_v27, %v8967_v62 }
 0x725   : > { %v9709_v52 = vpack.c.bf16 %v8966_v29, %v8965_v63  ;;  %v10506_v26 = vpop.f32.mrb[116].mxu1 }
 0x726   : > { %v8911_v53 = vadd.f32 %v10506_v26, %v19631_v23  ;;  %v8902_v7 = vpop.f32.mrb[117].mxu1 }
 0x727   : > { %v8903_v28 = vadd.f32 %v19631_v23, %v8902_v7  ;;  %v10507_v61 = vpop.f32.mrb[118].mxu1  ;;  %10636 = vmatprep.mubr.msk.bf16.mxu0 %vm20965_vm10, %v9709_v52  ;;  %vm20980_vm10 = vmmov %vm20972_vm2 }
 0x728   : > { %v8914_v37 = vadd.f32 %v10507_v61, %v19631_v23  ;;  %v8905_v31 = vpop.f32.mrb[119].mxu1  ;;  %10637 = vmatmul.mubr.msk.bf16.gmra.mrb[16].mxu0 %vm20966_vm13, %v9710_v13  ;;  %v8971_v2 = vmax.f32 %v8911_v53, 0.0  ;;  %vm20981_vm13 = vmmov %vm20972_vm2 }
 0x729   : > { %v8906_v49 = vadd.f32 %v19631_v23, %v8905_v31  ;;  %v8969_v1 = vmax.f32 %v8903_v28, 0.0 }
 0x72a   : > { %v8972_v12 = vmax.f32 %v8914_v37, 0.0 }
 0x72b   : > { %v8970_v18 = vmax.f32 %v8906_v49, 0.0 }
 0x72c   : > { %v9712_v34 = vpack.c.bf16 %v8972_v12, %v8971_v2 }
 0x72d   : > { %v9711_v36 = vpack.c.bf16 %v8970_v18, %v8969_v1  ;;  %v10510_v48 = vpop.f32.mrb[120].mxu1 }
 0x72e   : > { %v8927_v22 = vadd.f32 %v10510_v48, %v19631_v23  ;;  %v8918_v17 = vpop.f32.mrb[121].mxu1 }
 0x72f   : > { %v8919_v47 = vadd.f32 %v19631_v23, %v8918_v17  ;;  %v10511_v8 = vpop.f32.mrb[122].mxu1  ;;  %10640 = vmatprep.mubr.msk.bf16.mxu0 %vm20967_vm14, %v9711_v36  ;;  %vm20982_vm14 = vmmov %vm20972_vm2 }
 0x730   : > { %v8930_v45 = vadd.f32 %v10511_v8, %v19631_v23  ;;  %v8921_v41 = vpop.f32.mrb[123].mxu1  ;;  %10641 = vmatmul.mubr.msk.bf16.gmra.mrb[20].mxu0 %vm20968_vm15, %v9712_v34  ;;  %v8975_v60 = vmax.f32 %v8927_v22, 0.0  ;;  %vm20983_vm15 = vmmov %vm20972_vm2 }
 0x731   : > { %v8922_v11 = vadd.f32 %v19631_v23, %v8921_v41  ;;  %v8973_v58 = vmax.f32 %v8919_v47, 0.0 }
 0x732   : > { %v8976_v10 = vmax.f32 %v8930_v45, 0.0 }
 0x733   : > { %v8974_v15 = vmax.f32 %v8922_v11, 0.0 }
 0x734   : > { %v9714_v35 = vpack.c.bf16 %v8976_v10, %v8975_v60 }
 0x735   : > { %v9713_v59 = vpack.c.bf16 %v8974_v15, %v8973_v58  ;;  %v10514_v38 = vpop.f32.mrb[124].mxu1 }
 0x736   : > { %v8943_v4 = vadd.f32 %v10514_v38, %v19631_v23  ;;  %v8934_v56 = vpop.f32.mrb[125].mxu1 }
 0x737   : > { %v8935_v0 = vadd.f32 %v19631_v23, %v8934_v56  ;;  %v10515_v44 = vpop.f32.mrb[126].mxu1  ;;  %10644 = vmatprep.mubr.msk.bf16.mxu0 %vm20969_vm1, %v9713_v59  ;;  %vm20984_vm1 = vmmov %vm20972_vm2 }
 0x738   : > { %v8946_v42 = vadd.f32 %v10515_v44, %v19631_v23  ;;  %v8937_v39 = vpop.f32.mrb[127].mxu1  ;;  %10645 = vmatmul.mubr.msk.bf16.gmra.mrb[24].mxu0 %vm20970_vm3, %v9714_v35  ;;  %v8979_v21 = vmax.f32 %v8943_v4, 0.0  ;;  %vm20985_vm3 = vmmov %vm20984_vm1 }
 0x739   : > { %v8938_v6 = vadd.f32 %v19631_v23, %v8937_v39  ;;  %v8977_v32 = vmax.f32 %v8935_v0, 0.0 }
 0x73a   : > { %v8980_v51 = vmax.f32 %v8946_v42, 0.0 }
 0x73b   : > { %v8978_v43 = vmax.f32 %v8938_v6, 0.0 }
 0x73c   : > { %v9716_v24 = vpack.c.bf16 %v8980_v51, %v8979_v21 }
 0x73d   : > { %v9715_v50 = vpack.c.bf16 %v8978_v43, %v8977_v32 }
 0x73f   : > { %10648 = vmatprep.mubr.msk.bf16.mxu0 %vm20971_vm11, %v9715_v50  ;;  %vm20986_vm11 = vmmov %vm20984_vm1 }
 0x740   : > { %10649 = vmatmul.mubr.msk.bf16.gmra.mrb[28].mxu0 %vm20956_vm0, %v9716_v24  ;;  %vm20987_vm0 = vmmov %vm20984_vm1 }
 0x7db   : > { %v10622_v23 = vpop.f32.mrb[0].mxu0 }
 0x7dc   : > { %9964 = vst.msk [vmem:[%s19687_s18 + $0x10] sm:$0xff] %vm20972_vm2, %v10622_v23  ;;  %v9803_v33 = vpop.f32.mrb[1].mxu0  ;;  %vm20988_vm2 = vmmov %vm20987_vm0 }
 0x7dd   : > { %9962 = vst.msk [vmem:[%s19687_s18] sm:$0xff] %vm20973_vm4, %v9803_v33  ;;  %v10623_v16 = vpop.f32.mrb[2].mxu0  ;;  %vm20989_vm4 = vmmov %vm20987_vm0 }
 0x7de   : > { %9965 = vst.msk [vmem:[%s19687_s18 + $0x18] sm:$0xff] %vm20974_vm12, %v10623_v16  ;;  %v9806_v40 = vpop.f32.mrb[3].mxu0  ;;  %vm20990_vm12 = vmmov %vm20987_vm0 }
 0x7df   : > { %9963 = vst.msk [vmem:[%s19687_s18 + $0x8] sm:$0xff] %vm20975_vm5, %v9806_v40  ;;  %vm20991_vm5 = vmmov %vm20987_vm0 }
 0x7e3   : > { %v10626_v5 = vpop.f32.mrb[4].mxu0 }
 0x7e4   : > { %9968 = vst.msk [vmem:[%s19687_s18 + $0x30] sm:$0xff] %vm20976_vm6, %v10626_v5  ;;  %v9819_v14 = vpop.f32.mrb[5].mxu0  ;;  %vm20992_vm6 = vmmov %vm20987_vm0 }
 0x7e5   : > { %9966 = vst.msk [vmem:[%s19687_s18 + $0x20] sm:$0xff] %vm20977_vm7, %v9819_v14  ;;  %v10627_v55 = vpop.f32.mrb[6].mxu0  ;;  %vm20993_vm7 = vmmov %vm20987_vm0 }
 0x7e6   : > { %9969 = vst.msk [vmem:[%s19687_s18 + $0x38] sm:$0xff] %vm20978_vm8, %v10627_v55  ;;  %v9822_v54 = vpop.f32.mrb[7].mxu0  ;;  %vm20994_vm8 = vmmov %vm20987_vm0 }
 0x7e7   : > { %9967 = vst.msk [vmem:[%s19687_s18 + $0x28] sm:$0xff] %vm20979_vm9, %v9822_v54  ;;  %vm20995_vm9 = vmmov %vm20987_vm0 }
 0x7eb   : > { %v10630_v25 = vpop.f32.mrb[8].mxu0 }
 0x7ec   : > { %9972 = vst.msk [vmem:[%s19687_s18 + $0x50] sm:$0xff] %vm20980_vm10, %v10630_v25  ;;  %v9835_v57 = vpop.f32.mrb[9].mxu0  ;;  %vm20996_vm10 = vmmov %vm20987_vm0 }
 0x7ed   : > { %9970 = vst.msk [vmem:[%s19687_s18 + $0x40] sm:$0xff] %vm20981_vm13, %v9835_v57  ;;  %v10631_v20 = vpop.f32.mrb[10].mxu0  ;;  %vm20997_vm13 = vmmov %vm20987_vm0 }
 0x7ee   : > { %9973 = vst.msk [vmem:[%s19687_s18 + $0x58] sm:$0xff] %vm20982_vm14, %v10631_v20  ;;  %v9838_v30 = vpop.f32.mrb[11].mxu0  ;;  %vm20998_vm14 = vmmov %vm20987_vm0 }
 0x7ef   : > { %9971 = vst.msk [vmem:[%s19687_s18 + $0x48] sm:$0xff] %vm20983_vm15, %v9838_v30  ;;  %vm20999_vm15 = vmmov %vm20987_vm0 }
 0x7f3   : > { %v10634_v9 = vpop.f32.mrb[12].mxu0 }
 0x7f4   : > { %9976 = vst.msk [vmem:[%s19687_s18 + $0x70] sm:$0xff] %vm20984_vm1, %v10634_v9  ;;  %v9851_v3 = vpop.f32.mrb[13].mxu0  ;;  %vm21000_vm1 = vmmov %vm20987_vm0 }
 0x7f5   : > { %9974 = vst.msk [vmem:[%s19687_s18 + $0x60] sm:$0xff] %vm20985_vm3, %v9851_v3  ;;  %v10635_v19 = vpop.f32.mrb[14].mxu0  ;;  %vm21001_vm3 = vmmov %vm20987_vm0 }
 0x7f6   : > { %9977 = vst.msk [vmem:[%s19687_s18 + $0x78] sm:$0xff] %vm20986_vm11, %v10635_v19  ;;  %v9854_v46 = vpop.f32.mrb[15].mxu0  ;;  %vm21002_vm11 = vmmov %vm20987_vm0 }
 0x7f7   : > { %9975 = vst.msk [vmem:[%s19687_s18 + $0x68] sm:$0xff] %vm20987_vm0, %v9854_v46 }
 0x7fb   : > { %v10638_v62 = vpop.f32.mrb[16].mxu0 }
 0x7fc   : > { %9980 = vst.msk [vmem:[%s19687_s18 + $0x90] sm:$0xff] %vm20988_vm2, %v10638_v62  ;;  %v9867_v27 = vpop.f32.mrb[17].mxu0 }
 0x7fd   : > { %9978 = vst.msk [vmem:[%s19687_s18 + $0x80] sm:$0xff] %vm20989_vm4, %v9867_v27  ;;  %v10639_v63 = vpop.f32.mrb[18].mxu0 }
 0x7fe   : > { %9981 = vst.msk [vmem:[%s19687_s18 + $0x98] sm:$0xff] %vm20990_vm12, %v10639_v63  ;;  %v9870_v29 = vpop.f32.mrb[19].mxu0 }
 0x7ff   : > { %9979 = vst.msk [vmem:[%s19687_s18 + $0x88] sm:$0xff] %vm20991_vm5, %v9870_v29 }
 0x803   : > { %v10642_v13 = vpop.f32.mrb[20].mxu0 }
 0x804   : > { %9984 = vst.msk [vmem:[%s19687_s18 + $0xb0] sm:$0xff] %vm20992_vm6, %v10642_v13  ;;  %v9883_v52 = vpop.f32.mrb[21].mxu0 }
 0x805   : > { %9982 = vst.msk [vmem:[%s19687_s18 + $0xa0] sm:$0xff] %vm20993_vm7, %v9883_v52  ;;  %v10643_v26 = vpop.f32.mrb[22].mxu0 }
 0x806   : > { %9985 = vst.msk [vmem:[%s19687_s18 + $0xb8] sm:$0xff] %vm20994_vm8, %v10643_v26  ;;  %v9886_v53 = vpop.f32.mrb[23].mxu0 }
 0x807   : > { %9983 = vst.msk [vmem:[%s19687_s18 + $0xa8] sm:$0xff] %vm20995_vm9, %v9886_v53 }
 0x80b   : > { %v10646_v7 = vpop.f32.mrb[24].mxu0 }
 0x80c   : > { %9988 = vst.msk [vmem:[%s19687_s18 + $0xd0] sm:$0xff] %vm20996_vm10, %v10646_v7  ;;  %v9899_v28 = vpop.f32.mrb[25].mxu0 }
 0x80d   : > { %9986 = vst.msk [vmem:[%s19687_s18 + $0xc0] sm:$0xff] %vm20997_vm13, %v9899_v28  ;;  %v10647_v61 = vpop.f32.mrb[26].mxu0 }
 0x80e   : > { %9989 = vst.msk [vmem:[%s19687_s18 + $0xd8] sm:$0xff] %vm20998_vm14, %v10647_v61  ;;  %v9902_v37 = vpop.f32.mrb[27].mxu0 }
 0x80f   : > { %9987 = vst.msk [vmem:[%s19687_s18 + $0xc8] sm:$0xff] %vm20999_vm15, %v9902_v37 }
 0x813   : > { %v10650_v31 = vpop.f32.mrb[28].mxu0 }
 0x814   : > { %9992 = vst.msk [vmem:[%s19687_s18 + $0xf0] sm:$0xff] %vm21000_vm1, %v10650_v31  ;;  %v9915_v49 = vpop.f32.mrb[29].mxu0 }
 0x815   : > { %9990 = vst.msk [vmem:[%s19687_s18 + $0xe0] sm:$0xff] %vm21001_vm3, %v9915_v49  ;;  %v10651_v2 = vpop.f32.mrb[30].mxu0 }
 0x816   : > { %9993 = vst.msk [vmem:[%s19687_s18 + $0xf8] sm:$0xff] %vm21002_vm11, %v10651_v2  ;;  %v9918_v12 = vpop.f32.mrb[31].mxu0 }
 0x817   : > { %9991 = vst.msk [vmem:[%s19687_s18 + $0xe8] sm:$0xff] %vm20987_vm0, %v9918_v12 }
 0x818 PF: > { %s23_s25 = sadd.s32 1, %s13423_s25  }
 0x819   : > { %p20_p5 = scmp.ge.s32.totalorder %s23_s25, 4  }
 0x81b   :  { %22 = sbr.rel (!%p20_p5) target bundleno = 1 (0x1), region = 110 }

</bundles_post_ra>
